<compile_context>
chip_gen: v7x
topology: tpu7x:2x2x1
jax: 0.10.0
libtpu: 0.0.40
codegen_flags: <defaults>
</compile_context>

<pallas_src>
import math

import numpy as np
import jax
import jax.numpy as jnp
from jax.experimental import pallas as pl
from jax.experimental.pallas import tpu as pltpu

BN_EPS = 1e-5
MXU_MIN_CIN = 32          # below this the 1x1 convs stay on the VPU (no tiny-K matmuls)

# the 8 non-centre taps of the 3x3 depthwise kernel (dy, dx)
_TAPS = tuple((dy, dx) for dy in (-1, 0, 1) for dx in (-1, 0, 1) if (dy, dx) != (0, 0))


# --------------------------- fused Pallas kernel ----------------------------

def _pointwise(wT, x, bias, cin):
    """1x1 conv: (cout, cin) @ (cin, HWp) + bias, MXU for large cin else VPU."""
    if cin >= MXU_MIN_CIN:
        return jnp.dot(wT, x, preferred_element_type=jnp.float32) + bias
    out = None
    for ci in range(cin):
        contrib = x[ci:ci + 1, :] * wT[:, ci:ci + 1]
        out = contrib if out is None else out + contrib
    return out + bias


def _make_chain_kernel(chain_meta, H, W, apply_sigmoid=False):
    """Kernel running a chain of XceptionBlocks on one image, fully in VMEM.

    chain_meta: list of dicts {'units': [(apply_relu, cin, cout), ...],
                               'has_skip': bool}
    Refs: x_ref, mask_ref, <flat weights>, o_ref
      per unit:            dw (cin, 9), pwT (cout, cin) [BN-folded], b (cout, 1)
      per block with skip: swT (cout, cin_block) [BN-folded], sb (cout, 1)
    """

    def kernel(*refs):
        x_ref, mask_ref = refs[0], refs[1]
        o_ref = refs[-1]
        wrefs = refs[2:-1]
        HWp = x_ref.shape[2]

        # Border masks for the 8 shifted taps, hoisted once and reused by every
        # unit of every block in the chain (JAX does not CSE broadcasts).
        mv = mask_ref[...]                              # (8, HWp) float32
        mask_rows = [mv[i:i + 1, :] for i in range(len(_TAPS))]

        x = x_ref[0]                                    # (C_in, HWp) block input
        wi = 0
        for blk in chain_meta:
            y = x
            for apply_relu, cin, cout in blk['units']:
                dw = wrefs[wi][...]                     # (cin, 9) depthwise taps
                pwT = wrefs[wi + 1][...]                # (cout, cin) BN-folded 1x1
                b = wrefs[wi + 2][...]                  # (cout, 1) BN bias
                wi += 3
                if apply_relu:
                    y = jnp.maximum(y, 0.0)

                # depthwise 3x3, padding=1: XLU lane rolls + border masks;
                # accumulator seeded with the centre tap.
                acc = y * dw[:, 4:5]                    # centre tap (dy=dx=0)
                for ti, (dy, dx) in enumerate(_TAPS):
                    k = (dy + 1) * 3 + (dx + 1)
                    off = dy * W + dx
                    t = pltpu.roll(y, (-off) % HWp, 1)  # t[p] = y[p + off]
                    acc = acc + (t * mask_rows[ti]) * dw[:, k:k + 1]

                # pointwise 1x1 conv (+ folded BN scale, + bias)
                y = _pointwise(pwT, acc, b, cin)

            # residual connection
            if blk['has_skip']:
                swT = wrefs[wi][...]                    # (cout, cin_block)
                sb = wrefs[wi + 1][...]                 # (cout, 1)
                wi += 2
                x = y + _pointwise(swT, x, sb, x.shape[0])
            else:
                x = y + x                               # identity skip

        if apply_sigmoid:
            x = 1.0 / (1.0 + jnp.exp(-x))
        o_ref[0] = x

    return kernel


def _border_masks(H, W, HWp):
    """(8, HWp) float32 validity masks for the 8 shifted depthwise taps."""
    p = np.arange(HWp)
    r, c = p // W, p % W
    rows = []
    for dy, dx in _TAPS:
        ok = np.ones(HWp, dtype=np.float32)
        if dy == -1:
            ok *= (r >= 1)
        if dy == 1:
            ok *= (r <= H - 2)
        if dx == -1:
            ok *= (c >= 1)
        if dx == 1:
            ok *= (c <= W - 2)
        rows.append(ok)
    return jnp.asarray(np.stack(rows))


def run_xception_chain(blocks, x, apply_sigmoid=False):
    """Run a chain of XceptionBlocks in ONE fused pallas_call.

    blocks: list of block param dicts (see init_xception_block)
    x: (N, C, H, W) float32  ->  (N, C_out, H, W) float32
    """
    N, C, H, W = x.shape
    HW = H * W
    HWp = max(128, ((HW + 127) // 128) * 128)           # lane-dense spatial axis
    xf = x.reshape(N, C, HW)
    if HWp != HW:
        xf = jnp.pad(xf, ((0, 0), (0, 0), (0, HWp - HW)))
    mask_arr = _border_masks(H, W, HWp)                 # (8, HWp)

    chain_meta, weights = [], []
    for blk in blocks:
        units_meta = []
        for u in blk['units']:
            units_meta.append((u['relu'], u['cin'], u['cout']))
            weights += [u['dw'], u['pwT'], u['b']]
        has_skip = blk['skip'] is not None
        if has_skip:
            weights += [blk['skip']['swT'], blk['skip']['sb']]
        chain_meta.append(dict(units=units_meta, has_skip=has_skip))
    Cout = blocks[-1]['out_f']

    in_specs = [pl.BlockSpec((1, C, HWp), lambda n: (n, 0, 0)),
                pl.BlockSpec((len(_TAPS), HWp), lambda n: (0, 0))]
    in_specs += [pl.BlockSpec(w.shape, lambda n: (0, 0)) for w in weights]

    out = pl.pallas_call(
        _make_chain_kernel(chain_meta, H, W, apply_sigmoid=apply_sigmoid),
        out_shape=jax.ShapeDtypeStruct((N, Cout, HWp), jnp.float32),
        grid=(N,),
        in_specs=in_specs,
        out_specs=pl.BlockSpec((1, Cout, HWp), lambda n: (n, 0, 0)),
        compiler_params=pltpu.CompilerParams(dimension_semantics=("parallel",)),
    )(xf, mask_arr, *weights)
    return out[:, :, :HW].reshape(N, Cout, H, W)


# --------------------- parameter init / model glue --------------------------

def _normal(key, shape, std=0.1):
    return jax.random.normal(key, shape, dtype=jnp.float32) * std


def _bn_affine(c):
    # eval-mode BatchNorm2d with fresh running stats -> per-channel affine
    scale = jnp.full((c,), 1.0 / math.sqrt(1.0 + BN_EPS), dtype=jnp.float32)
    bias = jnp.zeros((c,), dtype=jnp.float32)
    return scale, bias


def _xception_unit_cfg(in_f, out_f, reps, start_with_relu, grow_first):
    # mirrors the `rep` list construction in XceptionBlock.__init__
    units = []
    filters = in_f
    if grow_first:
        units.append([True, in_f, out_f])
        filters = out_f
    for _ in range(reps - 1):
        units.append([True, filters, filters])
    if not grow_first:
        units.append([True, in_f, out_f])
    if not start_with_relu:
        units[0][0] = False                      # rep = rep[1:] drops leading ReLU
    return units


def init_xception_block(key, in_f, out_f, reps, start_with_relu=True, grow_first=True):
    cfg = _xception_unit_cfg(in_f, out_f, reps, start_with_relu, grow_first)
    units = []
    for relu, cin, cout in cfg:
        key, k1, k2 = jax.random.split(key, 3)
        dw = _normal(k1, (cin, 9))               # depthwise taps (channel, ky*3+kx)
        pw = _normal(k2, (cin, cout))            # pointwise 1x1 weights
        sc, bi = _bn_affine(cout)
        units.append(dict(relu=relu, cin=cin, cout=cout,
                          dw=dw,
                          pwT=(pw * sc[None, :]).T,   # BN scale folded, (cout, cin)
                          b=bi.reshape(cout, 1)))
    skip = None
    if out_f != in_f:                            # strides is always 1 in this model
        key, k = jax.random.split(key)
        sw = _normal(k, (in_f, out_f))
        ssc, sbi = _bn_affine(out_f)
        skip = dict(swT=(sw * ssc[None, :]).T, sb=sbi.reshape(out_f, 1))
    return dict(units=units, skip=skip, in_f=in_f, out_f=out_f)


def upsample_nearest(x, scale):                  # NCHW nearest upsampling
    if scale == 1:
        return x
    return jnp.repeat(jnp.repeat(x, scale, axis=2), scale, axis=3)


def init_sampling_block(key, inp_ch, out_ch, n_cat, depth):
    k1, k2 = jax.random.split(key)
    xb1 = init_xception_block(k1, n_cat * inp_ch, n_cat * out_ch, reps=depth,
                              start_with_relu=True, grow_first=True)
    xb2 = init_xception_block(k2, 2 * n_cat * inp_ch, n_cat * out_ch, reps=depth,
                              start_with_relu=True, grow_first=True)
    return dict(xb1=xb1, xb2=xb2, n_cat=n_cat)


def apply_sampling_block(params, image, previous_output=None):
    image = jnp.tile(image, (1, params['n_cat'], 1, 1))      # torch .repeat((1,K,1,1))
    if previous_output is None:
        return run_xception_chain([params['xb1']], image)
    prev = upsample_nearest(previous_output, 2)
    return run_xception_chain([params['xb2']],
                              jnp.concatenate([image, prev], axis=1))


def init_sampling_segmentation(key, n_channels, n_categories, depth):
    D = depth + 1
    keys = jax.random.split(key, D + 2)
    blocks = [init_sampling_block(keys[i], n_channels, n_channels, n_categories, 5)
              for i in range(D)]
    fl1 = init_xception_block(keys[D],
                              n_categories * n_channels * D + n_channels,
                              n_categories * n_channels, reps=D // 2,
                              start_with_relu=False, grow_first=True)
    fl2 = init_xception_block(keys[D + 1], n_categories * n_channels, n_categories,
                              reps=D - D // 2, start_with_relu=True, grow_first=False)
    scales = [2 ** d for d in reversed(range(D))]
    return dict(blocks=blocks, fl1=fl1, fl2=fl2, scales=scales,
                depth=D, n_channels=n_channels, n_categories=n_categories)


def apply_sampling_segmentation(params, image, use_sigmoid=False):
    D = params['depth']
    assert image.shape[1] == params['n_channels']
    assert image.shape[2] % 2 ** (D - 1) == 0 and image.shape[3] % 2 ** (D - 1) == 0
    inputs = [image]
    for _ in range(D - 1):
        inputs.append(inputs[-1][:, :, ::2, ::2])    # F.interpolate(scale=0.5, nearest)
    outputs = []
    x = None
    for inp, block, scale in zip(inputs[::-1], params['blocks'], params['scales']):
        x = apply_sampling_block(block, inp, x)
        outputs.append(upsample_nearest(x, scale))
    feat = jnp.concatenate([inputs[0]] + outputs, axis=1)
    # fl1 + fl2 fused in a single pallas_call, with the optional sigmoid folded in.
    return run_xception_chain([params['fl1'], params['fl2']], feat,
                              apply_sigmoid=use_sigmoid)


# -------------------------------- main --------------------------------------

if __name__ == "__main__":
    key = jax.random.PRNGKey(0)
    pkey, xkey = jax.random.split(key)

    n_channels, n_categories, depth = 2, 3, 1        # -> self.depth = 2 sampling blocks
    params = init_sampling_segmentation(pkey, n_channels, n_categories, depth)

    # NCHW input, same layout as the PyTorch reference
    image = jax.random.normal(xkey, (2, n_channels, 16, 16), dtype=jnp.float32)

    fwd = jax.jit(lambda img: apply_sampling_segmentation(params, img, use_sigmoid=False))
    out = jax.block_until_ready(fwd(image))

    assert out.shape == (2, n_categories, 16, 16), out.shape
    assert bool(jnp.all(jnp.isfinite(out)))
    print("KERNEL_OK")
</pallas_src>

<mosaic_0001>
module attributes {stable_mosaic.version = 11 : i64} {
  func.func @kernel(%arg0: i32, %arg1: memref<1x6x128xf32, #tpu.memory_space<vmem>>, %arg2: memref<8x128xf32, #tpu.memory_space<vmem>>, %arg3: memref<6x9xf32, #tpu.memory_space<vmem>>, %arg4: memref<6x6xf32, #tpu.memory_space<vmem>>, %arg5: memref<6x1xf32, #tpu.memory_space<vmem>>, %arg6: memref<6x9xf32, #tpu.memory_space<vmem>>, %arg7: memref<6x6xf32, #tpu.memory_space<vmem>>, %arg8: memref<6x1xf32, #tpu.memory_space<vmem>>, %arg9: memref<6x9xf32, #tpu.memory_space<vmem>>, %arg10: memref<6x6xf32, #tpu.memory_space<vmem>>, %arg11: memref<6x1xf32, #tpu.memory_space<vmem>>, %arg12: memref<6x9xf32, #tpu.memory_space<vmem>>, %arg13: memref<6x6xf32, #tpu.memory_space<vmem>>, %arg14: memref<6x1xf32, #tpu.memory_space<vmem>>, %arg15: memref<6x9xf32, #tpu.memory_space<vmem>>, %arg16: memref<6x6xf32, #tpu.memory_space<vmem>>, %arg17: memref<6x1xf32, #tpu.memory_space<vmem>>, %arg18: memref<1x6x128xf32, #tpu.memory_space<vmem>>) attributes {dimension_semantics = [#tpu.dimension_semantics<parallel>], iteration_bounds = array<i64: 2>, scalar_prefetch = 0 : i64, scratch_operands = 0 : i64, tpu.core_type = #tpu.core_type<tc>, window_params = [{transform_indices = @transform_0, window_bounds = array<i64: 1, 6, 128>}, {pipeline_mode = #tpu.pipeline_mode<synchronous>, transform_indices = @transform_1, window_bounds = array<i64: 8, 128>}, {pipeline_mode = #tpu.pipeline_mode<synchronous>, transform_indices = @transform_2, window_bounds = array<i64: 6, 9>}, {pipeline_mode = #tpu.pipeline_mode<synchronous>, transform_indices = @transform_3, window_bounds = array<i64: 6, 6>}, {pipeline_mode = #tpu.pipeline_mode<synchronous>, transform_indices = @transform_4, window_bounds = array<i64: 6, 1>}, {pipeline_mode = #tpu.pipeline_mode<synchronous>, transform_indices = @transform_5, window_bounds = array<i64: 6, 9>}, {pipeline_mode = #tpu.pipeline_mode<synchronous>, transform_indices = @transform_6, window_bounds = array<i64: 6, 6>}, {pipeline_mode = #tpu.pipeline_mode<synchronous>, transform_indices = @transform_7, window_bounds = array<i64: 6, 1>}, {pipeline_mode = #tpu.pipeline_mode<synchronous>, transform_indices = @transform_8, window_bounds = array<i64: 6, 9>}, {pipeline_mode = #tpu.pipeline_mode<synchronous>, transform_indices = @transform_9, window_bounds = array<i64: 6, 6>}, {pipeline_mode = #tpu.pipeline_mode<synchronous>, transform_indices = @transform_10, window_bounds = array<i64: 6, 1>}, {pipeline_mode = #tpu.pipeline_mode<synchronous>, transform_indices = @transform_11, window_bounds = array<i64: 6, 9>}, {pipeline_mode = #tpu.pipeline_mode<synchronous>, transform_indices = @transform_12, window_bounds = array<i64: 6, 6>}, {pipeline_mode = #tpu.pipeline_mode<synchronous>, transform_indices = @transform_13, window_bounds = array<i64: 6, 1>}, {pipeline_mode = #tpu.pipeline_mode<synchronous>, transform_indices = @transform_14, window_bounds = array<i64: 6, 9>}, {pipeline_mode = #tpu.pipeline_mode<synchronous>, transform_indices = @transform_15, window_bounds = array<i64: 6, 6>}, {pipeline_mode = #tpu.pipeline_mode<synchronous>, transform_indices = @transform_16, window_bounds = array<i64: 6, 1>}, {transform_indices = @transform_17, window_bounds = array<i64: 1, 6, 128>}]} {
    %c0 = arith.constant 0 : index
    %c0_0 = arith.constant 0 : index
    %0 = vector.load %arg2[%c0, %c0_0] : memref<8x128xf32, #tpu.memory_space<vmem>>, vector<8x128xf32>
    %1 = vector.extract_strided_slice %0 {offsets = [0, 0], sizes = [1, 128], strides = [1, 1]} : vector<8x128xf32> to vector<1x128xf32>
    %2 = vector.extract_strided_slice %0 {offsets = [1, 0], sizes = [1, 128], strides = [1, 1]} : vector<8x128xf32> to vector<1x128xf32>
    %3 = vector.extract_strided_slice %0 {offsets = [2, 0], sizes = [1, 128], strides = [1, 1]} : vector<8x128xf32> to vector<1x128xf32>
    %4 = vector.extract_strided_slice %0 {offsets = [3, 0], sizes = [1, 128], strides = [1, 1]} : vector<8x128xf32> to vector<1x128xf32>
    %5 = vector.extract_strided_slice %0 {offsets = [4, 0], sizes = [1, 128], strides = [1, 1]} : vector<8x128xf32> to vector<1x128xf32>
    %6 = vector.extract_strided_slice %0 {offsets = [5, 0], sizes = [1, 128], strides = [1, 1]} : vector<8x128xf32> to vector<1x128xf32>
    %7 = vector.extract_strided_slice %0 {offsets = [6, 0], sizes = [1, 128], strides = [1, 1]} : vector<8x128xf32> to vector<1x128xf32>
    %8 = vector.extract_strided_slice %0 {offsets = [7, 0], sizes = [1, 128], strides = [1, 1]} : vector<8x128xf32> to vector<1x128xf32>
    %c0_1 = arith.constant 0 : index
    %c0_2 = arith.constant 0 : index
    %c0_3 = arith.constant 0 : index
    %9 = vector.load %arg1[%c0_1, %c0_2, %c0_3] : memref<1x6x128xf32, #tpu.memory_space<vmem>>, vector<1x6x128xf32>
    %10 = vector.shape_cast %9 : vector<1x6x128xf32> to vector<6x128xf32>
    %c0_4 = arith.constant 0 : index
    %c0_5 = arith.constant 0 : index
    %11 = vector.load %arg3[%c0_4, %c0_5] : memref<6x9xf32, #tpu.memory_space<vmem>>, vector<6x9xf32>
    %c0_6 = arith.constant 0 : index
    %c0_7 = arith.constant 0 : index
    %12 = vector.load %arg4[%c0_6, %c0_7] : memref<6x6xf32, #tpu.memory_space<vmem>>, vector<6x6xf32>
    %c0_8 = arith.constant 0 : index
    %c0_9 = arith.constant 0 : index
    %13 = vector.load %arg5[%c0_8, %c0_9] : memref<6x1xf32, #tpu.memory_space<vmem>>, vector<6x1xf32>
    %cst = arith.constant 0.000000e+00 : f32
    %14 = vector.broadcast %cst : f32 to vector<6x128xf32>
    %15 = arith.maximumf %10, %14 : vector<6x128xf32>
    %16 = vector.extract_strided_slice %11 {offsets = [0, 4], sizes = [6, 1], strides = [1, 1]} : vector<6x9xf32> to vector<6x1xf32>
    %17 = vector.broadcast %16 : vector<6x1xf32> to vector<6x128xf32>
    %18 = arith.mulf %15, %17 : vector<6x128xf32>
    %c9_i32 = arith.constant 9 : i32
    %19 = tpu.dynamic_rotate %15 by %c9_i32 dim 1 : vector<6x128xf32>, i32 -> vector<6x128xf32>
    %20 = vector.broadcast %1 : vector<1x128xf32> to vector<6x128xf32>
    %21 = arith.mulf %19, %20 : vector<6x128xf32>
    %22 = vector.extract_strided_slice %11 {offsets = [0, 0], sizes = [6, 1], strides = [1, 1]} : vector<6x9xf32> to vector<6x1xf32>
    %23 = vector.broadcast %22 : vector<6x1xf32> to vector<6x128xf32>
    %24 = arith.mulf %21, %23 : vector<6x128xf32>
    %25 = arith.addf %18, %24 : vector<6x128xf32>
    %c8_i32 = arith.constant 8 : i32
    %26 = tpu.dynamic_rotate %15 by %c8_i32 dim 1 : vector<6x128xf32>, i32 -> vector<6x128xf32>
    %27 = vector.broadcast %2 : vector<1x128xf32> to vector<6x128xf32>
    %28 = arith.mulf %26, %27 : vector<6x128xf32>
    %29 = vector.extract_strided_slice %11 {offsets = [0, 1], sizes = [6, 1], strides = [1, 1]} : vector<6x9xf32> to vector<6x1xf32>
    %30 = vector.broadcast %29 : vector<6x1xf32> to vector<6x128xf32>
    %31 = arith.mulf %28, %30 : vector<6x128xf32>
    %32 = arith.addf %25, %31 : vector<6x128xf32>
    %c7_i32 = arith.constant 7 : i32
    %33 = tpu.dynamic_rotate %15 by %c7_i32 dim 1 : vector<6x128xf32>, i32 -> vector<6x128xf32>
    %34 = vector.broadcast %3 : vector<1x128xf32> to vector<6x128xf32>
    %35 = arith.mulf %33, %34 : vector<6x128xf32>
    %36 = vector.extract_strided_slice %11 {offsets = [0, 2], sizes = [6, 1], strides = [1, 1]} : vector<6x9xf32> to vector<6x1xf32>
    %37 = vector.broadcast %36 : vector<6x1xf32> to vector<6x128xf32>
    %38 = arith.mulf %35, %37 : vector<6x128xf32>
    %39 = arith.addf %32, %38 : vector<6x128xf32>
    %c1_i32 = arith.constant 1 : i32
    %40 = tpu.dynamic_rotate %15 by %c1_i32 dim 1 : vector<6x128xf32>, i32 -> vector<6x128xf32>
    %41 = vector.broadcast %4 : vector<1x128xf32> to vector<6x128xf32>
    %42 = arith.mulf %40, %41 : vector<6x128xf32>
    %43 = vector.extract_strided_slice %11 {offsets = [0, 3], sizes = [6, 1], strides = [1, 1]} : vector<6x9xf32> to vector<6x1xf32>
    %44 = vector.broadcast %43 : vector<6x1xf32> to vector<6x128xf32>
    %45 = arith.mulf %42, %44 : vector<6x128xf32>
    %46 = arith.addf %39, %45 : vector<6x128xf32>
    %c127_i32 = arith.constant 127 : i32
    %47 = tpu.dynamic_rotate %15 by %c127_i32 dim 1 : vector<6x128xf32>, i32 -> vector<6x128xf32>
    %48 = vector.broadcast %5 : vector<1x128xf32> to vector<6x128xf32>
    %49 = arith.mulf %47, %48 : vector<6x128xf32>
    %50 = vector.extract_strided_slice %11 {offsets = [0, 5], sizes = [6, 1], strides = [1, 1]} : vector<6x9xf32> to vector<6x1xf32>
    %51 = vector.broadcast %50 : vector<6x1xf32> to vector<6x128xf32>
    %52 = arith.mulf %49, %51 : vector<6x128xf32>
    %53 = arith.addf %46, %52 : vector<6x128xf32>
    %c121_i32 = arith.constant 121 : i32
    %54 = tpu.dynamic_rotate %15 by %c121_i32 dim 1 : vector<6x128xf32>, i32 -> vector<6x128xf32>
    %55 = vector.broadcast %6 : vector<1x128xf32> to vector<6x128xf32>
    %56 = arith.mulf %54, %55 : vector<6x128xf32>
    %57 = vector.extract_strided_slice %11 {offsets = [0, 6], sizes = [6, 1], strides = [1, 1]} : vector<6x9xf32> to vector<6x1xf32>
    %58 = vector.broadcast %57 : vector<6x1xf32> to vector<6x128xf32>
    %59 = arith.mulf %56, %58 : vector<6x128xf32>
    %60 = arith.addf %53, %59 : vector<6x128xf32>
    %c120_i32 = arith.constant 120 : i32
    %61 = tpu.dynamic_rotate %15 by %c120_i32 dim 1 : vector<6x128xf32>, i32 -> vector<6x128xf32>
    %62 = vector.broadcast %7 : vector<1x128xf32> to vector<6x128xf32>
    %63 = arith.mulf %61, %62 : vector<6x128xf32>
    %64 = vector.extract_strided_slice %11 {offsets = [0, 7], sizes = [6, 1], strides = [1, 1]} : vector<6x9xf32> to vector<6x1xf32>
    %65 = vector.broadcast %64 : vector<6x1xf32> to vector<6x128xf32>
    %66 = arith.mulf %63, %65 : vector<6x128xf32>
    %67 = arith.addf %60, %66 : vector<6x128xf32>
    %c119_i32 = arith.constant 119 : i32
    %68 = tpu.dynamic_rotate %15 by %c119_i32 dim 1 : vector<6x128xf32>, i32 -> vector<6x128xf32>
    %69 = vector.broadcast %8 : vector<1x128xf32> to vector<6x128xf32>
    %70 = arith.mulf %68, %69 : vector<6x128xf32>
    %71 = vector.extract_strided_slice %11 {offsets = [0, 8], sizes = [6, 1], strides = [1, 1]} : vector<6x9xf32> to vector<6x1xf32>
    %72 = vector.broadcast %71 : vector<6x1xf32> to vector<6x128xf32>
    %73 = arith.mulf %70, %72 : vector<6x128xf32>
    %74 = arith.addf %67, %73 : vector<6x128xf32>
    %75 = vector.extract_strided_slice %74 {offsets = [0, 0], sizes = [1, 128], strides = [1, 1]} : vector<6x128xf32> to vector<1x128xf32>
    %76 = vector.extract_strided_slice %12 {offsets = [0, 0], sizes = [6, 1], strides = [1, 1]} : vector<6x6xf32> to vector<6x1xf32>
    %77 = vector.broadcast %75 : vector<1x128xf32> to vector<6x128xf32>
    %78 = vector.broadcast %76 : vector<6x1xf32> to vector<6x128xf32>
    %79 = arith.mulf %77, %78 : vector<6x128xf32>
    %80 = vector.extract_strided_slice %74 {offsets = [1, 0], sizes = [1, 128], strides = [1, 1]} : vector<6x128xf32> to vector<1x128xf32>
    %81 = vector.extract_strided_slice %12 {offsets = [0, 1], sizes = [6, 1], strides = [1, 1]} : vector<6x6xf32> to vector<6x1xf32>
    %82 = vector.broadcast %80 : vector<1x128xf32> to vector<6x128xf32>
    %83 = vector.broadcast %81 : vector<6x1xf32> to vector<6x128xf32>
    %84 = arith.mulf %82, %83 : vector<6x128xf32>
    %85 = arith.addf %79, %84 : vector<6x128xf32>
    %86 = vector.extract_strided_slice %74 {offsets = [2, 0], sizes = [1, 128], strides = [1, 1]} : vector<6x128xf32> to vector<1x128xf32>
    %87 = vector.extract_strided_slice %12 {offsets = [0, 2], sizes = [6, 1], strides = [1, 1]} : vector<6x6xf32> to vector<6x1xf32>
    %88 = vector.broadcast %86 : vector<1x128xf32> to vector<6x128xf32>
    %89 = vector.broadcast %87 : vector<6x1xf32> to vector<6x128xf32>
    %90 = arith.mulf %88, %89 : vector<6x128xf32>
    %91 = arith.addf %85, %90 : vector<6x128xf32>
    %92 = vector.extract_strided_slice %74 {offsets = [3, 0], sizes = [1, 128], strides = [1, 1]} : vector<6x128xf32> to vector<1x128xf32>
    %93 = vector.extract_strided_slice %12 {offsets = [0, 3], sizes = [6, 1], strides = [1, 1]} : vector<6x6xf32> to vector<6x1xf32>
    %94 = vector.broadcast %92 : vector<1x128xf32> to vector<6x128xf32>
    %95 = vector.broadcast %93 : vector<6x1xf32> to vector<6x128xf32>
    %96 = arith.mulf %94, %95 : vector<6x128xf32>
    %97 = arith.addf %91, %96 : vector<6x128xf32>
    %98 = vector.extract_strided_slice %74 {offsets = [4, 0], sizes = [1, 128], strides = [1, 1]} : vector<6x128xf32> to vector<1x128xf32>
    %99 = vector.extract_strided_slice %12 {offsets = [0, 4], sizes = [6, 1], strides = [1, 1]} : vector<6x6xf32> to vector<6x1xf32>
    %100 = vector.broadcast %98 : vector<1x128xf32> to vector<6x128xf32>
    %101 = vector.broadcast %99 : vector<6x1xf32> to vector<6x128xf32>
    %102 = arith.mulf %100, %101 : vector<6x128xf32>
    %103 = arith.addf %97, %102 : vector<6x128xf32>
    %104 = vector.extract_strided_slice %74 {offsets = [5, 0], sizes = [1, 128], strides = [1, 1]} : vector<6x128xf32> to vector<1x128xf32>
    %105 = vector.extract_strided_slice %12 {offsets = [0, 5], sizes = [6, 1], strides = [1, 1]} : vector<6x6xf32> to vector<6x1xf32>
    %106 = vector.broadcast %104 : vector<1x128xf32> to vector<6x128xf32>
    %107 = vector.broadcast %105 : vector<6x1xf32> to vector<6x128xf32>
    %108 = arith.mulf %106, %107 : vector<6x128xf32>
    %109 = arith.addf %103, %108 : vector<6x128xf32>
    %110 = vector.broadcast %13 : vector<6x1xf32> to vector<6x128xf32>
    %111 = arith.addf %109, %110 : vector<6x128xf32>
    %c0_10 = arith.constant 0 : index
    %c0_11 = arith.constant 0 : index
    %112 = vector.load %arg6[%c0_10, %c0_11] : memref<6x9xf32, #tpu.memory_space<vmem>>, vector<6x9xf32>
    %c0_12 = arith.constant 0 : index
    %c0_13 = arith.constant 0 : index
    %113 = vector.load %arg7[%c0_12, %c0_13] : memref<6x6xf32, #tpu.memory_space<vmem>>, vector<6x6xf32>
    %c0_14 = arith.constant 0 : index
    %c0_15 = arith.constant 0 : index
    %114 = vector.load %arg8[%c0_14, %c0_15] : memref<6x1xf32, #tpu.memory_space<vmem>>, vector<6x1xf32>
    %cst_16 = arith.constant 0.000000e+00 : f32
    %115 = vector.broadcast %cst_16 : f32 to vector<6x128xf32>
    %116 = arith.maximumf %111, %115 : vector<6x128xf32>
    %117 = vector.extract_strided_slice %112 {offsets = [0, 4], sizes = [6, 1], strides = [1, 1]} : vector<6x9xf32> to vector<6x1xf32>
    %118 = vector.broadcast %117 : vector<6x1xf32> to vector<6x128xf32>
    %119 = arith.mulf %116, %118 : vector<6x128xf32>
    %c9_i32_17 = arith.constant 9 : i32
    %120 = tpu.dynamic_rotate %116 by %c9_i32_17 dim 1 : vector<6x128xf32>, i32 -> vector<6x128xf32>
    %121 = vector.broadcast %1 : vector<1x128xf32> to vector<6x128xf32>
    %122 = arith.mulf %120, %121 : vector<6x128xf32>
    %123 = vector.extract_strided_slice %112 {offsets = [0, 0], sizes = [6, 1], strides = [1, 1]} : vector<6x9xf32> to vector<6x1xf32>
    %124 = vector.broadcast %123 : vector<6x1xf32> to vector<6x128xf32>
    %125 = arith.mulf %122, %124 : vector<6x128xf32>
    %126 = arith.addf %119, %125 : vector<6x128xf32>
    %c8_i32_18 = arith.constant 8 : i32
    %127 = tpu.dynamic_rotate %116 by %c8_i32_18 dim 1 : vector<6x128xf32>, i32 -> vector<6x128xf32>
    %128 = vector.broadcast %2 : vector<1x128xf32> to vector<6x128xf32>
    %129 = arith.mulf %127, %128 : vector<6x128xf32>
    %130 = vector.extract_strided_slice %112 {offsets = [0, 1], sizes = [6, 1], strides = [1, 1]} : vector<6x9xf32> to vector<6x1xf32>
    %131 = vector.broadcast %130 : vector<6x1xf32> to vector<6x128xf32>
    %132 = arith.mulf %129, %131 : vector<6x128xf32>
    %133 = arith.addf %126, %132 : vector<6x128xf32>
    %c7_i32_19 = arith.constant 7 : i32
    %134 = tpu.dynamic_rotate %116 by %c7_i32_19 dim 1 : vector<6x128xf32>, i32 -> vector<6x128xf32>
    %135 = vector.broadcast %3 : vector<1x128xf32> to vector<6x128xf32>
    %136 = arith.mulf %134, %135 : vector<6x128xf32>
    %137 = vector.extract_strided_slice %112 {offsets = [0, 2], sizes = [6, 1], strides = [1, 1]} : vector<6x9xf32> to vector<6x1xf32>
    %138 = vector.broadcast %137 : vector<6x1xf32> to vector<6x128xf32>
    %139 = arith.mulf %136, %138 : vector<6x128xf32>
    %140 = arith.addf %133, %139 : vector<6x128xf32>
    %c1_i32_20 = arith.constant 1 : i32
    %141 = tpu.dynamic_rotate %116 by %c1_i32_20 dim 1 : vector<6x128xf32>, i32 -> vector<6x128xf32>
    %142 = vector.broadcast %4 : vector<1x128xf32> to vector<6x128xf32>
    %143 = arith.mulf %141, %142 : vector<6x128xf32>
    %144 = vector.extract_strided_slice %112 {offsets = [0, 3], sizes = [6, 1], strides = [1, 1]} : vector<6x9xf32> to vector<6x1xf32>
    %145 = vector.broadcast %144 : vector<6x1xf32> to vector<6x128xf32>
    %146 = arith.mulf %143, %145 : vector<6x128xf32>
    %147 = arith.addf %140, %146 : vector<6x128xf32>
    %c127_i32_21 = arith.constant 127 : i32
    %148 = tpu.dynamic_rotate %116 by %c127_i32_21 dim 1 : vector<6x128xf32>, i32 -> vector<6x128xf32>
    %149 = vector.broadcast %5 : vector<1x128xf32> to vector<6x128xf32>
    %150 = arith.mulf %148, %149 : vector<6x128xf32>
    %151 = vector.extract_strided_slice %112 {offsets = [0, 5], sizes = [6, 1], strides = [1, 1]} : vector<6x9xf32> to vector<6x1xf32>
    %152 = vector.broadcast %151 : vector<6x1xf32> to vector<6x128xf32>
    %153 = arith.mulf %150, %152 : vector<6x128xf32>
    %154 = arith.addf %147, %153 : vector<6x128xf32>
    %c121_i32_22 = arith.constant 121 : i32
    %155 = tpu.dynamic_rotate %116 by %c121_i32_22 dim 1 : vector<6x128xf32>, i32 -> vector<6x128xf32>
    %156 = vector.broadcast %6 : vector<1x128xf32> to vector<6x128xf32>
    %157 = arith.mulf %155, %156 : vector<6x128xf32>
    %158 = vector.extract_strided_slice %112 {offsets = [0, 6], sizes = [6, 1], strides = [1, 1]} : vector<6x9xf32> to vector<6x1xf32>
    %159 = vector.broadcast %158 : vector<6x1xf32> to vector<6x128xf32>
    %160 = arith.mulf %157, %159 : vector<6x128xf32>
    %161 = arith.addf %154, %160 : vector<6x128xf32>
    %c120_i32_23 = arith.constant 120 : i32
    %162 = tpu.dynamic_rotate %116 by %c120_i32_23 dim 1 : vector<6x128xf32>, i32 -> vector<6x128xf32>
    %163 = vector.broadcast %7 : vector<1x128xf32> to vector<6x128xf32>
    %164 = arith.mulf %162, %163 : vector<6x128xf32>
    %165 = vector.extract_strided_slice %112 {offsets = [0, 7], sizes = [6, 1], strides = [1, 1]} : vector<6x9xf32> to vector<6x1xf32>
    %166 = vector.broadcast %165 : vector<6x1xf32> to vector<6x128xf32>
    %167 = arith.mulf %164, %166 : vector<6x128xf32>
    %168 = arith.addf %161, %167 : vector<6x128xf32>
    %c119_i32_24 = arith.constant 119 : i32
    %169 = tpu.dynamic_rotate %116 by %c119_i32_24 dim 1 : vector<6x128xf32>, i32 -> vector<6x128xf32>
    %170 = vector.broadcast %8 : vector<1x128xf32> to vector<6x128xf32>
    %171 = arith.mulf %169, %170 : vector<6x128xf32>
    %172 = vector.extract_strided_slice %112 {offsets = [0, 8], sizes = [6, 1], strides = [1, 1]} : vector<6x9xf32> to vector<6x1xf32>
    %173 = vector.broadcast %172 : vector<6x1xf32> to vector<6x128xf32>
    %174 = arith.mulf %171, %173 : vector<6x128xf32>
    %175 = arith.addf %168, %174 : vector<6x128xf32>
    %176 = vector.extract_strided_slice %175 {offsets = [0, 0], sizes = [1, 128], strides = [1, 1]} : vector<6x128xf32> to vector<1x128xf32>
    %177 = vector.extract_strided_slice %113 {offsets = [0, 0], sizes = [6, 1], strides = [1, 1]} : vector<6x6xf32> to vector<6x1xf32>
    %178 = vector.broadcast %176 : vector<1x128xf32> to vector<6x128xf32>
    %179 = vector.broadcast %177 : vector<6x1xf32> to vector<6x128xf32>
    %180 = arith.mulf %178, %179 : vector<6x128xf32>
    %181 = vector.extract_strided_slice %175 {offsets = [1, 0], sizes = [1, 128], strides = [1, 1]} : vector<6x128xf32> to vector<1x128xf32>
    %182 = vector.extract_strided_slice %113 {offsets = [0, 1], sizes = [6, 1], strides = [1, 1]} : vector<6x6xf32> to vector<6x1xf32>
    %183 = vector.broadcast %181 : vector<1x128xf32> to vector<6x128xf32>
    %184 = vector.broadcast %182 : vector<6x1xf32> to vector<6x128xf32>
    %185 = arith.mulf %183, %184 : vector<6x128xf32>
    %186 = arith.addf %180, %185 : vector<6x128xf32>
    %187 = vector.extract_strided_slice %175 {offsets = [2, 0], sizes = [1, 128], strides = [1, 1]} : vector<6x128xf32> to vector<1x128xf32>
    %188 = vector.extract_strided_slice %113 {offsets = [0, 2], sizes = [6, 1], strides = [1, 1]} : vector<6x6xf32> to vector<6x1xf32>
    %189 = vector.broadcast %187 : vector<1x128xf32> to vector<6x128xf32>
    %190 = vector.broadcast %188 : vector<6x1xf32> to vector<6x128xf32>
    %191 = arith.mulf %189, %190 : vector<6x128xf32>
    %192 = arith.addf %186, %191 : vector<6x128xf32>
    %193 = vector.extract_strided_slice %175 {offsets = [3, 0], sizes = [1, 128], strides = [1, 1]} : vector<6x128xf32> to vector<1x128xf32>
    %194 = vector.extract_strided_slice %113 {offsets = [0, 3], sizes = [6, 1], strides = [1, 1]} : vector<6x6xf32> to vector<6x1xf32>
    %195 = vector.broadcast %193 : vector<1x128xf32> to vector<6x128xf32>
    %196 = vector.broadcast %194 : vector<6x1xf32> to vector<6x128xf32>
    %197 = arith.mulf %195, %196 : vector<6x128xf32>
    %198 = arith.addf %192, %197 : vector<6x128xf32>
    %199 = vector.extract_strided_slice %175 {offsets = [4, 0], sizes = [1, 128], strides = [1, 1]} : vector<6x128xf32> to vector<1x128xf32>
    %200 = vector.extract_strided_slice %113 {offsets = [0, 4], sizes = [6, 1], strides = [1, 1]} : vector<6x6xf32> to vector<6x1xf32>
    %201 = vector.broadcast %199 : vector<1x128xf32> to vector<6x128xf32>
    %202 = vector.broadcast %200 : vector<6x1xf32> to vector<6x128xf32>
    %203 = arith.mulf %201, %202 : vector<6x128xf32>
    %204 = arith.addf %198, %203 : vector<6x128xf32>
    %205 = vector.extract_strided_slice %175 {offsets = [5, 0], sizes = [1, 128], strides = [1, 1]} : vector<6x128xf32> to vector<1x128xf32>
    %206 = vector.extract_strided_slice %113 {offsets = [0, 5], sizes = [6, 1], strides = [1, 1]} : vector<6x6xf32> to vector<6x1xf32>
    %207 = vector.broadcast %205 : vector<1x128xf32> to vector<6x128xf32>
    %208 = vector.broadcast %206 : vector<6x1xf32> to vector<6x128xf32>
    %209 = arith.mulf %207, %208 : vector<6x128xf32>
    %210 = arith.addf %204, %209 : vector<6x128xf32>
    %211 = vector.broadcast %114 : vector<6x1xf32> to vector<6x128xf32>
    %212 = arith.addf %210, %211 : vector<6x128xf32>
    %c0_25 = arith.constant 0 : index
    %c0_26 = arith.constant 0 : index
    %213 = vector.load %arg9[%c0_25, %c0_26] : memref<6x9xf32, #tpu.memory_space<vmem>>, vector<6x9xf32>
    %c0_27 = arith.constant 0 : index
    %c0_28 = arith.constant 0 : index
    %214 = vector.load %arg10[%c0_27, %c0_28] : memref<6x6xf32, #tpu.memory_space<vmem>>, vector<6x6xf32>
    %c0_29 = arith.constant 0 : index
    %c0_30 = arith.constant 0 : index
    %215 = vector.load %arg11[%c0_29, %c0_30] : memref<6x1xf32, #tpu.memory_space<vmem>>, vector<6x1xf32>
    %cst_31 = arith.constant 0.000000e+00 : f32
    %216 = vector.broadcast %cst_31 : f32 to vector<6x128xf32>
    %217 = arith.maximumf %212, %216 : vector<6x128xf32>
    %218 = vector.extract_strided_slice %213 {offsets = [0, 4], sizes = [6, 1], strides = [1, 1]} : vector<6x9xf32> to vector<6x1xf32>
    %219 = vector.broadcast %218 : vector<6x1xf32> to vector<6x128xf32>
    %220 = arith.mulf %217, %219 : vector<6x128xf32>
    %c9_i32_32 = arith.constant 9 : i32
    %221 = tpu.dynamic_rotate %217 by %c9_i32_32 dim 1 : vector<6x128xf32>, i32 -> vector<6x128xf32>
    %222 = vector.broadcast %1 : vector<1x128xf32> to vector<6x128xf32>
    %223 = arith.mulf %221, %222 : vector<6x128xf32>
    %224 = vector.extract_strided_slice %213 {offsets = [0, 0], sizes = [6, 1], strides = [1, 1]} : vector<6x9xf32> to vector<6x1xf32>
    %225 = vector.broadcast %224 : vector<6x1xf32> to vector<6x128xf32>
    %226 = arith.mulf %223, %225 : vector<6x128xf32>
    %227 = arith.addf %220, %226 : vector<6x128xf32>
    %c8_i32_33 = arith.constant 8 : i32
    %228 = tpu.dynamic_rotate %217 by %c8_i32_33 dim 1 : vector<6x128xf32>, i32 -> vector<6x128xf32>
    %229 = vector.broadcast %2 : vector<1x128xf32> to vector<6x128xf32>
    %230 = arith.mulf %228, %229 : vector<6x128xf32>
    %231 = vector.extract_strided_slice %213 {offsets = [0, 1], sizes = [6, 1], strides = [1, 1]} : vector<6x9xf32> to vector<6x1xf32>
    %232 = vector.broadcast %231 : vector<6x1xf32> to vector<6x128xf32>
    %233 = arith.mulf %230, %232 : vector<6x128xf32>
    %234 = arith.addf %227, %233 : vector<6x128xf32>
    %c7_i32_34 = arith.constant 7 : i32
    %235 = tpu.dynamic_rotate %217 by %c7_i32_34 dim 1 : vector<6x128xf32>, i32 -> vector<6x128xf32>
    %236 = vector.broadcast %3 : vector<1x128xf32> to vector<6x128xf32>
    %237 = arith.mulf %235, %236 : vector<6x128xf32>
    %238 = vector.extract_strided_slice %213 {offsets = [0, 2], sizes = [6, 1], strides = [1, 1]} : vector<6x9xf32> to vector<6x1xf32>
    %239 = vector.broadcast %238 : vector<6x1xf32> to vector<6x128xf32>
    %240 = arith.mulf %237, %239 : vector<6x128xf32>
    %241 = arith.addf %234, %240 : vector<6x128xf32>
    %c1_i32_35 = arith.constant 1 : i32
    %242 = tpu.dynamic_rotate %217 by %c1_i32_35 dim 1 : vector<6x128xf32>, i32 -> vector<6x128xf32>
    %243 = vector.broadcast %4 : vector<1x128xf32> to vector<6x128xf32>
    %244 = arith.mulf %242, %243 : vector<6x128xf32>
    %245 = vector.extract_strided_slice %213 {offsets = [0, 3], sizes = [6, 1], strides = [1, 1]} : vector<6x9xf32> to vector<6x1xf32>
    %246 = vector.broadcast %245 : vector<6x1xf32> to vector<6x128xf32>
    %247 = arith.mulf %244, %246 : vector<6x128xf32>
    %248 = arith.addf %241, %247 : vector<6x128xf32>
    %c127_i32_36 = arith.constant 127 : i32
    %249 = tpu.dynamic_rotate %217 by %c127_i32_36 dim 1 : vector<6x128xf32>, i32 -> vector<6x128xf32>
    %250 = vector.broadcast %5 : vector<1x128xf32> to vector<6x128xf32>
    %251 = arith.mulf %249, %250 : vector<6x128xf32>
    %252 = vector.extract_strided_slice %213 {offsets = [0, 5], sizes = [6, 1], strides = [1, 1]} : vector<6x9xf32> to vector<6x1xf32>
    %253 = vector.broadcast %252 : vector<6x1xf32> to vector<6x128xf32>
    %254 = arith.mulf %251, %253 : vector<6x128xf32>
    %255 = arith.addf %248, %254 : vector<6x128xf32>
    %c121_i32_37 = arith.constant 121 : i32
    %256 = tpu.dynamic_rotate %217 by %c121_i32_37 dim 1 : vector<6x128xf32>, i32 -> vector<6x128xf32>
    %257 = vector.broadcast %6 : vector<1x128xf32> to vector<6x128xf32>
    %258 = arith.mulf %256, %257 : vector<6x128xf32>
    %259 = vector.extract_strided_slice %213 {offsets = [0, 6], sizes = [6, 1], strides = [1, 1]} : vector<6x9xf32> to vector<6x1xf32>
    %260 = vector.broadcast %259 : vector<6x1xf32> to vector<6x128xf32>
    %261 = arith.mulf %258, %260 : vector<6x128xf32>
    %262 = arith.addf %255, %261 : vector<6x128xf32>
    %c120_i32_38 = arith.constant 120 : i32
    %263 = tpu.dynamic_rotate %217 by %c120_i32_38 dim 1 : vector<6x128xf32>, i32 -> vector<6x128xf32>
    %264 = vector.broadcast %7 : vector<1x128xf32> to vector<6x128xf32>
    %265 = arith.mulf %263, %264 : vector<6x128xf32>
    %266 = vector.extract_strided_slice %213 {offsets = [0, 7], sizes = [6, 1], strides = [1, 1]} : vector<6x9xf32> to vector<6x1xf32>
    %267 = vector.broadcast %266 : vector<6x1xf32> to vector<6x128xf32>
    %268 = arith.mulf %265, %267 : vector<6x128xf32>
    %269 = arith.addf %262, %268 : vector<6x128xf32>
    %c119_i32_39 = arith.constant 119 : i32
    %270 = tpu.dynamic_rotate %217 by %c119_i32_39 dim 1 : vector<6x128xf32>, i32 -> vector<6x128xf32>
    %271 = vector.broadcast %8 : vector<1x128xf32> to vector<6x128xf32>
    %272 = arith.mulf %270, %271 : vector<6x128xf32>
    %273 = vector.extract_strided_slice %213 {offsets = [0, 8], sizes = [6, 1], strides = [1, 1]} : vector<6x9xf32> to vector<6x1xf32>
    %274 = vector.broadcast %273 : vector<6x1xf32> to vector<6x128xf32>
    %275 = arith.mulf %272, %274 : vector<6x128xf32>
    %276 = arith.addf %269, %275 : vector<6x128xf32>
    %277 = vector.extract_strided_slice %276 {offsets = [0, 0], sizes = [1, 128], strides = [1, 1]} : vector<6x128xf32> to vector<1x128xf32>
    %278 = vector.extract_strided_slice %214 {offsets = [0, 0], sizes = [6, 1], strides = [1, 1]} : vector<6x6xf32> to vector<6x1xf32>
    %279 = vector.broadcast %277 : vector<1x128xf32> to vector<6x128xf32>
    %280 = vector.broadcast %278 : vector<6x1xf32> to vector<6x128xf32>
    %281 = arith.mulf %279, %280 : vector<6x128xf32>
    %282 = vector.extract_strided_slice %276 {offsets = [1, 0], sizes = [1, 128], strides = [1, 1]} : vector<6x128xf32> to vector<1x128xf32>
    %283 = vector.extract_strided_slice %214 {offsets = [0, 1], sizes = [6, 1], strides = [1, 1]} : vector<6x6xf32> to vector<6x1xf32>
    %284 = vector.broadcast %282 : vector<1x128xf32> to vector<6x128xf32>
    %285 = vector.broadcast %283 : vector<6x1xf32> to vector<6x128xf32>
    %286 = arith.mulf %284, %285 : vector<6x128xf32>
    %287 = arith.addf %281, %286 : vector<6x128xf32>
    %288 = vector.extract_strided_slice %276 {offsets = [2, 0], sizes = [1, 128], strides = [1, 1]} : vector<6x128xf32> to vector<1x128xf32>
    %289 = vector.extract_strided_slice %214 {offsets = [0, 2], sizes = [6, 1], strides = [1, 1]} : vector<6x6xf32> to vector<6x1xf32>
    %290 = vector.broadcast %288 : vector<1x128xf32> to vector<6x128xf32>
    %291 = vector.broadcast %289 : vector<6x1xf32> to vector<6x128xf32>
    %292 = arith.mulf %290, %291 : vector<6x128xf32>
    %293 = arith.addf %287, %292 : vector<6x128xf32>
    %294 = vector.extract_strided_slice %276 {offsets = [3, 0], sizes = [1, 128], strides = [1, 1]} : vector<6x128xf32> to vector<1x128xf32>
    %295 = vector.extract_strided_slice %214 {offsets = [0, 3], sizes = [6, 1], strides = [1, 1]} : vector<6x6xf32> to vector<6x1xf32>
    %296 = vector.broadcast %294 : vector<1x128xf32> to vector<6x128xf32>
    %297 = vector.broadcast %295 : vector<6x1xf32> to vector<6x128xf32>
    %298 = arith.mulf %296, %297 : vector<6x128xf32>
    %299 = arith.addf %293, %298 : vector<6x128xf32>
    %300 = vector.extract_strided_slice %276 {offsets = [4, 0], sizes = [1, 128], strides = [1, 1]} : vector<6x128xf32> to vector<1x128xf32>
    %301 = vector.extract_strided_slice %214 {offsets = [0, 4], sizes = [6, 1], strides = [1, 1]} : vector<6x6xf32> to vector<6x1xf32>
    %302 = vector.broadcast %300 : vector<1x128xf32> to vector<6x128xf32>
    %303 = vector.broadcast %301 : vector<6x1xf32> to vector<6x128xf32>
    %304 = arith.mulf %302, %303 : vector<6x128xf32>
    %305 = arith.addf %299, %304 : vector<6x128xf32>
    %306 = vector.extract_strided_slice %276 {offsets = [5, 0], sizes = [1, 128], strides = [1, 1]} : vector<6x128xf32> to vector<1x128xf32>
    %307 = vector.extract_strided_slice %214 {offsets = [0, 5], sizes = [6, 1], strides = [1, 1]} : vector<6x6xf32> to vector<6x1xf32>
    %308 = vector.broadcast %306 : vector<1x128xf32> to vector<6x128xf32>
    %309 = vector.broadcast %307 : vector<6x1xf32> to vector<6x128xf32>
    %310 = arith.mulf %308, %309 : vector<6x128xf32>
    %311 = arith.addf %305, %310 : vector<6x128xf32>
    %312 = vector.broadcast %215 : vector<6x1xf32> to vector<6x128xf32>
    %313 = arith.addf %311, %312 : vector<6x128xf32>
    %c0_40 = arith.constant 0 : index
    %c0_41 = arith.constant 0 : index
    %314 = vector.load %arg12[%c0_40, %c0_41] : memref<6x9xf32, #tpu.memory_space<vmem>>, vector<6x9xf32>
    %c0_42 = arith.constant 0 : index
    %c0_43 = arith.constant 0 : index
    %315 = vector.load %arg13[%c0_42, %c0_43] : memref<6x6xf32, #tpu.memory_space<vmem>>, vector<6x6xf32>
    %c0_44 = arith.constant 0 : index
    %c0_45 = arith.constant 0 : index
    %316 = vector.load %arg14[%c0_44, %c0_45] : memref<6x1xf32, #tpu.memory_space<vmem>>, vector<6x1xf32>
    %cst_46 = arith.constant 0.000000e+00 : f32
    %317 = vector.broadcast %cst_46 : f32 to vector<6x128xf32>
    %318 = arith.maximumf %313, %317 : vector<6x128xf32>
    %319 = vector.extract_strided_slice %314 {offsets = [0, 4], sizes = [6, 1], strides = [1, 1]} : vector<6x9xf32> to vector<6x1xf32>
    %320 = vector.broadcast %319 : vector<6x1xf32> to vector<6x128xf32>
    %321 = arith.mulf %318, %320 : vector<6x128xf32>
    %c9_i32_47 = arith.constant 9 : i32
    %322 = tpu.dynamic_rotate %318 by %c9_i32_47 dim 1 : vector<6x128xf32>, i32 -> vector<6x128xf32>
    %323 = vector.broadcast %1 : vector<1x128xf32> to vector<6x128xf32>
    %324 = arith.mulf %322, %323 : vector<6x128xf32>
    %325 = vector.extract_strided_slice %314 {offsets = [0, 0], sizes = [6, 1], strides = [1, 1]} : vector<6x9xf32> to vector<6x1xf32>
    %326 = vector.broadcast %325 : vector<6x1xf32> to vector<6x128xf32>
    %327 = arith.mulf %324, %326 : vector<6x128xf32>
    %328 = arith.addf %321, %327 : vector<6x128xf32>
    %c8_i32_48 = arith.constant 8 : i32
    %329 = tpu.dynamic_rotate %318 by %c8_i32_48 dim 1 : vector<6x128xf32>, i32 -> vector<6x128xf32>
    %330 = vector.broadcast %2 : vector<1x128xf32> to vector<6x128xf32>
    %331 = arith.mulf %329, %330 : vector<6x128xf32>
    %332 = vector.extract_strided_slice %314 {offsets = [0, 1], sizes = [6, 1], strides = [1, 1]} : vector<6x9xf32> to vector<6x1xf32>
    %333 = vector.broadcast %332 : vector<6x1xf32> to vector<6x128xf32>
    %334 = arith.mulf %331, %333 : vector<6x128xf32>
    %335 = arith.addf %328, %334 : vector<6x128xf32>
    %c7_i32_49 = arith.constant 7 : i32
    %336 = tpu.dynamic_rotate %318 by %c7_i32_49 dim 1 : vector<6x128xf32>, i32 -> vector<6x128xf32>
    %337 = vector.broadcast %3 : vector<1x128xf32> to vector<6x128xf32>
    %338 = arith.mulf %336, %337 : vector<6x128xf32>
    %339 = vector.extract_strided_slice %314 {offsets = [0, 2], sizes = [6, 1], strides = [1, 1]} : vector<6x9xf32> to vector<6x1xf32>
    %340 = vector.broadcast %339 : vector<6x1xf32> to vector<6x128xf32>
    %341 = arith.mulf %338, %340 : vector<6x128xf32>
    %342 = arith.addf %335, %341 : vector<6x128xf32>
    %c1_i32_50 = arith.constant 1 : i32
    %343 = tpu.dynamic_rotate %318 by %c1_i32_50 dim 1 : vector<6x128xf32>, i32 -> vector<6x128xf32>
    %344 = vector.broadcast %4 : vector<1x128xf32> to vector<6x128xf32>
    %345 = arith.mulf %343, %344 : vector<6x128xf32>
    %346 = vector.extract_strided_slice %314 {offsets = [0, 3], sizes = [6, 1], strides = [1, 1]} : vector<6x9xf32> to vector<6x1xf32>
    %347 = vector.broadcast %346 : vector<6x1xf32> to vector<6x128xf32>
    %348 = arith.mulf %345, %347 : vector<6x128xf32>
    %349 = arith.addf %342, %348 : vector<6x128xf32>
    %c127_i32_51 = arith.constant 127 : i32
    %350 = tpu.dynamic_rotate %318 by %c127_i32_51 dim 1 : vector<6x128xf32>, i32 -> vector<6x128xf32>
    %351 = vector.broadcast %5 : vector<1x128xf32> to vector<6x128xf32>
    %352 = arith.mulf %350, %351 : vector<6x128xf32>
    %353 = vector.extract_strided_slice %314 {offsets = [0, 5], sizes = [6, 1], strides = [1, 1]} : vector<6x9xf32> to vector<6x1xf32>
    %354 = vector.broadcast %353 : vector<6x1xf32> to vector<6x128xf32>
    %355 = arith.mulf %352, %354 : vector<6x128xf32>
    %356 = arith.addf %349, %355 : vector<6x128xf32>
    %c121_i32_52 = arith.constant 121 : i32
    %357 = tpu.dynamic_rotate %318 by %c121_i32_52 dim 1 : vector<6x128xf32>, i32 -> vector<6x128xf32>
    %358 = vector.broadcast %6 : vector<1x128xf32> to vector<6x128xf32>
    %359 = arith.mulf %357, %358 : vector<6x128xf32>
    %360 = vector.extract_strided_slice %314 {offsets = [0, 6], sizes = [6, 1], strides = [1, 1]} : vector<6x9xf32> to vector<6x1xf32>
    %361 = vector.broadcast %360 : vector<6x1xf32> to vector<6x128xf32>
    %362 = arith.mulf %359, %361 : vector<6x128xf32>
    %363 = arith.addf %356, %362 : vector<6x128xf32>
    %c120_i32_53 = arith.constant 120 : i32
    %364 = tpu.dynamic_rotate %318 by %c120_i32_53 dim 1 : vector<6x128xf32>, i32 -> vector<6x128xf32>
    %365 = vector.broadcast %7 : vector<1x128xf32> to vector<6x128xf32>
    %366 = arith.mulf %364, %365 : vector<6x128xf32>
    %367 = vector.extract_strided_slice %314 {offsets = [0, 7], sizes = [6, 1], strides = [1, 1]} : vector<6x9xf32> to vector<6x1xf32>
    %368 = vector.broadcast %367 : vector<6x1xf32> to vector<6x128xf32>
    %369 = arith.mulf %366, %368 : vector<6x128xf32>
    %370 = arith.addf %363, %369 : vector<6x128xf32>
    %c119_i32_54 = arith.constant 119 : i32
    %371 = tpu.dynamic_rotate %318 by %c119_i32_54 dim 1 : vector<6x128xf32>, i32 -> vector<6x128xf32>
    %372 = vector.broadcast %8 : vector<1x128xf32> to vector<6x128xf32>
    %373 = arith.mulf %371, %372 : vector<6x128xf32>
    %374 = vector.extract_strided_slice %314 {offsets = [0, 8], sizes = [6, 1], strides = [1, 1]} : vector<6x9xf32> to vector<6x1xf32>
    %375 = vector.broadcast %374 : vector<6x1xf32> to vector<6x128xf32>
    %376 = arith.mulf %373, %375 : vector<6x128xf32>
    %377 = arith.addf %370, %376 : vector<6x128xf32>
    %378 = vector.extract_strided_slice %377 {offsets = [0, 0], sizes = [1, 128], strides = [1, 1]} : vector<6x128xf32> to vector<1x128xf32>
    %379 = vector.extract_strided_slice %315 {offsets = [0, 0], sizes = [6, 1], strides = [1, 1]} : vector<6x6xf32> to vector<6x1xf32>
    %380 = vector.broadcast %378 : vector<1x128xf32> to vector<6x128xf32>
    %381 = vector.broadcast %379 : vector<6x1xf32> to vector<6x128xf32>
    %382 = arith.mulf %380, %381 : vector<6x128xf32>
    %383 = vector.extract_strided_slice %377 {offsets = [1, 0], sizes = [1, 128], strides = [1, 1]} : vector<6x128xf32> to vector<1x128xf32>
    %384 = vector.extract_strided_slice %315 {offsets = [0, 1], sizes = [6, 1], strides = [1, 1]} : vector<6x6xf32> to vector<6x1xf32>
    %385 = vector.broadcast %383 : vector<1x128xf32> to vector<6x128xf32>
    %386 = vector.broadcast %384 : vector<6x1xf32> to vector<6x128xf32>
    %387 = arith.mulf %385, %386 : vector<6x128xf32>
    %388 = arith.addf %382, %387 : vector<6x128xf32>
    %389 = vector.extract_strided_slice %377 {offsets = [2, 0], sizes = [1, 128], strides = [1, 1]} : vector<6x128xf32> to vector<1x128xf32>
    %390 = vector.extract_strided_slice %315 {offsets = [0, 2], sizes = [6, 1], strides = [1, 1]} : vector<6x6xf32> to vector<6x1xf32>
    %391 = vector.broadcast %389 : vector<1x128xf32> to vector<6x128xf32>
    %392 = vector.broadcast %390 : vector<6x1xf32> to vector<6x128xf32>
    %393 = arith.mulf %391, %392 : vector<6x128xf32>
    %394 = arith.addf %388, %393 : vector<6x128xf32>
    %395 = vector.extract_strided_slice %377 {offsets = [3, 0], sizes = [1, 128], strides = [1, 1]} : vector<6x128xf32> to vector<1x128xf32>
    %396 = vector.extract_strided_slice %315 {offsets = [0, 3], sizes = [6, 1], strides = [1, 1]} : vector<6x6xf32> to vector<6x1xf32>
    %397 = vector.broadcast %395 : vector<1x128xf32> to vector<6x128xf32>
    %398 = vector.broadcast %396 : vector<6x1xf32> to vector<6x128xf32>
    %399 = arith.mulf %397, %398 : vector<6x128xf32>
    %400 = arith.addf %394, %399 : vector<6x128xf32>
    %401 = vector.extract_strided_slice %377 {offsets = [4, 0], sizes = [1, 128], strides = [1, 1]} : vector<6x128xf32> to vector<1x128xf32>
    %402 = vector.extract_strided_slice %315 {offsets = [0, 4], sizes = [6, 1], strides = [1, 1]} : vector<6x6xf32> to vector<6x1xf32>
    %403 = vector.broadcast %401 : vector<1x128xf32> to vector<6x128xf32>
    %404 = vector.broadcast %402 : vector<6x1xf32> to vector<6x128xf32>
    %405 = arith.mulf %403, %404 : vector<6x128xf32>
    %406 = arith.addf %400, %405 : vector<6x128xf32>
    %407 = vector.extract_strided_slice %377 {offsets = [5, 0], sizes = [1, 128], strides = [1, 1]} : vector<6x128xf32> to vector<1x128xf32>
    %408 = vector.extract_strided_slice %315 {offsets = [0, 5], sizes = [6, 1], strides = [1, 1]} : vector<6x6xf32> to vector<6x1xf32>
    %409 = vector.broadcast %407 : vector<1x128xf32> to vector<6x128xf32>
    %410 = vector.broadcast %408 : vector<6x1xf32> to vector<6x128xf32>
    %411 = arith.mulf %409, %410 : vector<6x128xf32>
    %412 = arith.addf %406, %411 : vector<6x128xf32>
    %413 = vector.broadcast %316 : vector<6x1xf32> to vector<6x128xf32>
    %414 = arith.addf %412, %413 : vector<6x128xf32>
    %c0_55 = arith.constant 0 : index
    %c0_56 = arith.constant 0 : index
    %415 = vector.load %arg15[%c0_55, %c0_56] : memref<6x9xf32, #tpu.memory_space<vmem>>, vector<6x9xf32>
    %c0_57 = arith.constant 0 : index
    %c0_58 = arith.constant 0 : index
    %416 = vector.load %arg16[%c0_57, %c0_58] : memref<6x6xf32, #tpu.memory_space<vmem>>, vector<6x6xf32>
    %c0_59 = arith.constant 0 : index
    %c0_60 = arith.constant 0 : index
    %417 = vector.load %arg17[%c0_59, %c0_60] : memref<6x1xf32, #tpu.memory_space<vmem>>, vector<6x1xf32>
    %cst_61 = arith.constant 0.000000e+00 : f32
    %418 = vector.broadcast %cst_61 : f32 to vector<6x128xf32>
    %419 = arith.maximumf %414, %418 : vector<6x128xf32>
    %420 = vector.extract_strided_slice %415 {offsets = [0, 4], sizes = [6, 1], strides = [1, 1]} : vector<6x9xf32> to vector<6x1xf32>
    %421 = vector.broadcast %420 : vector<6x1xf32> to vector<6x128xf32>
    %422 = arith.mulf %419, %421 : vector<6x128xf32>
    %c9_i32_62 = arith.constant 9 : i32
    %423 = tpu.dynamic_rotate %419 by %c9_i32_62 dim 1 : vector<6x128xf32>, i32 -> vector<6x128xf32>
    %424 = vector.broadcast %1 : vector<1x128xf32> to vector<6x128xf32>
    %425 = arith.mulf %423, %424 : vector<6x128xf32>
    %426 = vector.extract_strided_slice %415 {offsets = [0, 0], sizes = [6, 1], strides = [1, 1]} : vector<6x9xf32> to vector<6x1xf32>
    %427 = vector.broadcast %426 : vector<6x1xf32> to vector<6x128xf32>
    %428 = arith.mulf %425, %427 : vector<6x128xf32>
    %429 = arith.addf %422, %428 : vector<6x128xf32>
    %c8_i32_63 = arith.constant 8 : i32
    %430 = tpu.dynamic_rotate %419 by %c8_i32_63 dim 1 : vector<6x128xf32>, i32 -> vector<6x128xf32>
    %431 = vector.broadcast %2 : vector<1x128xf32> to vector<6x128xf32>
    %432 = arith.mulf %430, %431 : vector<6x128xf32>
    %433 = vector.extract_strided_slice %415 {offsets = [0, 1], sizes = [6, 1], strides = [1, 1]} : vector<6x9xf32> to vector<6x1xf32>
    %434 = vector.broadcast %433 : vector<6x1xf32> to vector<6x128xf32>
    %435 = arith.mulf %432, %434 : vector<6x128xf32>
    %436 = arith.addf %429, %435 : vector<6x128xf32>
    %c7_i32_64 = arith.constant 7 : i32
    %437 = tpu.dynamic_rotate %419 by %c7_i32_64 dim 1 : vector<6x128xf32>, i32 -> vector<6x128xf32>
    %438 = vector.broadcast %3 : vector<1x128xf32> to vector<6x128xf32>
    %439 = arith.mulf %437, %438 : vector<6x128xf32>
    %440 = vector.extract_strided_slice %415 {offsets = [0, 2], sizes = [6, 1], strides = [1, 1]} : vector<6x9xf32> to vector<6x1xf32>
    %441 = vector.broadcast %440 : vector<6x1xf32> to vector<6x128xf32>
    %442 = arith.mulf %439, %441 : vector<6x128xf32>
    %443 = arith.addf %436, %442 : vector<6x128xf32>
    %c1_i32_65 = arith.constant 1 : i32
    %444 = tpu.dynamic_rotate %419 by %c1_i32_65 dim 1 : vector<6x128xf32>, i32 -> vector<6x128xf32>
    %445 = vector.broadcast %4 : vector<1x128xf32> to vector<6x128xf32>
    %446 = arith.mulf %444, %445 : vector<6x128xf32>
    %447 = vector.extract_strided_slice %415 {offsets = [0, 3], sizes = [6, 1], strides = [1, 1]} : vector<6x9xf32> to vector<6x1xf32>
    %448 = vector.broadcast %447 : vector<6x1xf32> to vector<6x128xf32>
    %449 = arith.mulf %446, %448 : vector<6x128xf32>
    %450 = arith.addf %443, %449 : vector<6x128xf32>
    %c127_i32_66 = arith.constant 127 : i32
    %451 = tpu.dynamic_rotate %419 by %c127_i32_66 dim 1 : vector<6x128xf32>, i32 -> vector<6x128xf32>
    %452 = vector.broadcast %5 : vector<1x128xf32> to vector<6x128xf32>
    %453 = arith.mulf %451, %452 : vector<6x128xf32>
    %454 = vector.extract_strided_slice %415 {offsets = [0, 5], sizes = [6, 1], strides = [1, 1]} : vector<6x9xf32> to vector<6x1xf32>
    %455 = vector.broadcast %454 : vector<6x1xf32> to vector<6x128xf32>
    %456 = arith.mulf %453, %455 : vector<6x128xf32>
    %457 = arith.addf %450, %456 : vector<6x128xf32>
    %c121_i32_67 = arith.constant 121 : i32
    %458 = tpu.dynamic_rotate %419 by %c121_i32_67 dim 1 : vector<6x128xf32>, i32 -> vector<6x128xf32>
    %459 = vector.broadcast %6 : vector<1x128xf32> to vector<6x128xf32>
    %460 = arith.mulf %458, %459 : vector<6x128xf32>
    %461 = vector.extract_strided_slice %415 {offsets = [0, 6], sizes = [6, 1], strides = [1, 1]} : vector<6x9xf32> to vector<6x1xf32>
    %462 = vector.broadcast %461 : vector<6x1xf32> to vector<6x128xf32>
    %463 = arith.mulf %460, %462 : vector<6x128xf32>
    %464 = arith.addf %457, %463 : vector<6x128xf32>
    %c120_i32_68 = arith.constant 120 : i32
    %465 = tpu.dynamic_rotate %419 by %c120_i32_68 dim 1 : vector<6x128xf32>, i32 -> vector<6x128xf32>
    %466 = vector.broadcast %7 : vector<1x128xf32> to vector<6x128xf32>
    %467 = arith.mulf %465, %466 : vector<6x128xf32>
    %468 = vector.extract_strided_slice %415 {offsets = [0, 7], sizes = [6, 1], strides = [1, 1]} : vector<6x9xf32> to vector<6x1xf32>
    %469 = vector.broadcast %468 : vector<6x1xf32> to vector<6x128xf32>
    %470 = arith.mulf %467, %469 : vector<6x128xf32>
    %471 = arith.addf %464, %470 : vector<6x128xf32>
    %c119_i32_69 = arith.constant 119 : i32
    %472 = tpu.dynamic_rotate %419 by %c119_i32_69 dim 1 : vector<6x128xf32>, i32 -> vector<6x128xf32>
    %473 = vector.broadcast %8 : vector<1x128xf32> to vector<6x128xf32>
    %474 = arith.mulf %472, %473 : vector<6x128xf32>
    %475 = vector.extract_strided_slice %415 {offsets = [0, 8], sizes = [6, 1], strides = [1, 1]} : vector<6x9xf32> to vector<6x1xf32>
    %476 = vector.broadcast %475 : vector<6x1xf32> to vector<6x128xf32>
    %477 = arith.mulf %474, %476 : vector<6x128xf32>
    %478 = arith.addf %471, %477 : vector<6x128xf32>
    %479 = vector.extract_strided_slice %478 {offsets = [0, 0], sizes = [1, 128], strides = [1, 1]} : vector<6x128xf32> to vector<1x128xf32>
    %480 = vector.extract_strided_slice %416 {offsets = [0, 0], sizes = [6, 1], strides = [1, 1]} : vector<6x6xf32> to vector<6x1xf32>
    %481 = vector.broadcast %479 : vector<1x128xf32> to vector<6x128xf32>
    %482 = vector.broadcast %480 : vector<6x1xf32> to vector<6x128xf32>
    %483 = arith.mulf %481, %482 : vector<6x128xf32>
    %484 = vector.extract_strided_slice %478 {offsets = [1, 0], sizes = [1, 128], strides = [1, 1]} : vector<6x128xf32> to vector<1x128xf32>
    %485 = vector.extract_strided_slice %416 {offsets = [0, 1], sizes = [6, 1], strides = [1, 1]} : vector<6x6xf32> to vector<6x1xf32>
    %486 = vector.broadcast %484 : vector<1x128xf32> to vector<6x128xf32>
    %487 = vector.broadcast %485 : vector<6x1xf32> to vector<6x128xf32>
    %488 = arith.mulf %486, %487 : vector<6x128xf32>
    %489 = arith.addf %483, %488 : vector<6x128xf32>
    %490 = vector.extract_strided_slice %478 {offsets = [2, 0], sizes = [1, 128], strides = [1, 1]} : vector<6x128xf32> to vector<1x128xf32>
    %491 = vector.extract_strided_slice %416 {offsets = [0, 2], sizes = [6, 1], strides = [1, 1]} : vector<6x6xf32> to vector<6x1xf32>
    %492 = vector.broadcast %490 : vector<1x128xf32> to vector<6x128xf32>
    %493 = vector.broadcast %491 : vector<6x1xf32> to vector<6x128xf32>
    %494 = arith.mulf %492, %493 : vector<6x128xf32>
    %495 = arith.addf %489, %494 : vector<6x128xf32>
    %496 = vector.extract_strided_slice %478 {offsets = [3, 0], sizes = [1, 128], strides = [1, 1]} : vector<6x128xf32> to vector<1x128xf32>
    %497 = vector.extract_strided_slice %416 {offsets = [0, 3], sizes = [6, 1], strides = [1, 1]} : vector<6x6xf32> to vector<6x1xf32>
    %498 = vector.broadcast %496 : vector<1x128xf32> to vector<6x128xf32>
    %499 = vector.broadcast %497 : vector<6x1xf32> to vector<6x128xf32>
    %500 = arith.mulf %498, %499 : vector<6x128xf32>
    %501 = arith.addf %495, %500 : vector<6x128xf32>
    %502 = vector.extract_strided_slice %478 {offsets = [4, 0], sizes = [1, 128], strides = [1, 1]} : vector<6x128xf32> to vector<1x128xf32>
    %503 = vector.extract_strided_slice %416 {offsets = [0, 4], sizes = [6, 1], strides = [1, 1]} : vector<6x6xf32> to vector<6x1xf32>
    %504 = vector.broadcast %502 : vector<1x128xf32> to vector<6x128xf32>
    %505 = vector.broadcast %503 : vector<6x1xf32> to vector<6x128xf32>
    %506 = arith.mulf %504, %505 : vector<6x128xf32>
    %507 = arith.addf %501, %506 : vector<6x128xf32>
    %508 = vector.extract_strided_slice %478 {offsets = [5, 0], sizes = [1, 128], strides = [1, 1]} : vector<6x128xf32> to vector<1x128xf32>
    %509 = vector.extract_strided_slice %416 {offsets = [0, 5], sizes = [6, 1], strides = [1, 1]} : vector<6x6xf32> to vector<6x1xf32>
    %510 = vector.broadcast %508 : vector<1x128xf32> to vector<6x128xf32>
    %511 = vector.broadcast %509 : vector<6x1xf32> to vector<6x128xf32>
    %512 = arith.mulf %510, %511 : vector<6x128xf32>
    %513 = arith.addf %507, %512 : vector<6x128xf32>
    %514 = vector.broadcast %417 : vector<6x1xf32> to vector<6x128xf32>
    %515 = arith.addf %513, %514 : vector<6x128xf32>
    %516 = arith.addf %515, %10 : vector<6x128xf32>
    %c0_70 = arith.constant 0 : index
    %c0_71 = arith.constant 0 : index
    %c0_72 = arith.constant 0 : index
    %517 = vector.load %arg18[%c0_70, %c0_71, %c0_72] : memref<1x6x128xf32, #tpu.memory_space<vmem>>, vector<1x6x128xf32>
    %518 = vector.shape_cast %517 : vector<1x6x128xf32> to vector<6x128xf32>
    %519 = vector.shape_cast %516 : vector<6x128xf32> to vector<1x6x128xf32>
    tpu.vector_store %arg18[%c0_70, %c0_71, %c0_72], %519 {strides = array<i32>} : memref<1x6x128xf32, #tpu.memory_space<vmem>>, vector<1x6x128xf32>,
    return
  }
  func.func @transform_0(%arg0: i32) -> (i32, i32, i32) {
    %c0_i32 = arith.constant 0 : i32
    %c0_i32_0 = arith.constant 0 : i32
    %c0_i32_1 = arith.constant 0 : i32
    return %arg0, %c0_i32, %c0_i32_0 : i32, i32, i32
  }
  func.func @transform_1(%arg0: i32) -> (i32, i32) {
    %c0_i32 = arith.constant 0 : i32
    %c0_i32_0 = arith.constant 0 : i32
    %c0_i32_1 = arith.constant 0 : i32
    return %c0_i32, %c0_i32_0 : i32, i32
  }
  func.func @transform_2(%arg0: i32) -> (i32, i32) {
    %c0_i32 = arith.constant 0 : i32
    %c0_i32_0 = arith.constant 0 : i32
    %c0_i32_1 = arith.constant 0 : i32
    return %c0_i32, %c0_i32_0 : i32, i32
  }
  func.func @transform_3(%arg0: i32) -> (i32, i32) {
    %c0_i32 = arith.constant 0 : i32
    %c0_i32_0 = arith.constant 0 : i32
    %c0_i32_1 = arith.constant 0 : i32
    return %c0_i32, %c0_i32_0 : i32, i32
  }
  func.func @transform_4(%arg0: i32) -> (i32, i32) {
    %c0_i32 = arith.constant 0 : i32
    %c0_i32_0 = arith.constant 0 : i32
    %c0_i32_1 = arith.constant 0 : i32
    return %c0_i32, %c0_i32_0 : i32, i32
  }
  func.func @transform_5(%arg0: i32) -> (i32, i32) {
    %c0_i32 = arith.constant 0 : i32
    %c0_i32_0 = arith.constant 0 : i32
    %c0_i32_1 = arith.constant 0 : i32
    return %c0_i32, %c0_i32_0 : i32, i32
  }
  func.func @transform_6(%arg0: i32) -> (i32, i32) {
    %c0_i32 = arith.constant 0 : i32
    %c0_i32_0 = arith.constant 0 : i32
    %c0_i32_1 = arith.constant 0 : i32
    return %c0_i32, %c0_i32_0 : i32, i32
  }
  func.func @transform_7(%arg0: i32) -> (i32, i32) {
    %c0_i32 = arith.constant 0 : i32
    %c0_i32_0 = arith.constant 0 : i32
    %c0_i32_1 = arith.constant 0 : i32
    return %c0_i32, %c0_i32_0 : i32, i32
  }
  func.func @transform_8(%arg0: i32) -> (i32, i32) {
    %c0_i32 = arith.constant 0 : i32
    %c0_i32_0 = arith.constant 0 : i32
    %c0_i32_1 = arith.constant 0 : i32
    return %c0_i32, %c0_i32_0 : i32, i32
  }
  func.func @transform_9(%arg0: i32) -> (i32, i32) {
    %c0_i32 = arith.constant 0 : i32
    %c0_i32_0 = arith.constant 0 : i32
    %c0_i32_1 = arith.constant 0 : i32
    return %c0_i32, %c0_i32_0 : i32, i32
  }
  func.func @transform_10(%arg0: i32) -> (i32, i32) {
    %c0_i32 = arith.constant 0 : i32
    %c0_i32_0 = arith.constant 0 : i32
    %c0_i32_1 = arith.constant 0 : i32
    return %c0_i32, %c0_i32_0 : i32, i32
  }
  func.func @transform_11(%arg0: i32) -> (i32, i32) {
    %c0_i32 = arith.constant 0 : i32
    %c0_i32_0 = arith.constant 0 : i32
    %c0_i32_1 = arith.constant 0 : i32
    return %c0_i32, %c0_i32_0 : i32, i32
  }
  func.func @transform_12(%arg0: i32) -> (i32, i32) {
    %c0_i32 = arith.constant 0 : i32
    %c0_i32_0 = arith.constant 0 : i32
    %c0_i32_1 = arith.constant 0 : i32
    return %c0_i32, %c0_i32_0 : i32, i32
  }
  func.func @transform_13(%arg0: i32) -> (i32, i32) {
    %c0_i32 = arith.constant 0 : i32
    %c0_i32_0 = arith.constant 0 : i32
    %c0_i32_1 = arith.constant 0 : i32
    return %c0_i32, %c0_i32_0 : i32, i32
  }
  func.func @transform_14(%arg0: i32) -> (i32, i32) {
    %c0_i32 = arith.constant 0 : i32
    %c0_i32_0 = arith.constant 0 : i32
    %c0_i32_1 = arith.constant 0 : i32
    return %c0_i32, %c0_i32_0 : i32, i32
  }
  func.func @transform_15(%arg0: i32) -> (i32, i32) {
    %c0_i32 = arith.constant 0 : i32
    %c0_i32_0 = arith.constant 0 : i32
    %c0_i32_1 = arith.constant 0 : i32
    return %c0_i32, %c0_i32_0 : i32, i32
  }
  func.func @transform_16(%arg0: i32) -> (i32, i32) {
    %c0_i32 = arith.constant 0 : i32
    %c0_i32_0 = arith.constant 0 : i32
    %c0_i32_1 = arith.constant 0 : i32
    return %c0_i32, %c0_i32_0 : i32, i32
  }
  func.func @transform_17(%arg0: i32) -> (i32, i32, i32) {
    %c0_i32 = arith.constant 0 : i32
    %c0_i32_0 = arith.constant 0 : i32
    %c0_i32_1 = arith.constant 0 : i32
    return %arg0, %c0_i32, %c0_i32_0 : i32, i32, i32
  }
}

module attributes {stable_mosaic.version = 11 : i64} {
  func.func @kernel(%arg0: i32, %arg1: memref<1x12x256xf32, #tpu.memory_space<vmem>>, %arg2: memref<8x256xf32, #tpu.memory_space<vmem>>, %arg3: memref<12x9xf32, #tpu.memory_space<vmem>>, %arg4: memref<6x12xf32, #tpu.memory_space<vmem>>, %arg5: memref<6x1xf32, #tpu.memory_space<vmem>>, %arg6: memref<6x9xf32, #tpu.memory_space<vmem>>, %arg7: memref<6x6xf32, #tpu.memory_space<vmem>>, %arg8: memref<6x1xf32, #tpu.memory_space<vmem>>, %arg9: memref<6x9xf32, #tpu.memory_space<vmem>>, %arg10: memref<6x6xf32, #tpu.memory_space<vmem>>, %arg11: memref<6x1xf32, #tpu.memory_space<vmem>>, %arg12: memref<6x9xf32, #tpu.memory_space<vmem>>, %arg13: memref<6x6xf32, #tpu.memory_space<vmem>>, %arg14: memref<6x1xf32, #tpu.memory_space<vmem>>, %arg15: memref<6x9xf32, #tpu.memory_space<vmem>>, %arg16: memref<6x6xf32, #tpu.memory_space<vmem>>, %arg17: memref<6x1xf32, #tpu.memory_space<vmem>>, %arg18: memref<6x12xf32, #tpu.memory_space<vmem>>, %arg19: memref<6x1xf32, #tpu.memory_space<vmem>>, %arg20: memref<1x6x256xf32, #tpu.memory_space<vmem>>) attributes {dimension_semantics = [#tpu.dimension_semantics<parallel>], iteration_bounds = array<i64: 2>, scalar_prefetch = 0 : i64, scratch_operands = 0 : i64, tpu.core_type = #tpu.core_type<tc>, window_params = [{transform_indices = @transform_0, window_bounds = array<i64: 1, 12, 256>}, {pipeline_mode = #tpu.pipeline_mode<synchronous>, transform_indices = @transform_1, window_bounds = array<i64: 8, 256>}, {pipeline_mode = #tpu.pipeline_mode<synchronous>, transform_indices = @transform_2, window_bounds = array<i64: 12, 9>}, {pipeline_mode = #tpu.pipeline_mode<synchronous>, transform_indices = @transform_3, window_bounds = array<i64: 6, 12>}, {pipeline_mode = #tpu.pipeline_mode<synchronous>, transform_indices = @transform_4, window_bounds = array<i64: 6, 1>}, {pipeline_mode = #tpu.pipeline_mode<synchronous>, transform_indices = @transform_5, window_bounds = array<i64: 6, 9>}, {pipeline_mode = #tpu.pipeline_mode<synchronous>, transform_indices = @transform_6, window_bounds = array<i64: 6, 6>}, {pipeline_mode = #tpu.pipeline_mode<synchronous>, transform_indices = @transform_7, window_bounds = array<i64: 6, 1>}, {pipeline_mode = #tpu.pipeline_mode<synchronous>, transform_indices = @transform_8, window_bounds = array<i64: 6, 9>}, {pipeline_mode = #tpu.pipeline_mode<synchronous>, transform_indices = @transform_9, window_bounds = array<i64: 6, 6>}, {pipeline_mode = #tpu.pipeline_mode<synchronous>, transform_indices = @transform_10, window_bounds = array<i64: 6, 1>}, {pipeline_mode = #tpu.pipeline_mode<synchronous>, transform_indices = @transform_11, window_bounds = array<i64: 6, 9>}, {pipeline_mode = #tpu.pipeline_mode<synchronous>, transform_indices = @transform_12, window_bounds = array<i64: 6, 6>}, {pipeline_mode = #tpu.pipeline_mode<synchronous>, transform_indices = @transform_13, window_bounds = array<i64: 6, 1>}, {pipeline_mode = #tpu.pipeline_mode<synchronous>, transform_indices = @transform_14, window_bounds = array<i64: 6, 9>}, {pipeline_mode = #tpu.pipeline_mode<synchronous>, transform_indices = @transform_15, window_bounds = array<i64: 6, 6>}, {pipeline_mode = #tpu.pipeline_mode<synchronous>, transform_indices = @transform_16, window_bounds = array<i64: 6, 1>}, {pipeline_mode = #tpu.pipeline_mode<synchronous>, transform_indices = @transform_17, window_bounds = array<i64: 6, 12>}, {pipeline_mode = #tpu.pipeline_mode<synchronous>, transform_indices = @transform_18, window_bounds = array<i64: 6, 1>}, {transform_indices = @transform_19, window_bounds = array<i64: 1, 6, 256>}]} {
    %c0 = arith.constant 0 : index
    %c0_0 = arith.constant 0 : index
    %0 = vector.load %arg2[%c0, %c0_0] : memref<8x256xf32, #tpu.memory_space<vmem>>, vector<8x256xf32>
    %1 = vector.extract_strided_slice %0 {offsets = [0, 0], sizes = [1, 256], strides = [1, 1]} : vector<8x256xf32> to vector<1x256xf32>
    %2 = vector.extract_strided_slice %0 {offsets = [1, 0], sizes = [1, 256], strides = [1, 1]} : vector<8x256xf32> to vector<1x256xf32>
    %3 = vector.extract_strided_slice %0 {offsets = [2, 0], sizes = [1, 256], strides = [1, 1]} : vector<8x256xf32> to vector<1x256xf32>
    %4 = vector.extract_strided_slice %0 {offsets = [3, 0], sizes = [1, 256], strides = [1, 1]} : vector<8x256xf32> to vector<1x256xf32>
    %5 = vector.extract_strided_slice %0 {offsets = [4, 0], sizes = [1, 256], strides = [1, 1]} : vector<8x256xf32> to vector<1x256xf32>
    %6 = vector.extract_strided_slice %0 {offsets = [5, 0], sizes = [1, 256], strides = [1, 1]} : vector<8x256xf32> to vector<1x256xf32>
    %7 = vector.extract_strided_slice %0 {offsets = [6, 0], sizes = [1, 256], strides = [1, 1]} : vector<8x256xf32> to vector<1x256xf32>
    %8 = vector.extract_strided_slice %0 {offsets = [7, 0], sizes = [1, 256], strides = [1, 1]} : vector<8x256xf32> to vector<1x256xf32>
    %c0_1 = arith.constant 0 : index
    %c0_2 = arith.constant 0 : index
    %c0_3 = arith.constant 0 : index
    %9 = vector.load %arg1[%c0_1, %c0_2, %c0_3] : memref<1x12x256xf32, #tpu.memory_space<vmem>>, vector<1x12x256xf32>
    %10 = vector.shape_cast %9 : vector<1x12x256xf32> to vector<12x256xf32>
    %c0_4 = arith.constant 0 : index
    %c0_5 = arith.constant 0 : index
    %11 = vector.load %arg3[%c0_4, %c0_5] : memref<12x9xf32, #tpu.memory_space<vmem>>, vector<12x9xf32>
    %c0_6 = arith.constant 0 : index
    %c0_7 = arith.constant 0 : index
    %12 = vector.load %arg4[%c0_6, %c0_7] : memref<6x12xf32, #tpu.memory_space<vmem>>, vector<6x12xf32>
    %c0_8 = arith.constant 0 : index
    %c0_9 = arith.constant 0 : index
    %13 = vector.load %arg5[%c0_8, %c0_9] : memref<6x1xf32, #tpu.memory_space<vmem>>, vector<6x1xf32>
    %cst = arith.constant 0.000000e+00 : f32
    %14 = vector.broadcast %cst : f32 to vector<12x256xf32>
    %15 = arith.maximumf %10, %14 : vector<12x256xf32>
    %16 = vector.extract_strided_slice %11 {offsets = [0, 4], sizes = [12, 1], strides = [1, 1]} : vector<12x9xf32> to vector<12x1xf32>
    %17 = vector.broadcast %16 : vector<12x1xf32> to vector<12x256xf32>
    %18 = arith.mulf %15, %17 : vector<12x256xf32>
    %c17_i32 = arith.constant 17 : i32
    %19 = tpu.dynamic_rotate %15 by %c17_i32 dim 1 : vector<12x256xf32>, i32 -> vector<12x256xf32>
    %20 = vector.broadcast %1 : vector<1x256xf32> to vector<12x256xf32>
    %21 = arith.mulf %19, %20 : vector<12x256xf32>
    %22 = vector.extract_strided_slice %11 {offsets = [0, 0], sizes = [12, 1], strides = [1, 1]} : vector<12x9xf32> to vector<12x1xf32>
    %23 = vector.broadcast %22 : vector<12x1xf32> to vector<12x256xf32>
    %24 = arith.mulf %21, %23 : vector<12x256xf32>
    %25 = arith.addf %18, %24 : vector<12x256xf32>
    %c16_i32 = arith.constant 16 : i32
    %26 = tpu.dynamic_rotate %15 by %c16_i32 dim 1 : vector<12x256xf32>, i32 -> vector<12x256xf32>
    %27 = vector.broadcast %2 : vector<1x256xf32> to vector<12x256xf32>
    %28 = arith.mulf %26, %27 : vector<12x256xf32>
    %29 = vector.extract_strided_slice %11 {offsets = [0, 1], sizes = [12, 1], strides = [1, 1]} : vector<12x9xf32> to vector<12x1xf32>
    %30 = vector.broadcast %29 : vector<12x1xf32> to vector<12x256xf32>
    %31 = arith.mulf %28, %30 : vector<12x256xf32>
    %32 = arith.addf %25, %31 : vector<12x256xf32>
    %c15_i32 = arith.constant 15 : i32
    %33 = tpu.dynamic_rotate %15 by %c15_i32 dim 1 : vector<12x256xf32>, i32 -> vector<12x256xf32>
    %34 = vector.broadcast %3 : vector<1x256xf32> to vector<12x256xf32>
    %35 = arith.mulf %33, %34 : vector<12x256xf32>
    %36 = vector.extract_strided_slice %11 {offsets = [0, 2], sizes = [12, 1], strides = [1, 1]} : vector<12x9xf32> to vector<12x1xf32>
    %37 = vector.broadcast %36 : vector<12x1xf32> to vector<12x256xf32>
    %38 = arith.mulf %35, %37 : vector<12x256xf32>
    %39 = arith.addf %32, %38 : vector<12x256xf32>
    %c1_i32 = arith.constant 1 : i32
    %40 = tpu.dynamic_rotate %15 by %c1_i32 dim 1 : vector<12x256xf32>, i32 -> vector<12x256xf32>
    %41 = vector.broadcast %4 : vector<1x256xf32> to vector<12x256xf32>
    %42 = arith.mulf %40, %41 : vector<12x256xf32>
    %43 = vector.extract_strided_slice %11 {offsets = [0, 3], sizes = [12, 1], strides = [1, 1]} : vector<12x9xf32> to vector<12x1xf32>
    %44 = vector.broadcast %43 : vector<12x1xf32> to vector<12x256xf32>
    %45 = arith.mulf %42, %44 : vector<12x256xf32>
    %46 = arith.addf %39, %45 : vector<12x256xf32>
    %c255_i32 = arith.constant 255 : i32
    %47 = tpu.dynamic_rotate %15 by %c255_i32 dim 1 : vector<12x256xf32>, i32 -> vector<12x256xf32>
    %48 = vector.broadcast %5 : vector<1x256xf32> to vector<12x256xf32>
    %49 = arith.mulf %47, %48 : vector<12x256xf32>
    %50 = vector.extract_strided_slice %11 {offsets = [0, 5], sizes = [12, 1], strides = [1, 1]} : vector<12x9xf32> to vector<12x1xf32>
    %51 = vector.broadcast %50 : vector<12x1xf32> to vector<12x256xf32>
    %52 = arith.mulf %49, %51 : vector<12x256xf32>
    %53 = arith.addf %46, %52 : vector<12x256xf32>
    %c241_i32 = arith.constant 241 : i32
    %54 = tpu.dynamic_rotate %15 by %c241_i32 dim 1 : vector<12x256xf32>, i32 -> vector<12x256xf32>
    %55 = vector.broadcast %6 : vector<1x256xf32> to vector<12x256xf32>
    %56 = arith.mulf %54, %55 : vector<12x256xf32>
    %57 = vector.extract_strided_slice %11 {offsets = [0, 6], sizes = [12, 1], strides = [1, 1]} : vector<12x9xf32> to vector<12x1xf32>
    %58 = vector.broadcast %57 : vector<12x1xf32> to vector<12x256xf32>
    %59 = arith.mulf %56, %58 : vector<12x256xf32>
    %60 = arith.addf %53, %59 : vector<12x256xf32>
    %c240_i32 = arith.constant 240 : i32
    %61 = tpu.dynamic_rotate %15 by %c240_i32 dim 1 : vector<12x256xf32>, i32 -> vector<12x256xf32>
    %62 = vector.broadcast %7 : vector<1x256xf32> to vector<12x256xf32>
    %63 = arith.mulf %61, %62 : vector<12x256xf32>
    %64 = vector.extract_strided_slice %11 {offsets = [0, 7], sizes = [12, 1], strides = [1, 1]} : vector<12x9xf32> to vector<12x1xf32>
    %65 = vector.broadcast %64 : vector<12x1xf32> to vector<12x256xf32>
    %66 = arith.mulf %63, %65 : vector<12x256xf32>
    %67 = arith.addf %60, %66 : vector<12x256xf32>
    %c239_i32 = arith.constant 239 : i32
    %68 = tpu.dynamic_rotate %15 by %c239_i32 dim 1 : vector<12x256xf32>, i32 -> vector<12x256xf32>
    %69 = vector.broadcast %8 : vector<1x256xf32> to vector<12x256xf32>
    %70 = arith.mulf %68, %69 : vector<12x256xf32>
    %71 = vector.extract_strided_slice %11 {offsets = [0, 8], sizes = [12, 1], strides = [1, 1]} : vector<12x9xf32> to vector<12x1xf32>
    %72 = vector.broadcast %71 : vector<12x1xf32> to vector<12x256xf32>
    %73 = arith.mulf %70, %72 : vector<12x256xf32>
    %74 = arith.addf %67, %73 : vector<12x256xf32>
    %75 = vector.extract_strided_slice %74 {offsets = [0, 0], sizes = [1, 256], strides = [1, 1]} : vector<12x256xf32> to vector<1x256xf32>
    %76 = vector.extract_strided_slice %12 {offsets = [0, 0], sizes = [6, 1], strides = [1, 1]} : vector<6x12xf32> to vector<6x1xf32>
    %77 = vector.broadcast %75 : vector<1x256xf32> to vector<6x256xf32>
    %78 = vector.broadcast %76 : vector<6x1xf32> to vector<6x256xf32>
    %79 = arith.mulf %77, %78 : vector<6x256xf32>
    %80 = vector.extract_strided_slice %74 {offsets = [1, 0], sizes = [1, 256], strides = [1, 1]} : vector<12x256xf32> to vector<1x256xf32>
    %81 = vector.extract_strided_slice %12 {offsets = [0, 1], sizes = [6, 1], strides = [1, 1]} : vector<6x12xf32> to vector<6x1xf32>
    %82 = vector.broadcast %80 : vector<1x256xf32> to vector<6x256xf32>
    %83 = vector.broadcast %81 : vector<6x1xf32> to vector<6x256xf32>
    %84 = arith.mulf %82, %83 : vector<6x256xf32>
    %85 = arith.addf %79, %84 : vector<6x256xf32>
    %86 = vector.extract_strided_slice %74 {offsets = [2, 0], sizes = [1, 256], strides = [1, 1]} : vector<12x256xf32> to vector<1x256xf32>
    %87 = vector.extract_strided_slice %12 {offsets = [0, 2], sizes = [6, 1], strides = [1, 1]} : vector<6x12xf32> to vector<6x1xf32>
    %88 = vector.broadcast %86 : vector<1x256xf32> to vector<6x256xf32>
    %89 = vector.broadcast %87 : vector<6x1xf32> to vector<6x256xf32>
    %90 = arith.mulf %88, %89 : vector<6x256xf32>
    %91 = arith.addf %85, %90 : vector<6x256xf32>
    %92 = vector.extract_strided_slice %74 {offsets = [3, 0], sizes = [1, 256], strides = [1, 1]} : vector<12x256xf32> to vector<1x256xf32>
    %93 = vector.extract_strided_slice %12 {offsets = [0, 3], sizes = [6, 1], strides = [1, 1]} : vector<6x12xf32> to vector<6x1xf32>
    %94 = vector.broadcast %92 : vector<1x256xf32> to vector<6x256xf32>
    %95 = vector.broadcast %93 : vector<6x1xf32> to vector<6x256xf32>
    %96 = arith.mulf %94, %95 : vector<6x256xf32>
    %97 = arith.addf %91, %96 : vector<6x256xf32>
    %98 = vector.extract_strided_slice %74 {offsets = [4, 0], sizes = [1, 256], strides = [1, 1]} : vector<12x256xf32> to vector<1x256xf32>
    %99 = vector.extract_strided_slice %12 {offsets = [0, 4], sizes = [6, 1], strides = [1, 1]} : vector<6x12xf32> to vector<6x1xf32>
    %100 = vector.broadcast %98 : vector<1x256xf32> to vector<6x256xf32>
    %101 = vector.broadcast %99 : vector<6x1xf32> to vector<6x256xf32>
    %102 = arith.mulf %100, %101 : vector<6x256xf32>
    %103 = arith.addf %97, %102 : vector<6x256xf32>
    %104 = vector.extract_strided_slice %74 {offsets = [5, 0], sizes = [1, 256], strides = [1, 1]} : vector<12x256xf32> to vector<1x256xf32>
    %105 = vector.extract_strided_slice %12 {offsets = [0, 5], sizes = [6, 1], strides = [1, 1]} : vector<6x12xf32> to vector<6x1xf32>
    %106 = vector.broadcast %104 : vector<1x256xf32> to vector<6x256xf32>
    %107 = vector.broadcast %105 : vector<6x1xf32> to vector<6x256xf32>
    %108 = arith.mulf %106, %107 : vector<6x256xf32>
    %109 = arith.addf %103, %108 : vector<6x256xf32>
    %110 = vector.extract_strided_slice %74 {offsets = [6, 0], sizes = [1, 256], strides = [1, 1]} : vector<12x256xf32> to vector<1x256xf32>
    %111 = vector.extract_strided_slice %12 {offsets = [0, 6], sizes = [6, 1], strides = [1, 1]} : vector<6x12xf32> to vector<6x1xf32>
    %112 = vector.broadcast %110 : vector<1x256xf32> to vector<6x256xf32>
    %113 = vector.broadcast %111 : vector<6x1xf32> to vector<6x256xf32>
    %114 = arith.mulf %112, %113 : vector<6x256xf32>
    %115 = arith.addf %109, %114 : vector<6x256xf32>
    %116 = vector.extract_strided_slice %74 {offsets = [7, 0], sizes = [1, 256], strides = [1, 1]} : vector<12x256xf32> to vector<1x256xf32>
    %117 = vector.extract_strided_slice %12 {offsets = [0, 7], sizes = [6, 1], strides = [1, 1]} : vector<6x12xf32> to vector<6x1xf32>
    %118 = vector.broadcast %116 : vector<1x256xf32> to vector<6x256xf32>
    %119 = vector.broadcast %117 : vector<6x1xf32> to vector<6x256xf32>
    %120 = arith.mulf %118, %119 : vector<6x256xf32>
    %121 = arith.addf %115, %120 : vector<6x256xf32>
    %122 = vector.extract_strided_slice %74 {offsets = [8, 0], sizes = [1, 256], strides = [1, 1]} : vector<12x256xf32> to vector<1x256xf32>
    %123 = vector.extract_strided_slice %12 {offsets = [0, 8], sizes = [6, 1], strides = [1, 1]} : vector<6x12xf32> to vector<6x1xf32>
    %124 = vector.broadcast %122 : vector<1x256xf32> to vector<6x256xf32>
    %125 = vector.broadcast %123 : vector<6x1xf32> to vector<6x256xf32>
    %126 = arith.mulf %124, %125 : vector<6x256xf32>
    %127 = arith.addf %121, %126 : vector<6x256xf32>
    %128 = vector.extract_strided_slice %74 {offsets = [9, 0], sizes = [1, 256], strides = [1, 1]} : vector<12x256xf32> to vector<1x256xf32>
    %129 = vector.extract_strided_slice %12 {offsets = [0, 9], sizes = [6, 1], strides = [1, 1]} : vector<6x12xf32> to vector<6x1xf32>
    %130 = vector.broadcast %128 : vector<1x256xf32> to vector<6x256xf32>
    %131 = vector.broadcast %129 : vector<6x1xf32> to vector<6x256xf32>
    %132 = arith.mulf %130, %131 : vector<6x256xf32>
    %133 = arith.addf %127, %132 : vector<6x256xf32>
    %134 = vector.extract_strided_slice %74 {offsets = [10, 0], sizes = [1, 256], strides = [1, 1]} : vector<12x256xf32> to vector<1x256xf32>
    %135 = vector.extract_strided_slice %12 {offsets = [0, 10], sizes = [6, 1], strides = [1, 1]} : vector<6x12xf32> to vector<6x1xf32>
    %136 = vector.broadcast %134 : vector<1x256xf32> to vector<6x256xf32>
    %137 = vector.broadcast %135 : vector<6x1xf32> to vector<6x256xf32>
    %138 = arith.mulf %136, %137 : vector<6x256xf32>
    %139 = arith.addf %133, %138 : vector<6x256xf32>
    %140 = vector.extract_strided_slice %74 {offsets = [11, 0], sizes = [1, 256], strides = [1, 1]} : vector<12x256xf32> to vector<1x256xf32>
    %141 = vector.extract_strided_slice %12 {offsets = [0, 11], sizes = [6, 1], strides = [1, 1]} : vector<6x12xf32> to vector<6x1xf32>
    %142 = vector.broadcast %140 : vector<1x256xf32> to vector<6x256xf32>
    %143 = vector.broadcast %141 : vector<6x1xf32> to vector<6x256xf32>
    %144 = arith.mulf %142, %143 : vector<6x256xf32>
    %145 = arith.addf %139, %144 : vector<6x256xf32>
    %146 = vector.broadcast %13 : vector<6x1xf32> to vector<6x256xf32>
    %147 = arith.addf %145, %146 : vector<6x256xf32>
    %c0_10 = arith.constant 0 : index
    %c0_11 = arith.constant 0 : index
    %148 = vector.load %arg6[%c0_10, %c0_11] : memref<6x9xf32, #tpu.memory_space<vmem>>, vector<6x9xf32>
    %c0_12 = arith.constant 0 : index
    %c0_13 = arith.constant 0 : index
    %149 = vector.load %arg7[%c0_12, %c0_13] : memref<6x6xf32, #tpu.memory_space<vmem>>, vector<6x6xf32>
    %c0_14 = arith.constant 0 : index
    %c0_15 = arith.constant 0 : index
    %150 = vector.load %arg8[%c0_14, %c0_15] : memref<6x1xf32, #tpu.memory_space<vmem>>, vector<6x1xf32>
    %cst_16 = arith.constant 0.000000e+00 : f32
    %151 = vector.broadcast %cst_16 : f32 to vector<6x256xf32>
    %152 = arith.maximumf %147, %151 : vector<6x256xf32>
    %153 = vector.extract_strided_slice %148 {offsets = [0, 4], sizes = [6, 1], strides = [1, 1]} : vector<6x9xf32> to vector<6x1xf32>
    %154 = vector.broadcast %153 : vector<6x1xf32> to vector<6x256xf32>
    %155 = arith.mulf %152, %154 : vector<6x256xf32>
    %c17_i32_17 = arith.constant 17 : i32
    %156 = tpu.dynamic_rotate %152 by %c17_i32_17 dim 1 : vector<6x256xf32>, i32 -> vector<6x256xf32>
    %157 = vector.broadcast %1 : vector<1x256xf32> to vector<6x256xf32>
    %158 = arith.mulf %156, %157 : vector<6x256xf32>
    %159 = vector.extract_strided_slice %148 {offsets = [0, 0], sizes = [6, 1], strides = [1, 1]} : vector<6x9xf32> to vector<6x1xf32>
    %160 = vector.broadcast %159 : vector<6x1xf32> to vector<6x256xf32>
    %161 = arith.mulf %158, %160 : vector<6x256xf32>
    %162 = arith.addf %155, %161 : vector<6x256xf32>
    %c16_i32_18 = arith.constant 16 : i32
    %163 = tpu.dynamic_rotate %152 by %c16_i32_18 dim 1 : vector<6x256xf32>, i32 -> vector<6x256xf32>
    %164 = vector.broadcast %2 : vector<1x256xf32> to vector<6x256xf32>
    %165 = arith.mulf %163, %164 : vector<6x256xf32>
    %166 = vector.extract_strided_slice %148 {offsets = [0, 1], sizes = [6, 1], strides = [1, 1]} : vector<6x9xf32> to vector<6x1xf32>
    %167 = vector.broadcast %166 : vector<6x1xf32> to vector<6x256xf32>
    %168 = arith.mulf %165, %167 : vector<6x256xf32>
    %169 = arith.addf %162, %168 : vector<6x256xf32>
    %c15_i32_19 = arith.constant 15 : i32
    %170 = tpu.dynamic_rotate %152 by %c15_i32_19 dim 1 : vector<6x256xf32>, i32 -> vector<6x256xf32>
    %171 = vector.broadcast %3 : vector<1x256xf32> to vector<6x256xf32>
    %172 = arith.mulf %170, %171 : vector<6x256xf32>
    %173 = vector.extract_strided_slice %148 {offsets = [0, 2], sizes = [6, 1], strides = [1, 1]} : vector<6x9xf32> to vector<6x1xf32>
    %174 = vector.broadcast %173 : vector<6x1xf32> to vector<6x256xf32>
    %175 = arith.mulf %172, %174 : vector<6x256xf32>
    %176 = arith.addf %169, %175 : vector<6x256xf32>
    %c1_i32_20 = arith.constant 1 : i32
    %177 = tpu.dynamic_rotate %152 by %c1_i32_20 dim 1 : vector<6x256xf32>, i32 -> vector<6x256xf32>
    %178 = vector.broadcast %4 : vector<1x256xf32> to vector<6x256xf32>
    %179 = arith.mulf %177, %178 : vector<6x256xf32>
    %180 = vector.extract_strided_slice %148 {offsets = [0, 3], sizes = [6, 1], strides = [1, 1]} : vector<6x9xf32> to vector<6x1xf32>
    %181 = vector.broadcast %180 : vector<6x1xf32> to vector<6x256xf32>
    %182 = arith.mulf %179, %181 : vector<6x256xf32>
    %183 = arith.addf %176, %182 : vector<6x256xf32>
    %c255_i32_21 = arith.constant 255 : i32
    %184 = tpu.dynamic_rotate %152 by %c255_i32_21 dim 1 : vector<6x256xf32>, i32 -> vector<6x256xf32>
    %185 = vector.broadcast %5 : vector<1x256xf32> to vector<6x256xf32>
    %186 = arith.mulf %184, %185 : vector<6x256xf32>
    %187 = vector.extract_strided_slice %148 {offsets = [0, 5], sizes = [6, 1], strides = [1, 1]} : vector<6x9xf32> to vector<6x1xf32>
    %188 = vector.broadcast %187 : vector<6x1xf32> to vector<6x256xf32>
    %189 = arith.mulf %186, %188 : vector<6x256xf32>
    %190 = arith.addf %183, %189 : vector<6x256xf32>
    %c241_i32_22 = arith.constant 241 : i32
    %191 = tpu.dynamic_rotate %152 by %c241_i32_22 dim 1 : vector<6x256xf32>, i32 -> vector<6x256xf32>
    %192 = vector.broadcast %6 : vector<1x256xf32> to vector<6x256xf32>
    %193 = arith.mulf %191, %192 : vector<6x256xf32>
    %194 = vector.extract_strided_slice %148 {offsets = [0, 6], sizes = [6, 1], strides = [1, 1]} : vector<6x9xf32> to vector<6x1xf32>
    %195 = vector.broadcast %194 : vector<6x1xf32> to vector<6x256xf32>
    %196 = arith.mulf %193, %195 : vector<6x256xf32>
    %197 = arith.addf %190, %196 : vector<6x256xf32>
    %c240_i32_23 = arith.constant 240 : i32
    %198 = tpu.dynamic_rotate %152 by %c240_i32_23 dim 1 : vector<6x256xf32>, i32 -> vector<6x256xf32>
    %199 = vector.broadcast %7 : vector<1x256xf32> to vector<6x256xf32>
    %200 = arith.mulf %198, %199 : vector<6x256xf32>
    %201 = vector.extract_strided_slice %148 {offsets = [0, 7], sizes = [6, 1], strides = [1, 1]} : vector<6x9xf32> to vector<6x1xf32>
    %202 = vector.broadcast %201 : vector<6x1xf32> to vector<6x256xf32>
    %203 = arith.mulf %200, %202 : vector<6x256xf32>
    %204 = arith.addf %197, %203 : vector<6x256xf32>
    %c239_i32_24 = arith.constant 239 : i32
    %205 = tpu.dynamic_rotate %152 by %c239_i32_24 dim 1 : vector<6x256xf32>, i32 -> vector<6x256xf32>
    %206 = vector.broadcast %8 : vector<1x256xf32> to vector<6x256xf32>
    %207 = arith.mulf %205, %206 : vector<6x256xf32>
    %208 = vector.extract_strided_slice %148 {offsets = [0, 8], sizes = [6, 1], strides = [1, 1]} : vector<6x9xf32> to vector<6x1xf32>
    %209 = vector.broadcast %208 : vector<6x1xf32> to vector<6x256xf32>
    %210 = arith.mulf %207, %209 : vector<6x256xf32>
    %211 = arith.addf %204, %210 : vector<6x256xf32>
    %212 = vector.extract_strided_slice %211 {offsets = [0, 0], sizes = [1, 256], strides = [1, 1]} : vector<6x256xf32> to vector<1x256xf32>
    %213 = vector.extract_strided_slice %149 {offsets = [0, 0], sizes = [6, 1], strides = [1, 1]} : vector<6x6xf32> to vector<6x1xf32>
    %214 = vector.broadcast %212 : vector<1x256xf32> to vector<6x256xf32>
    %215 = vector.broadcast %213 : vector<6x1xf32> to vector<6x256xf32>
    %216 = arith.mulf %214, %215 : vector<6x256xf32>
    %217 = vector.extract_strided_slice %211 {offsets = [1, 0], sizes = [1, 256], strides = [1, 1]} : vector<6x256xf32> to vector<1x256xf32>
    %218 = vector.extract_strided_slice %149 {offsets = [0, 1], sizes = [6, 1], strides = [1, 1]} : vector<6x6xf32> to vector<6x1xf32>
    %219 = vector.broadcast %217 : vector<1x256xf32> to vector<6x256xf32>
    %220 = vector.broadcast %218 : vector<6x1xf32> to vector<6x256xf32>
    %221 = arith.mulf %219, %220 : vector<6x256xf32>
    %222 = arith.addf %216, %221 : vector<6x256xf32>
    %223 = vector.extract_strided_slice %211 {offsets = [2, 0], sizes = [1, 256], strides = [1, 1]} : vector<6x256xf32> to vector<1x256xf32>
    %224 = vector.extract_strided_slice %149 {offsets = [0, 2], sizes = [6, 1], strides = [1, 1]} : vector<6x6xf32> to vector<6x1xf32>
    %225 = vector.broadcast %223 : vector<1x256xf32> to vector<6x256xf32>
    %226 = vector.broadcast %224 : vector<6x1xf32> to vector<6x256xf32>
    %227 = arith.mulf %225, %226 : vector<6x256xf32>
    %228 = arith.addf %222, %227 : vector<6x256xf32>
    %229 = vector.extract_strided_slice %211 {offsets = [3, 0], sizes = [1, 256], strides = [1, 1]} : vector<6x256xf32> to vector<1x256xf32>
    %230 = vector.extract_strided_slice %149 {offsets = [0, 3], sizes = [6, 1], strides = [1, 1]} : vector<6x6xf32> to vector<6x1xf32>
    %231 = vector.broadcast %229 : vector<1x256xf32> to vector<6x256xf32>
    %232 = vector.broadcast %230 : vector<6x1xf32> to vector<6x256xf32>
    %233 = arith.mulf %231, %232 : vector<6x256xf32>
    %234 = arith.addf %228, %233 : vector<6x256xf32>
    %235 = vector.extract_strided_slice %211 {offsets = [4, 0], sizes = [1, 256], strides = [1, 1]} : vector<6x256xf32> to vector<1x256xf32>
    %236 = vector.extract_strided_slice %149 {offsets = [0, 4], sizes = [6, 1], strides = [1, 1]} : vector<6x6xf32> to vector<6x1xf32>
    %237 = vector.broadcast %235 : vector<1x256xf32> to vector<6x256xf32>
    %238 = vector.broadcast %236 : vector<6x1xf32> to vector<6x256xf32>
    %239 = arith.mulf %237, %238 : vector<6x256xf32>
    %240 = arith.addf %234, %239 : vector<6x256xf32>
    %241 = vector.extract_strided_slice %211 {offsets = [5, 0], sizes = [1, 256], strides = [1, 1]} : vector<6x256xf32> to vector<1x256xf32>
    %242 = vector.extract_strided_slice %149 {offsets = [0, 5], sizes = [6, 1], strides = [1, 1]} : vector<6x6xf32> to vector<6x1xf32>
    %243 = vector.broadcast %241 : vector<1x256xf32> to vector<6x256xf32>
    %244 = vector.broadcast %242 : vector<6x1xf32> to vector<6x256xf32>
    %245 = arith.mulf %243, %244 : vector<6x256xf32>
    %246 = arith.addf %240, %245 : vector<6x256xf32>
    %247 = vector.broadcast %150 : vector<6x1xf32> to vector<6x256xf32>
    %248 = arith.addf %246, %247 : vector<6x256xf32>
    %c0_25 = arith.constant 0 : index
    %c0_26 = arith.constant 0 : index
    %249 = vector.load %arg9[%c0_25, %c0_26] : memref<6x9xf32, #tpu.memory_space<vmem>>, vector<6x9xf32>
    %c0_27 = arith.constant 0 : index
    %c0_28 = arith.constant 0 : index
    %250 = vector.load %arg10[%c0_27, %c0_28] : memref<6x6xf32, #tpu.memory_space<vmem>>, vector<6x6xf32>
    %c0_29 = arith.constant 0 : index
    %c0_30 = arith.constant 0 : index
    %251 = vector.load %arg11[%c0_29, %c0_30] : memref<6x1xf32, #tpu.memory_space<vmem>>, vector<6x1xf32>
    %cst_31 = arith.constant 0.000000e+00 : f32
    %252 = vector.broadcast %cst_31 : f32 to vector<6x256xf32>
    %253 = arith.maximumf %248, %252 : vector<6x256xf32>
    %254 = vector.extract_strided_slice %249 {offsets = [0, 4], sizes = [6, 1], strides = [1, 1]} : vector<6x9xf32> to vector<6x1xf32>
    %255 = vector.broadcast %254 : vector<6x1xf32> to vector<6x256xf32>
    %256 = arith.mulf %253, %255 : vector<6x256xf32>
    %c17_i32_32 = arith.constant 17 : i32
    %257 = tpu.dynamic_rotate %253 by %c17_i32_32 dim 1 : vector<6x256xf32>, i32 -> vector<6x256xf32>
    %258 = vector.broadcast %1 : vector<1x256xf32> to vector<6x256xf32>
    %259 = arith.mulf %257, %258 : vector<6x256xf32>
    %260 = vector.extract_strided_slice %249 {offsets = [0, 0], sizes = [6, 1], strides = [1, 1]} : vector<6x9xf32> to vector<6x1xf32>
    %261 = vector.broadcast %260 : vector<6x1xf32> to vector<6x256xf32>
    %262 = arith.mulf %259, %261 : vector<6x256xf32>
    %263 = arith.addf %256, %262 : vector<6x256xf32>
    %c16_i32_33 = arith.constant 16 : i32
    %264 = tpu.dynamic_rotate %253 by %c16_i32_33 dim 1 : vector<6x256xf32>, i32 -> vector<6x256xf32>
    %265 = vector.broadcast %2 : vector<1x256xf32> to vector<6x256xf32>
    %266 = arith.mulf %264, %265 : vector<6x256xf32>
    %267 = vector.extract_strided_slice %249 {offsets = [0, 1], sizes = [6, 1], strides = [1, 1]} : vector<6x9xf32> to vector<6x1xf32>
    %268 = vector.broadcast %267 : vector<6x1xf32> to vector<6x256xf32>
    %269 = arith.mulf %266, %268 : vector<6x256xf32>
    %270 = arith.addf %263, %269 : vector<6x256xf32>
    %c15_i32_34 = arith.constant 15 : i32
    %271 = tpu.dynamic_rotate %253 by %c15_i32_34 dim 1 : vector<6x256xf32>, i32 -> vector<6x256xf32>
    %272 = vector.broadcast %3 : vector<1x256xf32> to vector<6x256xf32>
    %273 = arith.mulf %271, %272 : vector<6x256xf32>
    %274 = vector.extract_strided_slice %249 {offsets = [0, 2], sizes = [6, 1], strides = [1, 1]} : vector<6x9xf32> to vector<6x1xf32>
    %275 = vector.broadcast %274 : vector<6x1xf32> to vector<6x256xf32>
    %276 = arith.mulf %273, %275 : vector<6x256xf32>
    %277 = arith.addf %270, %276 : vector<6x256xf32>
    %c1_i32_35 = arith.constant 1 : i32
    %278 = tpu.dynamic_rotate %253 by %c1_i32_35 dim 1 : vector<6x256xf32>, i32 -> vector<6x256xf32>
    %279 = vector.broadcast %4 : vector<1x256xf32> to vector<6x256xf32>
    %280 = arith.mulf %278, %279 : vector<6x256xf32>
    %281 = vector.extract_strided_slice %249 {offsets = [0, 3], sizes = [6, 1], strides = [1, 1]} : vector<6x9xf32> to vector<6x1xf32>
    %282 = vector.broadcast %281 : vector<6x1xf32> to vector<6x256xf32>
    %283 = arith.mulf %280, %282 : vector<6x256xf32>
    %284 = arith.addf %277, %283 : vector<6x256xf32>
    %c255_i32_36 = arith.constant 255 : i32
    %285 = tpu.dynamic_rotate %253 by %c255_i32_36 dim 1 : vector<6x256xf32>, i32 -> vector<6x256xf32>
    %286 = vector.broadcast %5 : vector<1x256xf32> to vector<6x256xf32>
    %287 = arith.mulf %285, %286 : vector<6x256xf32>
    %288 = vector.extract_strided_slice %249 {offsets = [0, 5], sizes = [6, 1], strides = [1, 1]} : vector<6x9xf32> to vector<6x1xf32>
    %289 = vector.broadcast %288 : vector<6x1xf32> to vector<6x256xf32>
    %290 = arith.mulf %287, %289 : vector<6x256xf32>
    %291 = arith.addf %284, %290 : vector<6x256xf32>
    %c241_i32_37 = arith.constant 241 : i32
    %292 = tpu.dynamic_rotate %253 by %c241_i32_37 dim 1 : vector<6x256xf32>, i32 -> vector<6x256xf32>
    %293 = vector.broadcast %6 : vector<1x256xf32> to vector<6x256xf32>
    %294 = arith.mulf %292, %293 : vector<6x256xf32>
    %295 = vector.extract_strided_slice %249 {offsets = [0, 6], sizes = [6, 1], strides = [1, 1]} : vector<6x9xf32> to vector<6x1xf32>
    %296 = vector.broadcast %295 : vector<6x1xf32> to vector<6x256xf32>
    %297 = arith.mulf %294, %296 : vector<6x256xf32>
    %298 = arith.addf %291, %297 : vector<6x256xf32>
    %c240_i32_38 = arith.constant 240 : i32
    %299 = tpu.dynamic_rotate %253 by %c240_i32_38 dim 1 : vector<6x256xf32>, i32 -> vector<6x256xf32>
    %300 = vector.broadcast %7 : vector<1x256xf32> to vector<6x256xf32>
    %301 = arith.mulf %299, %300 : vector<6x256xf32>
    %302 = vector.extract_strided_slice %249 {offsets = [0, 7], sizes = [6, 1], strides = [1, 1]} : vector<6x9xf32> to vector<6x1xf32>
    %303 = vector.broadcast %302 : vector<6x1xf32> to vector<6x256xf32>
    %304 = arith.mulf %301, %303 : vector<6x256xf32>
    %305 = arith.addf %298, %304 : vector<6x256xf32>
    %c239_i32_39 = arith.constant 239 : i32
    %306 = tpu.dynamic_rotate %253 by %c239_i32_39 dim 1 : vector<6x256xf32>, i32 -> vector<6x256xf32>
    %307 = vector.broadcast %8 : vector<1x256xf32> to vector<6x256xf32>
    %308 = arith.mulf %306, %307 : vector<6x256xf32>
    %309 = vector.extract_strided_slice %249 {offsets = [0, 8], sizes = [6, 1], strides = [1, 1]} : vector<6x9xf32> to vector<6x1xf32>
    %310 = vector.broadcast %309 : vector<6x1xf32> to vector<6x256xf32>
    %311 = arith.mulf %308, %310 : vector<6x256xf32>
    %312 = arith.addf %305, %311 : vector<6x256xf32>
    %313 = vector.extract_strided_slice %312 {offsets = [0, 0], sizes = [1, 256], strides = [1, 1]} : vector<6x256xf32> to vector<1x256xf32>
    %314 = vector.extract_strided_slice %250 {offsets = [0, 0], sizes = [6, 1], strides = [1, 1]} : vector<6x6xf32> to vector<6x1xf32>
    %315 = vector.broadcast %313 : vector<1x256xf32> to vector<6x256xf32>
    %316 = vector.broadcast %314 : vector<6x1xf32> to vector<6x256xf32>
    %317 = arith.mulf %315, %316 : vector<6x256xf32>
    %318 = vector.extract_strided_slice %312 {offsets = [1, 0], sizes = [1, 256], strides = [1, 1]} : vector<6x256xf32> to vector<1x256xf32>
    %319 = vector.extract_strided_slice %250 {offsets = [0, 1], sizes = [6, 1], strides = [1, 1]} : vector<6x6xf32> to vector<6x1xf32>
    %320 = vector.broadcast %318 : vector<1x256xf32> to vector<6x256xf32>
    %321 = vector.broadcast %319 : vector<6x1xf32> to vector<6x256xf32>
    %322 = arith.mulf %320, %321 : vector<6x256xf32>
    %323 = arith.addf %317, %322 : vector<6x256xf32>
    %324 = vector.extract_strided_slice %312 {offsets = [2, 0], sizes = [1, 256], strides = [1, 1]} : vector<6x256xf32> to vector<1x256xf32>
    %325 = vector.extract_strided_slice %250 {offsets = [0, 2], sizes = [6, 1], strides = [1, 1]} : vector<6x6xf32> to vector<6x1xf32>
    %326 = vector.broadcast %324 : vector<1x256xf32> to vector<6x256xf32>
    %327 = vector.broadcast %325 : vector<6x1xf32> to vector<6x256xf32>
    %328 = arith.mulf %326, %327 : vector<6x256xf32>
    %329 = arith.addf %323, %328 : vector<6x256xf32>
    %330 = vector.extract_strided_slice %312 {offsets = [3, 0], sizes = [1, 256], strides = [1, 1]} : vector<6x256xf32> to vector<1x256xf32>
    %331 = vector.extract_strided_slice %250 {offsets = [0, 3], sizes = [6, 1], strides = [1, 1]} : vector<6x6xf32> to vector<6x1xf32>
    %332 = vector.broadcast %330 : vector<1x256xf32> to vector<6x256xf32>
    %333 = vector.broadcast %331 : vector<6x1xf32> to vector<6x256xf32>
    %334 = arith.mulf %332, %333 : vector<6x256xf32>
    %335 = arith.addf %329, %334 : vector<6x256xf32>
    %336 = vector.extract_strided_slice %312 {offsets = [4, 0], sizes = [1, 256], strides = [1, 1]} : vector<6x256xf32> to vector<1x256xf32>
    %337 = vector.extract_strided_slice %250 {offsets = [0, 4], sizes = [6, 1], strides = [1, 1]} : vector<6x6xf32> to vector<6x1xf32>
    %338 = vector.broadcast %336 : vector<1x256xf32> to vector<6x256xf32>
    %339 = vector.broadcast %337 : vector<6x1xf32> to vector<6x256xf32>
    %340 = arith.mulf %338, %339 : vector<6x256xf32>
    %341 = arith.addf %335, %340 : vector<6x256xf32>
    %342 = vector.extract_strided_slice %312 {offsets = [5, 0], sizes = [1, 256], strides = [1, 1]} : vector<6x256xf32> to vector<1x256xf32>
    %343 = vector.extract_strided_slice %250 {offsets = [0, 5], sizes = [6, 1], strides = [1, 1]} : vector<6x6xf32> to vector<6x1xf32>
    %344 = vector.broadcast %342 : vector<1x256xf32> to vector<6x256xf32>
    %345 = vector.broadcast %343 : vector<6x1xf32> to vector<6x256xf32>
    %346 = arith.mulf %344, %345 : vector<6x256xf32>
    %347 = arith.addf %341, %346 : vector<6x256xf32>
    %348 = vector.broadcast %251 : vector<6x1xf32> to vector<6x256xf32>
    %349 = arith.addf %347, %348 : vector<6x256xf32>
    %c0_40 = arith.constant 0 : index
    %c0_41 = arith.constant 0 : index
    %350 = vector.load %arg12[%c0_40, %c0_41] : memref<6x9xf32, #tpu.memory_space<vmem>>, vector<6x9xf32>
    %c0_42 = arith.constant 0 : index
    %c0_43 = arith.constant 0 : index
    %351 = vector.load %arg13[%c0_42, %c0_43] : memref<6x6xf32, #tpu.memory_space<vmem>>, vector<6x6xf32>
    %c0_44 = arith.constant 0 : index
    %c0_45 = arith.constant 0 : index
    %352 = vector.load %arg14[%c0_44, %c0_45] : memref<6x1xf32, #tpu.memory_space<vmem>>, vector<6x1xf32>
    %cst_46 = arith.constant 0.000000e+00 : f32
    %353 = vector.broadcast %cst_46 : f32 to vector<6x256xf32>
    %354 = arith.maximumf %349, %353 : vector<6x256xf32>
    %355 = vector.extract_strided_slice %350 {offsets = [0, 4], sizes = [6, 1], strides = [1, 1]} : vector<6x9xf32> to vector<6x1xf32>
    %356 = vector.broadcast %355 : vector<6x1xf32> to vector<6x256xf32>
    %357 = arith.mulf %354, %356 : vector<6x256xf32>
    %c17_i32_47 = arith.constant 17 : i32
    %358 = tpu.dynamic_rotate %354 by %c17_i32_47 dim 1 : vector<6x256xf32>, i32 -> vector<6x256xf32>
    %359 = vector.broadcast %1 : vector<1x256xf32> to vector<6x256xf32>
    %360 = arith.mulf %358, %359 : vector<6x256xf32>
    %361 = vector.extract_strided_slice %350 {offsets = [0, 0], sizes = [6, 1], strides = [1, 1]} : vector<6x9xf32> to vector<6x1xf32>
    %362 = vector.broadcast %361 : vector<6x1xf32> to vector<6x256xf32>
    %363 = arith.mulf %360, %362 : vector<6x256xf32>
    %364 = arith.addf %357, %363 : vector<6x256xf32>
    %c16_i32_48 = arith.constant 16 : i32
    %365 = tpu.dynamic_rotate %354 by %c16_i32_48 dim 1 : vector<6x256xf32>, i32 -> vector<6x256xf32>
    %366 = vector.broadcast %2 : vector<1x256xf32> to vector<6x256xf32>
    %367 = arith.mulf %365, %366 : vector<6x256xf32>
    %368 = vector.extract_strided_slice %350 {offsets = [0, 1], sizes = [6, 1], strides = [1, 1]} : vector<6x9xf32> to vector<6x1xf32>
    %369 = vector.broadcast %368 : vector<6x1xf32> to vector<6x256xf32>
    %370 = arith.mulf %367, %369 : vector<6x256xf32>
    %371 = arith.addf %364, %370 : vector<6x256xf32>
    %c15_i32_49 = arith.constant 15 : i32
    %372 = tpu.dynamic_rotate %354 by %c15_i32_49 dim 1 : vector<6x256xf32>, i32 -> vector<6x256xf32>
    %373 = vector.broadcast %3 : vector<1x256xf32> to vector<6x256xf32>
    %374 = arith.mulf %372, %373 : vector<6x256xf32>
    %375 = vector.extract_strided_slice %350 {offsets = [0, 2], sizes = [6, 1], strides = [1, 1]} : vector<6x9xf32> to vector<6x1xf32>
    %376 = vector.broadcast %375 : vector<6x1xf32> to vector<6x256xf32>
    %377 = arith.mulf %374, %376 : vector<6x256xf32>
    %378 = arith.addf %371, %377 : vector<6x256xf32>
    %c1_i32_50 = arith.constant 1 : i32
    %379 = tpu.dynamic_rotate %354 by %c1_i32_50 dim 1 : vector<6x256xf32>, i32 -> vector<6x256xf32>
    %380 = vector.broadcast %4 : vector<1x256xf32> to vector<6x256xf32>
    %381 = arith.mulf %379, %380 : vector<6x256xf32>
    %382 = vector.extract_strided_slice %350 {offsets = [0, 3], sizes = [6, 1], strides = [1, 1]} : vector<6x9xf32> to vector<6x1xf32>
    %383 = vector.broadcast %382 : vector<6x1xf32> to vector<6x256xf32>
    %384 = arith.mulf %381, %383 : vector<6x256xf32>
    %385 = arith.addf %378, %384 : vector<6x256xf32>
    %c255_i32_51 = arith.constant 255 : i32
    %386 = tpu.dynamic_rotate %354 by %c255_i32_51 dim 1 : vector<6x256xf32>, i32 -> vector<6x256xf32>
    %387 = vector.broadcast %5 : vector<1x256xf32> to vector<6x256xf32>
    %388 = arith.mulf %386, %387 : vector<6x256xf32>
    %389 = vector.extract_strided_slice %350 {offsets = [0, 5], sizes = [6, 1], strides = [1, 1]} : vector<6x9xf32> to vector<6x1xf32>
    %390 = vector.broadcast %389 : vector<6x1xf32> to vector<6x256xf32>
    %391 = arith.mulf %388, %390 : vector<6x256xf32>
    %392 = arith.addf %385, %391 : vector<6x256xf32>
    %c241_i32_52 = arith.constant 241 : i32
    %393 = tpu.dynamic_rotate %354 by %c241_i32_52 dim 1 : vector<6x256xf32>, i32 -> vector<6x256xf32>
    %394 = vector.broadcast %6 : vector<1x256xf32> to vector<6x256xf32>
    %395 = arith.mulf %393, %394 : vector<6x256xf32>
    %396 = vector.extract_strided_slice %350 {offsets = [0, 6], sizes = [6, 1], strides = [1, 1]} : vector<6x9xf32> to vector<6x1xf32>
    %397 = vector.broadcast %396 : vector<6x1xf32> to vector<6x256xf32>
    %398 = arith.mulf %395, %397 : vector<6x256xf32>
    %399 = arith.addf %392, %398 : vector<6x256xf32>
    %c240_i32_53 = arith.constant 240 : i32
    %400 = tpu.dynamic_rotate %354 by %c240_i32_53 dim 1 : vector<6x256xf32>, i32 -> vector<6x256xf32>
    %401 = vector.broadcast %7 : vector<1x256xf32> to vector<6x256xf32>
    %402 = arith.mulf %400, %401 : vector<6x256xf32>
    %403 = vector.extract_strided_slice %350 {offsets = [0, 7], sizes = [6, 1], strides = [1, 1]} : vector<6x9xf32> to vector<6x1xf32>
    %404 = vector.broadcast %403 : vector<6x1xf32> to vector<6x256xf32>
    %405 = arith.mulf %402, %404 : vector<6x256xf32>
    %406 = arith.addf %399, %405 : vector<6x256xf32>
    %c239_i32_54 = arith.constant 239 : i32
    %407 = tpu.dynamic_rotate %354 by %c239_i32_54 dim 1 : vector<6x256xf32>, i32 -> vector<6x256xf32>
    %408 = vector.broadcast %8 : vector<1x256xf32> to vector<6x256xf32>
    %409 = arith.mulf %407, %408 : vector<6x256xf32>
    %410 = vector.extract_strided_slice %350 {offsets = [0, 8], sizes = [6, 1], strides = [1, 1]} : vector<6x9xf32> to vector<6x1xf32>
    %411 = vector.broadcast %410 : vector<6x1xf32> to vector<6x256xf32>
    %412 = arith.mulf %409, %411 : vector<6x256xf32>
    %413 = arith.addf %406, %412 : vector<6x256xf32>
    %414 = vector.extract_strided_slice %413 {offsets = [0, 0], sizes = [1, 256], strides = [1, 1]} : vector<6x256xf32> to vector<1x256xf32>
    %415 = vector.extract_strided_slice %351 {offsets = [0, 0], sizes = [6, 1], strides = [1, 1]} : vector<6x6xf32> to vector<6x1xf32>
    %416 = vector.broadcast %414 : vector<1x256xf32> to vector<6x256xf32>
    %417 = vector.broadcast %415 : vector<6x1xf32> to vector<6x256xf32>
    %418 = arith.mulf %416, %417 : vector<6x256xf32>
    %419 = vector.extract_strided_slice %413 {offsets = [1, 0], sizes = [1, 256], strides = [1, 1]} : vector<6x256xf32> to vector<1x256xf32>
    %420 = vector.extract_strided_slice %351 {offsets = [0, 1], sizes = [6, 1], strides = [1, 1]} : vector<6x6xf32> to vector<6x1xf32>
    %421 = vector.broadcast %419 : vector<1x256xf32> to vector<6x256xf32>
    %422 = vector.broadcast %420 : vector<6x1xf32> to vector<6x256xf32>
    %423 = arith.mulf %421, %422 : vector<6x256xf32>
    %424 = arith.addf %418, %423 : vector<6x256xf32>
    %425 = vector.extract_strided_slice %413 {offsets = [2, 0], sizes = [1, 256], strides = [1, 1]} : vector<6x256xf32> to vector<1x256xf32>
    %426 = vector.extract_strided_slice %351 {offsets = [0, 2], sizes = [6, 1], strides = [1, 1]} : vector<6x6xf32> to vector<6x1xf32>
    %427 = vector.broadcast %425 : vector<1x256xf32> to vector<6x256xf32>
    %428 = vector.broadcast %426 : vector<6x1xf32> to vector<6x256xf32>
    %429 = arith.mulf %427, %428 : vector<6x256xf32>
    %430 = arith.addf %424, %429 : vector<6x256xf32>
    %431 = vector.extract_strided_slice %413 {offsets = [3, 0], sizes = [1, 256], strides = [1, 1]} : vector<6x256xf32> to vector<1x256xf32>
    %432 = vector.extract_strided_slice %351 {offsets = [0, 3], sizes = [6, 1], strides = [1, 1]} : vector<6x6xf32> to vector<6x1xf32>
    %433 = vector.broadcast %431 : vector<1x256xf32> to vector<6x256xf32>
    %434 = vector.broadcast %432 : vector<6x1xf32> to vector<6x256xf32>
    %435 = arith.mulf %433, %434 : vector<6x256xf32>
    %436 = arith.addf %430, %435 : vector<6x256xf32>
    %437 = vector.extract_strided_slice %413 {offsets = [4, 0], sizes = [1, 256], strides = [1, 1]} : vector<6x256xf32> to vector<1x256xf32>
    %438 = vector.extract_strided_slice %351 {offsets = [0, 4], sizes = [6, 1], strides = [1, 1]} : vector<6x6xf32> to vector<6x1xf32>
    %439 = vector.broadcast %437 : vector<1x256xf32> to vector<6x256xf32>
    %440 = vector.broadcast %438 : vector<6x1xf32> to vector<6x256xf32>
    %441 = arith.mulf %439, %440 : vector<6x256xf32>
    %442 = arith.addf %436, %441 : vector<6x256xf32>
    %443 = vector.extract_strided_slice %413 {offsets = [5, 0], sizes = [1, 256], strides = [1, 1]} : vector<6x256xf32> to vector<1x256xf32>
    %444 = vector.extract_strided_slice %351 {offsets = [0, 5], sizes = [6, 1], strides = [1, 1]} : vector<6x6xf32> to vector<6x1xf32>
    %445 = vector.broadcast %443 : vector<1x256xf32> to vector<6x256xf32>
    %446 = vector.broadcast %444 : vector<6x1xf32> to vector<6x256xf32>
    %447 = arith.mulf %445, %446 : vector<6x256xf32>
    %448 = arith.addf %442, %447 : vector<6x256xf32>
    %449 = vector.broadcast %352 : vector<6x1xf32> to vector<6x256xf32>
    %450 = arith.addf %448, %449 : vector<6x256xf32>
    %c0_55 = arith.constant 0 : index
    %c0_56 = arith.constant 0 : index
    %451 = vector.load %arg15[%c0_55, %c0_56] : memref<6x9xf32, #tpu.memory_space<vmem>>, vector<6x9xf32>
    %c0_57 = arith.constant 0 : index
    %c0_58 = arith.constant 0 : index
    %452 = vector.load %arg16[%c0_57, %c0_58] : memref<6x6xf32, #tpu.memory_space<vmem>>, vector<6x6xf32>
    %c0_59 = arith.constant 0 : index
    %c0_60 = arith.constant 0 : index
    %453 = vector.load %arg17[%c0_59, %c0_60] : memref<6x1xf32, #tpu.memory_space<vmem>>, vector<6x1xf32>
    %cst_61 = arith.constant 0.000000e+00 : f32
    %454 = vector.broadcast %cst_61 : f32 to vector<6x256xf32>
    %455 = arith.maximumf %450, %454 : vector<6x256xf32>
    %456 = vector.extract_strided_slice %451 {offsets = [0, 4], sizes = [6, 1], strides = [1, 1]} : vector<6x9xf32> to vector<6x1xf32>
    %457 = vector.broadcast %456 : vector<6x1xf32> to vector<6x256xf32>
    %458 = arith.mulf %455, %457 : vector<6x256xf32>
    %c17_i32_62 = arith.constant 17 : i32
    %459 = tpu.dynamic_rotate %455 by %c17_i32_62 dim 1 : vector<6x256xf32>, i32 -> vector<6x256xf32>
    %460 = vector.broadcast %1 : vector<1x256xf32> to vector<6x256xf32>
    %461 = arith.mulf %459, %460 : vector<6x256xf32>
    %462 = vector.extract_strided_slice %451 {offsets = [0, 0], sizes = [6, 1], strides = [1, 1]} : vector<6x9xf32> to vector<6x1xf32>
    %463 = vector.broadcast %462 : vector<6x1xf32> to vector<6x256xf32>
    %464 = arith.mulf %461, %463 : vector<6x256xf32>
    %465 = arith.addf %458, %464 : vector<6x256xf32>
    %c16_i32_63 = arith.constant 16 : i32
    %466 = tpu.dynamic_rotate %455 by %c16_i32_63 dim 1 : vector<6x256xf32>, i32 -> vector<6x256xf32>
    %467 = vector.broadcast %2 : vector<1x256xf32> to vector<6x256xf32>
    %468 = arith.mulf %466, %467 : vector<6x256xf32>
    %469 = vector.extract_strided_slice %451 {offsets = [0, 1], sizes = [6, 1], strides = [1, 1]} : vector<6x9xf32> to vector<6x1xf32>
    %470 = vector.broadcast %469 : vector<6x1xf32> to vector<6x256xf32>
    %471 = arith.mulf %468, %470 : vector<6x256xf32>
    %472 = arith.addf %465, %471 : vector<6x256xf32>
    %c15_i32_64 = arith.constant 15 : i32
    %473 = tpu.dynamic_rotate %455 by %c15_i32_64 dim 1 : vector<6x256xf32>, i32 -> vector<6x256xf32>
    %474 = vector.broadcast %3 : vector<1x256xf32> to vector<6x256xf32>
    %475 = arith.mulf %473, %474 : vector<6x256xf32>
    %476 = vector.extract_strided_slice %451 {offsets = [0, 2], sizes = [6, 1], strides = [1, 1]} : vector<6x9xf32> to vector<6x1xf32>
    %477 = vector.broadcast %476 : vector<6x1xf32> to vector<6x256xf32>
    %478 = arith.mulf %475, %477 : vector<6x256xf32>
    %479 = arith.addf %472, %478 : vector<6x256xf32>
    %c1_i32_65 = arith.constant 1 : i32
    %480 = tpu.dynamic_rotate %455 by %c1_i32_65 dim 1 : vector<6x256xf32>, i32 -> vector<6x256xf32>
    %481 = vector.broadcast %4 : vector<1x256xf32> to vector<6x256xf32>
    %482 = arith.mulf %480, %481 : vector<6x256xf32>
    %483 = vector.extract_strided_slice %451 {offsets = [0, 3], sizes = [6, 1], strides = [1, 1]} : vector<6x9xf32> to vector<6x1xf32>
    %484 = vector.broadcast %483 : vector<6x1xf32> to vector<6x256xf32>
    %485 = arith.mulf %482, %484 : vector<6x256xf32>
    %486 = arith.addf %479, %485 : vector<6x256xf32>
    %c255_i32_66 = arith.constant 255 : i32
    %487 = tpu.dynamic_rotate %455 by %c255_i32_66 dim 1 : vector<6x256xf32>, i32 -> vector<6x256xf32>
    %488 = vector.broadcast %5 : vector<1x256xf32> to vector<6x256xf32>
    %489 = arith.mulf %487, %488 : vector<6x256xf32>
    %490 = vector.extract_strided_slice %451 {offsets = [0, 5], sizes = [6, 1], strides = [1, 1]} : vector<6x9xf32> to vector<6x1xf32>
    %491 = vector.broadcast %490 : vector<6x1xf32> to vector<6x256xf32>
    %492 = arith.mulf %489, %491 : vector<6x256xf32>
    %493 = arith.addf %486, %492 : vector<6x256xf32>
    %c241_i32_67 = arith.constant 241 : i32
    %494 = tpu.dynamic_rotate %455 by %c241_i32_67 dim 1 : vector<6x256xf32>, i32 -> vector<6x256xf32>
    %495 = vector.broadcast %6 : vector<1x256xf32> to vector<6x256xf32>
    %496 = arith.mulf %494, %495 : vector<6x256xf32>
    %497 = vector.extract_strided_slice %451 {offsets = [0, 6], sizes = [6, 1], strides = [1, 1]} : vector<6x9xf32> to vector<6x1xf32>
    %498 = vector.broadcast %497 : vector<6x1xf32> to vector<6x256xf32>
    %499 = arith.mulf %496, %498 : vector<6x256xf32>
    %500 = arith.addf %493, %499 : vector<6x256xf32>
    %c240_i32_68 = arith.constant 240 : i32
    %501 = tpu.dynamic_rotate %455 by %c240_i32_68 dim 1 : vector<6x256xf32>, i32 -> vector<6x256xf32>
    %502 = vector.broadcast %7 : vector<1x256xf32> to vector<6x256xf32>
    %503 = arith.mulf %501, %502 : vector<6x256xf32>
    %504 = vector.extract_strided_slice %451 {offsets = [0, 7], sizes = [6, 1], strides = [1, 1]} : vector<6x9xf32> to vector<6x1xf32>
    %505 = vector.broadcast %504 : vector<6x1xf32> to vector<6x256xf32>
    %506 = arith.mulf %503, %505 : vector<6x256xf32>
    %507 = arith.addf %500, %506 : vector<6x256xf32>
    %c239_i32_69 = arith.constant 239 : i32
    %508 = tpu.dynamic_rotate %455 by %c239_i32_69 dim 1 : vector<6x256xf32>, i32 -> vector<6x256xf32>
    %509 = vector.broadcast %8 : vector<1x256xf32> to vector<6x256xf32>
    %510 = arith.mulf %508, %509 : vector<6x256xf32>
    %511 = vector.extract_strided_slice %451 {offsets = [0, 8], sizes = [6, 1], strides = [1, 1]} : vector<6x9xf32> to vector<6x1xf32>
    %512 = vector.broadcast %511 : vector<6x1xf32> to vector<6x256xf32>
    %513 = arith.mulf %510, %512 : vector<6x256xf32>
    %514 = arith.addf %507, %513 : vector<6x256xf32>
    %515 = vector.extract_strided_slice %514 {offsets = [0, 0], sizes = [1, 256], strides = [1, 1]} : vector<6x256xf32> to vector<1x256xf32>
    %516 = vector.extract_strided_slice %452 {offsets = [0, 0], sizes = [6, 1], strides = [1, 1]} : vector<6x6xf32> to vector<6x1xf32>
    %517 = vector.broadcast %515 : vector<1x256xf32> to vector<6x256xf32>
    %518 = vector.broadcast %516 : vector<6x1xf32> to vector<6x256xf32>
    %519 = arith.mulf %517, %518 : vector<6x256xf32>
    %520 = vector.extract_strided_slice %514 {offsets = [1, 0], sizes = [1, 256], strides = [1, 1]} : vector<6x256xf32> to vector<1x256xf32>
    %521 = vector.extract_strided_slice %452 {offsets = [0, 1], sizes = [6, 1], strides = [1, 1]} : vector<6x6xf32> to vector<6x1xf32>
    %522 = vector.broadcast %520 : vector<1x256xf32> to vector<6x256xf32>
    %523 = vector.broadcast %521 : vector<6x1xf32> to vector<6x256xf32>
    %524 = arith.mulf %522, %523 : vector<6x256xf32>
    %525 = arith.addf %519, %524 : vector<6x256xf32>
    %526 = vector.extract_strided_slice %514 {offsets = [2, 0], sizes = [1, 256], strides = [1, 1]} : vector<6x256xf32> to vector<1x256xf32>
    %527 = vector.extract_strided_slice %452 {offsets = [0, 2], sizes = [6, 1], strides = [1, 1]} : vector<6x6xf32> to vector<6x1xf32>
    %528 = vector.broadcast %526 : vector<1x256xf32> to vector<6x256xf32>
    %529 = vector.broadcast %527 : vector<6x1xf32> to vector<6x256xf32>
    %530 = arith.mulf %528, %529 : vector<6x256xf32>
    %531 = arith.addf %525, %530 : vector<6x256xf32>
    %532 = vector.extract_strided_slice %514 {offsets = [3, 0], sizes = [1, 256], strides = [1, 1]} : vector<6x256xf32> to vector<1x256xf32>
    %533 = vector.extract_strided_slice %452 {offsets = [0, 3], sizes = [6, 1], strides = [1, 1]} : vector<6x6xf32> to vector<6x1xf32>
    %534 = vector.broadcast %532 : vector<1x256xf32> to vector<6x256xf32>
    %535 = vector.broadcast %533 : vector<6x1xf32> to vector<6x256xf32>
    %536 = arith.mulf %534, %535 : vector<6x256xf32>
    %537 = arith.addf %531, %536 : vector<6x256xf32>
    %538 = vector.extract_strided_slice %514 {offsets = [4, 0], sizes = [1, 256], strides = [1, 1]} : vector<6x256xf32> to vector<1x256xf32>
    %539 = vector.extract_strided_slice %452 {offsets = [0, 4], sizes = [6, 1], strides = [1, 1]} : vector<6x6xf32> to vector<6x1xf32>
    %540 = vector.broadcast %538 : vector<1x256xf32> to vector<6x256xf32>
    %541 = vector.broadcast %539 : vector<6x1xf32> to vector<6x256xf32>
    %542 = arith.mulf %540, %541 : vector<6x256xf32>
    %543 = arith.addf %537, %542 : vector<6x256xf32>
    %544 = vector.extract_strided_slice %514 {offsets = [5, 0], sizes = [1, 256], strides = [1, 1]} : vector<6x256xf32> to vector<1x256xf32>
    %545 = vector.extract_strided_slice %452 {offsets = [0, 5], sizes = [6, 1], strides = [1, 1]} : vector<6x6xf32> to vector<6x1xf32>
    %546 = vector.broadcast %544 : vector<1x256xf32> to vector<6x256xf32>
    %547 = vector.broadcast %545 : vector<6x1xf32> to vector<6x256xf32>
    %548 = arith.mulf %546, %547 : vector<6x256xf32>
    %549 = arith.addf %543, %548 : vector<6x256xf32>
    %550 = vector.broadcast %453 : vector<6x1xf32> to vector<6x256xf32>
    %551 = arith.addf %549, %550 : vector<6x256xf32>
    %c0_70 = arith.constant 0 : index
    %c0_71 = arith.constant 0 : index
    %552 = vector.load %arg18[%c0_70, %c0_71] : memref<6x12xf32, #tpu.memory_space<vmem>>, vector<6x12xf32>
    %c0_72 = arith.constant 0 : index
    %c0_73 = arith.constant 0 : index
    %553 = vector.load %arg19[%c0_72, %c0_73] : memref<6x1xf32, #tpu.memory_space<vmem>>, vector<6x1xf32>
    %554 = vector.extract_strided_slice %10 {offsets = [0, 0], sizes = [1, 256], strides = [1, 1]} : vector<12x256xf32> to vector<1x256xf32>
    %555 = vector.extract_strided_slice %552 {offsets = [0, 0], sizes = [6, 1], strides = [1, 1]} : vector<6x12xf32> to vector<6x1xf32>
    %556 = vector.broadcast %554 : vector<1x256xf32> to vector<6x256xf32>
    %557 = vector.broadcast %555 : vector<6x1xf32> to vector<6x256xf32>
    %558 = arith.mulf %556, %557 : vector<6x256xf32>
    %559 = vector.extract_strided_slice %10 {offsets = [1, 0], sizes = [1, 256], strides = [1, 1]} : vector<12x256xf32> to vector<1x256xf32>
    %560 = vector.extract_strided_slice %552 {offsets = [0, 1], sizes = [6, 1], strides = [1, 1]} : vector<6x12xf32> to vector<6x1xf32>
    %561 = vector.broadcast %559 : vector<1x256xf32> to vector<6x256xf32>
    %562 = vector.broadcast %560 : vector<6x1xf32> to vector<6x256xf32>
    %563 = arith.mulf %561, %562 : vector<6x256xf32>
    %564 = arith.addf %558, %563 : vector<6x256xf32>
    %565 = vector.extract_strided_slice %10 {offsets = [2, 0], sizes = [1, 256], strides = [1, 1]} : vector<12x256xf32> to vector<1x256xf32>
    %566 = vector.extract_strided_slice %552 {offsets = [0, 2], sizes = [6, 1], strides = [1, 1]} : vector<6x12xf32> to vector<6x1xf32>
    %567 = vector.broadcast %565 : vector<1x256xf32> to vector<6x256xf32>
    %568 = vector.broadcast %566 : vector<6x1xf32> to vector<6x256xf32>
    %569 = arith.mulf %567, %568 : vector<6x256xf32>
    %570 = arith.addf %564, %569 : vector<6x256xf32>
    %571 = vector.extract_strided_slice %10 {offsets = [3, 0], sizes = [1, 256], strides = [1, 1]} : vector<12x256xf32> to vector<1x256xf32>
    %572 = vector.extract_strided_slice %552 {offsets = [0, 3], sizes = [6, 1], strides = [1, 1]} : vector<6x12xf32> to vector<6x1xf32>
    %573 = vector.broadcast %571 : vector<1x256xf32> to vector<6x256xf32>
    %574 = vector.broadcast %572 : vector<6x1xf32> to vector<6x256xf32>
    %575 = arith.mulf %573, %574 : vector<6x256xf32>
    %576 = arith.addf %570, %575 : vector<6x256xf32>
    %577 = vector.extract_strided_slice %10 {offsets = [4, 0], sizes = [1, 256], strides = [1, 1]} : vector<12x256xf32> to vector<1x256xf32>
    %578 = vector.extract_strided_slice %552 {offsets = [0, 4], sizes = [6, 1], strides = [1, 1]} : vector<6x12xf32> to vector<6x1xf32>
    %579 = vector.broadcast %577 : vector<1x256xf32> to vector<6x256xf32>
    %580 = vector.broadcast %578 : vector<6x1xf32> to vector<6x256xf32>
    %581 = arith.mulf %579, %580 : vector<6x256xf32>
    %582 = arith.addf %576, %581 : vector<6x256xf32>
    %583 = vector.extract_strided_slice %10 {offsets = [5, 0], sizes = [1, 256], strides = [1, 1]} : vector<12x256xf32> to vector<1x256xf32>
    %584 = vector.extract_strided_slice %552 {offsets = [0, 5], sizes = [6, 1], strides = [1, 1]} : vector<6x12xf32> to vector<6x1xf32>
    %585 = vector.broadcast %583 : vector<1x256xf32> to vector<6x256xf32>
    %586 = vector.broadcast %584 : vector<6x1xf32> to vector<6x256xf32>
    %587 = arith.mulf %585, %586 : vector<6x256xf32>
    %588 = arith.addf %582, %587 : vector<6x256xf32>
    %589 = vector.extract_strided_slice %10 {offsets = [6, 0], sizes = [1, 256], strides = [1, 1]} : vector<12x256xf32> to vector<1x256xf32>
    %590 = vector.extract_strided_slice %552 {offsets = [0, 6], sizes = [6, 1], strides = [1, 1]} : vector<6x12xf32> to vector<6x1xf32>
    %591 = vector.broadcast %589 : vector<1x256xf32> to vector<6x256xf32>
    %592 = vector.broadcast %590 : vector<6x1xf32> to vector<6x256xf32>
    %593 = arith.mulf %591, %592 : vector<6x256xf32>
    %594 = arith.addf %588, %593 : vector<6x256xf32>
    %595 = vector.extract_strided_slice %10 {offsets = [7, 0], sizes = [1, 256], strides = [1, 1]} : vector<12x256xf32> to vector<1x256xf32>
    %596 = vector.extract_strided_slice %552 {offsets = [0, 7], sizes = [6, 1], strides = [1, 1]} : vector<6x12xf32> to vector<6x1xf32>
    %597 = vector.broadcast %595 : vector<1x256xf32> to vector<6x256xf32>
    %598 = vector.broadcast %596 : vector<6x1xf32> to vector<6x256xf32>
    %599 = arith.mulf %597, %598 : vector<6x256xf32>
    %600 = arith.addf %594, %599 : vector<6x256xf32>
    %601 = vector.extract_strided_slice %10 {offsets = [8, 0], sizes = [1, 256], strides = [1, 1]} : vector<12x256xf32> to vector<1x256xf32>
    %602 = vector.extract_strided_slice %552 {offsets = [0, 8], sizes = [6, 1], strides = [1, 1]} : vector<6x12xf32> to vector<6x1xf32>
    %603 = vector.broadcast %601 : vector<1x256xf32> to vector<6x256xf32>
    %604 = vector.broadcast %602 : vector<6x1xf32> to vector<6x256xf32>
    %605 = arith.mulf %603, %604 : vector<6x256xf32>
    %606 = arith.addf %600, %605 : vector<6x256xf32>
    %607 = vector.extract_strided_slice %10 {offsets = [9, 0], sizes = [1, 256], strides = [1, 1]} : vector<12x256xf32> to vector<1x256xf32>
    %608 = vector.extract_strided_slice %552 {offsets = [0, 9], sizes = [6, 1], strides = [1, 1]} : vector<6x12xf32> to vector<6x1xf32>
    %609 = vector.broadcast %607 : vector<1x256xf32> to vector<6x256xf32>
    %610 = vector.broadcast %608 : vector<6x1xf32> to vector<6x256xf32>
    %611 = arith.mulf %609, %610 : vector<6x256xf32>
    %612 = arith.addf %606, %611 : vector<6x256xf32>
    %613 = vector.extract_strided_slice %10 {offsets = [10, 0], sizes = [1, 256], strides = [1, 1]} : vector<12x256xf32> to vector<1x256xf32>
    %614 = vector.extract_strided_slice %552 {offsets = [0, 10], sizes = [6, 1], strides = [1, 1]} : vector<6x12xf32> to vector<6x1xf32>
    %615 = vector.broadcast %613 : vector<1x256xf32> to vector<6x256xf32>
    %616 = vector.broadcast %614 : vector<6x1xf32> to vector<6x256xf32>
    %617 = arith.mulf %615, %616 : vector<6x256xf32>
    %618 = arith.addf %612, %617 : vector<6x256xf32>
    %619 = vector.extract_strided_slice %10 {offsets = [11, 0], sizes = [1, 256], strides = [1, 1]} : vector<12x256xf32> to vector<1x256xf32>
    %620 = vector.extract_strided_slice %552 {offsets = [0, 11], sizes = [6, 1], strides = [1, 1]} : vector<6x12xf32> to vector<6x1xf32>
    %621 = vector.broadcast %619 : vector<1x256xf32> to vector<6x256xf32>
    %622 = vector.broadcast %620 : vector<6x1xf32> to vector<6x256xf32>
    %623 = arith.mulf %621, %622 : vector<6x256xf32>
    %624 = arith.addf %618, %623 : vector<6x256xf32>
    %625 = vector.broadcast %553 : vector<6x1xf32> to vector<6x256xf32>
    %626 = arith.addf %624, %625 : vector<6x256xf32>
    %627 = arith.addf %551, %626 : vector<6x256xf32>
    %c0_74 = arith.constant 0 : index
    %c0_75 = arith.constant 0 : index
    %c0_76 = arith.constant 0 : index
    %628 = vector.load %arg20[%c0_74, %c0_75, %c0_76] : memref<1x6x256xf32, #tpu.memory_space<vmem>>, vector<1x6x256xf32>
    %629 = vector.shape_cast %628 : vector<1x6x256xf32> to vector<6x256xf32>
    %630 = vector.shape_cast %627 : vector<6x256xf32> to vector<1x6x256xf32>
    tpu.vector_store %arg20[%c0_74, %c0_75, %c0_76], %630 {strides = array<i32>} : memref<1x6x256xf32, #tpu.memory_space<vmem>>, vector<1x6x256xf32>,
    return
  }
  func.func @transform_0(%arg0: i32) -> (i32, i32, i32) {
    %c0_i32 = arith.constant 0 : i32
    %c0_i32_0 = arith.constant 0 : i32
    %c0_i32_1 = arith.constant 0 : i32
    return %arg0, %c0_i32, %c0_i32_0 : i32, i32, i32
  }
  func.func @transform_1(%arg0: i32) -> (i32, i32) {
    %c0_i32 = arith.constant 0 : i32
    %c0_i32_0 = arith.constant 0 : i32
    %c0_i32_1 = arith.constant 0 : i32
    return %c0_i32, %c0_i32_0 : i32, i32
  }
  func.func @transform_2(%arg0: i32) -> (i32, i32) {
    %c0_i32 = arith.constant 0 : i32
    %c0_i32_0 = arith.constant 0 : i32
    %c0_i32_1 = arith.constant 0 : i32
    return %c0_i32, %c0_i32_0 : i32, i32
  }
  func.func @transform_3(%arg0: i32) -> (i32, i32) {
    %c0_i32 = arith.constant 0 : i32
    %c0_i32_0 = arith.constant 0 : i32
    %c0_i32_1 = arith.constant 0 : i32
    return %c0_i32, %c0_i32_0 : i32, i32
  }
  func.func @transform_4(%arg0: i32) -> (i32, i32) {
    %c0_i32 = arith.constant 0 : i32
    %c0_i32_0 = arith.constant 0 : i32
    %c0_i32_1 = arith.constant 0 : i32
    return %c0_i32, %c0_i32_0 : i32, i32
  }
  func.func @transform_5(%arg0: i32) -> (i32, i32) {
    %c0_i32 = arith.constant 0 : i32
    %c0_i32_0 = arith.constant 0 : i32
    %c0_i32_1 = arith.constant 0 : i32
    return %c0_i32, %c0_i32_0 : i32, i32
  }
  func.func @transform_6(%arg0: i32) -> (i32, i32) {
    %c0_i32 = arith.constant 0 : i32
    %c0_i32_0 = arith.constant 0 : i32
    %c0_i32_1 = arith.constant 0 : i32
    return %c0_i32, %c0_i32_0 : i32, i32
  }
  func.func @transform_7(%arg0: i32) -> (i32, i32) {
    %c0_i32 = arith.constant 0 : i32
    %c0_i32_0 = arith.constant 0 : i32
    %c0_i32_1 = arith.constant 0 : i32
    return %c0_i32, %c0_i32_0 : i32, i32
  }
  func.func @transform_8(%arg0: i32) -> (i32, i32) {
    %c0_i32 = arith.constant 0 : i32
    %c0_i32_0 = arith.constant 0 : i32
    %c0_i32_1 = arith.constant 0 : i32
    return %c0_i32, %c0_i32_0 : i32, i32
  }
  func.func @transform_9(%arg0: i32) -> (i32, i32) {
    %c0_i32 = arith.constant 0 : i32
    %c0_i32_0 = arith.constant 0 : i32
    %c0_i32_1 = arith.constant 0 : i32
    return %c0_i32, %c0_i32_0 : i32, i32
  }
  func.func @transform_10(%arg0: i32) -> (i32, i32) {
    %c0_i32 = arith.constant 0 : i32
    %c0_i32_0 = arith.constant 0 : i32
    %c0_i32_1 = arith.constant 0 : i32
    return %c0_i32, %c0_i32_0 : i32, i32
  }
  func.func @transform_11(%arg0: i32) -> (i32, i32) {
    %c0_i32 = arith.constant 0 : i32
    %c0_i32_0 = arith.constant 0 : i32
    %c0_i32_1 = arith.constant 0 : i32
    return %c0_i32, %c0_i32_0 : i32, i32
  }
  func.func @transform_12(%arg0: i32) -> (i32, i32) {
    %c0_i32 = arith.constant 0 : i32
    %c0_i32_0 = arith.constant 0 : i32
    %c0_i32_1 = arith.constant 0 : i32
    return %c0_i32, %c0_i32_0 : i32, i32
  }
  func.func @transform_13(%arg0: i32) -> (i32, i32) {
    %c0_i32 = arith.constant 0 : i32
    %c0_i32_0 = arith.constant 0 : i32
    %c0_i32_1 = arith.constant 0 : i32
    return %c0_i32, %c0_i32_0 : i32, i32
  }
  func.func @transform_14(%arg0: i32) -> (i32, i32) {
    %c0_i32 = arith.constant 0 : i32
    %c0_i32_0 = arith.constant 0 : i32
    %c0_i32_1 = arith.constant 0 : i32
    return %c0_i32, %c0_i32_0 : i32, i32
  }
  func.func @transform_15(%arg0: i32) -> (i32, i32) {
    %c0_i32 = arith.constant 0 : i32
    %c0_i32_0 = arith.constant 0 : i32
    %c0_i32_1 = arith.constant 0 : i32
    return %c0_i32, %c0_i32_0 : i32, i32
  }
  func.func @transform_16(%arg0: i32) -> (i32, i32) {
    %c0_i32 = arith.constant 0 : i32
    %c0_i32_0 = arith.constant 0 : i32
    %c0_i32_1 = arith.constant 0 : i32
    return %c0_i32, %c0_i32_0 : i32, i32
  }
  func.func @transform_17(%arg0: i32) -> (i32, i32) {
    %c0_i32 = arith.constant 0 : i32
    %c0_i32_0 = arith.constant 0 : i32
    %c0_i32_1 = arith.constant 0 : i32
    return %c0_i32, %c0_i32_0 : i32, i32
  }
  func.func @transform_18(%arg0: i32) -> (i32, i32) {
    %c0_i32 = arith.constant 0 : i32
    %c0_i32_0 = arith.constant 0 : i32
    %c0_i32_1 = arith.constant 0 : i32
    return %c0_i32, %c0_i32_0 : i32, i32
  }
  func.func @transform_19(%arg0: i32) -> (i32, i32, i32) {
    %c0_i32 = arith.constant 0 : i32
    %c0_i32_0 = arith.constant 0 : i32
    %c0_i32_1 = arith.constant 0 : i32
    return %arg0, %c0_i32, %c0_i32_0 : i32, i32, i32
  }
}

module attributes {stable_mosaic.version = 11 : i64} {
  func.func @kernel(%arg0: i32, %arg1: memref<1x14x256xf32, #tpu.memory_space<vmem>>, %arg2: memref<8x256xf32, #tpu.memory_space<vmem>>, %arg3: memref<14x9xf32, #tpu.memory_space<vmem>>, %arg4: memref<6x14xf32, #tpu.memory_space<vmem>>, %arg5: memref<6x1xf32, #tpu.memory_space<vmem>>, %arg6: memref<6x14xf32, #tpu.memory_space<vmem>>, %arg7: memref<6x1xf32, #tpu.memory_space<vmem>>, %arg8: memref<6x9xf32, #tpu.memory_space<vmem>>, %arg9: memref<3x6xf32, #tpu.memory_space<vmem>>, %arg10: memref<3x1xf32, #tpu.memory_space<vmem>>, %arg11: memref<3x6xf32, #tpu.memory_space<vmem>>, %arg12: memref<3x1xf32, #tpu.memory_space<vmem>>, %arg13: memref<1x3x256xf32, #tpu.memory_space<vmem>>) attributes {dimension_semantics = [#tpu.dimension_semantics<parallel>], iteration_bounds = array<i64: 2>, scalar_prefetch = 0 : i64, scratch_operands = 0 : i64, tpu.core_type = #tpu.core_type<tc>, window_params = [{transform_indices = @transform_0, window_bounds = array<i64: 1, 14, 256>}, {pipeline_mode = #tpu.pipeline_mode<synchronous>, transform_indices = @transform_1, window_bounds = array<i64: 8, 256>}, {pipeline_mode = #tpu.pipeline_mode<synchronous>, transform_indices = @transform_2, window_bounds = array<i64: 14, 9>}, {pipeline_mode = #tpu.pipeline_mode<synchronous>, transform_indices = @transform_3, window_bounds = array<i64: 6, 14>}, {pipeline_mode = #tpu.pipeline_mode<synchronous>, transform_indices = @transform_4, window_bounds = array<i64: 6, 1>}, {pipeline_mode = #tpu.pipeline_mode<synchronous>, transform_indices = @transform_5, window_bounds = array<i64: 6, 14>}, {pipeline_mode = #tpu.pipeline_mode<synchronous>, transform_indices = @transform_6, window_bounds = array<i64: 6, 1>}, {pipeline_mode = #tpu.pipeline_mode<synchronous>, transform_indices = @transform_7, window_bounds = array<i64: 6, 9>}, {pipeline_mode = #tpu.pipeline_mode<synchronous>, transform_indices = @transform_8, window_bounds = array<i64: 3, 6>}, {pipeline_mode = #tpu.pipeline_mode<synchronous>, transform_indices = @transform_9, window_bounds = array<i64: 3, 1>}, {pipeline_mode = #tpu.pipeline_mode<synchronous>, transform_indices = @transform_10, window_bounds = array<i64: 3, 6>}, {pipeline_mode = #tpu.pipeline_mode<synchronous>, transform_indices = @transform_11, window_bounds = array<i64: 3, 1>}, {transform_indices = @transform_12, window_bounds = array<i64: 1, 3, 256>}]} {
    %c0 = arith.constant 0 : index
    %c0_0 = arith.constant 0 : index
    %0 = vector.load %arg2[%c0, %c0_0] : memref<8x256xf32, #tpu.memory_space<vmem>>, vector<8x256xf32>
    %1 = vector.extract_strided_slice %0 {offsets = [0, 0], sizes = [1, 256], strides = [1, 1]} : vector<8x256xf32> to vector<1x256xf32>
    %2 = vector.extract_strided_slice %0 {offsets = [1, 0], sizes = [1, 256], strides = [1, 1]} : vector<8x256xf32> to vector<1x256xf32>
    %3 = vector.extract_strided_slice %0 {offsets = [2, 0], sizes = [1, 256], strides = [1, 1]} : vector<8x256xf32> to vector<1x256xf32>
    %4 = vector.extract_strided_slice %0 {offsets = [3, 0], sizes = [1, 256], strides = [1, 1]} : vector<8x256xf32> to vector<1x256xf32>
    %5 = vector.extract_strided_slice %0 {offsets = [4, 0], sizes = [1, 256], strides = [1, 1]} : vector<8x256xf32> to vector<1x256xf32>
    %6 = vector.extract_strided_slice %0 {offsets = [5, 0], sizes = [1, 256], strides = [1, 1]} : vector<8x256xf32> to vector<1x256xf32>
    %7 = vector.extract_strided_slice %0 {offsets = [6, 0], sizes = [1, 256], strides = [1, 1]} : vector<8x256xf32> to vector<1x256xf32>
    %8 = vector.extract_strided_slice %0 {offsets = [7, 0], sizes = [1, 256], strides = [1, 1]} : vector<8x256xf32> to vector<1x256xf32>
    %c0_1 = arith.constant 0 : index
    %c0_2 = arith.constant 0 : index
    %c0_3 = arith.constant 0 : index
    %9 = vector.load %arg1[%c0_1, %c0_2, %c0_3] : memref<1x14x256xf32, #tpu.memory_space<vmem>>, vector<1x14x256xf32>
    %10 = vector.shape_cast %9 : vector<1x14x256xf32> to vector<14x256xf32>
    %c0_4 = arith.constant 0 : index
    %c0_5 = arith.constant 0 : index
    %11 = vector.load %arg3[%c0_4, %c0_5] : memref<14x9xf32, #tpu.memory_space<vmem>>, vector<14x9xf32>
    %c0_6 = arith.constant 0 : index
    %c0_7 = arith.constant 0 : index
    %12 = vector.load %arg4[%c0_6, %c0_7] : memref<6x14xf32, #tpu.memory_space<vmem>>, vector<6x14xf32>
    %c0_8 = arith.constant 0 : index
    %c0_9 = arith.constant 0 : index
    %13 = vector.load %arg5[%c0_8, %c0_9] : memref<6x1xf32, #tpu.memory_space<vmem>>, vector<6x1xf32>
    %14 = vector.extract_strided_slice %11 {offsets = [0, 4], sizes = [14, 1], strides = [1, 1]} : vector<14x9xf32> to vector<14x1xf32>
    %15 = vector.broadcast %14 : vector<14x1xf32> to vector<14x256xf32>
    %16 = arith.mulf %10, %15 : vector<14x256xf32>
    %c17_i32 = arith.constant 17 : i32
    %17 = tpu.dynamic_rotate %10 by %c17_i32 dim 1 : vector<14x256xf32>, i32 -> vector<14x256xf32>
    %18 = vector.broadcast %1 : vector<1x256xf32> to vector<14x256xf32>
    %19 = arith.mulf %17, %18 : vector<14x256xf32>
    %20 = vector.extract_strided_slice %11 {offsets = [0, 0], sizes = [14, 1], strides = [1, 1]} : vector<14x9xf32> to vector<14x1xf32>
    %21 = vector.broadcast %20 : vector<14x1xf32> to vector<14x256xf32>
    %22 = arith.mulf %19, %21 : vector<14x256xf32>
    %23 = arith.addf %16, %22 : vector<14x256xf32>
    %c16_i32 = arith.constant 16 : i32
    %24 = tpu.dynamic_rotate %10 by %c16_i32 dim 1 : vector<14x256xf32>, i32 -> vector<14x256xf32>
    %25 = vector.broadcast %2 : vector<1x256xf32> to vector<14x256xf32>
    %26 = arith.mulf %24, %25 : vector<14x256xf32>
    %27 = vector.extract_strided_slice %11 {offsets = [0, 1], sizes = [14, 1], strides = [1, 1]} : vector<14x9xf32> to vector<14x1xf32>
    %28 = vector.broadcast %27 : vector<14x1xf32> to vector<14x256xf32>
    %29 = arith.mulf %26, %28 : vector<14x256xf32>
    %30 = arith.addf %23, %29 : vector<14x256xf32>
    %c15_i32 = arith.constant 15 : i32
    %31 = tpu.dynamic_rotate %10 by %c15_i32 dim 1 : vector<14x256xf32>, i32 -> vector<14x256xf32>
    %32 = vector.broadcast %3 : vector<1x256xf32> to vector<14x256xf32>
    %33 = arith.mulf %31, %32 : vector<14x256xf32>
    %34 = vector.extract_strided_slice %11 {offsets = [0, 2], sizes = [14, 1], strides = [1, 1]} : vector<14x9xf32> to vector<14x1xf32>
    %35 = vector.broadcast %34 : vector<14x1xf32> to vector<14x256xf32>
    %36 = arith.mulf %33, %35 : vector<14x256xf32>
    %37 = arith.addf %30, %36 : vector<14x256xf32>
    %c1_i32 = arith.constant 1 : i32
    %38 = tpu.dynamic_rotate %10 by %c1_i32 dim 1 : vector<14x256xf32>, i32 -> vector<14x256xf32>
    %39 = vector.broadcast %4 : vector<1x256xf32> to vector<14x256xf32>
    %40 = arith.mulf %38, %39 : vector<14x256xf32>
    %41 = vector.extract_strided_slice %11 {offsets = [0, 3], sizes = [14, 1], strides = [1, 1]} : vector<14x9xf32> to vector<14x1xf32>
    %42 = vector.broadcast %41 : vector<14x1xf32> to vector<14x256xf32>
    %43 = arith.mulf %40, %42 : vector<14x256xf32>
    %44 = arith.addf %37, %43 : vector<14x256xf32>
    %c255_i32 = arith.constant 255 : i32
    %45 = tpu.dynamic_rotate %10 by %c255_i32 dim 1 : vector<14x256xf32>, i32 -> vector<14x256xf32>
    %46 = vector.broadcast %5 : vector<1x256xf32> to vector<14x256xf32>
    %47 = arith.mulf %45, %46 : vector<14x256xf32>
    %48 = vector.extract_strided_slice %11 {offsets = [0, 5], sizes = [14, 1], strides = [1, 1]} : vector<14x9xf32> to vector<14x1xf32>
    %49 = vector.broadcast %48 : vector<14x1xf32> to vector<14x256xf32>
    %50 = arith.mulf %47, %49 : vector<14x256xf32>
    %51 = arith.addf %44, %50 : vector<14x256xf32>
    %c241_i32 = arith.constant 241 : i32
    %52 = tpu.dynamic_rotate %10 by %c241_i32 dim 1 : vector<14x256xf32>, i32 -> vector<14x256xf32>
    %53 = vector.broadcast %6 : vector<1x256xf32> to vector<14x256xf32>
    %54 = arith.mulf %52, %53 : vector<14x256xf32>
    %55 = vector.extract_strided_slice %11 {offsets = [0, 6], sizes = [14, 1], strides = [1, 1]} : vector<14x9xf32> to vector<14x1xf32>
    %56 = vector.broadcast %55 : vector<14x1xf32> to vector<14x256xf32>
    %57 = arith.mulf %54, %56 : vector<14x256xf32>
    %58 = arith.addf %51, %57 : vector<14x256xf32>
    %c240_i32 = arith.constant 240 : i32
    %59 = tpu.dynamic_rotate %10 by %c240_i32 dim 1 : vector<14x256xf32>, i32 -> vector<14x256xf32>
    %60 = vector.broadcast %7 : vector<1x256xf32> to vector<14x256xf32>
    %61 = arith.mulf %59, %60 : vector<14x256xf32>
    %62 = vector.extract_strided_slice %11 {offsets = [0, 7], sizes = [14, 1], strides = [1, 1]} : vector<14x9xf32> to vector<14x1xf32>
    %63 = vector.broadcast %62 : vector<14x1xf32> to vector<14x256xf32>
    %64 = arith.mulf %61, %63 : vector<14x256xf32>
    %65 = arith.addf %58, %64 : vector<14x256xf32>
    %c239_i32 = arith.constant 239 : i32
    %66 = tpu.dynamic_rotate %10 by %c239_i32 dim 1 : vector<14x256xf32>, i32 -> vector<14x256xf32>
    %67 = vector.broadcast %8 : vector<1x256xf32> to vector<14x256xf32>
    %68 = arith.mulf %66, %67 : vector<14x256xf32>
    %69 = vector.extract_strided_slice %11 {offsets = [0, 8], sizes = [14, 1], strides = [1, 1]} : vector<14x9xf32> to vector<14x1xf32>
    %70 = vector.broadcast %69 : vector<14x1xf32> to vector<14x256xf32>
    %71 = arith.mulf %68, %70 : vector<14x256xf32>
    %72 = arith.addf %65, %71 : vector<14x256xf32>
    %73 = vector.extract_strided_slice %72 {offsets = [0, 0], sizes = [1, 256], strides = [1, 1]} : vector<14x256xf32> to vector<1x256xf32>
    %74 = vector.extract_strided_slice %12 {offsets = [0, 0], sizes = [6, 1], strides = [1, 1]} : vector<6x14xf32> to vector<6x1xf32>
    %75 = vector.broadcast %73 : vector<1x256xf32> to vector<6x256xf32>
    %76 = vector.broadcast %74 : vector<6x1xf32> to vector<6x256xf32>
    %77 = arith.mulf %75, %76 : vector<6x256xf32>
    %78 = vector.extract_strided_slice %72 {offsets = [1, 0], sizes = [1, 256], strides = [1, 1]} : vector<14x256xf32> to vector<1x256xf32>
    %79 = vector.extract_strided_slice %12 {offsets = [0, 1], sizes = [6, 1], strides = [1, 1]} : vector<6x14xf32> to vector<6x1xf32>
    %80 = vector.broadcast %78 : vector<1x256xf32> to vector<6x256xf32>
    %81 = vector.broadcast %79 : vector<6x1xf32> to vector<6x256xf32>
    %82 = arith.mulf %80, %81 : vector<6x256xf32>
    %83 = arith.addf %77, %82 : vector<6x256xf32>
    %84 = vector.extract_strided_slice %72 {offsets = [2, 0], sizes = [1, 256], strides = [1, 1]} : vector<14x256xf32> to vector<1x256xf32>
    %85 = vector.extract_strided_slice %12 {offsets = [0, 2], sizes = [6, 1], strides = [1, 1]} : vector<6x14xf32> to vector<6x1xf32>
    %86 = vector.broadcast %84 : vector<1x256xf32> to vector<6x256xf32>
    %87 = vector.broadcast %85 : vector<6x1xf32> to vector<6x256xf32>
    %88 = arith.mulf %86, %87 : vector<6x256xf32>
    %89 = arith.addf %83, %88 : vector<6x256xf32>
    %90 = vector.extract_strided_slice %72 {offsets = [3, 0], sizes = [1, 256], strides = [1, 1]} : vector<14x256xf32> to vector<1x256xf32>
    %91 = vector.extract_strided_slice %12 {offsets = [0, 3], sizes = [6, 1], strides = [1, 1]} : vector<6x14xf32> to vector<6x1xf32>
    %92 = vector.broadcast %90 : vector<1x256xf32> to vector<6x256xf32>
    %93 = vector.broadcast %91 : vector<6x1xf32> to vector<6x256xf32>
    %94 = arith.mulf %92, %93 : vector<6x256xf32>
    %95 = arith.addf %89, %94 : vector<6x256xf32>
    %96 = vector.extract_strided_slice %72 {offsets = [4, 0], sizes = [1, 256], strides = [1, 1]} : vector<14x256xf32> to vector<1x256xf32>
    %97 = vector.extract_strided_slice %12 {offsets = [0, 4], sizes = [6, 1], strides = [1, 1]} : vector<6x14xf32> to vector<6x1xf32>
    %98 = vector.broadcast %96 : vector<1x256xf32> to vector<6x256xf32>
    %99 = vector.broadcast %97 : vector<6x1xf32> to vector<6x256xf32>
    %100 = arith.mulf %98, %99 : vector<6x256xf32>
    %101 = arith.addf %95, %100 : vector<6x256xf32>
    %102 = vector.extract_strided_slice %72 {offsets = [5, 0], sizes = [1, 256], strides = [1, 1]} : vector<14x256xf32> to vector<1x256xf32>
    %103 = vector.extract_strided_slice %12 {offsets = [0, 5], sizes = [6, 1], strides = [1, 1]} : vector<6x14xf32> to vector<6x1xf32>
    %104 = vector.broadcast %102 : vector<1x256xf32> to vector<6x256xf32>
    %105 = vector.broadcast %103 : vector<6x1xf32> to vector<6x256xf32>
    %106 = arith.mulf %104, %105 : vector<6x256xf32>
    %107 = arith.addf %101, %106 : vector<6x256xf32>
    %108 = vector.extract_strided_slice %72 {offsets = [6, 0], sizes = [1, 256], strides = [1, 1]} : vector<14x256xf32> to vector<1x256xf32>
    %109 = vector.extract_strided_slice %12 {offsets = [0, 6], sizes = [6, 1], strides = [1, 1]} : vector<6x14xf32> to vector<6x1xf32>
    %110 = vector.broadcast %108 : vector<1x256xf32> to vector<6x256xf32>
    %111 = vector.broadcast %109 : vector<6x1xf32> to vector<6x256xf32>
    %112 = arith.mulf %110, %111 : vector<6x256xf32>
    %113 = arith.addf %107, %112 : vector<6x256xf32>
    %114 = vector.extract_strided_slice %72 {offsets = [7, 0], sizes = [1, 256], strides = [1, 1]} : vector<14x256xf32> to vector<1x256xf32>
    %115 = vector.extract_strided_slice %12 {offsets = [0, 7], sizes = [6, 1], strides = [1, 1]} : vector<6x14xf32> to vector<6x1xf32>
    %116 = vector.broadcast %114 : vector<1x256xf32> to vector<6x256xf32>
    %117 = vector.broadcast %115 : vector<6x1xf32> to vector<6x256xf32>
    %118 = arith.mulf %116, %117 : vector<6x256xf32>
    %119 = arith.addf %113, %118 : vector<6x256xf32>
    %120 = vector.extract_strided_slice %72 {offsets = [8, 0], sizes = [1, 256], strides = [1, 1]} : vector<14x256xf32> to vector<1x256xf32>
    %121 = vector.extract_strided_slice %12 {offsets = [0, 8], sizes = [6, 1], strides = [1, 1]} : vector<6x14xf32> to vector<6x1xf32>
    %122 = vector.broadcast %120 : vector<1x256xf32> to vector<6x256xf32>
    %123 = vector.broadcast %121 : vector<6x1xf32> to vector<6x256xf32>
    %124 = arith.mulf %122, %123 : vector<6x256xf32>
    %125 = arith.addf %119, %124 : vector<6x256xf32>
    %126 = vector.extract_strided_slice %72 {offsets = [9, 0], sizes = [1, 256], strides = [1, 1]} : vector<14x256xf32> to vector<1x256xf32>
    %127 = vector.extract_strided_slice %12 {offsets = [0, 9], sizes = [6, 1], strides = [1, 1]} : vector<6x14xf32> to vector<6x1xf32>
    %128 = vector.broadcast %126 : vector<1x256xf32> to vector<6x256xf32>
    %129 = vector.broadcast %127 : vector<6x1xf32> to vector<6x256xf32>
    %130 = arith.mulf %128, %129 : vector<6x256xf32>
    %131 = arith.addf %125, %130 : vector<6x256xf32>
    %132 = vector.extract_strided_slice %72 {offsets = [10, 0], sizes = [1, 256], strides = [1, 1]} : vector<14x256xf32> to vector<1x256xf32>
    %133 = vector.extract_strided_slice %12 {offsets = [0, 10], sizes = [6, 1], strides = [1, 1]} : vector<6x14xf32> to vector<6x1xf32>
    %134 = vector.broadcast %132 : vector<1x256xf32> to vector<6x256xf32>
    %135 = vector.broadcast %133 : vector<6x1xf32> to vector<6x256xf32>
    %136 = arith.mulf %134, %135 : vector<6x256xf32>
    %137 = arith.addf %131, %136 : vector<6x256xf32>
    %138 = vector.extract_strided_slice %72 {offsets = [11, 0], sizes = [1, 256], strides = [1, 1]} : vector<14x256xf32> to vector<1x256xf32>
    %139 = vector.extract_strided_slice %12 {offsets = [0, 11], sizes = [6, 1], strides = [1, 1]} : vector<6x14xf32> to vector<6x1xf32>
    %140 = vector.broadcast %138 : vector<1x256xf32> to vector<6x256xf32>
    %141 = vector.broadcast %139 : vector<6x1xf32> to vector<6x256xf32>
    %142 = arith.mulf %140, %141 : vector<6x256xf32>
    %143 = arith.addf %137, %142 : vector<6x256xf32>
    %144 = vector.extract_strided_slice %72 {offsets = [12, 0], sizes = [1, 256], strides = [1, 1]} : vector<14x256xf32> to vector<1x256xf32>
    %145 = vector.extract_strided_slice %12 {offsets = [0, 12], sizes = [6, 1], strides = [1, 1]} : vector<6x14xf32> to vector<6x1xf32>
    %146 = vector.broadcast %144 : vector<1x256xf32> to vector<6x256xf32>
    %147 = vector.broadcast %145 : vector<6x1xf32> to vector<6x256xf32>
    %148 = arith.mulf %146, %147 : vector<6x256xf32>
    %149 = arith.addf %143, %148 : vector<6x256xf32>
    %150 = vector.extract_strided_slice %72 {offsets = [13, 0], sizes = [1, 256], strides = [1, 1]} : vector<14x256xf32> to vector<1x256xf32>
    %151 = vector.extract_strided_slice %12 {offsets = [0, 13], sizes = [6, 1], strides = [1, 1]} : vector<6x14xf32> to vector<6x1xf32>
    %152 = vector.broadcast %150 : vector<1x256xf32> to vector<6x256xf32>
    %153 = vector.broadcast %151 : vector<6x1xf32> to vector<6x256xf32>
    %154 = arith.mulf %152, %153 : vector<6x256xf32>
    %155 = arith.addf %149, %154 : vector<6x256xf32>
    %156 = vector.broadcast %13 : vector<6x1xf32> to vector<6x256xf32>
    %157 = arith.addf %155, %156 : vector<6x256xf32>
    %c0_10 = arith.constant 0 : index
    %c0_11 = arith.constant 0 : index
    %158 = vector.load %arg6[%c0_10, %c0_11] : memref<6x14xf32, #tpu.memory_space<vmem>>, vector<6x14xf32>
    %c0_12 = arith.constant 0 : index
    %c0_13 = arith.constant 0 : index
    %159 = vector.load %arg7[%c0_12, %c0_13] : memref<6x1xf32, #tpu.memory_space<vmem>>, vector<6x1xf32>
    %160 = vector.extract_strided_slice %10 {offsets = [0, 0], sizes = [1, 256], strides = [1, 1]} : vector<14x256xf32> to vector<1x256xf32>
    %161 = vector.extract_strided_slice %158 {offsets = [0, 0], sizes = [6, 1], strides = [1, 1]} : vector<6x14xf32> to vector<6x1xf32>
    %162 = vector.broadcast %160 : vector<1x256xf32> to vector<6x256xf32>
    %163 = vector.broadcast %161 : vector<6x1xf32> to vector<6x256xf32>
    %164 = arith.mulf %162, %163 : vector<6x256xf32>
    %165 = vector.extract_strided_slice %10 {offsets = [1, 0], sizes = [1, 256], strides = [1, 1]} : vector<14x256xf32> to vector<1x256xf32>
    %166 = vector.extract_strided_slice %158 {offsets = [0, 1], sizes = [6, 1], strides = [1, 1]} : vector<6x14xf32> to vector<6x1xf32>
    %167 = vector.broadcast %165 : vector<1x256xf32> to vector<6x256xf32>
    %168 = vector.broadcast %166 : vector<6x1xf32> to vector<6x256xf32>
    %169 = arith.mulf %167, %168 : vector<6x256xf32>
    %170 = arith.addf %164, %169 : vector<6x256xf32>
    %171 = vector.extract_strided_slice %10 {offsets = [2, 0], sizes = [1, 256], strides = [1, 1]} : vector<14x256xf32> to vector<1x256xf32>
    %172 = vector.extract_strided_slice %158 {offsets = [0, 2], sizes = [6, 1], strides = [1, 1]} : vector<6x14xf32> to vector<6x1xf32>
    %173 = vector.broadcast %171 : vector<1x256xf32> to vector<6x256xf32>
    %174 = vector.broadcast %172 : vector<6x1xf32> to vector<6x256xf32>
    %175 = arith.mulf %173, %174 : vector<6x256xf32>
    %176 = arith.addf %170, %175 : vector<6x256xf32>
    %177 = vector.extract_strided_slice %10 {offsets = [3, 0], sizes = [1, 256], strides = [1, 1]} : vector<14x256xf32> to vector<1x256xf32>
    %178 = vector.extract_strided_slice %158 {offsets = [0, 3], sizes = [6, 1], strides = [1, 1]} : vector<6x14xf32> to vector<6x1xf32>
    %179 = vector.broadcast %177 : vector<1x256xf32> to vector<6x256xf32>
    %180 = vector.broadcast %178 : vector<6x1xf32> to vector<6x256xf32>
    %181 = arith.mulf %179, %180 : vector<6x256xf32>
    %182 = arith.addf %176, %181 : vector<6x256xf32>
    %183 = vector.extract_strided_slice %10 {offsets = [4, 0], sizes = [1, 256], strides = [1, 1]} : vector<14x256xf32> to vector<1x256xf32>
    %184 = vector.extract_strided_slice %158 {offsets = [0, 4], sizes = [6, 1], strides = [1, 1]} : vector<6x14xf32> to vector<6x1xf32>
    %185 = vector.broadcast %183 : vector<1x256xf32> to vector<6x256xf32>
    %186 = vector.broadcast %184 : vector<6x1xf32> to vector<6x256xf32>
    %187 = arith.mulf %185, %186 : vector<6x256xf32>
    %188 = arith.addf %182, %187 : vector<6x256xf32>
    %189 = vector.extract_strided_slice %10 {offsets = [5, 0], sizes = [1, 256], strides = [1, 1]} : vector<14x256xf32> to vector<1x256xf32>
    %190 = vector.extract_strided_slice %158 {offsets = [0, 5], sizes = [6, 1], strides = [1, 1]} : vector<6x14xf32> to vector<6x1xf32>
    %191 = vector.broadcast %189 : vector<1x256xf32> to vector<6x256xf32>
    %192 = vector.broadcast %190 : vector<6x1xf32> to vector<6x256xf32>
    %193 = arith.mulf %191, %192 : vector<6x256xf32>
    %194 = arith.addf %188, %193 : vector<6x256xf32>
    %195 = vector.extract_strided_slice %10 {offsets = [6, 0], sizes = [1, 256], strides = [1, 1]} : vector<14x256xf32> to vector<1x256xf32>
    %196 = vector.extract_strided_slice %158 {offsets = [0, 6], sizes = [6, 1], strides = [1, 1]} : vector<6x14xf32> to vector<6x1xf32>
    %197 = vector.broadcast %195 : vector<1x256xf32> to vector<6x256xf32>
    %198 = vector.broadcast %196 : vector<6x1xf32> to vector<6x256xf32>
    %199 = arith.mulf %197, %198 : vector<6x256xf32>
    %200 = arith.addf %194, %199 : vector<6x256xf32>
    %201 = vector.extract_strided_slice %10 {offsets = [7, 0], sizes = [1, 256], strides = [1, 1]} : vector<14x256xf32> to vector<1x256xf32>
    %202 = vector.extract_strided_slice %158 {offsets = [0, 7], sizes = [6, 1], strides = [1, 1]} : vector<6x14xf32> to vector<6x1xf32>
    %203 = vector.broadcast %201 : vector<1x256xf32> to vector<6x256xf32>
    %204 = vector.broadcast %202 : vector<6x1xf32> to vector<6x256xf32>
    %205 = arith.mulf %203, %204 : vector<6x256xf32>
    %206 = arith.addf %200, %205 : vector<6x256xf32>
    %207 = vector.extract_strided_slice %10 {offsets = [8, 0], sizes = [1, 256], strides = [1, 1]} : vector<14x256xf32> to vector<1x256xf32>
    %208 = vector.extract_strided_slice %158 {offsets = [0, 8], sizes = [6, 1], strides = [1, 1]} : vector<6x14xf32> to vector<6x1xf32>
    %209 = vector.broadcast %207 : vector<1x256xf32> to vector<6x256xf32>
    %210 = vector.broadcast %208 : vector<6x1xf32> to vector<6x256xf32>
    %211 = arith.mulf %209, %210 : vector<6x256xf32>
    %212 = arith.addf %206, %211 : vector<6x256xf32>
    %213 = vector.extract_strided_slice %10 {offsets = [9, 0], sizes = [1, 256], strides = [1, 1]} : vector<14x256xf32> to vector<1x256xf32>
    %214 = vector.extract_strided_slice %158 {offsets = [0, 9], sizes = [6, 1], strides = [1, 1]} : vector<6x14xf32> to vector<6x1xf32>
    %215 = vector.broadcast %213 : vector<1x256xf32> to vector<6x256xf32>
    %216 = vector.broadcast %214 : vector<6x1xf32> to vector<6x256xf32>
    %217 = arith.mulf %215, %216 : vector<6x256xf32>
    %218 = arith.addf %212, %217 : vector<6x256xf32>
    %219 = vector.extract_strided_slice %10 {offsets = [10, 0], sizes = [1, 256], strides = [1, 1]} : vector<14x256xf32> to vector<1x256xf32>
    %220 = vector.extract_strided_slice %158 {offsets = [0, 10], sizes = [6, 1], strides = [1, 1]} : vector<6x14xf32> to vector<6x1xf32>
    %221 = vector.broadcast %219 : vector<1x256xf32> to vector<6x256xf32>
    %222 = vector.broadcast %220 : vector<6x1xf32> to vector<6x256xf32>
    %223 = arith.mulf %221, %222 : vector<6x256xf32>
    %224 = arith.addf %218, %223 : vector<6x256xf32>
    %225 = vector.extract_strided_slice %10 {offsets = [11, 0], sizes = [1, 256], strides = [1, 1]} : vector<14x256xf32> to vector<1x256xf32>
    %226 = vector.extract_strided_slice %158 {offsets = [0, 11], sizes = [6, 1], strides = [1, 1]} : vector<6x14xf32> to vector<6x1xf32>
    %227 = vector.broadcast %225 : vector<1x256xf32> to vector<6x256xf32>
    %228 = vector.broadcast %226 : vector<6x1xf32> to vector<6x256xf32>
    %229 = arith.mulf %227, %228 : vector<6x256xf32>
    %230 = arith.addf %224, %229 : vector<6x256xf32>
    %231 = vector.extract_strided_slice %10 {offsets = [12, 0], sizes = [1, 256], strides = [1, 1]} : vector<14x256xf32> to vector<1x256xf32>
    %232 = vector.extract_strided_slice %158 {offsets = [0, 12], sizes = [6, 1], strides = [1, 1]} : vector<6x14xf32> to vector<6x1xf32>
    %233 = vector.broadcast %231 : vector<1x256xf32> to vector<6x256xf32>
    %234 = vector.broadcast %232 : vector<6x1xf32> to vector<6x256xf32>
    %235 = arith.mulf %233, %234 : vector<6x256xf32>
    %236 = arith.addf %230, %235 : vector<6x256xf32>
    %237 = vector.extract_strided_slice %10 {offsets = [13, 0], sizes = [1, 256], strides = [1, 1]} : vector<14x256xf32> to vector<1x256xf32>
    %238 = vector.extract_strided_slice %158 {offsets = [0, 13], sizes = [6, 1], strides = [1, 1]} : vector<6x14xf32> to vector<6x1xf32>
    %239 = vector.broadcast %237 : vector<1x256xf32> to vector<6x256xf32>
    %240 = vector.broadcast %238 : vector<6x1xf32> to vector<6x256xf32>
    %241 = arith.mulf %239, %240 : vector<6x256xf32>
    %242 = arith.addf %236, %241 : vector<6x256xf32>
    %243 = vector.broadcast %159 : vector<6x1xf32> to vector<6x256xf32>
    %244 = arith.addf %242, %243 : vector<6x256xf32>
    %245 = arith.addf %157, %244 : vector<6x256xf32>
    %c0_14 = arith.constant 0 : index
    %c0_15 = arith.constant 0 : index
    %246 = vector.load %arg8[%c0_14, %c0_15] : memref<6x9xf32, #tpu.memory_space<vmem>>, vector<6x9xf32>
    %c0_16 = arith.constant 0 : index
    %c0_17 = arith.constant 0 : index
    %247 = vector.load %arg9[%c0_16, %c0_17] : memref<3x6xf32, #tpu.memory_space<vmem>>, vector<3x6xf32>
    %c0_18 = arith.constant 0 : index
    %c0_19 = arith.constant 0 : index
    %248 = vector.load %arg10[%c0_18, %c0_19] : memref<3x1xf32, #tpu.memory_space<vmem>>, vector<3x1xf32>
    %cst = arith.constant 0.000000e+00 : f32
    %249 = vector.broadcast %cst : f32 to vector<6x256xf32>
    %250 = arith.maximumf %245, %249 : vector<6x256xf32>
    %251 = vector.extract_strided_slice %246 {offsets = [0, 4], sizes = [6, 1], strides = [1, 1]} : vector<6x9xf32> to vector<6x1xf32>
    %252 = vector.broadcast %251 : vector<6x1xf32> to vector<6x256xf32>
    %253 = arith.mulf %250, %252 : vector<6x256xf32>
    %c17_i32_20 = arith.constant 17 : i32
    %254 = tpu.dynamic_rotate %250 by %c17_i32_20 dim 1 : vector<6x256xf32>, i32 -> vector<6x256xf32>
    %255 = vector.broadcast %1 : vector<1x256xf32> to vector<6x256xf32>
    %256 = arith.mulf %254, %255 : vector<6x256xf32>
    %257 = vector.extract_strided_slice %246 {offsets = [0, 0], sizes = [6, 1], strides = [1, 1]} : vector<6x9xf32> to vector<6x1xf32>
    %258 = vector.broadcast %257 : vector<6x1xf32> to vector<6x256xf32>
    %259 = arith.mulf %256, %258 : vector<6x256xf32>
    %260 = arith.addf %253, %259 : vector<6x256xf32>
    %c16_i32_21 = arith.constant 16 : i32
    %261 = tpu.dynamic_rotate %250 by %c16_i32_21 dim 1 : vector<6x256xf32>, i32 -> vector<6x256xf32>
    %262 = vector.broadcast %2 : vector<1x256xf32> to vector<6x256xf32>
    %263 = arith.mulf %261, %262 : vector<6x256xf32>
    %264 = vector.extract_strided_slice %246 {offsets = [0, 1], sizes = [6, 1], strides = [1, 1]} : vector<6x9xf32> to vector<6x1xf32>
    %265 = vector.broadcast %264 : vector<6x1xf32> to vector<6x256xf32>
    %266 = arith.mulf %263, %265 : vector<6x256xf32>
    %267 = arith.addf %260, %266 : vector<6x256xf32>
    %c15_i32_22 = arith.constant 15 : i32
    %268 = tpu.dynamic_rotate %250 by %c15_i32_22 dim 1 : vector<6x256xf32>, i32 -> vector<6x256xf32>
    %269 = vector.broadcast %3 : vector<1x256xf32> to vector<6x256xf32>
    %270 = arith.mulf %268, %269 : vector<6x256xf32>
    %271 = vector.extract_strided_slice %246 {offsets = [0, 2], sizes = [6, 1], strides = [1, 1]} : vector<6x9xf32> to vector<6x1xf32>
    %272 = vector.broadcast %271 : vector<6x1xf32> to vector<6x256xf32>
    %273 = arith.mulf %270, %272 : vector<6x256xf32>
    %274 = arith.addf %267, %273 : vector<6x256xf32>
    %c1_i32_23 = arith.constant 1 : i32
    %275 = tpu.dynamic_rotate %250 by %c1_i32_23 dim 1 : vector<6x256xf32>, i32 -> vector<6x256xf32>
    %276 = vector.broadcast %4 : vector<1x256xf32> to vector<6x256xf32>
    %277 = arith.mulf %275, %276 : vector<6x256xf32>
    %278 = vector.extract_strided_slice %246 {offsets = [0, 3], sizes = [6, 1], strides = [1, 1]} : vector<6x9xf32> to vector<6x1xf32>
    %279 = vector.broadcast %278 : vector<6x1xf32> to vector<6x256xf32>
    %280 = arith.mulf %277, %279 : vector<6x256xf32>
    %281 = arith.addf %274, %280 : vector<6x256xf32>
    %c255_i32_24 = arith.constant 255 : i32
    %282 = tpu.dynamic_rotate %250 by %c255_i32_24 dim 1 : vector<6x256xf32>, i32 -> vector<6x256xf32>
    %283 = vector.broadcast %5 : vector<1x256xf32> to vector<6x256xf32>
    %284 = arith.mulf %282, %283 : vector<6x256xf32>
    %285 = vector.extract_strided_slice %246 {offsets = [0, 5], sizes = [6, 1], strides = [1, 1]} : vector<6x9xf32> to vector<6x1xf32>
    %286 = vector.broadcast %285 : vector<6x1xf32> to vector<6x256xf32>
    %287 = arith.mulf %284, %286 : vector<6x256xf32>
    %288 = arith.addf %281, %287 : vector<6x256xf32>
    %c241_i32_25 = arith.constant 241 : i32
    %289 = tpu.dynamic_rotate %250 by %c241_i32_25 dim 1 : vector<6x256xf32>, i32 -> vector<6x256xf32>
    %290 = vector.broadcast %6 : vector<1x256xf32> to vector<6x256xf32>
    %291 = arith.mulf %289, %290 : vector<6x256xf32>
    %292 = vector.extract_strided_slice %246 {offsets = [0, 6], sizes = [6, 1], strides = [1, 1]} : vector<6x9xf32> to vector<6x1xf32>
    %293 = vector.broadcast %292 : vector<6x1xf32> to vector<6x256xf32>
    %294 = arith.mulf %291, %293 : vector<6x256xf32>
    %295 = arith.addf %288, %294 : vector<6x256xf32>
    %c240_i32_26 = arith.constant 240 : i32
    %296 = tpu.dynamic_rotate %250 by %c240_i32_26 dim 1 : vector<6x256xf32>, i32 -> vector<6x256xf32>
    %297 = vector.broadcast %7 : vector<1x256xf32> to vector<6x256xf32>
    %298 = arith.mulf %296, %297 : vector<6x256xf32>
    %299 = vector.extract_strided_slice %246 {offsets = [0, 7], sizes = [6, 1], strides = [1, 1]} : vector<6x9xf32> to vector<6x1xf32>
    %300 = vector.broadcast %299 : vector<6x1xf32> to vector<6x256xf32>
    %301 = arith.mulf %298, %300 : vector<6x256xf32>
    %302 = arith.addf %295, %301 : vector<6x256xf32>
    %c239_i32_27 = arith.constant 239 : i32
    %303 = tpu.dynamic_rotate %250 by %c239_i32_27 dim 1 : vector<6x256xf32>, i32 -> vector<6x256xf32>
    %304 = vector.broadcast %8 : vector<1x256xf32> to vector<6x256xf32>
    %305 = arith.mulf %303, %304 : vector<6x256xf32>
    %306 = vector.extract_strided_slice %246 {offsets = [0, 8], sizes = [6, 1], strides = [1, 1]} : vector<6x9xf32> to vector<6x1xf32>
    %307 = vector.broadcast %306 : vector<6x1xf32> to vector<6x256xf32>
    %308 = arith.mulf %305, %307 : vector<6x256xf32>
    %309 = arith.addf %302, %308 : vector<6x256xf32>
    %310 = vector.extract_strided_slice %309 {offsets = [0, 0], sizes = [1, 256], strides = [1, 1]} : vector<6x256xf32> to vector<1x256xf32>
    %311 = vector.extract_strided_slice %247 {offsets = [0, 0], sizes = [3, 1], strides = [1, 1]} : vector<3x6xf32> to vector<3x1xf32>
    %312 = vector.broadcast %310 : vector<1x256xf32> to vector<3x256xf32>
    %313 = vector.broadcast %311 : vector<3x1xf32> to vector<3x256xf32>
    %314 = arith.mulf %312, %313 : vector<3x256xf32>
    %315 = vector.extract_strided_slice %309 {offsets = [1, 0], sizes = [1, 256], strides = [1, 1]} : vector<6x256xf32> to vector<1x256xf32>
    %316 = vector.extract_strided_slice %247 {offsets = [0, 1], sizes = [3, 1], strides = [1, 1]} : vector<3x6xf32> to vector<3x1xf32>
    %317 = vector.broadcast %315 : vector<1x256xf32> to vector<3x256xf32>
    %318 = vector.broadcast %316 : vector<3x1xf32> to vector<3x256xf32>
    %319 = arith.mulf %317, %318 : vector<3x256xf32>
    %320 = arith.addf %314, %319 : vector<3x256xf32>
    %321 = vector.extract_strided_slice %309 {offsets = [2, 0], sizes = [1, 256], strides = [1, 1]} : vector<6x256xf32> to vector<1x256xf32>
    %322 = vector.extract_strided_slice %247 {offsets = [0, 2], sizes = [3, 1], strides = [1, 1]} : vector<3x6xf32> to vector<3x1xf32>
    %323 = vector.broadcast %321 : vector<1x256xf32> to vector<3x256xf32>
    %324 = vector.broadcast %322 : vector<3x1xf32> to vector<3x256xf32>
    %325 = arith.mulf %323, %324 : vector<3x256xf32>
    %326 = arith.addf %320, %325 : vector<3x256xf32>
    %327 = vector.extract_strided_slice %309 {offsets = [3, 0], sizes = [1, 256], strides = [1, 1]} : vector<6x256xf32> to vector<1x256xf32>
    %328 = vector.extract_strided_slice %247 {offsets = [0, 3], sizes = [3, 1], strides = [1, 1]} : vector<3x6xf32> to vector<3x1xf32>
    %329 = vector.broadcast %327 : vector<1x256xf32> to vector<3x256xf32>
    %330 = vector.broadcast %328 : vector<3x1xf32> to vector<3x256xf32>
    %331 = arith.mulf %329, %330 : vector<3x256xf32>
    %332 = arith.addf %326, %331 : vector<3x256xf32>
    %333 = vector.extract_strided_slice %309 {offsets = [4, 0], sizes = [1, 256], strides = [1, 1]} : vector<6x256xf32> to vector<1x256xf32>
    %334 = vector.extract_strided_slice %247 {offsets = [0, 4], sizes = [3, 1], strides = [1, 1]} : vector<3x6xf32> to vector<3x1xf32>
    %335 = vector.broadcast %333 : vector<1x256xf32> to vector<3x256xf32>
    %336 = vector.broadcast %334 : vector<3x1xf32> to vector<3x256xf32>
    %337 = arith.mulf %335, %336 : vector<3x256xf32>
    %338 = arith.addf %332, %337 : vector<3x256xf32>
    %339 = vector.extract_strided_slice %309 {offsets = [5, 0], sizes = [1, 256], strides = [1, 1]} : vector<6x256xf32> to vector<1x256xf32>
    %340 = vector.extract_strided_slice %247 {offsets = [0, 5], sizes = [3, 1], strides = [1, 1]} : vector<3x6xf32> to vector<3x1xf32>
    %341 = vector.broadcast %339 : vector<1x256xf32> to vector<3x256xf32>
    %342 = vector.broadcast %340 : vector<3x1xf32> to vector<3x256xf32>
    %343 = arith.mulf %341, %342 : vector<3x256xf32>
    %344 = arith.addf %338, %343 : vector<3x256xf32>
    %345 = vector.broadcast %248 : vector<3x1xf32> to vector<3x256xf32>
    %346 = arith.addf %344, %345 : vector<3x256xf32>
    %c0_28 = arith.constant 0 : index
    %c0_29 = arith.constant 0 : index
    %347 = vector.load %arg11[%c0_28, %c0_29] : memref<3x6xf32, #tpu.memory_space<vmem>>, vector<3x6xf32>
    %c0_30 = arith.constant 0 : index
    %c0_31 = arith.constant 0 : index
    %348 = vector.load %arg12[%c0_30, %c0_31] : memref<3x1xf32, #tpu.memory_space<vmem>>, vector<3x1xf32>
    %349 = vector.extract_strided_slice %245 {offsets = [0, 0], sizes = [1, 256], strides = [1, 1]} : vector<6x256xf32> to vector<1x256xf32>
    %350 = vector.extract_strided_slice %347 {offsets = [0, 0], sizes = [3, 1], strides = [1, 1]} : vector<3x6xf32> to vector<3x1xf32>
    %351 = vector.broadcast %349 : vector<1x256xf32> to vector<3x256xf32>
    %352 = vector.broadcast %350 : vector<3x1xf32> to vector<3x256xf32>
    %353 = arith.mulf %351, %352 : vector<3x256xf32>
    %354 = vector.extract_strided_slice %245 {offsets = [1, 0], sizes = [1, 256], strides = [1, 1]} : vector<6x256xf32> to vector<1x256xf32>
    %355 = vector.extract_strided_slice %347 {offsets = [0, 1], sizes = [3, 1], strides = [1, 1]} : vector<3x6xf32> to vector<3x1xf32>
    %356 = vector.broadcast %354 : vector<1x256xf32> to vector<3x256xf32>
    %357 = vector.broadcast %355 : vector<3x1xf32> to vector<3x256xf32>
    %358 = arith.mulf %356, %357 : vector<3x256xf32>
    %359 = arith.addf %353, %358 : vector<3x256xf32>
    %360 = vector.extract_strided_slice %245 {offsets = [2, 0], sizes = [1, 256], strides = [1, 1]} : vector<6x256xf32> to vector<1x256xf32>
    %361 = vector.extract_strided_slice %347 {offsets = [0, 2], sizes = [3, 1], strides = [1, 1]} : vector<3x6xf32> to vector<3x1xf32>
    %362 = vector.broadcast %360 : vector<1x256xf32> to vector<3x256xf32>
    %363 = vector.broadcast %361 : vector<3x1xf32> to vector<3x256xf32>
    %364 = arith.mulf %362, %363 : vector<3x256xf32>
    %365 = arith.addf %359, %364 : vector<3x256xf32>
    %366 = vector.extract_strided_slice %245 {offsets = [3, 0], sizes = [1, 256], strides = [1, 1]} : vector<6x256xf32> to vector<1x256xf32>
    %367 = vector.extract_strided_slice %347 {offsets = [0, 3], sizes = [3, 1], strides = [1, 1]} : vector<3x6xf32> to vector<3x1xf32>
    %368 = vector.broadcast %366 : vector<1x256xf32> to vector<3x256xf32>
    %369 = vector.broadcast %367 : vector<3x1xf32> to vector<3x256xf32>
    %370 = arith.mulf %368, %369 : vector<3x256xf32>
    %371 = arith.addf %365, %370 : vector<3x256xf32>
    %372 = vector.extract_strided_slice %245 {offsets = [4, 0], sizes = [1, 256], strides = [1, 1]} : vector<6x256xf32> to vector<1x256xf32>
    %373 = vector.extract_strided_slice %347 {offsets = [0, 4], sizes = [3, 1], strides = [1, 1]} : vector<3x6xf32> to vector<3x1xf32>
    %374 = vector.broadcast %372 : vector<1x256xf32> to vector<3x256xf32>
    %375 = vector.broadcast %373 : vector<3x1xf32> to vector<3x256xf32>
    %376 = arith.mulf %374, %375 : vector<3x256xf32>
    %377 = arith.addf %371, %376 : vector<3x256xf32>
    %378 = vector.extract_strided_slice %245 {offsets = [5, 0], sizes = [1, 256], strides = [1, 1]} : vector<6x256xf32> to vector<1x256xf32>
    %379 = vector.extract_strided_slice %347 {offsets = [0, 5], sizes = [3, 1], strides = [1, 1]} : vector<3x6xf32> to vector<3x1xf32>
    %380 = vector.broadcast %378 : vector<1x256xf32> to vector<3x256xf32>
    %381 = vector.broadcast %379 : vector<3x1xf32> to vector<3x256xf32>
    %382 = arith.mulf %380, %381 : vector<3x256xf32>
    %383 = arith.addf %377, %382 : vector<3x256xf32>
    %384 = vector.broadcast %348 : vector<3x1xf32> to vector<3x256xf32>
    %385 = arith.addf %383, %384 : vector<3x256xf32>
    %386 = arith.addf %346, %385 : vector<3x256xf32>
    %c0_32 = arith.constant 0 : index
    %c0_33 = arith.constant 0 : index
    %c0_34 = arith.constant 0 : index
    %387 = vector.load %arg13[%c0_32, %c0_33, %c0_34] : memref<1x3x256xf32, #tpu.memory_space<vmem>>, vector<1x3x256xf32>
    %388 = vector.shape_cast %387 : vector<1x3x256xf32> to vector<3x256xf32>
    %389 = vector.shape_cast %386 : vector<3x256xf32> to vector<1x3x256xf32>
    tpu.vector_store %arg13[%c0_32, %c0_33, %c0_34], %389 {strides = array<i32>} : memref<1x3x256xf32, #tpu.memory_space<vmem>>, vector<1x3x256xf32>,
    return
  }
  func.func @transform_0(%arg0: i32) -> (i32, i32, i32) {
    %c0_i32 = arith.constant 0 : i32
    %c0_i32_0 = arith.constant 0 : i32
    %c0_i32_1 = arith.constant 0 : i32
    return %arg0, %c0_i32, %c0_i32_0 : i32, i32, i32
  }
  func.func @transform_1(%arg0: i32) -> (i32, i32) {
    %c0_i32 = arith.constant 0 : i32
    %c0_i32_0 = arith.constant 0 : i32
    %c0_i32_1 = arith.constant 0 : i32
    return %c0_i32, %c0_i32_0 : i32, i32
  }
  func.func @transform_2(%arg0: i32) -> (i32, i32) {
    %c0_i32 = arith.constant 0 : i32
    %c0_i32_0 = arith.constant 0 : i32
    %c0_i32_1 = arith.constant 0 : i32
    return %c0_i32, %c0_i32_0 : i32, i32
  }
  func.func @transform_3(%arg0: i32) -> (i32, i32) {
    %c0_i32 = arith.constant 0 : i32
    %c0_i32_0 = arith.constant 0 : i32
    %c0_i32_1 = arith.constant 0 : i32
    return %c0_i32, %c0_i32_0 : i32, i32
  }
  func.func @transform_4(%arg0: i32) -> (i32, i32) {
    %c0_i32 = arith.constant 0 : i32
    %c0_i32_0 = arith.constant 0 : i32
    %c0_i32_1 = arith.constant 0 : i32
    return %c0_i32, %c0_i32_0 : i32, i32
  }
  func.func @transform_5(%arg0: i32) -> (i32, i32) {
    %c0_i32 = arith.constant 0 : i32
    %c0_i32_0 = arith.constant 0 : i32
    %c0_i32_1 = arith.constant 0 : i32
    return %c0_i32, %c0_i32_0 : i32, i32
  }
  func.func @transform_6(%arg0: i32) -> (i32, i32) {
    %c0_i32 = arith.constant 0 : i32
    %c0_i32_0 = arith.constant 0 : i32
    %c0_i32_1 = arith.constant 0 : i32
    return %c0_i32, %c0_i32_0 : i32, i32
  }
  func.func @transform_7(%arg0: i32) -> (i32, i32) {
    %c0_i32 = arith.constant 0 : i32
    %c0_i32_0 = arith.constant 0 : i32
    %c0_i32_1 = arith.constant 0 : i32
    return %c0_i32, %c0_i32_0 : i32, i32
  }
  func.func @transform_8(%arg0: i32) -> (i32, i32) {
    %c0_i32 = arith.constant 0 : i32
    %c0_i32_0 = arith.constant 0 : i32
    %c0_i32_1 = arith.constant 0 : i32
    return %c0_i32, %c0_i32_0 : i32, i32
  }
  func.func @transform_9(%arg0: i32) -> (i32, i32) {
    %c0_i32 = arith.constant 0 : i32
    %c0_i32_0 = arith.constant 0 : i32
    %c0_i32_1 = arith.constant 0 : i32
    return %c0_i32, %c0_i32_0 : i32, i32
  }
  func.func @transform_10(%arg0: i32) -> (i32, i32) {
    %c0_i32 = arith.constant 0 : i32
    %c0_i32_0 = arith.constant 0 : i32
    %c0_i32_1 = arith.constant 0 : i32
    return %c0_i32, %c0_i32_0 : i32, i32
  }
  func.func @transform_11(%arg0: i32) -> (i32, i32) {
    %c0_i32 = arith.constant 0 : i32
    %c0_i32_0 = arith.constant 0 : i32
    %c0_i32_1 = arith.constant 0 : i32
    return %c0_i32, %c0_i32_0 : i32, i32
  }
  func.func @transform_12(%arg0: i32) -> (i32, i32, i32) {
    %c0_i32 = arith.constant 0 : i32
    %c0_i32_0 = arith.constant 0 : i32
    %c0_i32_1 = arith.constant 0 : i32
    return %arg0, %c0_i32, %c0_i32_0 : i32, i32, i32
  }
}

</mosaic_0001>

<bundles_post_ra>
// kernel: tile.14
= control target key start
LH: loop header
LB: loop body
LE: loop exit
PB: predicated region body
PF: predicated region fallthrough
CT: control target
= control target key end

     0   :  { %vm4_vm0 = vcmask 1047556   ;;  %s269_s14 = smov 48   ;;  %s270_s15 = smov 56   ;;  %vm6_vm1 = vcmask 64512   ;;  %vm29_vm2 = vcmask 523712   ;;  %vm54_vm3 = vcmask 458112   ;;  %s396_s0 = inlined_call_operand.vmem [shape: f32[2,3,2,8,1,8], index: 0, kind: input, shape index: {}]   ;;  %s397_s1 = inlined_call_operand.vmem [shape: f32[2,6,64], index: 1, kind: output, shape index: {}]  }
   0x1   :  { %v239_v0 = vld [vmem:[%s396_s0 + $0x6] ss:$8 sm:$0xf]   ;;  %v236_v2 = vld [vmem:[%s396_s0 + $0x7] ss:$8 sm:$0xf]  }
   0x2   :  { %v240_v1 = vld [vmem:[%s396_s0 + $0x6] ss:$8 sm:$0xf0]   ;;  %v237_v4 = vld [vmem:[%s396_s0 + $0x7] ss:$8 sm:$0xf0]  }
   0x3   :  { %v51_v3 = vsel %vm4_vm0, %v240_v1, %v239_v0  ;;  %v26_v5 = vsel %vm4_vm0, %v237_v4, %v236_v2  ;;  %v241_v6 = vld [vmem:[%s396_s0 + $0x46] ss:$8 sm:$0xf]   ;;  %v238_v7 = vld [vmem:[%s396_s0 + $0x47] ss:$8 sm:$0xf]  }
   0x4   :  { %52 = vrot.lane.b32.xlu1 %v51_v3, %s269_s14  ;;  %27 = vrot.lane.b32.xlu0 %v26_v5, %s270_s15  ;;  %v242_v8 = vld [vmem:[%s396_s0 + $0x5] ss:$8 sm:$0xf]   ;;  %v245_v12 = vld [vmem:[%s396_s0 + $0x4] ss:$8 sm:$0xf]  }
   0x5   :  { %v243_v9 = vld [vmem:[%s396_s0 + $0x5] ss:$8 sm:$0xf0]   ;;  %v246_v13 = vld [vmem:[%s396_s0 + $0x4] ss:$8 sm:$0xf0]  }
   0x6   :  { %v244_v10 = vld [vmem:[%s396_s0 + $0x45] ss:$8 sm:$0xf]   ;;  %v76_v11 = vsel %vm4_vm0, %v243_v9, %v242_v8  ;;  %s271_s30 = smov 40   ;;  %v101_v16 = vsel %vm4_vm0, %v246_v13, %v245_v12  ;;  %s273_s21 = smov 24   ;;  %vm79_vm4 = vcmask 392512  }
   0x7   :  { %v247_v14 = vld [vmem:[%s396_s0 + $0x44] ss:$8 sm:$0xf]   ;;  %v2_v15 = vld [vmem:[%s396_s0] ss:$8 sm:$0xf]  }
   0x8   :  { %64 = vrot.lane.b32.xlu1 %v241_v6, %s269_s14  ;;  %39 = vrot.lane.b32.xlu0 %v238_v7, %s270_s15  ;;  %v3_v17 = vld [vmem:[%s396_s0] ss:$8 sm:$0xf0]   ;;  %v248_v19 = vld [vmem:[%s396_s0 + $0x3] ss:$8 sm:$0xf]  }
   0x9   :  { %v235_v18 = vld [vmem:[%s396_s0 + $0x40] ss:$8 sm:$0xf]   ;;  %v249_v20 = vld [vmem:[%s396_s0 + $0x3] ss:$8 sm:$0xf0]   ;;  %v5_v21 = vsel %vm4_vm0, %v3_v17, %v2_v15 }
   0xa   :  { %18 = vst.msk [vmem:[#allocation0 + $0x20] sm:$0x3] %vm6_vm1, %v235_v18   ;;  %20 = vst.msk [vmem:[#allocation0 + $0x26] sm:$0xc] %vm6_vm1, %v235_v18   ;;  %s272_s14 = smov 32   ;;  %v126_v23 = vsel %vm4_vm0, %v249_v20, %v248_v19  ;;  %s274_s28 = smov 16  }
   0xb   :  { %7 = vst.msk [vmem:[#allocation0] sm:$0x3] %vm6_vm1, %v5_v21   ;;  %9 = vst.msk [vmem:[#allocation0 + $0x6] sm:$0xc] %vm6_vm1, %v5_v21   ;;  %vm104_vm5 = vcmask 326912   ;;  %vm129_vm6 = vcmask 261312  }
   0xc   :  { %89 = vrot.lane.b32.xlu1 %v244_v10, %s271_s30  ;;  %77 = vrot.lane.b32.xlu0 %v76_v11, %s271_s30  ;;  %11 = vst.msk [vmem:[#allocation0 + $0xc] sm:$0x30] %vm6_vm1, %v5_v21   ;;  %13 = vst.msk [vmem:[#allocation0 + $0x12] sm:$0xc0] %vm6_vm1, %v5_v21   ;;  %vm154_vm7 = vcmask 195712   ;;  %vm179_vm8 = vcmask 130112  }
   0xd   :  { %v250_v22 = vld [vmem:[%s396_s0 + $0x43] ss:$8 sm:$0xf]   ;;  %v251_v24 = vld [vmem:[%s396_s0 + $0x2] ss:$8 sm:$0xf]  }
   0xe   :  { %v252_v25 = vld [vmem:[%s396_s0 + $0x2] ss:$8 sm:$0xf0]   ;;  %v254_v28 = vld [vmem:[%s396_s0 + $0x1] ss:$8 sm:$0xf]  }
   0xf   :  { %v253_v26 = vld [vmem:[%s396_s0 + $0x42] ss:$8 sm:$0xf]   ;;  %v151_v27 = vsel %vm4_vm0, %v252_v25, %v251_v24  ;;  %v255_v29 = vld [vmem:[%s396_s0 + $0x1] ss:$8 sm:$0xf0]  }
  0x10   :  { %114 = vrot.lane.b32.xlu1 %v247_v14, %s272_s14  ;;  %102 = vrot.lane.b32.xlu0 %v101_v16, %s272_s14  ;;  %v256_v30 = vld [vmem:[%s396_s0 + $0x41] ss:$8 sm:$0xf]   ;;  %v176_v31 = vsel %vm4_vm0, %v255_v29, %v254_v28  ;;  %s275_s0 = smov 8  }
  0x14   :  { %139 = vrot.lane.b32.xlu1 %v250_v22, %s273_s21  ;;  %127 = vrot.lane.b32.xlu0 %v126_v23, %s273_s21 }
  0x18   :  { %164 = vrot.lane.b32.xlu1 %v253_v26, %s274_s28  ;;  %152 = vrot.lane.b32.xlu0 %v151_v27, %s274_s28 }
  0x1c   :  { %189 = vrot.lane.b32.xlu1 %v256_v30, %s275_s0  ;;  %177 = vrot.lane.b32.xlu0 %v176_v31, %s275_s0 }
  0x76   :  { %v53_v32 = vpop.permute.xlu1 %52   ;;  %v28_v33 = vpop.permute.xlu0 %27  }
  0x77   :  { %30 = vst.msk [vmem:[#allocation0] sm:$0x3] %vm29_vm2, %v28_v33   ;;  %32 = vst.msk [vmem:[#allocation0 + $0x6] sm:$0xc] %vm29_vm2, %v28_v33  }
  0x78   :  { %34 = vst.msk [vmem:[#allocation0 + $0xc] sm:$0x30] %vm29_vm2, %v28_v33   ;;  %36 = vst.msk [vmem:[#allocation0 + $0x12] sm:$0xc0] %vm29_vm2, %v28_v33  }
  0x79   :  { %55 = vst.msk [vmem:[#allocation0] sm:$0x3] %vm54_vm3, %v53_v32   ;;  %57 = vst.msk [vmem:[#allocation0 + $0x6] sm:$0xc] %vm54_vm3, %v53_v32  }
  0x7a   :  { %59 = vst.msk [vmem:[#allocation0 + $0xc] sm:$0x30] %vm54_vm3, %v53_v32   ;;  %61 = vst.msk [vmem:[#allocation0 + $0x12] sm:$0xc0] %vm54_vm3, %v53_v32   ;;  %v65_v34 = vpop.permute.xlu1 %64   ;;  %v40_v35 = vpop.permute.xlu0 %39  }
  0x7b   :  { %43 = vst.msk [vmem:[#allocation0 + $0x20] sm:$0x3] %vm29_vm2, %v40_v35   ;;  %45 = vst.msk [vmem:[#allocation0 + $0x26] sm:$0xc] %vm29_vm2, %v40_v35  }
  0x7c   :  { %68 = vst.msk [vmem:[#allocation0 + $0x20] sm:$0x3] %vm54_vm3, %v65_v34   ;;  %70 = vst.msk [vmem:[#allocation0 + $0x26] sm:$0xc] %vm54_vm3, %v65_v34  }
  0x7e   :  { %v90_v36 = vpop.permute.xlu1 %89   ;;  %v78_v37 = vpop.permute.xlu0 %77  }
  0x7f   :  { %93 = vst.msk [vmem:[#allocation0 + $0x20] sm:$0x3] %vm79_vm4, %v90_v36   ;;  %95 = vst.msk [vmem:[#allocation0 + $0x26] sm:$0xc] %vm79_vm4, %v90_v36  }
  0x80   :  { %80 = vst.msk [vmem:[#allocation0] sm:$0x3] %vm79_vm4, %v78_v37   ;;  %82 = vst.msk [vmem:[#allocation0 + $0x6] sm:$0xc] %vm79_vm4, %v78_v37  }
  0x81   :  { %84 = vst.msk [vmem:[#allocation0 + $0xc] sm:$0x30] %vm79_vm4, %v78_v37   ;;  %86 = vst.msk [vmem:[#allocation0 + $0x12] sm:$0xc0] %vm79_vm4, %v78_v37  }
  0x82   :  { %v115_v38 = vpop.permute.xlu1 %114   ;;  %v103_v39 = vpop.permute.xlu0 %102  }
  0x83   :  { %118 = vst.msk [vmem:[#allocation0 + $0x20] sm:$0x3] %vm104_vm5, %v115_v38   ;;  %120 = vst.msk [vmem:[#allocation0 + $0x26] sm:$0xc] %vm104_vm5, %v115_v38  }
  0x84   :  { %105 = vst.msk [vmem:[#allocation0] sm:$0x3] %vm104_vm5, %v103_v39   ;;  %107 = vst.msk [vmem:[#allocation0 + $0x6] sm:$0xc] %vm104_vm5, %v103_v39  }
  0x85   :  { %109 = vst.msk [vmem:[#allocation0 + $0xc] sm:$0x30] %vm104_vm5, %v103_v39   ;;  %111 = vst.msk [vmem:[#allocation0 + $0x12] sm:$0xc0] %vm104_vm5, %v103_v39  }
  0x86   :  { %v140_v40 = vpop.permute.xlu1 %139   ;;  %v128_v41 = vpop.permute.xlu0 %127  }
  0x87   :  { %143 = vst.msk [vmem:[#allocation0 + $0x20] sm:$0x3] %vm129_vm6, %v140_v40   ;;  %145 = vst.msk [vmem:[#allocation0 + $0x26] sm:$0xc] %vm129_vm6, %v140_v40  }
  0x88   :  { %130 = vst.msk [vmem:[#allocation0] sm:$0x3] %vm129_vm6, %v128_v41   ;;  %132 = vst.msk [vmem:[#allocation0 + $0x6] sm:$0xc] %vm129_vm6, %v128_v41  }
  0x89   :  { %134 = vst.msk [vmem:[#allocation0 + $0xc] sm:$0x30] %vm129_vm6, %v128_v41   ;;  %136 = vst.msk [vmem:[#allocation0 + $0x12] sm:$0xc0] %vm129_vm6, %v128_v41  }
  0x8a   :  { %v165_v42 = vpop.permute.xlu1 %164   ;;  %v153_v43 = vpop.permute.xlu0 %152  }
  0x8b   :  { %168 = vst.msk [vmem:[#allocation0 + $0x20] sm:$0x3] %vm154_vm7, %v165_v42   ;;  %170 = vst.msk [vmem:[#allocation0 + $0x26] sm:$0xc] %vm154_vm7, %v165_v42  }
  0x8c   :  { %155 = vst.msk [vmem:[#allocation0] sm:$0x3] %vm154_vm7, %v153_v43   ;;  %157 = vst.msk [vmem:[#allocation0 + $0x6] sm:$0xc] %vm154_vm7, %v153_v43  }
  0x8d   :  { %159 = vst.msk [vmem:[#allocation0 + $0xc] sm:$0x30] %vm154_vm7, %v153_v43   ;;  %161 = vst.msk [vmem:[#allocation0 + $0x12] sm:$0xc0] %vm154_vm7, %v153_v43  }
  0x8e   :  { %v190_v44 = vpop.permute.xlu1 %189   ;;  %v178_v45 = vpop.permute.xlu0 %177  }
  0x8f   :  { %193 = vst.msk [vmem:[#allocation0 + $0x20] sm:$0x3] %vm179_vm8, %v190_v44   ;;  %195 = vst.msk [vmem:[#allocation0 + $0x26] sm:$0xc] %vm179_vm8, %v190_v44  }
  0x90   :  { %180 = vst.msk [vmem:[#allocation0] sm:$0x3] %vm179_vm8, %v178_v45   ;;  %182 = vst.msk [vmem:[#allocation0 + $0x6] sm:$0xc] %vm179_vm8, %v178_v45  }
  0x91   :  { %184 = vst.msk [vmem:[#allocation0 + $0xc] sm:$0x30] %vm179_vm8, %v178_v45   ;;  %186 = vst.msk [vmem:[#allocation0 + $0x12] sm:$0xc0] %vm179_vm8, %v178_v45  }
  0x96   :  { %v220_v46 = vld [vmem:[#allocation0 + $0x20] sm:$0x3]  ;;  %v226_v47 = vld [vmem:[#allocation0 + $0x28] sm:$0x3] }
  0x97   :  { %260 = vst [vmem:[%s397_s1 + $0x8] sm:$0x3] %v220_v46  ;;  %261 = vst [vmem:[%s397_s1 + $0xa] sm:$0x3] %v226_v47  ;;  %v199_v48 = vld [vmem:[#allocation0] sm:$0x3] }
  0x98   :  { %v203_v49 = vld [vmem:[#allocation0 + $0x8] sm:$0x3]  ;;  %v208_v50 = vld [vmem:[#allocation0 + $0x10] sm:$0x3]  ;;  %201 = vst [vmem:[%s397_s1] sm:$0x3] %v199_v48 }
  0x99   :  { %257 = vst [vmem:[%s397_s1 + $0x2] sm:$0x3] %v203_v49  ;;  %258 = vst [vmem:[%s397_s1 + $0x4] sm:$0x3] %v208_v50  ;;  %v214_v51 = vld [vmem:[#allocation0 + $0x18] sm:$0x3] }
  0x9a   :  { %259 = vst [vmem:[%s397_s1 + $0x6] sm:$0x3] %v214_v51 }

// kernel: _lambda_.3
= control target key start
LH: loop header
LB: loop body
LE: loop exit
PB: predicated region body
PF: predicated region fallthrough
CT: control target
= control target key end

     0   :  { %s1592_s24 = smov 0   ;;  %s1936_s0 = inlined_call_operand.vmem [shape: f32[2,6,128], index: 0, kind: input, shape index: {}]   ;;  %s1937_s1 = inlined_call_operand.vmem [shape: f32[8,128], index: 1, kind: input, shape index: {}]   ;;  %s1938_s2 = inlined_call_operand.vmem [shape: f32[6,9], index: 2, kind: input, shape index: {}]   ;;  %s1939_s3 = inlined_call_operand.vmem [shape: f32[6,6], index: 3, kind: input, shape index: {}]   ;;  %s1940_s4 = inlined_call_operand.vmem [shape: f32[6,1], index: 4, kind: input, shape index: {}, may-alias: {4,7,10,13,16}]   ;;  %s1941_s5 = inlined_call_operand.vmem [shape: f32[6,9], index: 5, kind: input, shape index: {}]   ;;  %s1942_s6 = inlined_call_operand.vmem [shape: f32[6,6], index: 6, kind: input, shape index: {}]   ;;  %s1943_s7 = inlined_call_operand.vmem [shape: f32[6,1], index: 7, kind: input, shape index: {}, may-alias: {4,7,10,13,16}]   ;;  %s1944_s8 = inlined_call_operand.vmem [shape: f32[6,9], index: 8, kind: input, shape index: {}]   ;;  %s1945_s9 = inlined_call_operand.vmem [shape: f32[6,6], index: 9, kind: input, shape index: {}]   ;;  %s1946_s10 = inlined_call_operand.vmem [shape: f32[6,1], index: 10, kind: input, shape index: {}, may-alias: {4,7,10,13,16}]   ;;  %s1947_s11 = inlined_call_operand.vmem [shape: f32[6,9], index: 11, kind: input, shape index: {}]   ;;  %s1948_s12 = inlined_call_operand.vmem [shape: f32[6,6], index: 12, kind: input, shape index: {}]   ;;  %s1949_s13 = inlined_call_operand.vmem [shape: f32[6,1], index: 13, kind: input, shape index: {}, may-alias: {4,7,10,13,16}]   ;;  %s1950_s14 = inlined_call_operand.vmem [shape: f32[6,9], index: 14, kind: input, shape index: {}]   ;;  %s1951_s15 = inlined_call_operand.vmem [shape: f32[6,6], index: 15, kind: input, shape index: {}]   ;;  %s1952_s16 = inlined_call_operand.vmem [shape: f32[6,1], index: 16, kind: input, shape index: {}, may-alias: {4,7,10,13,16}]   ;;  %s1953_s17 = inlined_call_operand.vmem [shape: f32[2,6,128], index: 17, kind: output, shape index: {}]  }
   0x1   :  { %1955 = sst [smem:[#allocation2_spill]] %s1936_s0 }
   0x2   :  { %1956 = sst [smem:[#allocation3_spill]] %s1937_s1 }
   0x3 LB: > { %s1373_s25 = sadd.s32 4294967295, %s1483_s24   ;;  %p1377_p0 = scmp.ge.s32.totalorder %s1483_s24, 1  ;;  %s1483_s24 = sphi %s1592_s24, %s27_s24  }
   0x4   : > { %p486_p1 = scmp.lt.s32.totalorder %s1483_s24, 3 }
   0x6   : > { %p487_p2 = pnand %p1377_p0, %p486_p1 }
   0x7   : > { %v546_v0 = vld [vmem:[%s1938_s2] sm:$0x3f] (!%p487_p2)  ;;  %v1485_v1 = vmov (!%p487_p2), 1   ;;  %v1486_v2 = vmov (!%p487_p2), 4   ;;  %p536_p3 = scmp.lt.s32.totalorder (!%p487_p2), %s1373_s25, 1  ;;  %v1487_v3 = vmov (!%p487_p2), 2   ;;  %v558_v17 = vlaneseq (!%p487_p2) }
   0x8   : > { %490 = sbr.rel (%p487_p2) target bundleno = 889 (0x379), region = 88  ;;  %1409 = vset.pattern.permute.xlu1 (!%p487_p2), %v1485_v1  ;;  %1407 = vset.pattern.permute.xlu0 (!%p487_p2), %v1486_v2  ;;  %v1488_v4 = vmov (!%p487_p2), 0   ;;  %s1957_s30 = sld [smem:[#allocation2_spill]] (!%p487_p2)  ;;  %v1489_v7 = vmov (!%p487_p2), 3   ;;  %v1491_v8 = vmov (!%p487_p2), 5   ;;  %v1495_v9 = vmov (!%p487_p2), 6  }
   0x9   : > { %577 = vperm.xlu1 (!%p487_p2), %1409, %v546_v0   ;;  %552 = vperm.xlu0 (!%p487_p2), %1407, %v546_v0   ;;  %s1490_s19 = smov (!%p487_p2), 9   ;;  %s1492_s1 = smov (!%p487_p2), 8   ;;  %v1497_v10 = vmov (!%p487_p2), 7   ;;  %v1500_v11 = vmov (!%p487_p2), 8   ;;  %v547_v12 = vld [vmem:[%s1939_s3] sm:$0x3f] (!%p487_p2) }
   0xa   : > { %s1493_s20 = smov (!%p487_p2), 7   ;;  %s1494_s21 = smov (!%p487_p2), 1   ;;  %v1650_v13 = vld [vmem:[%s1941_s5] sm:$0x3f] (!%p487_p2)  ;;  %v559_v20 = vshrl.u32 (!%p487_p2), %v558_v17, 7 }
   0xb   : > { %s1496_s22 = smov (!%p487_p2), 127   ;;  %s1498_s23 = smov (!%p487_p2), 121   ;;  %v548_v14 = vld [vmem:[%s1940_s4] sm:$0x3f] (!%p487_p2) }
   0xc   : > { %s1499_s26 = smov (!%p487_p2), 119   ;;  %s1501_s0 = smov (!%p487_p2), 120   ;;  %v1674_v21 = vsub.s32 (!%p487_p2), 0, %v559_v20  ;;  %v1679_v25 = vsub.s32 (!%p487_p2), 1, %v559_v20  ;;  %v1687_v30 = vsub.s32 (!%p487_p2), 2, %v559_v20  ;;  %v1694_v36 = vsub.s32 (!%p487_p2), 3, %v559_v20 }
   0xd   : > { %1410 = vset.pattern.permute.xlu1 (!%p487_p2), %v1487_v3  ;;  %1408 = vset.pattern.permute.xlu0 (!%p487_p2), %v1488_v4  ;;  %v1697_v39 = vsub.s32 (!%p487_p2), 4, %v559_v20  ;;  %v1703_v45 = vsub.s32 (!%p487_p2), 5, %v559_v20  ;;  %v651_v55 = vsub.s32 (!%p487_p2), 7, %v559_v20  ;;  %v638_v56 = vsub.s32 (!%p487_p2), 6, %v559_v20 }
   0xe   : > { %590 = vperm.xlu1 (!%p487_p2), %1410, %v546_v0   ;;  %564 = vperm.xlu0 (!%p487_p2), %1408, %v546_v0  }
   0xf   : > { %s1961_s25 = smov (!%p536_p3, %s1373_s25), 1 }
  0x10   : > { %s1954_s28 = sshll.u32 %s1961_s25, 3 }
  0x11   : > { %s1615_s18 = scalar_lea.vmem %s1957_s30, %s1954_s28  ;;  %s1958_s28 = sld [smem:[#allocation3_spill]] }
  0x12   : > { %v545_v5 = vld [vmem:[%s1615_s18] sm:$0x3f]  ;;  %1411 = vset.pattern.permute.xlu0 %v1489_v7  ;;  %1412 = vset.pattern.permute.xlu1 %v1491_v8 }
  0x13   : > { %v1618_v6 = vmax.f32 %v545_v5, 0.0  ;;  %603 = vperm.xlu0 %1411, %v546_v0  }
  0x15   : > { %556 = vrot.lane.b32.xlu1 %v1618_v6, %s1490_s19 }
  0x17   : > { %582 = vrot.lane.b32.xlu0 %v1618_v6, %s1493_s20  ;;  %v544_v23 = vld [vmem:[%s1958_s28] sm:$0xff] }
  0x18   : > { %1417 = vset.pattern.permute.xlu0 %v1485_v1  ;;  %v1682_v26 = vrot.slane %v544_v23, %v1674_v21  ;;  %v1685_v29 = vrot.slane %v544_v23, %v1679_v25  ;;  %v1692_v35 = vrot.slane %v544_v23, %v1687_v30  ;;  %v1701_v44 = vrot.slane %v544_v23, %v1694_v36 }
  0x19   : > { %569 = vrot.lane.b32.xlu1 %v1618_v6, %s1492_s1  ;;  %v1706_v47 = vrot.slane %v544_v23, %v1697_v39  ;;  %v1710_v51 = vrot.slane %v544_v23, %v1703_v45  ;;  %v1714_v62 = vrot.slane %v544_v23, %v651_v55  ;;  %v1716_v63 = vrot.slane %v544_v23, %v638_v56 }
  0x1b   : > { %595 = vrot.lane.b32.xlu0 %v1618_v6, %s1494_s21 }
  0x1d   : > { %616 = vperm.xlu1 %1412, %v546_v0  }
  0x1f   : > { %608 = vrot.lane.b32.xlu0 %v1618_v6, %s1496_s22 }
  0x21   : > { %1413 = vset.pattern.permute.xlu1 %v1495_v9 }
  0x22   : > { %629 = vperm.xlu1 %1413, %v546_v0  }
  0x23   : > { %621 = vrot.lane.b32.xlu0 %v1618_v6, %s1498_s23 }
  0x26   : > { %1414 = vset.pattern.permute.xlu1 %v1497_v10 }
  0x27   : > { %642 = vperm.xlu1 %1414, %v546_v0   ;;  %647 = vrot.lane.b32.xlu0 %v1618_v6, %s1499_s26 }
  0x2b   : > { %1415 = vset.pattern.permute.xlu1 %v1500_v11  ;;  %675 = vperm.xlu0 %1417, %v547_v12  }
  0x2c   : > { %655 = vperm.xlu1 %1415, %v546_v0  }
  0x2f   : > { %1420 = vset.pattern.permute.xlu0 %v1486_v2 }
  0x30   : > { %634 = vrot.lane.b32.xlu1 %v1618_v6, %s1501_s0  ;;  %705 = vperm.xlu0 %1420, %v547_v12  }
  0x31   : > { %1416 = vset.pattern.permute.xlu1 %v1488_v4 }
  0x34   : > { %666 = vperm.xlu1 %1416, %v547_v12   ;;  %732 = vperm.xlu0 %1420, %v1650_v13  }
  0x38   : > { %1418 = vset.pattern.permute.xlu1 %v1487_v3  ;;  %1424 = vset.pattern.permute.xlu0 %v1489_v7 }
  0x39   : > { %685 = vperm.xlu1 %1418, %v547_v12   ;;  %767 = vperm.xlu0 %1424, %v1650_v13  }
  0x3d   : > { %1419 = vset.pattern.permute.xlu1 %v1489_v7  ;;  %1425 = vset.pattern.permute.xlu0 %v1485_v1 }
  0x3e   : > { %695 = vperm.xlu1 %1419, %v547_v12   ;;  %749 = vperm.xlu0 %1425, %v1650_v13  }
  0x42   : > { %1421 = vset.pattern.permute.xlu1 %v1491_v8 }
  0x43   : > { %715 = vperm.xlu1 %1421, %v547_v12  }
  0x47   : > { %1422 = vset.pattern.permute.xlu1 %v1488_v4 }
  0x48   : > { %722 = vperm.xlu1 %1422, %v548_v14  }
  0x4c   : > { %740 = vperm.xlu1 %1422, %v1650_v13  }
  0x50   : > { %1423 = vset.pattern.permute.xlu1 %v1487_v3 }
  0x51   : > { %758 = vperm.xlu1 %1423, %v1650_v13  }
  0x55   : > { %1426 = vset.pattern.permute.xlu1 %v1491_v8 }
  0x56   : > { %776 = vperm.xlu1 %1426, %v1650_v13  }
  0x5a   : > { %1427 = vset.pattern.permute.xlu1 %v1495_v9 }
  0x5b   : > { %785 = vperm.xlu1 %1427, %v1650_v13  }
  0x5f   : > { %1428 = vset.pattern.permute.xlu1 %v1497_v10 }
  0x60   : > { %794 = vperm.xlu1 %1428, %v1650_v13  }
  0x64   : > { %1429 = vset.pattern.permute.xlu1 %v1500_v11 }
  0x88   : > { %v578_v15 = vpop.permute.xlu1 %577  ;;  %v553_v16 = vpop.permute.xlu0 %552 }
  0x89   : > { %v555_v37 = vmul.f32 %v553_v16, %v1618_v6 }
  0x8d   : > { %v591_v18 = vpop.permute.xlu1 %590  ;;  %v565_v19 = vpop.permute.xlu0 %564 }
  0x91   : > { %v557_v22 = vpop.permute.xlu1 %556 }
  0x92   : > { %v604_v24 = vpop.permute.xlu0 %603  ;;  %v562_v31 = vmul.f32 %v1682_v26, %v557_v22 }
  0x94   : > { %v567_v38 = vmul.f32 %v565_v19, %v562_v31 }
  0x95   : > { %v570_v27 = vpop.permute.xlu1 %569 }
  0x96   : > { %v583_v28 = vpop.permute.xlu0 %582  ;;  %v575_v34 = vmul.f32 %v1685_v29, %v570_v27  ;;  %v568_v46 = vadd.f32 %v567_v38, %v555_v37 }
  0x97   : > { %v588_v43 = vmul.f32 %v1692_v35, %v583_v28 }
  0x98   : > { %v580_v42 = vmul.f32 %v578_v15, %v575_v34 }
  0x99   : > { %v593_v49 = vmul.f32 %v591_v18, %v588_v43 }
  0x9a   : > { %v596_v33 = vpop.permute.xlu0 %595  ;;  %v581_v48 = vadd.f32 %v580_v42, %v568_v46 }
  0x9b   : > { %v601_v50 = vmul.f32 %v1701_v44, %v596_v33 }
  0x9c   : > { %v617_v32 = vpop.permute.xlu1 %616  ;;  %v594_v57 = vadd.f32 %v593_v49, %v581_v48 }
  0x9d   : > { %v606_v58 = vmul.f32 %v604_v24, %v601_v50 }
  0x9e   : > { %v609_v40 = vpop.permute.xlu0 %608 }
  0x9f   : > { %v614_v54 = vmul.f32 %v1706_v47, %v609_v40  ;;  %v607_v5 = vadd.f32 %v606_v58, %v594_v57 }
  0xa1   : > { %v630_v41 = vpop.permute.xlu1 %629  ;;  %v619_v61 = vmul.f32 %v617_v32, %v614_v54 }
  0xa2   : > { %v622_v53 = vpop.permute.xlu0 %621 }
  0xa3   : > { %v627_v59 = vmul.f32 %v1710_v51, %v622_v53  ;;  %v620_v14 = vadd.f32 %v619_v61, %v607_v5  ;;  %v728_v61 = vld [vmem:[%s1943_s7] sm:$0x3f] }
  0xa5   : > { %v632_v6 = vmul.f32 %v630_v41, %v627_v59 }
  0xa6   : > { %v643_v52 = vpop.permute.xlu1 %642  ;;  %v648_v0 = vpop.permute.xlu0 %647 }
  0xa7   : > { %v653_v15 = vmul.f32 %v1714_v62, %v648_v0  ;;  %v633_v17 = vadd.f32 %v632_v6, %v620_v14 }
  0xaa   : > { %v676_v27 = vpop.permute.xlu0 %675 }
  0xab   : > { %v656_v60 = vpop.permute.xlu1 %655 }
  0xac   : > { %v658_v20 = vmul.f32 %v656_v60, %v653_v15  ;;  %v727_v60 = vld [vmem:[%s1942_s6] sm:$0x3f] }
  0xaf   : > { %v635_v12 = vpop.permute.xlu1 %634  ;;  %v706_v42 = vpop.permute.xlu0 %705 }
  0xb0   : > { %v640_v16 = vmul.f32 %v1716_v63, %v635_v12 }
  0xb2   : > { %v645_v18 = vmul.f32 %v643_v52, %v640_v16 }
  0xb3   : > { %v667_v19 = vpop.permute.xlu1 %666  ;;  %v733_v12 = vpop.permute.xlu0 %732 }
  0xb4   : > { %v646_v22 = vadd.f32 %v645_v18, %v633_v17 }
  0xb6   : > { %v659_v24 = vadd.f32 %v658_v20, %v646_v22 }
  0xb8   : > { %v663_v28 = vrot.slane %v659_v24, %v1674_v21  ;;  %v673_v23 = vrot.slane %v659_v24, %v1679_v25  ;;  %v686_v31 = vpop.permute.xlu1 %685  ;;  %v683_v32 = vrot.slane %v659_v24, %v1687_v30  ;;  %v703_v40 = vrot.slane %v659_v24, %v1697_v39  ;;  %v768_v15 = vpop.permute.xlu0 %767 }
  0xb9   : > { %v693_v41 = vrot.slane %v659_v24, %v1694_v36  ;;  %v713_v52 = vrot.slane %v659_v24, %v1703_v45 }
  0xba   : > { %v669_v33 = vmul.f32 %v667_v19, %v663_v28  ;;  %v678_v34 = vmul.f32 %v676_v27, %v673_v23  ;;  %v688_v38 = vmul.f32 %v686_v31, %v683_v32  ;;  %v708_v49 = vmul.f32 %v706_v42, %v703_v40 }
  0xbc   : > { %v679_v37 = vadd.f32 %v678_v34, %v669_v33 }
  0xbd   : > { %v696_v43 = vpop.permute.xlu1 %695  ;;  %v750_v17 = vpop.permute.xlu0 %749 }
  0xbe   : > { %v689_v46 = vadd.f32 %v688_v38, %v679_v37  ;;  %v698_v48 = vmul.f32 %v696_v43, %v693_v41 }
  0xc0   : > { %v699_v50 = vadd.f32 %v698_v48, %v689_v46 }
  0xc2   : > { %v716_v53 = vpop.permute.xlu1 %715  ;;  %v709_v54 = vadd.f32 %v708_v49, %v699_v50 }
  0xc3   : > { %v718_v55 = vmul.f32 %v716_v53, %v713_v52 }
  0xc5   : > { %v719_v56 = vadd.f32 %v718_v55, %v709_v54 }
  0xc7   : > { %v723_v57 = vpop.permute.xlu1 %722 }
  0xc8   : > { %v725_v58 = vadd.f32 %v723_v57, %v719_v56 }
  0xca   : > { %v729_v59 = vmax.f32 %v725_v58, 0.0 }
  0xcb   : > { %v741_v0 = vpop.permute.xlu1 %740 }
  0xcc   : > { %754 = vrot.lane.b32.xlu0 %v729_v59, %s1493_s20  ;;  %736 = vrot.lane.b32.xlu1 %v729_v59, %s1490_s19  ;;  %v735_v23 = vmul.f32 %v733_v12, %v729_v59 }
  0xd0   : > { %763 = vrot.lane.b32.xlu0 %v729_v59, %s1494_s21  ;;  %745 = vrot.lane.b32.xlu1 %v729_v59, %s1492_s1  ;;  %v759_v5 = vpop.permute.xlu1 %758 }
  0xd4   : > { %772 = vrot.lane.b32.xlu0 %v729_v59, %s1496_s22  ;;  %803 = vperm.xlu1 %1429, %v1650_v13   ;;  %v1745_v13 = vld [vmem:[%s1944_s8] sm:$0x3f] }
  0xd5   : > { %v777_v6 = vpop.permute.xlu1 %776 }
  0xd8   : > { %781 = vrot.lane.b32.xlu0 %v729_v59, %s1498_s23  ;;  %1430 = vset.pattern.permute.xlu1 %v1488_v4 }
  0xd9   : > { %814 = vperm.xlu1 %1430, %v727_v60  }
  0xda   : > { %v786_v14 = vpop.permute.xlu1 %785 }
  0xdc   : > { %799 = vrot.lane.b32.xlu0 %v729_v59, %s1499_s26 }
  0xdd   : > { %790 = vrot.lane.b32.xlu1 %v729_v59, %s1501_s0 }
  0xde   : > { %1431 = vset.pattern.permute.xlu1 %v1487_v3 }
  0xdf   : > { %v795_v16 = vpop.permute.xlu1 %794 }
  0xe0   : > { %823 = vperm.xlu0 %1425, %v727_v60  }
  0xe1   : > { %833 = vperm.xlu1 %1431, %v727_v60  }
  0xe4   : > { %1433 = vset.pattern.permute.xlu0 %v1486_v2 }
  0xe5   : > { %1432 = vset.pattern.permute.xlu1 %v1489_v7  ;;  %853 = vperm.xlu0 %1433, %v727_v60  }
  0xe6   : > { %843 = vperm.xlu1 %1432, %v727_v60  }
  0xe9   : > { %880 = vperm.xlu0 %1433, %v1745_v13  }
  0xea   : > { %1434 = vset.pattern.permute.xlu1 %v1491_v8 }
  0xeb   : > { %863 = vperm.xlu1 %1434, %v727_v60  }
  0xed   : > { %1437 = vset.pattern.permute.xlu0 %v1489_v7 }
  0xee   : > { %915 = vperm.xlu0 %1437, %v1745_v13  }
  0xef   : > { %1435 = vset.pattern.permute.xlu1 %v1488_v4 }
  0xf0   : > { %870 = vperm.xlu1 %1435, %v728_v61  }
  0xf2   : > { %1438 = vset.pattern.permute.xlu0 %v1485_v1 }
  0xf3   : > { %897 = vperm.xlu0 %1438, %v1745_v13  }
  0xf4   : > { %888 = vperm.xlu1 %1435, %v1745_v13  }
  0xf8   : > { %1436 = vset.pattern.permute.xlu1 %v1487_v3 }
  0xf9   : > { %906 = vperm.xlu1 %1436, %v1745_v13  }
  0xfd   : > { %1439 = vset.pattern.permute.xlu1 %v1491_v8 }
  0xfe   : > { %924 = vperm.xlu1 %1439, %v1745_v13  }
 0x102   : > { %1440 = vset.pattern.permute.xlu1 %v1495_v9 }
 0x103   : > { %933 = vperm.xlu1 %1440, %v1745_v13  }
 0x107   : > { %1441 = vset.pattern.permute.xlu1 %v1497_v10 }
 0x108   : > { %942 = vperm.xlu1 %1441, %v1745_v13  }
 0x10c   : > { %1442 = vset.pattern.permute.xlu1 %v1500_v11 }
 0x13e   : > { %v737_v18 = vpop.permute.xlu1 %736  ;;  %v755_v19 = vpop.permute.xlu0 %754 }
 0x13f   : > { %v738_v22 = vmul.f32 %v737_v18, %v1682_v26  ;;  %v756_v32 = vmul.f32 %v755_v19, %v1692_v35 }
 0x141   : > { %v743_v28 = vmul.f32 %v741_v0, %v738_v22  ;;  %v761_v38 = vmul.f32 %v759_v5, %v756_v32 }
 0x142   : > { %v746_v20 = vpop.permute.xlu1 %745  ;;  %v764_v27 = vpop.permute.xlu0 %763 }
 0x143   : > { %v747_v24 = vmul.f32 %v746_v20, %v1685_v29  ;;  %v744_v33 = vadd.f32 %v743_v28, %v735_v23  ;;  %v765_v40 = vmul.f32 %v764_v27, %v1701_v44 }
 0x145   : > { %v752_v31 = vmul.f32 %v750_v17, %v747_v24  ;;  %v770_v46 = vmul.f32 %v768_v15, %v765_v40 }
 0x146   : > { %v773_v34 = vpop.permute.xlu0 %772 }
 0x147   : > { %v753_v37 = vadd.f32 %v752_v31, %v744_v33  ;;  %v774_v48 = vmul.f32 %v773_v34, %v1706_v47 }
 0x149   : > { %v762_v41 = vadd.f32 %v761_v38, %v753_v37  ;;  %v779_v53 = vmul.f32 %v777_v6, %v774_v48 }
 0x14a   : > { %v782_v43 = vpop.permute.xlu0 %781 }
 0x14b   : > { %v771_v49 = vadd.f32 %v770_v46, %v762_v41  ;;  %v783_v50 = vmul.f32 %v782_v43, %v1710_v51 }
 0x14d   : > { %v780_v54 = vadd.f32 %v779_v53, %v771_v49  ;;  %v788_v55 = vmul.f32 %v786_v14, %v783_v50  ;;  %v875_v49 = vld [vmem:[%s1945_s9] sm:$0x3f] }
 0x14e   : > { %v800_v56 = vpop.permute.xlu0 %799  ;;  %v876_v50 = vld [vmem:[%s1946_s10] sm:$0x3f] }
 0x14f   : > { %v789_v59 = vadd.f32 %v788_v55, %v780_v54  ;;  %v801_v60 = vmul.f32 %v800_v56, %v1714_v62 }
 0x153   : > { %v804_v42 = vpop.permute.xlu1 %803 }
 0x154   : > { %v806_v5 = vmul.f32 %v804_v42, %v801_v60 }
 0x158   : > { %v815_v52 = vpop.permute.xlu1 %814 }
 0x15c   : > { %v791_v57 = vpop.permute.xlu1 %790 }
 0x15d   : > { %v792_v58 = vmul.f32 %v791_v57, %v1716_v63 }
 0x15f   : > { %v797_v61 = vmul.f32 %v795_v16, %v792_v58  ;;  %v824_v19 = vpop.permute.xlu0 %823 }
 0x160   : > { %v834_v0 = vpop.permute.xlu1 %833 }
 0x161   : > { %v798_v12 = vadd.f32 %v797_v61, %v789_v59 }
 0x163   : > { %v807_v15 = vadd.f32 %v806_v5, %v798_v12 }
 0x164   : > { %v854_v23 = vpop.permute.xlu0 %853 }
 0x165   : > { %v811_v17 = vrot.slane %v807_v15, %v1674_v21  ;;  %v821_v18 = vrot.slane %v807_v15, %v1679_v25  ;;  %v831_v6 = vrot.slane %v807_v15, %v1687_v30  ;;  %v844_v14 = vpop.permute.xlu1 %843  ;;  %v841_v24 = vrot.slane %v807_v15, %v1694_v36 }
 0x166   : > { %v851_v16 = vrot.slane %v807_v15, %v1697_v39  ;;  %v861_v38 = vrot.slane %v807_v15, %v1703_v45 }
 0x167   : > { %v817_v20 = vmul.f32 %v815_v52, %v811_v17  ;;  %v826_v22 = vmul.f32 %v824_v19, %v821_v18  ;;  %v836_v28 = vmul.f32 %v834_v0, %v831_v6  ;;  %v846_v32 = vmul.f32 %v844_v14, %v841_v24 }
 0x168   : > { %v856_v34 = vmul.f32 %v854_v23, %v851_v16  ;;  %v881_v55 = vpop.permute.xlu0 %880 }
 0x169   : > { %v827_v27 = vadd.f32 %v826_v22, %v817_v20 }
 0x16a   : > { %v864_v33 = vpop.permute.xlu1 %863 }
 0x16b   : > { %v837_v31 = vadd.f32 %v836_v28, %v827_v27  ;;  %v866_v40 = vmul.f32 %v864_v33, %v861_v38 }
 0x16d   : > { %v847_v37 = vadd.f32 %v846_v32, %v837_v31  ;;  %v916_v57 = vpop.permute.xlu0 %915 }
 0x16f   : > { %v857_v41 = vadd.f32 %v856_v34, %v847_v37  ;;  %v871_v43 = vpop.permute.xlu1 %870 }
 0x171   : > { %v867_v42 = vadd.f32 %v866_v40, %v857_v41 }
 0x172   : > { %v898_v59 = vpop.permute.xlu0 %897 }
 0x173   : > { %v873_v46 = vadd.f32 %v871_v43, %v867_v42  ;;  %v889_v52 = vpop.permute.xlu1 %888 }
 0x175   : > { %v877_v48 = vmax.f32 %v873_v46, 0.0 }
 0x177   : > { %902 = vrot.lane.b32.xlu0 %v877_v48, %s1493_s20  ;;  %884 = vrot.lane.b32.xlu1 %v877_v48, %s1490_s19  ;;  %v883_v18 = vmul.f32 %v881_v55, %v877_v48 }
 0x178   : > { %v907_v53 = vpop.permute.xlu1 %906 }
 0x17b   : > { %911 = vrot.lane.b32.xlu0 %v877_v48, %s1494_s21  ;;  %893 = vrot.lane.b32.xlu1 %v877_v48, %s1492_s1 }
 0x17d   : > { %v925_v54 = vpop.permute.xlu1 %924 }
 0x17f   : > { %920 = vrot.lane.b32.xlu0 %v877_v48, %s1496_s22  ;;  %951 = vperm.xlu1 %1442, %v1745_v13   ;;  %v1800_v13 = vld [vmem:[%s1947_s11] sm:$0x3f] }
 0x182   : > { %v934_v56 = vpop.permute.xlu1 %933 }
 0x183   : > { %929 = vrot.lane.b32.xlu0 %v877_v48, %s1498_s23  ;;  %1443 = vset.pattern.permute.xlu1 %v1488_v4 }
 0x184   : > { %962 = vperm.xlu1 %1443, %v875_v49  }
 0x187   : > { %947 = vrot.lane.b32.xlu0 %v877_v48, %s1499_s26  ;;  %v943_v58 = vpop.permute.xlu1 %942 }
 0x188   : > { %938 = vrot.lane.b32.xlu1 %v877_v48, %s1501_s0 }
 0x189   : > { %1444 = vset.pattern.permute.xlu1 %v1487_v3 }
 0x18b   : > { %971 = vperm.xlu0 %1438, %v875_v49  }
 0x18c   : > { %981 = vperm.xlu1 %1444, %v875_v49  }
 0x18f   : > { %1446 = vset.pattern.permute.xlu0 %v1486_v2 }
 0x190   : > { %1445 = vset.pattern.permute.xlu1 %v1489_v7  ;;  %1001 = vperm.xlu0 %1446, %v875_v49  }
 0x191   : > { %991 = vperm.xlu1 %1445, %v875_v49  }
 0x194   : > { %1028 = vperm.xlu0 %1446, %v1800_v13  }
 0x195   : > { %1447 = vset.pattern.permute.xlu1 %v1491_v8 }
 0x196   : > { %1011 = vperm.xlu1 %1447, %v875_v49  }
 0x198   : > { %1450 = vset.pattern.permute.xlu0 %v1489_v7 }
 0x199   : > { %1063 = vperm.xlu0 %1450, %v1800_v13  }
 0x19a   : > { %1448 = vset.pattern.permute.xlu1 %v1488_v4 }
 0x19b   : > { %1018 = vperm.xlu1 %1448, %v876_v50  }
 0x19d   : > { %1451 = vset.pattern.permute.xlu0 %v1485_v1 }
 0x19e   : > { %1045 = vperm.xlu0 %1451, %v1800_v13  }
 0x19f   : > { %1036 = vperm.xlu1 %1448, %v1800_v13  }
 0x1a3   : > { %1449 = vset.pattern.permute.xlu1 %v1487_v3 }
 0x1a4   : > { %1054 = vperm.xlu1 %1449, %v1800_v13  }
 0x1a8   : > { %1452 = vset.pattern.permute.xlu1 %v1491_v8 }
 0x1a9   : > { %1072 = vperm.xlu1 %1452, %v1800_v13  }
 0x1ad   : > { %1453 = vset.pattern.permute.xlu1 %v1495_v9 }
 0x1ae   : > { %1081 = vperm.xlu1 %1453, %v1800_v13  }
 0x1b2   : > { %1454 = vset.pattern.permute.xlu1 %v1497_v10 }
 0x1b3   : > { %1090 = vperm.xlu1 %1454, %v1800_v13  }
 0x1b7   : > { %1455 = vset.pattern.permute.xlu1 %v1500_v11 }
 0x1e9   : > { %v885_v60 = vpop.permute.xlu1 %884  ;;  %v903_v61 = vpop.permute.xlu0 %902 }
 0x1ea   : > { %v886_v5 = vmul.f32 %v885_v60, %v1682_v26  ;;  %v904_v19 = vmul.f32 %v903_v61, %v1692_v35 }
 0x1ec   : > { %v891_v17 = vmul.f32 %v889_v52, %v886_v5  ;;  %v909_v24 = vmul.f32 %v907_v53, %v904_v19 }
 0x1ed   : > { %v894_v0 = vpop.permute.xlu1 %893  ;;  %v912_v15 = vpop.permute.xlu0 %911 }
 0x1ee   : > { %v895_v12 = vmul.f32 %v894_v0, %v1685_v29  ;;  %v892_v14 = vadd.f32 %v891_v17, %v883_v18  ;;  %v913_v27 = vmul.f32 %v912_v15, %v1701_v44 }
 0x1f0   : > { %v900_v6 = vmul.f32 %v898_v59, %v895_v12  ;;  %v918_v31 = vmul.f32 %v916_v57, %v913_v27 }
 0x1f1   : > { %v921_v20 = vpop.permute.xlu0 %920 }
 0x1f2   : > { %v901_v22 = vadd.f32 %v900_v6, %v892_v14  ;;  %v922_v32 = vmul.f32 %v921_v20, %v1706_v47 }
 0x1f4   : > { %v910_v28 = vadd.f32 %v909_v24, %v901_v22  ;;  %v927_v38 = vmul.f32 %v925_v54, %v922_v32 }
 0x1f5   : > { %v930_v23 = vpop.permute.xlu0 %929 }
 0x1f6   : > { %v919_v33 = vadd.f32 %v918_v31, %v910_v28  ;;  %v931_v34 = vmul.f32 %v930_v23, %v1710_v51 }
 0x1f8   : > { %v928_v40 = vadd.f32 %v927_v38, %v919_v33  ;;  %v936_v41 = vmul.f32 %v934_v56, %v931_v34  ;;  %v1023_v33 = vld [vmem:[%s1948_s12] sm:$0x3f] }
 0x1f9   : > { %v948_v42 = vpop.permute.xlu0 %947  ;;  %v1024_v34 = vld [vmem:[%s1949_s13] sm:$0x3f] }
 0x1fa   : > { %v937_v48 = vadd.f32 %v936_v41, %v928_v40  ;;  %v949_v49 = vmul.f32 %v948_v42, %v1714_v62 }
 0x1fe   : > { %v952_v16 = vpop.permute.xlu1 %951 }
 0x1ff   : > { %v954_v53 = vmul.f32 %v952_v16, %v949_v49 }
 0x203   : > { %v963_v37 = vpop.permute.xlu1 %962 }
 0x207   : > { %v939_v43 = vpop.permute.xlu1 %938 }
 0x208   : > { %v940_v46 = vmul.f32 %v939_v43, %v1716_v63 }
 0x20a   : > { %v945_v50 = vmul.f32 %v943_v58, %v940_v46  ;;  %v972_v61 = vpop.permute.xlu0 %971 }
 0x20b   : > { %v982_v52 = vpop.permute.xlu1 %981 }
 0x20c   : > { %v946_v55 = vadd.f32 %v945_v50, %v937_v48 }
 0x20e   : > { %v955_v57 = vadd.f32 %v954_v53, %v946_v55 }
 0x20f   : > { %v1002_v18 = vpop.permute.xlu0 %1001 }
 0x210   : > { %v959_v59 = vrot.slane %v955_v57, %v1674_v21  ;;  %v969_v60 = vrot.slane %v955_v57, %v1679_v25  ;;  %v979_v54 = vrot.slane %v955_v57, %v1687_v30  ;;  %v992_v56 = vpop.permute.xlu1 %991  ;;  %v989_v12 = vrot.slane %v955_v57, %v1694_v36 }
 0x211   : > { %v999_v58 = vrot.slane %v955_v57, %v1697_v39  ;;  %v1009_v24 = vrot.slane %v955_v57, %v1703_v45 }
 0x212   : > { %v965_v0 = vmul.f32 %v963_v37, %v959_v59  ;;  %v974_v5 = vmul.f32 %v972_v61, %v969_v60  ;;  %v984_v17 = vmul.f32 %v982_v52, %v979_v54  ;;  %v994_v19 = vmul.f32 %v992_v56, %v989_v12 }
 0x213   : > { %v1004_v20 = vmul.f32 %v1002_v18, %v999_v58  ;;  %v1029_v40 = vpop.permute.xlu0 %1028 }
 0x214   : > { %v975_v15 = vadd.f32 %v974_v5, %v965_v0 }
 0x215   : > { %v1012_v14 = vpop.permute.xlu1 %1011 }
 0x216   : > { %v985_v6 = vadd.f32 %v984_v17, %v975_v15  ;;  %v1014_v27 = vmul.f32 %v1012_v14, %v1009_v24 }
 0x218   : > { %v995_v22 = vadd.f32 %v994_v19, %v985_v6  ;;  %v1064_v42 = vpop.permute.xlu0 %1063 }
 0x21a   : > { %v1005_v28 = vadd.f32 %v1004_v20, %v995_v22  ;;  %v1019_v23 = vpop.permute.xlu1 %1018 }
 0x21c   : > { %v1015_v16 = vadd.f32 %v1014_v27, %v1005_v28 }
 0x21d   : > { %v1046_v46 = vpop.permute.xlu0 %1045 }
 0x21e   : > { %v1021_v31 = vadd.f32 %v1019_v23, %v1015_v16 }
 0x220   : > { %v1025_v32 = vmax.f32 %v1021_v31, 0.0 }
 0x222   : > { %1050 = vrot.lane.b32.xlu0 %v1025_v32, %s1493_s20  ;;  %1032 = vrot.lane.b32.xlu1 %v1025_v32, %s1490_s19  ;;  %v1031_v55 = vmul.f32 %v1029_v40, %v1025_v32 }
 0x226   : > { %1059 = vrot.lane.b32.xlu0 %v1025_v32, %s1494_s21  ;;  %1041 = vrot.lane.b32.xlu1 %v1025_v32, %s1492_s1 }
 0x22a   : > { %1068 = vrot.lane.b32.xlu0 %v1025_v32, %s1496_s22  ;;  %1099 = vperm.xlu1 %1455, %v1800_v13   ;;  %v1855_v13 = vld [vmem:[%s1950_s14] sm:$0x3f] }
 0x22e   : > { %1077 = vrot.lane.b32.xlu0 %v1025_v32, %s1498_s23  ;;  %1456 = vset.pattern.permute.xlu1 %v1488_v4 }
 0x22f   : > { %1110 = vperm.xlu1 %1456, %v1023_v33  }
 0x232   : > { %1095 = vrot.lane.b32.xlu0 %v1025_v32, %s1499_s26 }
 0x233   : > { %1086 = vrot.lane.b32.xlu1 %v1025_v32, %s1501_s0 }
 0x234   : > { %1457 = vset.pattern.permute.xlu1 %v1487_v3 }
 0x236   : > { %1119 = vperm.xlu0 %1451, %v1023_v33  }
 0x237   : > { %1129 = vperm.xlu1 %1457, %v1023_v33  }
 0x23a   : > { %1459 = vset.pattern.permute.xlu0 %v1486_v2 }
 0x23b   : > { %1458 = vset.pattern.permute.xlu1 %v1489_v7  ;;  %1149 = vperm.xlu0 %1459, %v1023_v33  }
 0x23c   : > { %1139 = vperm.xlu1 %1458, %v1023_v33  }
 0x23f   : > { %1176 = vperm.xlu0 %1459, %v1855_v13  }
 0x240   : > { %1460 = vset.pattern.permute.xlu1 %v1491_v8 }
 0x241   : > { %1159 = vperm.xlu1 %1460, %v1023_v33  }
 0x243   : > { %1463 = vset.pattern.permute.xlu0 %v1489_v7 }
 0x244   : > { %1211 = vperm.xlu0 %1463, %v1855_v13  }
 0x245   : > { %1461 = vset.pattern.permute.xlu1 %v1488_v4 }
 0x246   : > { %1166 = vperm.xlu1 %1461, %v1024_v34  }
 0x248   : > { %1464 = vset.pattern.permute.xlu0 %v1485_v1  ;;  %v1037_v1 = vpop.permute.xlu1 %1036 }
 0x249   : > { %1193 = vperm.xlu0 %1464, %v1855_v13  }
 0x24a   : > { %1184 = vperm.xlu1 %1461, %v1855_v13  }
 0x24c   : > { %v1055_v37 = vpop.permute.xlu1 %1054 }
 0x24e   : > { %1462 = vset.pattern.permute.xlu1 %v1487_v3 }
 0x24f   : > { %1202 = vperm.xlu1 %1462, %v1855_v13  }
 0x250   : > { %v1073_v38 = vpop.permute.xlu1 %1072 }
 0x253   : > { %1465 = vset.pattern.permute.xlu1 %v1491_v8 }
 0x254   : > { %1220 = vperm.xlu1 %1465, %v1855_v13   ;;  %v1082_v41 = vpop.permute.xlu1 %1081 }
 0x258   : > { %1466 = vset.pattern.permute.xlu1 %v1495_v9  ;;  %v1091_v43 = vpop.permute.xlu1 %1090 }
 0x259   : > { %1229 = vperm.xlu1 %1466, %v1855_v13  }
 0x25d   : > { %1467 = vset.pattern.permute.xlu1 %v1497_v10 }
 0x25e   : > { %1238 = vperm.xlu1 %1467, %v1855_v13  }
 0x262   : > { %1468 = vset.pattern.permute.xlu1 %v1500_v11 }
 0x294   : > { %v1033_v48 = vpop.permute.xlu1 %1032  ;;  %v1051_v49 = vpop.permute.xlu0 %1050 }
 0x295   : > { %v1034_v9 = vmul.f32 %v1033_v48, %v1682_v26  ;;  %v1052_v11 = vmul.f32 %v1051_v49, %v1692_v35 }
 0x297   : > { %v1039_v53 = vmul.f32 %v1037_v1, %v1034_v9  ;;  %v1057_v61 = vmul.f32 %v1055_v37, %v1052_v11 }
 0x298   : > { %v1042_v50 = vpop.permute.xlu1 %1041  ;;  %v1060_v10 = vpop.permute.xlu0 %1059 }
 0x299   : > { %v1043_v52 = vmul.f32 %v1042_v50, %v1685_v29  ;;  %v1040_v59 = vadd.f32 %v1039_v53, %v1031_v55  ;;  %v1061_v56 = vmul.f32 %v1060_v10, %v1701_v44 }
 0x29b   : > { %v1048_v57 = vmul.f32 %v1046_v46, %v1043_v52  ;;  %v1066_v15 = vmul.f32 %v1064_v42, %v1061_v56 }
 0x29c   : > { %v1069_v60 = vpop.permute.xlu0 %1068 }
 0x29d   : > { %v1049_v54 = vadd.f32 %v1048_v57, %v1040_v59  ;;  %v1070_v17 = vmul.f32 %v1069_v60, %v1706_v47 }
 0x29f   : > { %v1058_v0 = vadd.f32 %v1057_v61, %v1049_v54  ;;  %v1075_v19 = vmul.f32 %v1073_v38, %v1070_v17 }
 0x2a0   : > { %v1078_v12 = vpop.permute.xlu0 %1077 }
 0x2a1   : > { %v1067_v58 = vadd.f32 %v1066_v15, %v1058_v0  ;;  %v1079_v18 = vmul.f32 %v1078_v12, %v1710_v51 }
 0x2a3   : > { %v1076_v14 = vadd.f32 %v1075_v19, %v1067_v58  ;;  %v1084_v20 = vmul.f32 %v1082_v41, %v1079_v18 }
 0x2a4   : > { %v1096_v22 = vpop.permute.xlu0 %1095 }
 0x2a5   : > { %v1085_v28 = vadd.f32 %v1084_v20, %v1076_v14  ;;  %v1097_v16 = vmul.f32 %v1096_v22, %v1714_v62 }
 0x2a9   : > { %v1100_v5 = vpop.permute.xlu1 %1099 }
 0x2aa   : > { %v1102_v32 = vmul.f32 %v1100_v5, %v1097_v16  ;;  %v1171_v5 = vld [vmem:[%s1951_s15] sm:$0x3f] }
 0x2ae   : > { %v1111_v6 = vpop.permute.xlu1 %1110 }
 0x2b2   : > { %v1087_v24 = vpop.permute.xlu1 %1086 }
 0x2b3   : > { %v1088_v27 = vmul.f32 %v1087_v24, %v1716_v63 }
 0x2b5   : > { %v1093_v23 = vmul.f32 %v1091_v43, %v1088_v27  ;;  %v1120_v40 = vpop.permute.xlu0 %1119 }
 0x2b6   : > { %v1130_v31 = vpop.permute.xlu1 %1129 }
 0x2b7   : > { %v1094_v33 = vadd.f32 %v1093_v23, %v1085_v28 }
 0x2b9   : > { %v1103_v34 = vadd.f32 %v1102_v32, %v1094_v33 }
 0x2ba   : > { %v1150_v9 = vpop.permute.xlu0 %1149 }
 0x2bb   : > { %v1107_v1 = vrot.slane %v1103_v34, %v1674_v21  ;;  %v1117_v37 = vrot.slane %v1103_v34, %v1679_v25  ;;  %v1127_v38 = vrot.slane %v1103_v34, %v1687_v30  ;;  %v1140_v41 = vpop.permute.xlu1 %1139  ;;  %v1137_v48 = vrot.slane %v1103_v34, %v1694_v36 }
 0x2bc   : > { %v1147_v43 = vrot.slane %v1103_v34, %v1697_v39  ;;  %v1157_v11 = vrot.slane %v1103_v34, %v1703_v45 }
 0x2bd   : > { %v1113_v42 = vmul.f32 %v1111_v6, %v1107_v1  ;;  %v1122_v46 = vmul.f32 %v1120_v40, %v1117_v37  ;;  %v1132_v50 = vmul.f32 %v1130_v31, %v1127_v38  ;;  %v1142_v10 = vmul.f32 %v1140_v41, %v1137_v48 }
 0x2be   : > { %v1152_v55 = vmul.f32 %v1150_v9, %v1147_v43 }
 0x2bf   : > { %v1123_v49 = vadd.f32 %v1122_v46, %v1113_v42 }
 0x2c0   : > { %v1160_v53 = vpop.permute.xlu1 %1159 }
 0x2c1   : > { %v1133_v52 = vadd.f32 %v1132_v50, %v1123_v49  ;;  %v1162_v59 = vmul.f32 %v1160_v53, %v1157_v11 }
 0x2c3   : > { %v1143_v57 = vadd.f32 %v1142_v10, %v1133_v52 }
 0x2c5   : > { %v1153_v60 = vadd.f32 %v1152_v55, %v1143_v57  ;;  %v1167_v61 = vpop.permute.xlu1 %1166 }
 0x2c7   : > { %v1163_v54 = vadd.f32 %v1162_v59, %v1153_v60 }
 0x2c9   : > { %v1169_v56 = vadd.f32 %v1167_v61, %v1163_v54 }
 0x2cb   : > { %v1173_v0 = vmax.f32 %v1169_v56, 0.0 }
 0x2cd   : > { %1198 = vrot.lane.b32.xlu0 %v1173_v0, %s1493_s20  ;;  %1180 = vrot.lane.b32.xlu1 %v1173_v0, %s1490_s19  ;;  %s1959_s20 = sshll.u32 %s1961_s25, 3 }
 0x2d1   : > { %1207 = vrot.lane.b32.xlu0 %v1173_v0, %s1494_s21  ;;  %1189 = vrot.lane.b32.xlu1 %v1173_v0, %s1492_s1 }
 0x2d5   : > { %1216 = vrot.lane.b32.xlu0 %v1173_v0, %s1496_s22  ;;  %1247 = vperm.xlu1 %1468, %v1855_v13   ;;  %v1172_v13 = vld [vmem:[%s1952_s16] sm:$0x3f] }
 0x2d9   : > { %1225 = vrot.lane.b32.xlu0 %v1173_v0, %s1498_s23  ;;  %1469 = vset.pattern.permute.xlu1 %v1488_v4  ;;  %s543_s23 = scalar_lea.vmem %s1953_s17, %s1959_s20 }
 0x2da   : > { %1258 = vperm.xlu1 %1469, %v1171_v5  }
 0x2dd   : > { %1243 = vrot.lane.b32.xlu0 %v1173_v0, %s1499_s26 }
 0x2de   : > { %1234 = vrot.lane.b32.xlu1 %v1173_v0, %s1501_s0 }
 0x2df   : > { %1470 = vset.pattern.permute.xlu1 %v1487_v3  ;;  %v1185_v3 = vpop.permute.xlu1 %1184 }
 0x2e1   : > { %1267 = vperm.xlu0 %1464, %v1171_v5  }
 0x2e2   : > { %1277 = vperm.xlu1 %1470, %v1171_v5  }
 0x2e3   : > { %v1203_v12 = vpop.permute.xlu1 %1202 }
 0x2e5   : > { %1472 = vset.pattern.permute.xlu0 %v1486_v2  ;;  %v1177_v2 = vpop.permute.xlu0 %1176 }
 0x2e6   : > { %1471 = vset.pattern.permute.xlu1 %v1489_v7  ;;  %1297 = vperm.xlu0 %1472, %v1171_v5   ;;  %v1179_v27 = vmul.f32 %v1177_v2, %v1173_v0 }
 0x2e7   : > { %1287 = vperm.xlu1 %1471, %v1171_v5   ;;  %v1221_v15 = vpop.permute.xlu1 %1220 }
 0x2e9   : > { %v1212_v7 = vpop.permute.xlu0 %1211 }
 0x2ea   : > { %1475 = vset.pattern.permute.xlu0 %v1488_v4 }
 0x2eb   : > { %1473 = vset.pattern.permute.xlu1 %v1491_v8  ;;  %v1230_v17 = vpop.permute.xlu1 %1229 }
 0x2ec   : > { %1307 = vperm.xlu1 %1473, %v1171_v5  }
 0x2ed   : > { %v1194_v18 = vpop.permute.xlu0 %1193 }
 0x2ef   : > { %v1239_v58 = vpop.permute.xlu1 %1238 }
 0x2f0   : > { %1474 = vset.pattern.permute.xlu1 %v1488_v4 }
 0x2f1   : > { %1314 = vperm.xlu1 %1474, %v1172_v13  }
 0x33f   : > { %v1181_v6 = vpop.permute.xlu1 %1180  ;;  %v1199_v19 = vpop.permute.xlu0 %1198 }
 0x340   : > { %v1182_v8 = vmul.f32 %v1181_v6, %v1682_v26  ;;  %v1200_v28 = vmul.f32 %v1199_v19, %v1692_v35 }
 0x342   : > { %v1187_v24 = vmul.f32 %v1185_v3, %v1182_v8  ;;  %v1205_v32 = vmul.f32 %v1203_v12, %v1200_v28 }
 0x343   : > { %v1190_v14 = vpop.permute.xlu1 %1189  ;;  %v1208_v22 = vpop.permute.xlu0 %1207 }
 0x344   : > { %v1191_v20 = vmul.f32 %v1190_v14, %v1685_v29  ;;  %v1188_v16 = vadd.f32 %v1187_v24, %v1179_v27  ;;  %v1209_v33 = vmul.f32 %v1208_v22, %v1701_v44 }
 0x346   : > { %v1196_v4 = vmul.f32 %v1194_v18, %v1191_v20  ;;  %v1214_v38 = vmul.f32 %v1212_v7, %v1209_v33 }
 0x347   : > { %v1217_v23 = vpop.permute.xlu0 %1216 }
 0x348   : > { %v1197_v31 = vadd.f32 %v1196_v4, %v1188_v16  ;;  %v1218_v26 = vmul.f32 %v1217_v23, %v1706_v47 }
 0x34a   : > { %v1206_v34 = vadd.f32 %v1205_v32, %v1197_v31  ;;  %v1223_v42 = vmul.f32 %v1221_v15, %v1218_v26 }
 0x34b   : > { %v1226_v37 = vpop.permute.xlu0 %1225 }
 0x34c   : > { %v1215_v40 = vadd.f32 %v1214_v38, %v1206_v34  ;;  %v1227_v29 = vmul.f32 %v1226_v37, %v1710_v51 }
 0x34e   : > { %v1224_v46 = vadd.f32 %v1223_v42, %v1215_v40  ;;  %v1232_v48 = vmul.f32 %v1230_v17, %v1227_v29 }
 0x34f   : > { %v1244_v35 = vpop.permute.xlu0 %1243 }
 0x350   : > { %v1233_v43 = vadd.f32 %v1232_v48, %v1224_v46  ;;  %v1245_v44 = vmul.f32 %v1244_v35, %v1714_v62 }
 0x354   : > { %v1248_v1 = vpop.permute.xlu1 %1247 }
 0x355   : > { %v1250_v10 = vmul.f32 %v1248_v1, %v1245_v44 }
 0x359   : > { %v1259_v41 = vpop.permute.xlu1 %1258 }
 0x35d   : > { %v1235_v49 = vpop.permute.xlu1 %1234 }
 0x35e   : > { %v1236_v50 = vmul.f32 %v1235_v49, %v1716_v63 }
 0x360   : > { %v1241_v9 = vmul.f32 %v1239_v58, %v1236_v50  ;;  %v1268_v11 = vpop.permute.xlu0 %1267 }
 0x361   : > { %v1278_v52 = vpop.permute.xlu1 %1277 }
 0x362   : > { %v1242_v53 = vadd.f32 %v1241_v9, %v1233_v43 }
 0x364   : > { %v1251_v55 = vadd.f32 %v1250_v10, %v1242_v53 }
 0x365   : > { %v1298_v0 = vpop.permute.xlu0 %1297 }
 0x366   : > { %v1255_v47 = vrot.slane %v1251_v55, %v1674_v21  ;;  %v1265_v51 = vrot.slane %v1251_v55, %v1679_v25  ;;  %v1275_v57 = vrot.slane %v1251_v55, %v1687_v30  ;;  %v1288_v59 = vpop.permute.xlu1 %1287  ;;  %v1285_v63 = vrot.slane %v1251_v55, %v1694_v36  ;;  %v1476_v36 = vld [vmem:[%s1615_s18] sm:$0x3f] }
 0x367   : > { %v1295_v56 = vrot.slane %v1251_v55, %v1697_v39  ;;  %v1305_v30 = vrot.slane %v1251_v55, %v1703_v45 }
 0x368   : > { %v1261_v60 = vmul.f32 %v1259_v41, %v1255_v47  ;;  %v1270_v54 = vmul.f32 %v1268_v11, %v1265_v51  ;;  %v1280_v62 = vmul.f32 %v1278_v52, %v1275_v57  ;;  %v1290_v13 = vmul.f32 %v1288_v59, %v1285_v63 }
 0x369   : > { %v1300_v3 = vmul.f32 %v1298_v0, %v1295_v56 }
 0x36a   : > { %v1271_v61 = vadd.f32 %v1270_v54, %v1261_v60 }
 0x36b   : > { %v1308_v21 = vpop.permute.xlu1 %1307 }
 0x36c   : > { %v1281_v5 = vadd.f32 %v1280_v62, %v1271_v61  ;;  %v1310_v12 = vmul.f32 %v1308_v21, %v1305_v30 }
 0x36e   : > { %v1291_v25 = vadd.f32 %v1290_v13, %v1281_v5 }
 0x370   : > { %v1301_v15 = vadd.f32 %v1300_v3, %v1291_v25  ;;  %v1315_v2 = vpop.permute.xlu1 %1314 }
 0x372   : > { %v1311_v17 = vadd.f32 %v1310_v12, %v1301_v15 }
 0x374   : > { %v1317_v7 = vadd.f32 %v1315_v2, %v1311_v17 }
 0x376   : > { %v1318_v39 = vadd.f32 %v1476_v36, %v1317_v7 }
 0x378   : > { %1319 = vst [vmem:[%s543_s23] sm:$0x3f] %v1318_v39 }
 0x379 PF: > { %s27_s24 = sadd.s32 1, %s1483_s24  }
 0x37a   : > { %p24_p4 = scmp.ge.s32.totalorder %s27_s24, 4  }
 0x37c   :  { %26 = sbr.rel (!%p24_p4) target bundleno = 3 (0x3), region = 118 }

// kernel: _lambda_.5
= control target key start
LH: loop header
LB: loop body
LE: loop exit
PB: predicated region body
PF: predicated region fallthrough
CT: control target
= control target key end

     0   :  { %s1840_s21 = smov 0   ;;  %s2643_s0 = inlined_call_operand.vmem [shape: f32[2,14,256], index: 0, kind: input, shape index: {}]   ;;  %s2644_s1 = inlined_call_operand.vmem [shape: f32[8,256], index: 1, kind: input, shape index: {}]   ;;  %s2645_s2 = inlined_call_operand.vmem [shape: f32[14,9], index: 2, kind: input, shape index: {}]   ;;  %s2646_s3 = inlined_call_operand.vmem [shape: f32[6,14], index: 3, kind: input, shape index: {}]   ;;  %s2647_s4 = inlined_call_operand.vmem [shape: f32[6,1], index: 4, kind: input, shape index: {}, may-alias: {4,6}]   ;;  %s2648_s5 = inlined_call_operand.vmem [shape: f32[6,14], index: 5, kind: input, shape index: {}]   ;;  %s2649_s6 = inlined_call_operand.vmem [shape: f32[6,1], index: 6, kind: input, shape index: {}, may-alias: {4,6}]   ;;  %s2650_s7 = inlined_call_operand.vmem [shape: f32[6,9], index: 7, kind: input, shape index: {}]   ;;  %s2651_s8 = inlined_call_operand.vmem [shape: f32[3,6], index: 8, kind: input, shape index: {}]   ;;  %s2652_s9 = inlined_call_operand.vmem [shape: f32[3,1], index: 9, kind: input, shape index: {}, may-alias: {9,11}]   ;;  %s2653_s10 = inlined_call_operand.vmem [shape: f32[3,6], index: 10, kind: input, shape index: {}]   ;;  %s2654_s11 = inlined_call_operand.vmem [shape: f32[3,1], index: 11, kind: input, shape index: {}, may-alias: {9,11}]   ;;  %s2655_s12 = inlined_call_operand.vmem [shape: f32[2,3,256], index: 12, kind: output, shape index: {}]  }
   0x1 LB: > { %s1640_s22 = sadd.s32 4294967295, %s1751_s21   ;;  %p1644_p0 = scmp.ge.s32.totalorder %s1751_s21, 1  ;;  %s1751_s21 = sphi %s1840_s21, %s22_s21  }
   0x2   : > { %p362_p1 = scmp.lt.s32.totalorder %s1751_s21, 3 }
   0x4   : > { %p363_p2 = pnand %p1644_p0, %p362_p1 }
   0x6   : > { %366 = sbr.rel (%p363_p2) target bundleno = 594 (0x252), region = 68 }
   0xd   : > { %v1851_v0 = vld [vmem:[%s2645_s2] sm:$0xff]  ;;  %p404_p3 = scmp.lt.s32.totalorder %s1640_s22, 1  ;;  %v2671_v1 = vmov 4   ;;  %v2667_v2 = vmov 0   ;;  %v1861_v3 = vld [vmem:[%s2645_s2 + $0x8] sm:$0x3f]  ;;  %v446_v18 = vlaneseq }
   0xe   : > { %1683 = vset.pattern.permute.xlu0 %v2671_v1  ;;  %1685 = vset.pattern.permute.xlu1 %v2667_v2  ;;  %s1755_s13 = smov 17   ;;  %s1756_s14 = smov 16   ;;  %v2656_v8 = vmov 1   ;;  %v2665_v9 = vmov 3   ;;  %v2663_v10 = vmov 2   ;;  %v2662_v11 = vmov 6  }
   0xf   : > { %426 = vperm.xlu0 %1683, %v1851_v0   ;;  %s2699_s22 = smov (!%p404_p3, %s1640_s22), 1  ;;  %s1758_s15 = smov 15   ;;  %v2659_v12 = vmov 7   ;;  %v2660_v13 = vmov 5   ;;  %v1958_v14 = vld [vmem:[%s2646_s3] sm:$0x3f] }
  0x10   : > { %s1651_s27 = sshll.u32 %s2699_s22, 5  ;;  %s1760_s16 = smov 1   ;;  %v1967_v15 = vld [vmem:[%s2648_s5] sm:$0x3f]  ;;  %v2658_v16 = vmov 8   ;;  %v1770_v17 = vmov 11  }
  0x11   : > { %s1867_s30 = scalar_lea.vmem %s2643_s0, %s1651_s27  ;;  %s1762_s17 = smov 127   ;;  %v1771_v19 = vmov 13   ;;  %v2002_v21 = vshrl.u32 %v446_v18, 7  ;;  %v999_v22 = vld [vmem:[%s2649_s6] sm:$0x3f]  ;;  %v2009_v24 = vand.u32 127, %v446_v18 }
  0x12   : > { %v1871_v4 = vld [vmem:[%s1867_s30] sm:$0xff]  ;;  %v1876_v5 = vld [vmem:[%s1867_s30 + $0x8] sm:$0xff]  ;;  %v1879_v6 = vld [vmem:[%s1867_s30 + $0x10] sm:$0x3f]  ;;  %s1764_s18 = smov 113   ;;  %s1765_s19 = smov 112  }
  0x13   : > { %431 = vperm.xlu0 %1683, %v1861_v3   ;;  %438 = vrot.lane.b32.xlu1 %v1871_v4, %s1755_s13  ;;  %v1887_v7 = vld [vmem:[%s1867_s30 + $0x18] sm:$0x3f]  ;;  %s1768_s20 = smov 111   ;;  %v2012_v25 = vsub.s32 0, %v2002_v21  ;;  %v2017_v27 = vld [vmem:[%s2644_s1] sm:$0xff]  ;;  %v2022_v28 = vld [vmem:[%s2644_s1 + $0x8] sm:$0xff] }
  0x14   : > { %vm448_vm0 = vcmp.lt.s32.totalorder %v2009_v24, 17  ;;  %v2047_v43 = vsub.s32 1, %v2002_v21  ;;  %vm489_vm1 = vcmp.lt.s32.totalorder %v2009_v24, 16  ;;  %v1772_v57 = vmov 9  }
  0x15   : > { %v2030_v30 = vrot.slane %v2017_v27, %v2012_v25  ;;  %v2034_v31 = vrot.slane %v2022_v28, %v2012_v25  ;;  %vm571_vm2 = vcmp.lt.s32.totalorder %v2009_v24, 1  ;;  %vm530_vm3 = vcmp.lt.s32.totalorder %v2009_v24, 15 }
  0x16   : > { %v2062_v50 = vrot.slane %v2017_v27, %v2047_v43  ;;  %v2066_v51 = vrot.slane %v2022_v28, %v2047_v43  ;;  %vm612_vm4 = vcmp.lt.s32.totalorder %v2009_v24, 127  ;;  %vm653_vm5 = vcmp.lt.s32.totalorder %v2009_v24, 113 }
  0x17   : > { %442 = vrot.lane.b32.xlu0 %v1876_v5, %s1755_s13  ;;  %440 = vrot.lane.b32.xlu1 %v1879_v6, %s1755_s13  ;;  %2677 = vst [vmem:[#allocation2_spill] sm:$0xff] %v2030_v30  ;;  %2678 = vst [vmem:[#allocation3_spill] sm:$0xff] %v2034_v31  ;;  %vm694_vm6 = vcmp.lt.s32.totalorder %v2009_v24, 112  ;;  %vm735_vm7 = vcmp.lt.s32.totalorder %v2009_v24, 111 }
  0x18   : > { %1684 = vset.pattern.permute.xlu0 %v2667_v2  ;;  %2679 = vst [vmem:[#allocation4_spill] sm:$0xff] %v2062_v50  ;;  %2680 = vst [vmem:[#allocation5_spill] sm:$0xff] %v2066_v51 }
  0x1b   : > { %466 = vperm.xlu0 %1684, %v1851_v0   ;;  %444 = vrot.lane.b32.xlu1 %v1887_v7, %s1755_s13 }
  0x1f   : > { %483 = vrot.lane.b32.xlu0 %v1879_v6, %s1756_s14  ;;  %470 = vperm.xlu1 %1685, %v1861_v3  }
  0x20   : > { %1687 = vset.pattern.permute.xlu0 %v2656_v8 }
  0x23   : > { %487 = vrot.lane.b32.xlu0 %v1887_v7, %s1756_s14  ;;  %481 = vrot.lane.b32.xlu1 %v1871_v4, %s1756_s14 }
  0x24   : > { %1686 = vset.pattern.permute.xlu1 %v2656_v8 }
  0x27   : > { %511 = vperm.xlu0 %1687, %v1861_v3   ;;  %485 = vrot.lane.b32.xlu1 %v1876_v5, %s1756_s14 }
  0x2b   : > { %526 = vrot.lane.b32.xlu0 %v1876_v5, %s1758_s15  ;;  %507 = vperm.xlu1 %1686, %v1851_v0  }
  0x2c   : > { %1690 = vset.pattern.permute.xlu0 %v2665_v9 }
  0x2f   : > { %565 = vrot.lane.b32.xlu0 %v1879_v6, %s1760_s16  ;;  %522 = vrot.lane.b32.xlu1 %v1871_v4, %s1758_s15 }
  0x30   : > { %1688 = vset.pattern.permute.xlu1 %v2663_v10 }
  0x33   : > { %569 = vrot.lane.b32.xlu0 %v1887_v7, %s1760_s16  ;;  %524 = vrot.lane.b32.xlu1 %v1879_v6, %s1758_s15 }
  0x37   : > { %593 = vperm.xlu0 %1690, %v1861_v3   ;;  %528 = vrot.lane.b32.xlu1 %v1887_v7, %s1758_s15 }
  0x3b   : > { %608 = vrot.lane.b32.xlu0 %v1876_v5, %s1762_s17  ;;  %552 = vperm.xlu1 %1688, %v1861_v3  }
  0x3c   : > { %1693 = vset.pattern.permute.xlu0 %v2662_v11 }
  0x3f   : > { %647 = vrot.lane.b32.xlu0 %v1879_v6, %s1764_s18  ;;  %563 = vrot.lane.b32.xlu1 %v1871_v4, %s1760_s16 }
  0x40   : > { %1689 = vset.pattern.permute.xlu1 %v2665_v9 }
  0x43   : > { %651 = vrot.lane.b32.xlu0 %v1887_v7, %s1764_s18  ;;  %567 = vrot.lane.b32.xlu1 %v1876_v5, %s1760_s16 }
  0x47   : > { %675 = vperm.xlu0 %1693, %v1861_v3   ;;  %589 = vperm.xlu1 %1689, %v1851_v0  }
  0x4b   : > { %690 = vrot.lane.b32.xlu0 %v1876_v5, %s1765_s19  ;;  %604 = vrot.lane.b32.xlu1 %v1871_v4, %s1762_s17 }
  0x4c   : > { %1694 = vset.pattern.permute.xlu0 %v2659_v12  ;;  %1691 = vset.pattern.permute.xlu1 %v2660_v13 }
  0x4f   : > { %712 = vperm.xlu0 %1694, %v1851_v0   ;;  %606 = vrot.lane.b32.xlu1 %v1879_v6, %s1762_s17 }
  0x53   : > { %1695 = vset.pattern.permute.xlu0 %v2663_v10  ;;  %610 = vrot.lane.b32.xlu1 %v1887_v7, %s1762_s17 }
  0x54   : > { %548 = vperm.xlu0 %1695, %v1851_v0  }
  0x57   : > { %634 = vperm.xlu1 %1691, %v1861_v3  }
  0x58   : > { %729 = vrot.lane.b32.xlu0 %v1879_v6, %s1768_s20 }
  0x5b   : > { %645 = vrot.lane.b32.xlu1 %v1871_v4, %s1764_s18 }
  0x5c   : > { %733 = vrot.lane.b32.xlu0 %v1887_v7, %s1768_s20  ;;  %1692 = vset.pattern.permute.xlu1 %v2662_v11 }
  0x5f   : > { %649 = vrot.lane.b32.xlu1 %v1876_v5, %s1764_s18 }
  0x60   : > { %808 = vperm.xlu0 %1695, %v1958_v14  }
  0x63   : > { %671 = vperm.xlu1 %1692, %v1851_v0  }
  0x64   : > { %1040 = vperm.xlu0 %1695, %v1967_v15  }
  0x67   : > { %686 = vrot.lane.b32.xlu1 %v1871_v4, %s1765_s19 }
  0x68   : > { %1708 = vset.pattern.permute.xlu0 %v2660_v13  ;;  %1696 = vset.pattern.permute.xlu1 %v2659_v12 }
  0x69   : > { %630 = vperm.xlu0 %1708, %v1851_v0  }
  0x6b   : > { %688 = vrot.lane.b32.xlu1 %v1879_v6, %s1765_s19 }
  0x6d   : > { %856 = vperm.xlu0 %1708, %v1958_v14  }
  0x6f   : > { %692 = vrot.lane.b32.xlu1 %v1887_v7, %s1765_s19 }
  0x71   : > { %1088 = vperm.xlu0 %1708, %v1967_v15  }
  0x73   : > { %716 = vperm.xlu1 %1696, %v1861_v3  }
  0x75   : > { %1711 = vset.pattern.permute.xlu0 %v2658_v16 }
  0x76   : > { %757 = vperm.xlu0 %1711, %v1861_v3  }
  0x77   : > { %727 = vrot.lane.b32.xlu1 %v1871_v4, %s1768_s20 }
  0x78   : > { %1697 = vset.pattern.permute.xlu1 %v2658_v16 }
  0x7a   : > { %904 = vperm.xlu0 %1711, %v1958_v14  }
  0x7b   : > { %731 = vrot.lane.b32.xlu1 %v1876_v5, %s1768_s20 }
  0x7e   : > { %1136 = vperm.xlu0 %1711, %v1967_v15  }
  0x7f   : > { %753 = vperm.xlu1 %1697, %v1851_v0  }
  0x82   : > { %1714 = vset.pattern.permute.xlu0 %v1770_v17 }
  0x83   : > { %952 = vperm.xlu0 %1714, %v1958_v14   ;;  %1698 = vset.pattern.permute.xlu1 %v2667_v2 }
  0x84   : > { %778 = vperm.xlu1 %1698, %v1958_v14  }
  0x85   : > { %v439_v23 = vpop.permute.xlu1 %438 }
  0x87   : > { %1184 = vperm.xlu0 %1714, %v1967_v15  }
  0x88   : > { %1699 = vset.pattern.permute.xlu1 %v2656_v8 }
  0x89   : > { %792 = vperm.xlu1 %1699, %v1958_v14   ;;  %v441_v29 = vpop.permute.xlu1 %440 }
  0x8b   : > { %1718 = vset.pattern.permute.xlu0 %v1771_v19 }
  0x8c   : > { %984 = vperm.xlu0 %1718, %v1958_v14  }
  0x8d   : > { %1700 = vset.pattern.permute.xlu1 %v2665_v9  ;;  %v445_v40 = vpop.permute.xlu1 %444 }
  0x8e   : > { %v427_v20 = vpop.permute.xlu0 %426  ;;  %824 = vperm.xlu1 %1700, %v1958_v14   ;;  %v450_v46 = vsel %vm448_vm0, %v441_v29, %v445_v40  ;;  %v452_v47 = vsel %vm448_vm0, %v445_v40, %v441_v29  ;;  %v2100_v40 = vsub.s32 2, %v2002_v21 }
  0x8f   : > { %v434_v37 = vmul.f32 %v427_v20, %v1871_v4  ;;  %v435_v38 = vmul.f32 %v427_v20, %v1876_v5  ;;  %v463_v52 = vmul.f32 %v2030_v30, %v452_v47  ;;  %v464_v53 = vmul.f32 %v2034_v31, %v450_v46 }
  0x90   : > { %1721 = vset.pattern.permute.xlu0 %v2667_v2 }
  0x91   : > { %1225 = vperm.xlu0 %1721, %v999_v22  }
  0x92   : > { %v432_v26 = vpop.permute.xlu0 %431  ;;  %1701 = vset.pattern.permute.xlu1 %v2671_v1 }
  0x93   : > { %840 = vperm.xlu1 %1701, %v1958_v14   ;;  %v436_v54 = vmul.f32 %v432_v26, %v1879_v6  ;;  %v437_v55 = vmul.f32 %v432_v26, %v1887_v7 }
  0x95   : > { %1724 = vset.pattern.permute.xlu0 %v2656_v8 }
  0x96   : > { %v443_v32 = vpop.permute.xlu0 %442 }
  0x97   : > { %v449_v33 = vsel %vm448_vm0, %v439_v23, %v443_v32  ;;  %v451_v34 = vsel %vm448_vm0, %v443_v32, %v439_v23  ;;  %1702 = vset.pattern.permute.xlu1 %v2662_v11  ;;  %v1773_v23 = vmov 10  }
  0x98   : > { %v461_v35 = vmul.f32 %v2030_v30, %v451_v34  ;;  %v462_v36 = vmul.f32 %v2034_v31, %v449_v33  ;;  %872 = vperm.xlu1 %1702, %v1958_v14  }
  0x9a   : > { %v467_v39 = vpop.permute.xlu0 %466 }
  0x9b   : > { %v473_v41 = vmul.f32 %v467_v39, %v461_v35  ;;  %v474_v42 = vmul.f32 %v467_v39, %v462_v36 }
  0x9c   : > { %1703 = vset.pattern.permute.xlu1 %v2659_v12 }
  0x9d   : > { %v2049_v44 = vadd.f32 %v473_v41, %v434_v37  ;;  %v2051_v45 = vadd.f32 %v474_v42, %v435_v38  ;;  %888 = vperm.xlu1 %1703, %v1958_v14   ;;  %v2094_v37 = vsub.s32 3, %v2002_v21 }
  0x9e   : > { %v484_v48 = vpop.permute.xlu0 %483  ;;  %v471_v49 = vpop.permute.xlu1 %470 }
  0x9f   : > { %v475_v58 = vmul.f32 %v471_v49, %v463_v52  ;;  %v476_v59 = vmul.f32 %v471_v49, %v464_v53  ;;  %v2104_v41 = vrot.slane %v2017_v27, %v2094_v37  ;;  %v2108_v42 = vrot.slane %v2022_v28, %v2094_v37 }
  0xa0   : > { %v2119_v49 = vrot.slane %v2017_v27, %v2100_v40  ;;  %v2123_v52 = vrot.slane %v2022_v28, %v2100_v40 }
  0xa1   : > { %1704 = vset.pattern.permute.xlu1 %v1772_v57  ;;  %v479_v17 = vadd.f32 %v475_v58, %v436_v54  ;;  %v480_v18 = vadd.f32 %v476_v59, %v437_v55 }
  0xa2   : > { %v488_v56 = vpop.permute.xlu0 %487  ;;  %920 = vperm.xlu1 %1704, %v1958_v14   ;;  %v2078_v62 = vpop.permute.xlu1 %481  ;;  %2681 = vst [vmem:[#allocation6_spill] sm:$0xff] %v2119_v49  ;;  %2682 = vst [vmem:[#allocation7_spill] sm:$0xff] %v2123_v52 }
  0xa3   : > { %v491_v60 = vsel %vm489_vm1, %v484_v48, %v488_v56  ;;  %v493_v61 = vsel %vm489_vm1, %v488_v56, %v484_v48 }
  0xa4   : > { %v504_v63 = vmul.f32 %v2062_v50, %v493_v61  ;;  %v505_v0 = vmul.f32 %v2066_v51, %v491_v60 }
  0xa6   : > { %v512_v3 = vpop.permute.xlu0 %511  ;;  %1705 = vset.pattern.permute.xlu1 %v1773_v23  ;;  %v2082_v26 = vpop.permute.xlu1 %485 }
  0xa7   : > { %v516_v20 = vmul.f32 %v512_v3, %v504_v63  ;;  %v517_v22 = vmul.f32 %v512_v3, %v505_v0  ;;  %936 = vperm.xlu1 %1705, %v1958_v14  }
  0xa9   : > { %v520_v29 = vadd.f32 %v516_v20, %v479_v17  ;;  %v521_v32 = vadd.f32 %v517_v22, %v480_v18 }
  0xaa   : > { %v2085_v33 = vpop.permute.xlu0 %526  ;;  %v2087_v34 = vpop.permute.xlu1 %507 }
  0xab   : > { %1706 = vset.pattern.permute.xlu1 %v2667_v2 }
  0xac   : > { %1010 = vperm.xlu1 %1706, %v1967_v15  }
  0xae   : > { %v566_v35 = vpop.permute.xlu0 %565  ;;  %v2091_v36 = vpop.permute.xlu1 %522 }
  0xb0   : > { %1707 = vset.pattern.permute.xlu1 %v2656_v8 }
  0xb1   : > { %1024 = vperm.xlu1 %1707, %v1967_v15  }
  0xb2   : > { %v570_v38 = vpop.permute.xlu0 %569  ;;  %v525_v39 = vpop.permute.xlu1 %524 }
  0xb3   : > { %v573_v46 = vsel %vm571_vm2, %v566_v35, %v570_v38  ;;  %v575_v47 = vsel %vm571_vm2, %v570_v38, %v566_v35 }
  0xb4   : > { %v586_v54 = vmul.f32 %v2104_v41, %v575_v47  ;;  %v587_v55 = vmul.f32 %v2108_v42, %v573_v46 }
  0xb5   : > { %1709 = vset.pattern.permute.xlu1 %v2665_v9 }
  0xb6   : > { %v594_v48 = vpop.permute.xlu0 %593  ;;  %1056 = vperm.xlu1 %1709, %v1967_v15   ;;  %v529_v53 = vpop.permute.xlu1 %528 }
  0xb7   : > { %v532_v56 = vsel %vm530_vm3, %v525_v39, %v529_v53  ;;  %v534_v58 = vsel %vm530_vm3, %v529_v53, %v525_v39  ;;  %v598_v0 = vmul.f32 %v594_v48, %v586_v54  ;;  %v599_v3 = vmul.f32 %v594_v48, %v587_v55 }
  0xb8   : > { %v545_v59 = vmul.f32 %v2119_v49, %v534_v58  ;;  %v546_v60 = vmul.f32 %v2123_v52, %v532_v56 }
  0xba   : > { %v2133_v61 = vpop.permute.xlu0 %608  ;;  %1710 = vset.pattern.permute.xlu1 %v2671_v1  ;;  %v553_v63 = vpop.permute.xlu1 %552 }
  0xbb   : > { %v557_v17 = vmul.f32 %v553_v63, %v545_v59  ;;  %v558_v18 = vmul.f32 %v553_v63, %v546_v60  ;;  %1072 = vperm.xlu1 %1710, %v1967_v15   ;;  %v1774_v60 = vmov 12  }
  0xbd   : > { %v561_v20 = vadd.f32 %v557_v17, %v520_v29  ;;  %v562_v22 = vadd.f32 %v558_v18, %v521_v32  ;;  %v423_v17 = vld [vmem:[%s2647_s4] sm:$0x3f]  ;;  %v490_v18 = vsel %vm489_vm1, %v2078_v62, %v2082_v26 }
  0xbe   : > { %v648_v35 = vpop.permute.xlu0 %647  ;;  %v2137_v38 = vpop.permute.xlu1 %563 }
  0xbf   : > { %1712 = vset.pattern.permute.xlu1 %v2662_v11  ;;  %v2140_v39 = vadd.f32 %v598_v0, %v561_v20  ;;  %v2142_v46 = vadd.f32 %v599_v3, %v562_v22 }
  0xc0   : > { %1104 = vperm.xlu1 %1712, %v1967_v15  }
  0xc2   : > { %v652_v47 = vpop.permute.xlu0 %651  ;;  %v2145_v53 = vpop.permute.xlu1 %567 }
  0xc3   : > { %v655_v13 = vsel %vm653_vm5, %v648_v35, %v652_v47  ;;  %v657_v11 = vsel %vm653_vm5, %v652_v47, %v648_v35 }
  0xc4   : > { %1713 = vset.pattern.permute.xlu1 %v2659_v12  ;;  %v2215_v12 = vld [vmem:[%s2650_s7] sm:$0x3f] }
  0xc5   : > { %1120 = vperm.xlu1 %1713, %v1967_v15  }
  0xc6   : > { %v2149_v29 = vpop.permute.xlu0 %675  ;;  %v2151_v32 = vpop.permute.xlu1 %589 }
  0xc9   : > { %1715 = vset.pattern.permute.xlu1 %v1772_v57 }
  0xca   : > { %v2154_v48 = vpop.permute.xlu0 %690  ;;  %1152 = vperm.xlu1 %1715, %v1967_v15   ;;  %v2157_v54 = vpop.permute.xlu1 %604 }
  0xcb   : > { %v613_v30 = vsel %vm612_vm4, %v2157_v54, %v2133_v61 }
  0xce   : > { %v2159_v55 = vpop.permute.xlu0 %712  ;;  %1716 = vset.pattern.permute.xlu1 %v1773_v23  ;;  %v607_v56 = vpop.permute.xlu1 %606 }
  0xcf   : > { %1168 = vperm.xlu1 %1716, %v1967_v15  }
  0xd2   : > { %v611_v59 = vpop.permute.xlu1 %610 }
  0xd3   : > { %v549_v58 = vpop.permute.xlu0 %548  ;;  %1717 = vset.pattern.permute.xlu1 %v1774_v60  ;;  %v614_v22 = vsel %vm612_vm4, %v607_v56, %v611_v59  ;;  %v616_v60 = vsel %vm612_vm4, %v611_v59, %v607_v56  ;;  %v531_v56 = vsel %vm530_vm3, %v2091_v36, %v2085_v33  ;;  %v533_v59 = vsel %vm530_vm3, %v2085_v33, %v2091_v36 }
  0xd4   : > { %968 = vperm.xlu1 %1717, %v1958_v14   ;;  %v2178_v14 = vsub.s32 4, %v2002_v21  ;;  %v2241_v33 = vsub.s32 6, %v2002_v21  ;;  %v543_v47 = vmul.f32 %v2119_v49, %v533_v59  ;;  %v2683_v59 = vmov 0  }
  0xd6   : > { %v635_v63 = vpop.permute.xlu1 %634  ;;  %v2204_v8 = vrot.slane %v2017_v27, %v2178_v14 }
  0xd7   : > { %v2163_v57 = vpop.permute.xlu0 %729 }
  0xd8   : > { %1200 = vperm.xlu1 %1717, %v1967_v15   ;;  %v627_v10 = vmul.f32 %v2204_v8, %v614_v22  ;;  %v544_v22 = vmul.f32 %v2123_v52, %v531_v56  ;;  %v2267_v56 = vrot.slane %v2022_v28, %v2241_v33 }
  0xda   : > { %v2166_v0 = vpop.permute.xlu1 %645 }
  0xdb   : > { %v2170_v23 = vpop.permute.xlu0 %733 }
  0xdc   : > { %1719 = vset.pattern.permute.xlu1 %v1771_v19  ;;  %v2189_v19 = vsub.s32 5, %v2002_v21 }
  0xdd   : > { %1216 = vperm.xlu1 %1719, %v1967_v15   ;;  %v492_v15 = vsel %vm489_vm1, %v2082_v26, %v2078_v62  ;;  %v503_v26 = vmul.f32 %v2066_v51, %v490_v18 }
  0xde   : > { %v2172_v3 = vpop.permute.xlu1 %649  ;;  %v502_v62 = vmul.f32 %v2062_v50, %v492_v15  ;;  %v2227_v18 = vrot.slane %v2017_v27, %v2189_v19  ;;  %v2231_v15 = vrot.slane %v2022_v28, %v2189_v19 }
  0xdf   : > { %v2210_v16 = vpop.permute.xlu0 %808  ;;  %v515_v51 = vmul.f32 %v2087_v34, %v503_v26 }
  0xe0   : > { %v514_v36 = vmul.f32 %v2087_v34, %v502_v62  ;;  %v668_v50 = vmul.f32 %v2227_v18, %v655_v13  ;;  %v669_v35 = vmul.f32 %v2231_v15, %v657_v11  ;;  %v574_v62 = vsel %vm571_vm2, %v2145_v53, %v2137_v38 }
  0xe1   : > { %1720 = vset.pattern.permute.xlu1 %v2667_v2  ;;  %v2263_v11 = vrot.slane %v2017_v27, %v2241_v33 }
  0xe2   : > { %993 = vperm.xlu1 %1720, %v423_v17   ;;  %v2193_v20 = vpop.permute.xlu1 %671  ;;  %v2208_v17 = vrot.slane %v2022_v28, %v2178_v14  ;;  %v518_v52 = vadd.f32 %v514_v36, %v2049_v44  ;;  %v680_v49 = vmul.f32 %v2149_v29, %v668_v50  ;;  %v681_v31 = vmul.f32 %v2149_v29, %v669_v35 }
  0xe3   : > { %v2258_v26 = vpop.permute.xlu0 %1040  ;;  %v615_v44 = vsel %vm612_vm4, %v2133_v61, %v2157_v54  ;;  %v654_v54 = vsel %vm653_vm5, %v2166_v0, %v2172_v3 }
  0xe4   : > { %v628_v9 = vmul.f32 %v2208_v17, %v616_v60  ;;  %v572_v60 = vsel %vm571_vm2, %v2137_v38, %v2145_v53  ;;  %v556_v38 = vmul.f32 %v549_v58, %v544_v22  ;;  %v584_v53 = vmul.f32 %v2104_v41, %v574_v62 }
  0xe6   : > { %v687_v2 = vpop.permute.xlu1 %686  ;;  %1722 = vset.pattern.permute.xlu1 %v2671_v1  ;;  %v639_v1 = vmul.f32 %v635_v63, %v627_v10  ;;  %v640_v34 = vmul.f32 %v635_v63, %v628_v9  ;;  %v519_v10 = vadd.f32 %v515_v51, %v2051_v45  ;;  %v555_v9 = vmul.f32 %v549_v58, %v543_v47 }
  0xe7   : > { %1239 = vperm.xlu1 %1722, %v2215_v12   ;;  %v585_v63 = vmul.f32 %v2108_v42, %v572_v60  ;;  %v596_v61 = vmul.f32 %v2151_v32, %v584_v53 }
  0xe8   : > { %v643_v45 = vadd.f32 %v639_v1, %v2140_v39  ;;  %v644_v51 = vadd.f32 %v640_v34, %v2142_v46  ;;  %v559_v36 = vadd.f32 %v555_v9, %v518_v52  ;;  %v560_v35 = vadd.f32 %v556_v38, %v519_v10  ;;  %v631_v47 = vpop.permute.xlu0 %630 }
  0xe9   : > { %v597_v1 = vmul.f32 %v2151_v32, %v585_v63  ;;  %v625_v39 = vmul.f32 %v2204_v8, %v613_v30  ;;  %v626_v46 = vmul.f32 %v2208_v17, %v615_v44  ;;  %v656_v52 = vsel %vm653_vm5, %v2172_v3, %v2166_v0 }
  0xea   : > { %v689_v13 = vpop.permute.xlu1 %688  ;;  %v684_v62 = vadd.f32 %v680_v49, %v643_v45  ;;  %v685_v34 = vadd.f32 %v681_v31, %v644_v51  ;;  %v600_v30 = vadd.f32 %v596_v61, %v559_v36  ;;  %v666_v63 = vmul.f32 %v2227_v18, %v654_v54 }
  0xeb   : > { %1723 = vset.pattern.permute.xlu1 %v2683_v59  ;;  %v637_v10 = vmul.f32 %v631_v47, %v625_v39  ;;  %v638_v9 = vmul.f32 %v631_v47, %v626_v46  ;;  %v601_v53 = vadd.f32 %v597_v1, %v560_v35  ;;  %v667_v44 = vmul.f32 %v2231_v15, %v656_v52 }
  0xec   : > { %v695_v31 = vsel %vm694_vm6, %v687_v2, %v2154_v48  ;;  %v697_v49 = vsel %vm694_vm6, %v2154_v48, %v687_v2  ;;  %v678_v51 = vmul.f32 %v2193_v20, %v666_v63 }
  0xed   : > { %v641_v3 = vadd.f32 %v637_v10, %v600_v30  ;;  %v642_v45 = vadd.f32 %v638_v9, %v601_v53  ;;  %v679_v36 = vmul.f32 %v2193_v20, %v667_v44  ;;  %v707_v35 = vmul.f32 %v2263_v11, %v695_v31  ;;  %v857_v9 = vpop.permute.xlu0 %856 }
  0xee   : > { %v693_v58 = vpop.permute.xlu1 %692 }
  0xef   : > { %v696_v50 = vsel %vm694_vm6, %v689_v13, %v693_v58  ;;  %v698_v29 = vsel %vm694_vm6, %v693_v58, %v689_v13 }
  0xf0   : > { %v709_v22 = vmul.f32 %v2263_v11, %v696_v50  ;;  %v710_v60 = vmul.f32 %v2267_v56, %v698_v29  ;;  %v2311_v29 = vsub.s32 7, %v2002_v21  ;;  %v708_v21 = vmul.f32 %v2267_v56, %v697_v49 }
  0xf1   : > { %v2356_v49 = vpop.permute.xlu0 %1088 }
  0xf2   : > { %v717_v13 = vpop.permute.xlu1 %716  ;;  %v2326_v47 = vrot.slane %v2017_v27, %v2311_v29  ;;  %v2330_v2 = vrot.slane %v2022_v28, %v2311_v29  ;;  %v719_v27 = vmul.f32 %v2159_v55, %v707_v35  ;;  %v720_v46 = vmul.f32 %v2159_v55, %v708_v21 }
  0xf3   : > { %v721_v32 = vmul.f32 %v717_v13, %v709_v22  ;;  %v722_v38 = vmul.f32 %v717_v13, %v710_v60  ;;  %v682_v22 = vadd.f32 %v678_v51, %v641_v3  ;;  %v683_v60 = vadd.f32 %v679_v36, %v642_v45 }
  0xf4   : > { %v737_v36 = vsel %vm735_vm7, %v2163_v57, %v2170_v23  ;;  %v739_v35 = vsel %vm735_vm7, %v2170_v23, %v2163_v57 }
  0xf5   : > { %v2306_v58 = vadd.f32 %v721_v32, %v684_v62  ;;  %v2308_v50 = vadd.f32 %v722_v38, %v685_v34  ;;  %v723_v28 = vadd.f32 %v719_v27, %v682_v22  ;;  %v724_v52 = vadd.f32 %v720_v46, %v683_v60  ;;  %v758_v46 = vpop.permute.xlu0 %757 }
  0xf6   : > { %v728_v0 = vpop.permute.xlu1 %727  ;;  %v751_v27 = vmul.f32 %v2330_v2, %v739_v35 }
  0xfa   : > { %v732_v48 = vpop.permute.xlu1 %731 }
  0xfb   : > { %v736_v20 = vsel %vm735_vm7, %v728_v0, %v732_v48  ;;  %v738_v61 = vsel %vm735_vm7, %v732_v48, %v728_v0 }
  0xfc   : > { %v748_v1 = vmul.f32 %v2326_v47, %v736_v20  ;;  %v749_v39 = vmul.f32 %v2330_v2, %v738_v61 }
  0xfe   : > { %v754_v54 = vpop.permute.xlu1 %753 }
  0xff   : > { %v760_v62 = vmul.f32 %v754_v54, %v748_v1  ;;  %v761_v34 = vmul.f32 %v754_v54, %v749_v39  ;;  %v750_v39 = vmul.f32 %v2326_v47, %v737_v36 }
 0x101   : > { %v2340_v13 = vadd.f32 %v760_v62, %v723_v28  ;;  %v2342_v10 = vadd.f32 %v761_v34, %v724_v52  ;;  %v762_v34 = vmul.f32 %v758_v46, %v750_v39 }
 0x103   : > { %v779_v32 = vpop.permute.xlu1 %778  ;;  %v775_v38 = vrot.slane %v2342_v10, %v2012_v25  ;;  %v771_v30 = vrot.slane %v2340_v13, %v2012_v25  ;;  %v790_v55 = vrot.slane %v2342_v10, %v2047_v43  ;;  %v786_v53 = vrot.slane %v2340_v13, %v2047_v43 }
 0x104   : > { %v806_v44 = vrot.slane %v2342_v10, %v2100_v40  ;;  %v802_v31 = vrot.slane %v2340_v13, %v2100_v40  ;;  %v822_v60 = vrot.slane %v2342_v10, %v2094_v37  ;;  %v818_v1 = vrot.slane %v2340_v13, %v2094_v37 }
 0x105   : > { %v781_v0 = vmul.f32 %v779_v32, %v771_v30  ;;  %v782_v3 = vmul.f32 %v779_v32, %v775_v38  ;;  %v838_v52 = vrot.slane %v2342_v10, %v2178_v14  ;;  %v834_v62 = vrot.slane %v2340_v13, %v2178_v14 }
 0x106   : > { %v812_v22 = vmul.f32 %v2210_v16, %v806_v44  ;;  %v811_v61 = vmul.f32 %v2210_v16, %v802_v31  ;;  %v763_v16 = vmul.f32 %v758_v46, %v751_v27  ;;  %v854_v38 = vrot.slane %v2342_v10, %v2189_v19 }
 0x107   : > { %v850_v30 = vrot.slane %v2340_v13, %v2189_v19  ;;  %v870_v36 = vrot.slane %v2342_v10, %v2241_v33  ;;  %v886_v39 = vrot.slane %v2342_v10, %v2311_v29 }
 0x108   : > { %v793_v63 = vpop.permute.xlu1 %792 }
 0x109   : > { %v795_v45 = vmul.f32 %v793_v63, %v786_v53  ;;  %v796_v51 = vmul.f32 %v793_v63, %v790_v55 }
 0x10b   : > { %v797_v21 = vadd.f32 %v795_v45, %v781_v0  ;;  %v798_v48 = vadd.f32 %v796_v51, %v782_v3  ;;  %v2383_v3 = vadd.f32 %v762_v34, %v2306_v58  ;;  %v2386_v45 = vadd.f32 %v763_v16, %v2308_v50 }
 0x10c   : > { %v860_v51 = vmul.f32 %v857_v9, %v854_v38 }
 0x10d   : > { %v825_v20 = vpop.permute.xlu1 %824  ;;  %v814_v54 = vadd.f32 %v812_v22, %v798_v48  ;;  %v813_v57 = vadd.f32 %v811_v61, %v797_v21  ;;  %v859_v21 = vmul.f32 %v857_v9, %v850_v30  ;;  %v866_v48 = vrot.slane %v2340_v13, %v2241_v33 }
 0x10e   : > { %v827_v23 = vmul.f32 %v825_v20, %v818_v1  ;;  %v828_v28 = vmul.f32 %v825_v20, %v822_v60  ;;  %v905_v1 = vpop.permute.xlu0 %904  ;;  %v898_v58 = vrot.slane %v2383_v3, %v2012_v25  ;;  %v902_v50 = vrot.slane %v2386_v45, %v2012_v25 }
 0x10f   : > { %v882_v9 = vrot.slane %v2340_v13, %v2311_v29  ;;  %v918_v10 = vrot.slane %v2386_v45, %v2047_v43 }
 0x110   : > { %v829_v55 = vadd.f32 %v827_v23, %v813_v57  ;;  %v830_v53 = vadd.f32 %v828_v28, %v814_v54  ;;  %v907_v28 = vmul.f32 %v905_v1, %v898_v58 }
 0x112   : > { %v841_v32 = vpop.permute.xlu1 %840  ;;  %v2400_v16 = vpop.permute.xlu0 %1136 }
 0x113   : > { %v843_v63 = vmul.f32 %v841_v32, %v834_v62  ;;  %v844_v44 = vmul.f32 %v841_v32, %v838_v52  ;;  %v908_v52 = vmul.f32 %v905_v1, %v902_v50  ;;  %v914_v32 = vrot.slane %v2383_v3, %v2047_v43 }
 0x115   : > { %v845_v31 = vadd.f32 %v843_v63, %v829_v55  ;;  %v846_v0 = vadd.f32 %v844_v44, %v830_v53 }
 0x117   : > { %v873_v35 = vpop.permute.xlu1 %872  ;;  %v862_v22 = vadd.f32 %v860_v51, %v846_v0  ;;  %v861_v60 = vadd.f32 %v859_v21, %v845_v31  ;;  %v930_v31 = vrot.slane %v2383_v3, %v2100_v40  ;;  %v934_v0 = vrot.slane %v2386_v45, %v2100_v40  ;;  %v953_v51 = vpop.permute.xlu0 %952 }
 0x118   : > { %v875_v20 = vmul.f32 %v873_v35, %v866_v48  ;;  %v876_v61 = vmul.f32 %v873_v35, %v870_v36  ;;  %v946_v35 = vrot.slane %v2383_v3, %v2094_v37  ;;  %v950_v21 = vrot.slane %v2386_v45, %v2094_v37 }
 0x11a   : > { %v877_v46 = vadd.f32 %v875_v20, %v861_v60  ;;  %v878_v54 = vadd.f32 %v876_v61, %v862_v22  ;;  %v955_v60 = vmul.f32 %v953_v51, %v946_v35  ;;  %v956_v20 = vmul.f32 %v953_v51, %v950_v21 }
 0x11c   : > { %v889_v27 = vpop.permute.xlu1 %888 }
 0x11d   : > { %v891_v57 = vmul.f32 %v889_v27, %v882_v9  ;;  %v892_v23 = vmul.f32 %v889_v27, %v886_v39  ;;  %v1022_v27 = vrot.slane %v1876_v5, %v2047_v43 }
 0x11f   : > { %v893_v62 = vadd.f32 %v891_v57, %v877_v46  ;;  %v894_v34 = vadd.f32 %v892_v23, %v878_v54  ;;  %v1018_v46 = vrot.slane %v1871_v4, %v2047_v43  ;;  %v1007_v54 = vrot.slane %v1876_v5, %v2012_v25 }
 0x120   : > { %v1003_v57 = vrot.slane %v1871_v4, %v2012_v25 }
 0x121   : > { %v910_v38 = vadd.f32 %v908_v52, %v894_v34  ;;  %v921_v30 = vpop.permute.xlu1 %920  ;;  %v909_v13 = vadd.f32 %v907_v28, %v893_v62  ;;  %v1034_v62 = vrot.slane %v1871_v4, %v2100_v40  ;;  %v1038_v34 = vrot.slane %v1876_v5, %v2100_v40 }
 0x122   : > { %v923_v55 = vmul.f32 %v921_v30, %v914_v32  ;;  %v924_v53 = vmul.f32 %v921_v30, %v918_v10 }
 0x124   : > { %v925_v63 = vadd.f32 %v923_v55, %v909_v13  ;;  %v926_v44 = vadd.f32 %v924_v53, %v910_v38  ;;  %v1054_v13 = vrot.slane %v1876_v5, %v2094_v37  ;;  %v1050_v55 = vrot.slane %v1871_v4, %v2094_v37 }
 0x126   : > { %v937_v36 = vpop.permute.xlu1 %936 }
 0x127   : > { %v939_v48 = vmul.f32 %v937_v36, %v930_v31  ;;  %v940_v22 = vmul.f32 %v937_v36, %v934_v0  ;;  %v1070_v31 = vrot.slane %v1876_v5, %v2178_v14  ;;  %v1066_v0 = vrot.slane %v1871_v4, %v2178_v14 }
 0x129   : > { %v941_v61 = vadd.f32 %v939_v48, %v925_v63  ;;  %v942_v1 = vadd.f32 %v940_v22, %v926_v44  ;;  %v1043_v63 = vmul.f32 %v2258_v26, %v1034_v62  ;;  %v1044_v44 = vmul.f32 %v2258_v26, %v1038_v34 }
 0x12b   : > { %v1011_v58 = vpop.permute.xlu1 %1010  ;;  %v2414_v50 = vadd.f32 %v956_v20, %v942_v1  ;;  %v2416_v39 = vadd.f32 %v955_v60, %v941_v61  ;;  %v1082_v20 = vrot.slane %v1871_v4, %v2189_v19  ;;  %v1086_v61 = vrot.slane %v1876_v5, %v2189_v19 }
 0x12c   : > { %v1013_v32 = vmul.f32 %v1011_v58, %v1003_v57  ;;  %v1014_v10 = vmul.f32 %v1011_v58, %v1007_v54 }
 0x12d   : > { %v1091_v57 = vmul.f32 %v2356_v49, %v1082_v20  ;;  %v962_v20 = vrot.slane %v2383_v3, %v2178_v14 }
 0x130   : > { %v1025_v9 = vpop.permute.xlu1 %1024 }
 0x131   : > { %v1027_v23 = vmul.f32 %v1025_v9, %v1018_v46  ;;  %v1028_v28 = vmul.f32 %v1025_v9, %v1022_v27  ;;  %v1102_v27 = vrot.slane %v1876_v5, %v2241_v33  ;;  %v1098_v46 = vrot.slane %v1871_v4, %v2241_v33 }
 0x132   : > { %v1134_v33 = vrot.slane %v1887_v7, %v2012_v25 }
 0x133   : > { %v1029_v38 = vadd.f32 %v1027_v23, %v1013_v32  ;;  %v1030_v30 = vadd.f32 %v1028_v28, %v1014_v10  ;;  %v1092_v23 = vmul.f32 %v2356_v49, %v1086_v61  ;;  %v1118_v28 = vrot.slane %v1876_v5, %v2311_v29  ;;  %v1743_v61 = vld [vmem:[%s1867_s30 + $0x10] sm:$0x3f] }
 0x134   : > { %v1146_v5 = vrot.slane %v1879_v6, %v2047_v43 }
 0x135   : > { %v1057_v52 = vpop.permute.xlu1 %1056  ;;  %v1046_v51 = vadd.f32 %v1044_v44, %v1030_v30  ;;  %v1045_v36 = vadd.f32 %v1043_v63, %v1029_v38  ;;  %v1130_v38 = vrot.slane %v1879_v6, %v2012_v25  ;;  %v1140_v63 = vmul.f32 %v2400_v16, %v1134_v33  ;;  %v1185_v44 = vpop.permute.xlu0 %1184 }
 0x136   : > { %v1059_v35 = vmul.f32 %v1057_v52, %v1050_v55  ;;  %v1060_v21 = vmul.f32 %v1057_v52, %v1054_v13  ;;  %v1114_v52 = vrot.slane %v1871_v4, %v2311_v29  ;;  %v1150_v4 = vrot.slane %v1887_v7, %v2047_v43 }
 0x137   : > { %v1139_v29 = vmul.f32 %v2400_v16, %v1130_v38  ;;  %v966_v16 = vrot.slane %v2386_v45, %v2178_v14 }
 0x138   : > { %v1061_v26 = vadd.f32 %v1059_v35, %v1045_v36  ;;  %v1062_v1 = vadd.f32 %v1060_v21, %v1046_v51  ;;  %v1162_v36 = vrot.slane %v1879_v6, %v2100_v40  ;;  %v1166_v35 = vrot.slane %v1887_v7, %v2100_v40 }
 0x139   : > { %v985_v6 = vpop.permute.xlu0 %984 }
 0x13a   : > { %v1073_v53 = vpop.permute.xlu1 %1072 }
 0x13b   : > { %v1075_v48 = vmul.f32 %v1073_v53, %v1066_v0  ;;  %v1076_v22 = vmul.f32 %v1073_v53, %v1070_v31 }
 0x13d   : > { %v1077_v58 = vadd.f32 %v1075_v48, %v1061_v26  ;;  %v1078_v9 = vadd.f32 %v1076_v22, %v1062_v1  ;;  %v1178_v26 = vrot.slane %v1743_v61, %v2094_v37  ;;  %v1744_v1 = vld [vmem:[%s1867_s30 + $0x18] sm:$0x3f] }
 0x13f   : > { %v1105_v60 = vpop.permute.xlu1 %1104  ;;  %v1094_v62 = vadd.f32 %v1092_v23, %v1078_v9  ;;  %v1093_v34 = vadd.f32 %v1091_v57, %v1077_v58  ;;  %v1182_v58 = vrot.slane %v1744_v1, %v2094_v37 }
 0x140   : > { %v1107_v32 = vmul.f32 %v1105_v60, %v1098_v46  ;;  %v1108_v10 = vmul.f32 %v1105_v60, %v1102_v27  ;;  %v978_v46 = vrot.slane %v2383_v3, %v2189_v19 }
 0x142   : > { %v1109_v49 = vadd.f32 %v1107_v32, %v1093_v34  ;;  %v1110_v53 = vadd.f32 %v1108_v10, %v1094_v62  ;;  %v1194_v62 = vrot.slane %v1743_v61, %v2178_v14  ;;  %v1198_v34 = vrot.slane %v1744_v1, %v2178_v14 }
 0x143   : > { %v987_v32 = vmul.f32 %v985_v6, %v978_v46  ;;  %v2684_v46 = vmov 3  }
 0x144   : > { %v1121_v54 = vpop.permute.xlu1 %1120 }
 0x145   : > { %v1123_v30 = vmul.f32 %v1121_v54, %v1114_v52  ;;  %v1124_v13 = vmul.f32 %v1121_v54, %v1118_v28  ;;  %v982_v54 = vrot.slane %v2386_v45, %v2189_v19 }
 0x147   : > { %v1125_v31 = vadd.f32 %v1123_v30, %v1109_v49  ;;  %v1126_v0 = vadd.f32 %v1124_v13, %v1110_v53  ;;  %v988_v10 = vmul.f32 %v985_v6, %v982_v54  ;;  %v1187_v30 = vmul.f32 %v1185_v44, %v1178_v26 }
 0x148   : > { %v1188_v13 = vmul.f32 %v1185_v44, %v1182_v58  ;;  %v2685_v54 = vmov 2  }
 0x149   : > { %v1153_v55 = vpop.permute.xlu1 %1152  ;;  %v1142_v21 = vadd.f32 %v1140_v63, %v1126_v0  ;;  %v1141_v48 = vadd.f32 %v1139_v29, %v1125_v31  ;;  %v1210_v29 = vrot.slane %v1743_v61, %v2189_v19  ;;  %v1214_v63 = vrot.slane %v1744_v1, %v2189_v19 }
 0x14a   : > { %v1155_v22 = vmul.f32 %v1153_v55, %v1146_v5  ;;  %v1156_v60 = vmul.f32 %v1153_v55, %v1150_v4 }
 0x14c   : > { %v1157_v28 = vadd.f32 %v1155_v22, %v1141_v48  ;;  %v1158_v52 = vadd.f32 %v1156_v60, %v1142_v21  ;;  %v1226_v21 = vpop.permute.xlu0 %1225 }
 0x14e   : > { %v1169_v51 = vpop.permute.xlu1 %1168 }
 0x14f   : > { %v1171_v9 = vmul.f32 %v1169_v51, %v1162_v36  ;;  %v1172_v27 = vmul.f32 %v1169_v51, %v1166_v35 }
 0x151   : > { %v1173_v3 = vadd.f32 %v1171_v9, %v1157_v28  ;;  %v1174_v55 = vadd.f32 %v1172_v27, %v1158_v52  ;;  %v2688_v28 = vmov 7   ;;  %v2689_v52 = vmov 8  }
 0x153   : > { %v969_v7 = vpop.permute.xlu1 %968  ;;  %v1190_v31 = vadd.f32 %v1188_v13, %v1174_v55  ;;  %v1189_v0 = vadd.f32 %v1187_v30, %v1173_v3 }
 0x154   : > { %v971_v57 = vmul.f32 %v969_v7, %v962_v20  ;;  %v972_v23 = vmul.f32 %v969_v7, %v966_v16 }
 0x156   : > { %v973_v38 = vadd.f32 %v971_v57, %v2416_v39  ;;  %v974_v33 = vadd.f32 %v972_v23, %v2414_v50  ;;  %v2686_v57 = vmov 6   ;;  %v2687_v23 = vmov 5  }
 0x157   : > { %v1201_v49 = vpop.permute.xlu1 %1200 }
 0x158   : > { %v990_v45 = vadd.f32 %v988_v10, %v974_v33  ;;  %v989_v53 = vadd.f32 %v987_v32, %v973_v38  ;;  %v1203_v5 = vmul.f32 %v1201_v49, %v1194_v62  ;;  %v1204_v4 = vmul.f32 %v1201_v49, %v1198_v34  ;;  %v1233_v34 = vld [vmem:[%s2651_s8] sm:$0x7] }
 0x159   : > { %v2690_v62 = vmov 1   ;;  %v1474_v32 = vld [vmem:[%s2653_s10] sm:$0x7] }
 0x15a   : > { %v1205_v36 = vadd.f32 %v1203_v5, %v1189_v0  ;;  %v1206_v39 = vadd.f32 %v1204_v4, %v1190_v31  ;;  %v1234_v10 = vld [vmem:[%s2652_s9] sm:$0x7] }
 0x15b   : > { %v1475_v38 = vld [vmem:[%s2654_s11] sm:$0x7] }
 0x15c   : > { %v1217_v51 = vpop.permute.xlu1 %1216 }
 0x15d   : > { %v1219_v35 = vmul.f32 %v1217_v51, %v1210_v29  ;;  %v1220_v50 = vmul.f32 %v1217_v51, %v1214_v63 }
 0x15f   : > { %v1221_v44 = vadd.f32 %v1219_v35, %v1205_v36  ;;  %v1222_v48 = vadd.f32 %v1220_v50, %v1206_v39 }
 0x161   : > { %v1228_v22 = vadd.f32 %v1226_v21, %v1221_v44  ;;  %v1229_v60 = vadd.f32 %v1226_v21, %v1222_v48  ;;  %v994_v20 = vpop.permute.xlu1 %993 }
 0x162   : > { %v996_v16 = vadd.f32 %v994_v20, %v989_v53  ;;  %v997_v26 = vadd.f32 %v994_v20, %v990_v45 }
 0x164   : > { %v2486_v58 = vadd.f32 %v1228_v22, %v996_v16  ;;  %v2488_v61 = vadd.f32 %v1229_v60, %v997_v26  ;;  %v2692_v60 = vld [vmem:[#allocation2_spill] sm:$0xff]  ;;  %v2693_v16 = vld [vmem:[#allocation3_spill] sm:$0xff] }
 0x166   : > { %v1235_v1 = vmax.f32 %v2486_v58, 0.0  ;;  %v1236_v6 = vmax.f32 %v2488_v61, 0.0  ;;  %v1240_v9 = vpop.permute.xlu1 %1239 }
 0x168   : > { %v2492_v27 = vmul.f32 %v1240_v9, %v1235_v1  ;;  %v2494_v7 = vmul.f32 %v1240_v9, %v1236_v6  ;;  %1246 = vrot.lane.b32.xlu0 %v1236_v6, %s1755_s13  ;;  %1244 = vrot.lane.b32.xlu1 %v1235_v1, %s1755_s13  ;;  %v2695_v9 = vld [vmem:[#allocation5_spill] sm:$0xff] }
 0x16c   : > { %1260 = vrot.lane.b32.xlu0 %v1235_v1, %s1756_s14  ;;  %1253 = vperm.xlu1 %1723, %v2215_v12  }
 0x170   : > { %1269 = vperm.xlu0 %1724, %v2215_v12   ;;  %1262 = vrot.lane.b32.xlu1 %v1236_v6, %s1756_s14 }
 0x171   : > { %1726 = vset.pattern.permute.xlu1 %v2684_v46 }
 0x174   : > { %1725 = vset.pattern.permute.xlu0 %v2685_v54  ;;  %1276 = vrot.lane.b32.xlu1 %v1235_v1, %s1758_s15 }
 0x175   : > { %1285 = vperm.xlu0 %1725, %v2215_v12  }
 0x178   : > { %1278 = vrot.lane.b32.xlu1 %v1236_v6, %s1758_s15 }
 0x179   : > { %1292 = vrot.lane.b32.xlu0 %v1235_v1, %s1760_s16 }
 0x17a   : > { %1728 = vset.pattern.permute.xlu0 %v2686_v57 }
 0x17c   : > { %1301 = vperm.xlu1 %1726, %v2215_v12  }
 0x17d   : > { %1333 = vperm.xlu0 %1728, %v2215_v12  }
 0x180   : > { %1727 = vset.pattern.permute.xlu1 %v2687_v23 }
 0x181   : > { %1729 = vset.pattern.permute.xlu0 %v2688_v28  ;;  %1317 = vperm.xlu1 %1727, %v2215_v12  }
 0x182   : > { %1349 = vperm.xlu0 %1729, %v2215_v12  }
 0x185   : > { %1294 = vrot.lane.b32.xlu1 %v1236_v6, %s1760_s16 }
 0x186   : > { %1730 = vset.pattern.permute.xlu0 %v2689_v52  ;;  %1732 = vset.pattern.permute.xlu1 %v2690_v62 }
 0x187   : > { %1365 = vperm.xlu0 %1730, %v2215_v12   ;;  %v2691_v12 = vmov 4  }
 0x189   : > { %1308 = vrot.lane.b32.xlu1 %v1235_v1, %s1762_s17 }
 0x18b   : > { %1356 = vrot.lane.b32.xlu0 %v1235_v1, %s1768_s20 }
 0x18c   : > { %1731 = vset.pattern.permute.xlu0 %v2683_v59 }
 0x18d   : > { %1310 = vrot.lane.b32.xlu1 %v1236_v6, %s1762_s17 }
 0x18f   : > { %1382 = vperm.xlu0 %1731, %v1233_v34  }
 0x191   : > { %1324 = vrot.lane.b32.xlu1 %v1235_v1, %s1764_s18 }
 0x193   : > { %1734 = vset.pattern.permute.xlu0 %v2690_v62 }
 0x194   : > { %1500 = vperm.xlu0 %1734, %v1474_v32  }
 0x195   : > { %1326 = vrot.lane.b32.xlu1 %v1236_v6, %s1764_s18 }
 0x198   : > { %1736 = vset.pattern.permute.xlu0 %v2684_v46 }
 0x199   : > { %1428 = vperm.xlu0 %1736, %v1233_v34   ;;  %1340 = vrot.lane.b32.xlu1 %v1235_v1, %s1765_s19  ;;  %v2694_v1 = vld [vmem:[#allocation4_spill] sm:$0xff] }
 0x19d   : > { %1739 = vset.pattern.permute.xlu0 %v2691_v12  ;;  %1342 = vrot.lane.b32.xlu1 %v1236_v6, %s1765_s19 }
 0x19e   : > { %1548 = vperm.xlu0 %1739, %v1474_v32  }
 0x1a1   : > { %1358 = vrot.lane.b32.xlu1 %v1236_v6, %s1768_s20  ;;  %s1652_s20 = sshll.u32 %s2699_s22, 3 }
 0x1a2   : > { %1741 = vset.pattern.permute.xlu0 %v2683_v59  ;;  %s413_s25 = scalar_lea.vmem %s2655_s12, %s1652_s20 }
 0x1a3   : > { %1469 = vperm.xlu0 %1741, %v1234_v10   ;;  %v2697_v10 = vld [vmem:[#allocation7_spill] sm:$0xff] }
 0x1a5   : > { %1396 = vperm.xlu1 %1732, %v1233_v34  }
 0x1a9   : > { %1733 = vset.pattern.permute.xlu1 %v2683_v59 }
 0x1aa   : > { %1486 = vperm.xlu1 %1733, %v1474_v32  }
 0x1ae   : > { %1735 = vset.pattern.permute.xlu1 %v2685_v54 }
 0x1af   : > { %1412 = vperm.xlu1 %1735, %v1233_v34  }
 0x1b3   : > { %1516 = vperm.xlu1 %1735, %v1474_v32  }
 0x1b7   : > { %1737 = vset.pattern.permute.xlu1 %v2684_v46 }
 0x1b8   : > { %1532 = vperm.xlu1 %1737, %v1474_v32  }
 0x1bc   : > { %1738 = vset.pattern.permute.xlu1 %v2691_v12 }
 0x1bd   : > { %1444 = vperm.xlu1 %1738, %v1233_v34  }
 0x1c1   : > { %1740 = vset.pattern.permute.xlu1 %v2687_v23 }
 0x1c2   : > { %1460 = vperm.xlu1 %1740, %v1233_v34  }
 0x1c6   : > { %1564 = vperm.xlu1 %1740, %v1474_v32   ;;  %v2696_v32 = vld [vmem:[#allocation6_spill] sm:$0xff] }
 0x1ca   : > { %1742 = vset.pattern.permute.xlu1 %v2683_v59 }
 0x1cb   : > { %1573 = vperm.xlu1 %1742, %v1475_v38  }
 0x1da   : > { %v1245_v33 = vpop.permute.xlu1 %1244  ;;  %v1247_v49 = vpop.permute.xlu0 %1246 }
 0x1db   : > { %v1248_v59 = vsel %vm448_vm0, %v1245_v33, %v1247_v49  ;;  %v1249_v50 = vsel %vm448_vm0, %v1247_v49, %v1245_v33 }
 0x1dc   : > { %v1250_v20 = vmul.f32 %v1249_v50, %v2692_v60  ;;  %v1251_v26 = vmul.f32 %v1248_v59, %v2693_v16 }
 0x1de   : > { %v1261_v53 = vpop.permute.xlu0 %1260 }
 0x1eb   : > { %v1254_v30 = vpop.permute.xlu1 %1253 }
 0x1ec   : > { %v1256_v28 = vmul.f32 %v1254_v30, %v1250_v20  ;;  %v1257_v52 = vmul.f32 %v1254_v30, %v1251_v26 }
 0x1ef   : > { %v1263_v13 = vpop.permute.xlu1 %1262  ;;  %v1270_v4 = vpop.permute.xlu0 %1269 }
 0x1f0   : > { %v1264_v21 = vsel %vm489_vm1, %v1261_v53, %v1263_v13  ;;  %v1265_v44 = vsel %vm489_vm1, %v1263_v13, %v1261_v53 }
 0x1f1   : > { %v1266_v6 = vmul.f32 %v1265_v44, %v2694_v1  ;;  %v1267_v46 = vmul.f32 %v1264_v21, %v2695_v9 }
 0x1f3   : > { %v1277_v3 = vpop.permute.xlu1 %1276  ;;  %v1272_v33 = vmul.f32 %v1270_v4, %v1266_v6  ;;  %v1273_v13 = vmul.f32 %v1270_v4, %v1267_v46 }
 0x1f4   : > { %v1286_v31 = vpop.permute.xlu0 %1285 }
 0x1f7   : > { %v1279_v55 = vpop.permute.xlu1 %1278 }
 0x1f8   : > { %v1293_v51 = vpop.permute.xlu0 %1292  ;;  %v1280_v54 = vsel %vm530_vm3, %v1277_v3, %v1279_v55  ;;  %v1281_v57 = vsel %vm530_vm3, %v1279_v55, %v1277_v3 }
 0x1f9   : > { %v1282_v12 = vmul.f32 %v1281_v57, %v2696_v32  ;;  %v1283_v38 = vmul.f32 %v1280_v54, %v2697_v10 }
 0x1fb   : > { %v1302_v45 = vpop.permute.xlu1 %1301  ;;  %v1288_v50 = vmul.f32 %v1286_v31, %v1282_v12  ;;  %v1289_v21 = vmul.f32 %v1286_v31, %v1283_v38 }
 0x1fc   : > { %v1334_v39 = vpop.permute.xlu0 %1333 }
 0x200   : > { %v1318_v5 = vpop.permute.xlu1 %1317 }
 0x201   : > { %v1350_v22 = vpop.permute.xlu0 %1349 }
 0x204   : > { %v1295_v29 = vpop.permute.xlu1 %1294 }
 0x205   : > { %v1296_v62 = vsel %vm571_vm2, %v1293_v51, %v1295_v29  ;;  %v1297_v34 = vsel %vm571_vm2, %v1295_v29, %v1293_v51  ;;  %v1258_v29 = vadd.f32 %v1256_v28, %v2492_v27  ;;  %v1259_v51 = vadd.f32 %v1257_v52, %v2494_v7 }
 0x206   : > { %v1366_v49 = vpop.permute.xlu0 %1365  ;;  %v1298_v53 = vmul.f32 %v1297_v34, %v2104_v41  ;;  %v1299_v3 = vmul.f32 %v1296_v62, %v2108_v42 }
 0x207   : > { %v1274_v42 = vadd.f32 %v1272_v33, %v1258_v29  ;;  %v1275_v44 = vadd.f32 %v1273_v13, %v1259_v51  ;;  %v1483_v51 = vrot.slane %v2488_v61, %v2012_v25 }
 0x208   : > { %v1309_v63 = vpop.permute.xlu1 %1308 }
 0x209   : > { %v1291_v1 = vadd.f32 %v1289_v21, %v1275_v44 }
 0x20a   : > { %v1357_v16 = vpop.permute.xlu0 %1356 }
 0x20c   : > { %v1311_v0 = vpop.permute.xlu1 %1310 }
 0x20d   : > { %v1312_v30 = vsel %vm612_vm4, %v1309_v63, %v1311_v0  ;;  %v1313_v55 = vsel %vm612_vm4, %v1311_v0, %v1309_v63  ;;  %v1304_v63 = vmul.f32 %v1302_v45, %v1298_v53  ;;  %v1305_v0 = vmul.f32 %v1302_v45, %v1299_v3 }
 0x20e   : > { %v1314_v60 = vmul.f32 %v1312_v30, %v2204_v8  ;;  %v1315_v20 = vmul.f32 %v1313_v55, %v2208_v17  ;;  %v1383_v33 = vpop.permute.xlu0 %1382 }
 0x20f   : > { %v1307_v54 = vadd.f32 %v1305_v0, %v1291_v1  ;;  %v1526_v0 = vrot.slane %v2486_v58, %v2094_v37 }
 0x210   : > { %v1325_v36 = vpop.permute.xlu1 %1324  ;;  %v1320_v45 = vmul.f32 %v1318_v5, %v1314_v60  ;;  %v1321_v6 = vmul.f32 %v1318_v5, %v1315_v20 }
 0x212   : > { %v1323_v62 = vadd.f32 %v1321_v6, %v1307_v54 }
 0x213   : > { %v1501_v55 = vpop.permute.xlu0 %1500 }
 0x214   : > { %v1327_v35 = vpop.permute.xlu1 %1326 }
 0x215   : > { %v1328_v4 = vsel %vm653_vm5, %v1325_v36, %v1327_v35  ;;  %v1329_v41 = vsel %vm653_vm5, %v1327_v35, %v1325_v36  ;;  %v1290_v35 = vadd.f32 %v1288_v50, %v1274_v42 }
 0x216   : > { %v1330_v26 = vmul.f32 %v1328_v4, %v2227_v18  ;;  %v1331_v36 = vmul.f32 %v1329_v41, %v2231_v15  ;;  %v1510_v4 = vrot.slane %v2486_v58, %v2100_v40 }
 0x217   : > { %v1306_v46 = vadd.f32 %v1304_v63, %v1290_v35  ;;  %v1514_v63 = vrot.slane %v2488_v61, %v2100_v40 }
 0x218   : > { %v1341_v48 = vpop.permute.xlu1 %1340  ;;  %v1336_v57 = vmul.f32 %v1334_v39, %v1330_v26  ;;  %v1337_v18 = vmul.f32 %v1334_v39, %v1331_v36  ;;  %v1530_v26 = vrot.slane %v2488_v61, %v2094_v37 }
 0x219   : > { %v1322_v52 = vadd.f32 %v1320_v45, %v1306_v46 }
 0x21a   : > { %v1339_v12 = vadd.f32 %v1337_v18, %v1323_v62 }
 0x21b   : > { %v1338_v32 = vadd.f32 %v1336_v57, %v1322_v52 }
 0x21c   : > { %v1343_v23 = vpop.permute.xlu1 %1342 }
 0x21d   : > { %v1344_v27 = vsel %vm694_vm6, %v1341_v48, %v1343_v23  ;;  %v1345_v7 = vsel %vm694_vm6, %v1343_v23, %v1341_v48 }
 0x21e   : > { %v1346_v9 = vmul.f32 %v1344_v27, %v2263_v11  ;;  %v1347_v48 = vmul.f32 %v1345_v7, %v2267_v56  ;;  %v1429_v27 = vpop.permute.xlu0 %1428 }
 0x220   : > { %v1359_v59 = vpop.permute.xlu1 %1358  ;;  %v1352_v34 = vmul.f32 %v1350_v22, %v1346_v9  ;;  %v1353_v24 = vmul.f32 %v1350_v22, %v1347_v48  ;;  %v1494_v22 = vrot.slane %v2486_v58, %v2047_v43 }
 0x221   : > { %v1360_v8 = vsel %vm735_vm7, %v1357_v16, %v1359_v59  ;;  %v1361_v17 = vsel %vm735_vm7, %v1359_v59, %v1357_v16  ;;  %v1479_v59 = vrot.slane %v2486_v58, %v2012_v25 }
 0x222   : > { %v1362_v15 = vmul.f32 %v1360_v8, %v2326_v47  ;;  %v1363_v23 = vmul.f32 %v1361_v17, %v2330_v2  ;;  %v1354_v38 = vadd.f32 %v1352_v34, %v1338_v32  ;;  %v1355_v56 = vadd.f32 %v1353_v24, %v1339_v12  ;;  %v1549_v34 = vpop.permute.xlu0 %1548 }
 0x224   : > { %v1397_v31 = vpop.permute.xlu1 %1396  ;;  %v1368_v5 = vmul.f32 %v1366_v49, %v1362_v15  ;;  %v1369_v10 = vmul.f32 %v1366_v49, %v1363_v23  ;;  %v1498_v49 = vrot.slane %v2488_v61, %v2047_v43 }
 0x226   : > { %v1370_v13 = vadd.f32 %v1368_v5, %v1354_v38  ;;  %v1371_v53 = vadd.f32 %v1369_v10, %v1355_v56  ;;  %v1504_v36 = vmul.f32 %v1501_v55, %v1498_v49  ;;  %v1542_v10 = vrot.slane %v2486_v58, %v2178_v14 }
 0x228   : > { %v1379_v47 = vrot.slane %v1371_v53, %v2012_v25  ;;  %v1394_v2 = vrot.slane %v1371_v53, %v2047_v43  ;;  %v1375_v3 = vrot.slane %v1370_v13, %v2012_v25  ;;  %v1390_v30 = vrot.slane %v1370_v13, %v2047_v43 }
 0x229   : > { %v1487_v28 = vpop.permute.xlu1 %1486  ;;  %v1410_v50 = vrot.slane %v1371_v53, %v2100_v40  ;;  %v1406_v21 = vrot.slane %v1370_v13, %v2100_v40  ;;  %v1503_v25 = vmul.f32 %v1501_v55, %v1494_v22  ;;  %v1422_v40 = vrot.slane %v1370_v13, %v2094_v37 }
 0x22a   : > { %v1386_v41 = vmul.f32 %v1383_v33, %v1379_v47  ;;  %v1385_v42 = vmul.f32 %v1383_v33, %v1375_v3  ;;  %v1399_v44 = vmul.f32 %v1397_v31, %v1390_v30  ;;  %v1400_v60 = vmul.f32 %v1397_v31, %v1394_v2 }
 0x22b   : > { %v1489_v43 = vmul.f32 %v1487_v28, %v1479_v59  ;;  %v1490_v20 = vmul.f32 %v1487_v28, %v1483_v51  ;;  %v1426_v31 = vrot.slane %v1371_v53, %v2094_v37  ;;  %v1442_v18 = vrot.slane %v1371_v53, %v2178_v14 }
 0x22c   : > { %v1401_v17 = vadd.f32 %v1399_v44, %v1385_v42  ;;  %v1402_v45 = vadd.f32 %v1400_v60, %v1386_v41  ;;  %v1438_v15 = vrot.slane %v1370_v13, %v2178_v14  ;;  %v1458_v62 = vrot.slane %v1371_v53, %v2189_v19 }
 0x22d   : > { %v1505_v6 = vadd.f32 %v1503_v25, %v1489_v43  ;;  %v1506_v9 = vadd.f32 %v1504_v36, %v1490_v20  ;;  %v1432_v52 = vmul.f32 %v1429_v27, %v1426_v31  ;;  %v1431_v24 = vmul.f32 %v1429_v27, %v1422_v40 }
 0x22e   : > { %v1413_v11 = vpop.permute.xlu1 %1412  ;;  %v1454_v5 = vrot.slane %v1370_v13, %v2189_v19  ;;  %v1551_v53 = vmul.f32 %v1549_v34, %v1542_v10  ;;  %v1558_v30 = vrot.slane %v2486_v58, %v2189_v19  ;;  %v1562_v13 = vrot.slane %v2488_v61, %v2189_v19 }
 0x22f   : > { %v1415_v7 = vmul.f32 %v1413_v11, %v1406_v21  ;;  %v1416_v16 = vmul.f32 %v1413_v11, %v1410_v50  ;;  %v1546_v11 = vrot.slane %v2488_v61, %v2178_v14 }
 0x231   : > { %v1417_v54 = vadd.f32 %v1415_v7, %v1401_v17  ;;  %v1418_v57 = vadd.f32 %v1416_v16, %v1402_v45  ;;  %v1552_v3 = vmul.f32 %v1549_v34, %v1546_v11 }
 0x232   : > { %v1517_v39 = vpop.permute.xlu1 %1516 }
 0x233   : > { %v1519_v35 = vmul.f32 %v1517_v39, %v1510_v4  ;;  %v1520_v1 = vmul.f32 %v1517_v39, %v1514_v63  ;;  %v1434_v33 = vadd.f32 %v1432_v52, %v1418_v57  ;;  %v1433_v39 = vadd.f32 %v1431_v24, %v1417_v54  ;;  %v1470_v4 = vpop.permute.xlu0 %1469 }
 0x235   : > { %v1521_v23 = vadd.f32 %v1519_v35, %v1505_v6  ;;  %v1522_v28 = vadd.f32 %v1520_v1, %v1506_v9 }
 0x237   : > { %v1533_v29 = vpop.permute.xlu1 %1532 }
 0x238   : > { %v1535_v48 = vmul.f32 %v1533_v29, %v1526_v0  ;;  %v1536_v46 = vmul.f32 %v1533_v29, %v1530_v26 }
 0x23a   : > { %v1537_v38 = vadd.f32 %v1535_v48, %v1521_v23  ;;  %v1538_v56 = vadd.f32 %v1536_v46, %v1522_v28 }
 0x23c   : > { %v1445_v8 = vpop.permute.xlu1 %1444  ;;  %v1553_v29 = vadd.f32 %v1551_v53, %v1537_v38  ;;  %v1554_v51 = vadd.f32 %v1552_v3, %v1538_v56 }
 0x23d   : > { %v1447_v32 = vmul.f32 %v1445_v8, %v1438_v15  ;;  %v1448_v12 = vmul.f32 %v1445_v8, %v1442_v18 }
 0x23f   : > { %v1449_v22 = vadd.f32 %v1447_v32, %v1433_v39  ;;  %v1450_v49 = vadd.f32 %v1448_v12, %v1434_v33 }
 0x241   : > { %v1461_v37 = vpop.permute.xlu1 %1460 }
 0x242   : > { %v1463_v47 = vmul.f32 %v1461_v37, %v1454_v5  ;;  %v1464_v2 = vmul.f32 %v1461_v37, %v1458_v62 }
 0x244   : > { %v1465_v50 = vadd.f32 %v1463_v47, %v1449_v22  ;;  %v1466_v21 = vadd.f32 %v1464_v2, %v1450_v49 }
 0x245   : > { %v1565_v55 = vpop.permute.xlu1 %1564 }
 0x246   : > { %v1567_v59 = vmul.f32 %v1565_v55, %v1558_v30  ;;  %v1568_v14 = vmul.f32 %v1565_v55, %v1562_v13  ;;  %v1472_v60 = vadd.f32 %v1470_v4, %v1465_v50  ;;  %v1473_v43 = vadd.f32 %v1470_v4, %v1466_v21 }
 0x248   : > { %v1569_v41 = vadd.f32 %v1567_v59, %v1553_v29  ;;  %v1570_v42 = vadd.f32 %v1568_v14, %v1554_v51 }
 0x24a   : > { %v1574_v44 = vpop.permute.xlu1 %1573 }
 0x24b   : > { %v1576_v58 = vadd.f32 %v1574_v44, %v1569_v41  ;;  %v1577_v20 = vadd.f32 %v1574_v44, %v1570_v42 }
 0x24d   : > { %v1578_v19 = vadd.f32 %v1576_v58, %v1472_v60  ;;  %v1579_v61 = vadd.f32 %v1577_v20, %v1473_v43 }
 0x24f   : > { %v1582_v63 = vcombine.low %v1578_v19, %v1579_v61 }
 0x251   : > { %1584 = vst [vmem:[%s413_s25] sm:$0x77] %v1582_v63 }
 0x252 PF: > { %s22_s21 = sadd.s32 1, %s1751_s21  }
 0x253   : > { %p19_p4 = scmp.ge.s32.totalorder %s22_s21, 4  }
 0x255   :  { %21 = sbr.rel (!%p19_p4) target bundleno = 1 (0x1), region = 98 }

// kernel: _lambda_.4
= control target key start
LH: loop header
LB: loop body
LE: loop exit
PB: predicated region body
PF: predicated region fallthrough
CT: control target
= control target key end

     0   :  { %s3966_s0 = inlined_call_operand.vmem [shape: f32[2,12,256], index: 0, kind: input, shape index: {}]   ;;  %s3967_s1 = inlined_call_operand.vmem [shape: f32[8,256], index: 1, kind: input, shape index: {}]   ;;  %s3968_s2 = inlined_call_operand.vmem [shape: f32[12,9], index: 2, kind: input, shape index: {}]   ;;  %s3969_s3 = inlined_call_operand.vmem [shape: f32[6,12], index: 3, kind: input, shape index: {}]   ;;  %s3970_s4 = inlined_call_operand.vmem [shape: f32[6,1], index: 4, kind: input, shape index: {}, may-alias: {4,7,10,13,16,18}]   ;;  %s3971_s5 = inlined_call_operand.vmem [shape: f32[6,9], index: 5, kind: input, shape index: {}]   ;;  %s3972_s6 = inlined_call_operand.vmem [shape: f32[6,6], index: 6, kind: input, shape index: {}]   ;;  %s3973_s7 = inlined_call_operand.vmem [shape: f32[6,1], index: 7, kind: input, shape index: {}, may-alias: {4,7,10,13,16,18}]   ;;  %s3974_s8 = inlined_call_operand.vmem [shape: f32[6,9], index: 8, kind: input, shape index: {}]   ;;  %s3975_s9 = inlined_call_operand.vmem [shape: f32[6,6], index: 9, kind: input, shape index: {}]   ;;  %s3976_s10 = inlined_call_operand.vmem [shape: f32[6,1], index: 10, kind: input, shape index: {}, may-alias: {4,7,10,13,16,18}]   ;;  %s3977_s11 = inlined_call_operand.vmem [shape: f32[6,9], index: 11, kind: input, shape index: {}]   ;;  %s3978_s12 = inlined_call_operand.vmem [shape: f32[6,6], index: 12, kind: input, shape index: {}]   ;;  %s3979_s13 = inlined_call_operand.vmem [shape: f32[6,1], index: 13, kind: input, shape index: {}, may-alias: {4,7,10,13,16,18}]   ;;  %s3980_s14 = inlined_call_operand.vmem [shape: f32[6,9], index: 14, kind: input, shape index: {}]   ;;  %s3981_s15 = inlined_call_operand.vmem [shape: f32[6,6], index: 15, kind: input, shape index: {}]   ;;  %s3982_s16 = inlined_call_operand.vmem [shape: f32[6,1], index: 16, kind: input, shape index: {}, may-alias: {4,7,10,13,16,18}]   ;;  %s3983_s17 = inlined_call_operand.vmem [shape: f32[6,12], index: 17, kind: input, shape index: {}]   ;;  %s3984_s18 = inlined_call_operand.vmem [shape: f32[6,1], index: 18, kind: input, shape index: {}, may-alias: {4,7,10,13,16,18}]   ;;  %s3985_s19 = inlined_call_operand.vmem [shape: f32[2,6,256], index: 19, kind: output, shape index: {}]  }
   0x1   :  { %4062 = sst [smem:[#allocation22_spill]] %s3966_s0  ;;  %s2655_s0 = smov 0  }
   0x2   :  { %4063 = sst [smem:[#allocation23_spill]] %s3967_s1 }
   0x3   :  { %4064 = sst [smem:[#allocation24_spill]] %s3968_s2 }
   0x4   :  { %4065 = sst [smem:[#allocation25_spill]] %s3969_s3 }
   0x5 LB: > { %s2386_s30 = sadd.s32 4294967295, %s2533_s0   ;;  %p2390_p0 = scmp.ge.s32.totalorder %s2533_s0, 1  ;;  %s2533_s0 = sphi %s2655_s0, %s29_s0  }
   0x6   : > { %p537_p1 = scmp.lt.s32.totalorder %s2533_s0, 3 }
   0x8   : > { %p538_p2 = pnand %p2390_p0, %p537_p1 }
   0xa   : > { %541 = sbr.rel (%p538_p2) target bundleno = 1158 (0x486), region = 96 }
  0x11   : > { %s4066_s1 = sld [smem:[#allocation24_spill]]  ;;  %p593_p3 = scmp.lt.s32.totalorder %s2386_s30, 1  ;;  %v4003_v1 = vmov 4   ;;  %v3997_v2 = vmov 0   ;;  %v4005_v12 = vmov 1   ;;  %v3999_v13 = vmov 3  }
  0x12   : > { %2427 = vset.pattern.permute.xlu0 %v4003_v1  ;;  %2429 = vset.pattern.permute.xlu1 %v3997_v2  ;;  %s4067_s3 = sld [smem:[#allocation22_spill]]  ;;  %s4055_s27 = smov 17   ;;  %v4001_v14 = vmov 2   ;;  %v4011_v15 = vmov 5   ;;  %v4009_v16 = vmov 6   ;;  %v4007_v17 = vmov 7  }
  0x13   : > { %s4142_s30 = smov (!%p593_p3, %s2386_s30), 1  ;;  %s4053_s28 = smov 16   ;;  %v3995_v19 = vmov 8   ;;  %v3992_v20 = vmov 11   ;;  %v2797_v21 = vld [vmem:[%s3971_s5] sm:$0x3f]  ;;  %v639_v58 = vlaneseq }
  0x14   : > { %s2397_s23 = sshll.u32 %s4142_s30, 5  ;;  %s4046_s29 = smov 15   ;;  %4069 = vst [vmem:[#allocation2_spill] sm:$0xff] %v2797_v21  ;;  %v3994_v32 = vmov 9   ;;  %v3993_v35 = vmov 10  }
  0x15   : > { %s4034_s20 = smov 1   ;;  %s4044_s21 = smov 127   ;;  %v612_v37 = vld [vmem:[%s3970_s4] sm:$0x3f]  ;;  %v2888_v61 = vshrl.u32 %v639_v58, 7  ;;  %v2892_v63 = vand.u32 127, %v639_v58 }
  0x16   : > { %s3990_s22 = smov 113   ;;  %s3988_s2 = smov 112  }
  0x17   : > { %v2666_v0 = vld [vmem:[%s4066_s1] sm:$0xff]  ;;  %v2676_v3 = vld [vmem:[%s4066_s1 + $0x8] sm:$0xf]  ;;  %s4077_s24 = sld [smem:[#allocation23_spill]]  ;;  %vm641_vm0 = vcmp.lt.s32.totalorder %v2892_v63, 17  ;;  %vm682_vm1 = vcmp.lt.s32.totalorder %v2892_v63, 16 }
  0x18   : > { %619 = vperm.xlu0 %2427, %v2666_v0   ;;  %s2682_s26 = scalar_lea.vmem %s4067_s3, %s2397_s23  ;;  %s2550_s23 = smov 111   ;;  %vm723_vm2 = vcmp.lt.s32.totalorder %v2892_v63, 15  ;;  %vm764_vm3 = vcmp.lt.s32.totalorder %v2892_v63, 1  ;;  %vm846_vm4 = vcmp.lt.s32.totalorder %v2892_v63, 113  ;;  %vm805_vm5 = vcmp.lt.s32.totalorder %v2892_v63, 127 }
  0x19   : > { %v605_v4 = vld [vmem:[%s2682_s26] sm:$0xff]  ;;  %v606_v5 = vld [vmem:[%s2682_s26 + $0x8] sm:$0xff]  ;;  %v607_v6 = vld [vmem:[%s2682_s26 + $0x10] sm:$0xf]  ;;  %s4068_s3 = sld [smem:[#allocation25_spill]]  ;;  %vm887_vm6 = vcmp.lt.s32.totalorder %v2892_v63, 112 }
  0x1a   : > { %v2688_v7 = vmax.f32 %v605_v4, 0.0  ;;  %v2690_v8 = vmax.f32 %v606_v5, 0.0  ;;  %v2694_v9 = vmax.f32 %v607_v6, 0.0  ;;  %v608_v10 = vld [vmem:[%s2682_s26 + $0x18] sm:$0xf]  ;;  %v2910_v6 = vsub.s32 1, %v2888_v61 }
  0x1b   : > { %v2702_v11 = vmax.f32 %v608_v10, 0.0  ;;  %vm928_vm7 = vcmp.lt.s32.totalorder %v2892_v63, 111 }
  0x1c   : > { %624 = vperm.xlu0 %2427, %v2676_v3   ;;  %631 = vrot.lane.b32.xlu1 %v2688_v7, %s4055_s27  ;;  %4078 = vst [vmem:[#allocation10_spill] sm:$0xff] %v2910_v6 }
  0x1d   : > { %v2907_v5 = vld [vmem:[%s4077_s24 + $0x8] sm:$0xff] }
  0x1f   : > { %v611_v18 = vld [vmem:[%s4068_s3] sm:$0x3f]  ;;  %s4119_s3 = smov 127  }
  0x20   : > { %635 = vrot.lane.b32.xlu0 %v2690_v8, %s4055_s27  ;;  %633 = vrot.lane.b32.xlu1 %v2694_v9, %s4055_s27 }
  0x21   : > { %2428 = vset.pattern.permute.xlu0 %v3997_v2 }
  0x24   : > { %659 = vperm.xlu0 %2428, %v2666_v0   ;;  %637 = vrot.lane.b32.xlu1 %v2702_v11, %s4055_s27 }
  0x28   : > { %676 = vrot.lane.b32.xlu0 %v2694_v9, %s4053_s28  ;;  %663 = vperm.xlu1 %2429, %v2676_v3  }
  0x29   : > { %2431 = vset.pattern.permute.xlu0 %v4005_v12 }
  0x2c   : > { %680 = vrot.lane.b32.xlu0 %v2702_v11, %s4053_s28  ;;  %674 = vrot.lane.b32.xlu1 %v2688_v7, %s4053_s28 }
  0x2d   : > { %2430 = vset.pattern.permute.xlu1 %v4005_v12 }
  0x30   : > { %704 = vperm.xlu0 %2431, %v2676_v3   ;;  %678 = vrot.lane.b32.xlu1 %v2690_v8, %s4053_s28 }
  0x34   : > { %719 = vrot.lane.b32.xlu0 %v2690_v8, %s4046_s29  ;;  %700 = vperm.xlu1 %2430, %v2666_v0  }
  0x35   : > { %2434 = vset.pattern.permute.xlu0 %v3999_v13 }
  0x38   : > { %758 = vrot.lane.b32.xlu0 %v2694_v9, %s4034_s20  ;;  %715 = vrot.lane.b32.xlu1 %v2688_v7, %s4046_s29 }
  0x39   : > { %2432 = vset.pattern.permute.xlu1 %v4001_v14 }
  0x3c   : > { %762 = vrot.lane.b32.xlu0 %v2702_v11, %s4034_s20  ;;  %717 = vrot.lane.b32.xlu1 %v2694_v9, %s4046_s29 }
  0x40   : > { %786 = vperm.xlu0 %2434, %v2676_v3   ;;  %721 = vrot.lane.b32.xlu1 %v2702_v11, %s4046_s29 }
  0x44   : > { %801 = vrot.lane.b32.xlu0 %v2690_v8, %s4044_s21  ;;  %745 = vperm.xlu1 %2432, %v2676_v3  }
  0x45   : > { %2435 = vset.pattern.permute.xlu0 %v4011_v15 }
  0x48   : > { %823 = vperm.xlu0 %2435, %v2666_v0   ;;  %756 = vrot.lane.b32.xlu1 %v2688_v7, %s4034_s20 }
  0x49   : > { %2433 = vset.pattern.permute.xlu1 %v3999_v13 }
  0x4c   : > { %840 = vrot.lane.b32.xlu0 %v2694_v9, %s3990_s22  ;;  %760 = vrot.lane.b32.xlu1 %v2690_v8, %s4034_s20 }
  0x4d   : > { %2438 = vset.pattern.permute.xlu0 %v4009_v16 }
  0x50   : > { %844 = vrot.lane.b32.xlu0 %v2702_v11, %s3990_s22  ;;  %782 = vperm.xlu1 %2433, %v2666_v0  }
  0x54   : > { %868 = vperm.xlu0 %2438, %v2676_v3   ;;  %797 = vrot.lane.b32.xlu1 %v2688_v7, %s4044_s21 }
  0x55   : > { %2436 = vset.pattern.permute.xlu1 %v4011_v15 }
  0x58   : > { %883 = vrot.lane.b32.xlu0 %v2690_v8, %s3988_s2  ;;  %799 = vrot.lane.b32.xlu1 %v2694_v9, %s4044_s21 }
  0x59   : > { %2439 = vset.pattern.permute.xlu0 %v4007_v17 }
  0x5c   : > { %905 = vperm.xlu0 %2439, %v2666_v0   ;;  %803 = vrot.lane.b32.xlu1 %v2702_v11, %s4044_s21 }
  0x60   : > { %2440 = vset.pattern.permute.xlu0 %v4001_v14  ;;  %827 = vperm.xlu1 %2436, %v2676_v3  }
  0x61   : > { %741 = vperm.xlu0 %2440, %v2666_v0  }
  0x64   : > { %838 = vrot.lane.b32.xlu1 %v2688_v7, %s3990_s22 }
  0x65   : > { %922 = vrot.lane.b32.xlu0 %v2694_v9, %s2550_s23  ;;  %2437 = vset.pattern.permute.xlu1 %v4009_v16 }
  0x68   : > { %842 = vrot.lane.b32.xlu1 %v2690_v8, %s3990_s22  ;;  %s4110_s22 = smov 112  }
  0x69   : > { %926 = vrot.lane.b32.xlu0 %v2702_v11, %s2550_s23 }
  0x6c   : > { %864 = vperm.xlu1 %2437, %v2666_v0  }
  0x6d   : > { %1001 = vperm.xlu0 %2440, %v611_v18  }
  0x70   : > { %879 = vrot.lane.b32.xlu1 %v2688_v7, %s3988_s2 }
  0x71   : > { %2447 = vset.pattern.permute.xlu0 %v4011_v15  ;;  %2441 = vset.pattern.permute.xlu1 %v4007_v17 }
  0x72   : > { %1049 = vperm.xlu0 %2447, %v611_v18  }
  0x74   : > { %881 = vrot.lane.b32.xlu1 %v2694_v9, %s3988_s2 }
  0x76   : > { %2448 = vset.pattern.permute.xlu0 %v3995_v19 }
  0x77   : > { %950 = vperm.xlu0 %2448, %v2676_v3  }
  0x78   : > { %885 = vrot.lane.b32.xlu1 %v2702_v11, %s3988_s2  ;;  %s4115_s2 = smov 1  }
  0x7b   : > { %1097 = vperm.xlu0 %2448, %v611_v18  }
  0x7c   : > { %909 = vperm.xlu1 %2441, %v2676_v3   ;;  %v2900_v3 = vld [vmem:[%s4077_s24] sm:$0xff] }
  0x7f   : > { %2453 = vset.pattern.permute.xlu0 %v3992_v20  ;;  %v2929_v20 = vsub.s32 2, %v2888_v61 }
  0x80   : > { %1145 = vperm.xlu0 %2453, %v611_v18   ;;  %920 = vrot.lane.b32.xlu1 %v2688_v7, %s2550_s23 }
  0x81   : > { %2442 = vset.pattern.permute.xlu1 %v3995_v19  ;;  %4079 = vst [vmem:[#allocation11_spill] sm:$0xff] %v2929_v20  ;;  %v2966_v15 = vrot.slane %v2907_v5, %v2929_v20 }
  0x84   : > { %2456 = vset.pattern.permute.xlu0 %v3997_v2  ;;  %924 = vrot.lane.b32.xlu1 %v2690_v8, %s2550_s23 }
  0x85   : > { %1180 = vperm.xlu0 %2456, %v2797_v21  }
  0x88   : > { %946 = vperm.xlu1 %2442, %v2666_v0   ;;  %v2895_v0 = vsub.s32 0, %v2888_v61 }
  0x89   : > { %2457 = vset.pattern.permute.xlu0 %v4005_v12 }
  0x8a   : > { %1196 = vperm.xlu0 %2457, %v2797_v21   ;;  %4076 = vst [vmem:[#allocation9_spill] sm:$0xff] %v2895_v0 }
  0x8c   : > { %2443 = vset.pattern.permute.xlu1 %v3997_v2 }
  0x8d   : > { %971 = vperm.xlu1 %2443, %v611_v18  }
  0x8e   : > { %2458 = vset.pattern.permute.xlu0 %v4001_v14  ;;  %v2814_v23 = vpop.permute.xlu1 %631 }
  0x8f   : > { %1212 = vperm.xlu0 %2458, %v2797_v21  }
  0x91   : > { %2444 = vset.pattern.permute.xlu1 %v4005_v12 }
  0x92   : > { %985 = vperm.xlu1 %2444, %v611_v18   ;;  %v2821_v26 = vpop.permute.xlu1 %633 }
  0x93   : > { %2459 = vset.pattern.permute.xlu0 %v3999_v13 }
  0x96   : > { %2445 = vset.pattern.permute.xlu1 %v3999_v13  ;;  %v2826_v28 = vpop.permute.xlu1 %637 }
  0x97   : > { %v2811_v22 = vpop.permute.xlu0 %619  ;;  %1017 = vperm.xlu1 %2445, %v611_v18  }
  0x9b   : > { %v2816_v24 = vpop.permute.xlu0 %624  ;;  %2446 = vset.pattern.permute.xlu1 %v4003_v1 }
  0x9c   : > { %1033 = vperm.xlu1 %2446, %v611_v18  }
  0x9f   : > { %v2819_v25 = vpop.permute.xlu0 %635 }
  0xa0   : > { %2449 = vset.pattern.permute.xlu1 %v4009_v16  ;;  %v644_v58 = vsel %vm641_vm0, %v2819_v25, %v2814_v23  ;;  %v2962_v16 = vsub.s32 5, %v2888_v61 }
  0xa1   : > { %1065 = vperm.xlu1 %2449, %v611_v18  }
  0xa2   : > { %4084 = vst [vmem:[#allocation16_spill] sm:$0xff] %v2962_v16 }
  0xa3   : > { %v2823_v27 = vpop.permute.xlu0 %659 }
  0xa5   : > { %2450 = vset.pattern.permute.xlu1 %v4007_v17  ;;  %v2959_v17 = vrot.slane %v2900_v3, %v2929_v20 }
  0xa6   : > { %1081 = vperm.xlu1 %2450, %v611_v18  }
  0xa7   : > { %v2828_v29 = vpop.permute.xlu0 %676  ;;  %v2831_v30 = vpop.permute.xlu1 %663 }
  0xaa   : > { %2451 = vset.pattern.permute.xlu1 %v3994_v32 }
  0xab   : > { %v2833_v31 = vpop.permute.xlu0 %680  ;;  %1113 = vperm.xlu1 %2451, %v611_v18   ;;  %v675_v33 = vpop.permute.xlu1 %674 }
  0xaf   : > { %v2836_v34 = vpop.permute.xlu0 %704  ;;  %2452 = vset.pattern.permute.xlu1 %v3993_v35  ;;  %v679_v36 = vpop.permute.xlu1 %678  ;;  %v2933_v35 = vrot.slane %v2907_v5, %v2895_v0 }
  0xb0   : > { %1129 = vperm.xlu1 %2452, %v611_v18   ;;  %v2917_v18 = vrot.slane %v2900_v3, %v2895_v0  ;;  %v683_v32 = vsel %vm682_vm1, %v675_v33, %v679_v36  ;;  %v3032_v0 = vsub.s32 7, %v2888_v61 }
  0xb1   : > { %4080 = vst [vmem:[#allocation12_spill] sm:$0xff] %v2933_v35 }
  0xb2   : > { %4089 = vst [vmem:[#allocation21_spill] sm:$0xff] %v3032_v0 }
  0xb3   : > { %v2842_v38 = vpop.permute.xlu0 %719  ;;  %v2844_v39 = vpop.permute.xlu1 %700 }
  0xb4   : > { %2454 = vset.pattern.permute.xlu1 %v3997_v2  ;;  %v2940_v2 = vsub.s32 3, %v2888_v61 }
  0xb5   : > { %1154 = vperm.xlu1 %2454, %v612_v37   ;;  %v642_v37 = vsel %vm641_vm0, %v2814_v23, %v2819_v25  ;;  %v2944_v23 = vrot.slane %v2900_v3, %v2910_v6  ;;  %v2948_v25 = vrot.slane %v2907_v5, %v2910_v6 }
  0xb6   : > { %4081 = vst [vmem:[#allocation13_spill] sm:$0xff] %v2940_v2  ;;  %v655_v12 = vmul.f32 %v2933_v35, %v642_v37  ;;  %v2971_v37 = vrot.slane %v2900_v3, %v2940_v2 }
  0xb7   : > { %v716_v40 = vpop.permute.xlu1 %715  ;;  %v2847_v41 = vpop.permute.xlu0 %758  ;;  %4082 = vst [vmem:[#allocation14_spill] sm:$0xff] %v2944_v23  ;;  %4083 = vst [vmem:[#allocation15_spill] sm:$0xff] %v2948_v25 }
  0xb8   : > { %v667_v6 = vmul.f32 %v2823_v27, %v655_v12 }
  0xb9   : > { %2455 = vset.pattern.permute.xlu1 %v4003_v1  ;;  %v654_v1 = vmul.f32 %v2917_v18, %v644_v58  ;;  %v726_v58 = vsel %vm723_vm2, %v2842_v38, %v716_v40 }
  0xba   : > { %1166 = vperm.xlu1 %2455, %v2797_v21   ;;  %v2985_v21 = vsub.s32 4, %v2888_v61 }
  0xbb   : > { %v2851_v42 = vpop.permute.xlu1 %717  ;;  %v2854_v43 = vpop.permute.xlu0 %762  ;;  %v666_v20 = vmul.f32 %v2823_v27, %v654_v1 }
  0xbc   : > { %4086 = vst [vmem:[#allocation18_spill] sm:$0xff] %v2985_v21  ;;  %v3021_v27 = vrot.slane %v2900_v3, %v2985_v21 }
  0xbe   : > { %2463 = vset.pattern.permute.xlu1 %v3995_v19  ;;  %v685_v19 = vsel %vm682_vm1, %v679_v36, %v675_v33  ;;  %v696_v36 = vmul.f32 %v2948_v25, %v683_v32  ;;  %v724_v32 = vsel %vm723_vm2, %v716_v40, %v2842_v38  ;;  %v2999_v40 = vrot.slane %v2900_v3, %v2962_v16 }
  0xbf   : > { %v2856_v44 = vpop.permute.xlu1 %721  ;;  %v2860_v46 = vpop.permute.xlu0 %786  ;;  %v695_v33 = vmul.f32 %v2944_v23, %v685_v19  ;;  %v2975_v19 = vrot.slane %v2907_v5, %v2940_v2  ;;  %v628_v2 = vmul.f32 %v2811_v22, %v2690_v8  ;;  %v737_v8 = vmul.f32 %v2966_v15, %v724_v32 }
  0xc0   : > { %4070 = vst [vmem:[#allocation3_spill] sm:$0xff] %v2860_v46  ;;  %v708_v38 = vmul.f32 %v2844_v39, %v696_v36 }
  0xc1   : > { %4085 = vst [vmem:[#allocation17_spill] sm:$0xff] %v2975_v19  ;;  %v671_v32 = vadd.f32 %v667_v6, %v628_v2  ;;  %v643_v6 = vsel %vm641_vm0, %v2821_v26, %v2826_v28 }
  0xc3   : > { %v2858_v45 = vpop.permute.xlu1 %745  ;;  %v2864_v48 = vpop.permute.xlu0 %801 }
  0xc7   : > { %v2862_v47 = vpop.permute.xlu1 %756  ;;  %v2870_v51 = vpop.permute.xlu0 %823 }
  0xcb   : > { %v2866_v49 = vpop.permute.xlu1 %760  ;;  %v2874_v53 = vpop.permute.xlu0 %840 }
  0xcc   : > { %4071 = vst [vmem:[#allocation4_spill] sm:$0xff] %v2874_v53  ;;  %v707_v53 = vmul.f32 %v2844_v39, %v695_v33  ;;  %v765_v1 = vsel %vm764_vm3, %v2862_v47, %v2866_v49  ;;  %v767_v12 = vsel %vm764_vm3, %v2866_v49, %v2862_v47  ;;  %v3025_v39 = vrot.slane %v2907_v5, %v2985_v21 }
  0xcd   : > { %v777_v49 = vmul.f32 %v2971_v37, %v767_v12  ;;  %v3090_v12 = vrot.slane %v2907_v5, %v3032_v0 }
  0xcf   : > { %v2868_v50 = vpop.permute.xlu1 %782  ;;  %v2880_v56 = vpop.permute.xlu0 %844 }
  0xd0   : > { %4073 = vst [vmem:[#allocation6_spill] sm:$0xff] %v2880_v56 }
  0xd3   : > { %v2872_v52 = vpop.permute.xlu1 %797  ;;  %v2884_v59 = vpop.permute.xlu0 %868 }
  0xd4   : > { %4075 = vst [vmem:[#allocation8_spill] sm:$0xff] %v2884_v59 }
  0xd7   : > { %v2876_v54 = vpop.permute.xlu1 %799  ;;  %v2902_v4 = vpop.permute.xlu0 %883 }
  0xd8   : > { %4072 = vst [vmem:[#allocation5_spill] sm:$0xff] %v2876_v54  ;;  %v712_v54 = vadd.f32 %v708_v38, %v671_v32 }
  0xdb   : > { %v2878_v55 = vpop.permute.xlu1 %803  ;;  %v2950_v13 = vpop.permute.xlu0 %905 }
  0xdf   : > { %v2882_v57 = vpop.permute.xlu1 %827 }
  0xe0   : > { %4074 = vst [vmem:[#allocation7_spill] sm:$0xff] %v2882_v57  ;;  %v627_v57 = vmul.f32 %v2811_v22, %v2688_v7  ;;  %v742_v56 = vpop.permute.xlu0 %741  ;;  %v736_v7 = vmul.f32 %v2959_v17, %v726_v58  ;;  %v3016_v22 = vrot.slane %v2907_v5, %v2962_v16  ;;  %v778_v16 = vmul.f32 %v2975_v19, %v765_v1 }
  0xe1   : > { %v749_v47 = vmul.f32 %v742_v56, %v737_v8 }
  0xe2   : > { %v670_v36 = vadd.f32 %v666_v20, %v627_v57  ;;  %v748_v58 = vmul.f32 %v742_v56, %v736_v7  ;;  %v806_v20 = vsel %vm805_vm5, %v2872_v52, %v2864_v48  ;;  %v808_v56 = vsel %vm805_vm5, %v2864_v48, %v2872_v52 }
  0xe3   : > { %v2886_v60 = vpop.permute.xlu1 %838  ;;  %v645_v48 = vsel %vm641_vm0, %v2826_v28, %v2821_v26  ;;  %v753_v38 = vadd.f32 %v749_v47, %v712_v54  ;;  %v789_v7 = vmul.f32 %v2868_v50, %v777_v49  ;;  %v818_v1 = vmul.f32 %v3021_v27, %v806_v20 }
  0xe4   : > { %v711_v46 = vadd.f32 %v707_v53, %v670_v36  ;;  %v819_v26 = vmul.f32 %v3025_v39, %v808_v56  ;;  %v656_v54 = vmul.f32 %v2917_v18, %v645_v48  ;;  %v629_v47 = vmul.f32 %v2816_v24, %v2694_v9 }
  0xe5   : > { %v630_v49 = vmul.f32 %v2816_v24, %v2702_v11  ;;  %v830_v20 = vmul.f32 %v2870_v51, %v818_v1  ;;  %v768_v1 = vsel %vm764_vm3, %v2854_v43, %v2847_v41 }
  0xe6   : > { %v752_v52 = vadd.f32 %v748_v58, %v711_v46  ;;  %v831_v56 = vmul.f32 %v2870_v51, %v819_v26  ;;  %v668_v11 = vmul.f32 %v2831_v30, %v656_v54  ;;  %v3120_v51 = vpop.permute.xlu0 %922 }
  0xe7   : > { %v2890_v62 = vpop.permute.xlu1 %842 }
  0xe8   : > { %v847_v53 = vsel %vm846_vm4, %v2886_v60, %v2890_v62  ;;  %v849_v57 = vsel %vm846_vm4, %v2890_v62, %v2886_v60  ;;  %v790_v60 = vmul.f32 %v2868_v50, %v778_v16  ;;  %v657_v16 = vmul.f32 %v2933_v35, %v643_v6 }
  0xe9   : > { %v859_v28 = vmul.f32 %v2999_v40, %v847_v53  ;;  %v860_v46 = vmul.f32 %v3016_v22, %v849_v57  ;;  %v3086_v50 = vrot.slane %v2900_v3, %v3032_v0  ;;  %v725_v57 = vsel %vm723_vm2, %v2851_v42, %v2856_v44 }
  0xea   : > { %v794_v36 = vadd.f32 %v790_v60, %v753_v38  ;;  %v669_v24 = vmul.f32 %v2831_v30, %v657_v16 }
  0xeb   : > { %v2912_v10 = vpop.permute.xlu1 %864 }
  0xec   : > { %v871_v53 = vmul.f32 %v2912_v10, %v859_v28  ;;  %v872_v9 = vmul.f32 %v2912_v10, %v860_v46  ;;  %v835_v6 = vadd.f32 %v831_v56, %v794_v36  ;;  %v739_v28 = vmul.f32 %v2966_v15, %v725_v57  ;;  %v4090_v57 = vld [vmem:[#allocation5_spill] sm:$0xff] }
  0xed   : > { %v673_v56 = vadd.f32 %v669_v24, %v630_v49 }
  0xef   : > { %v880_v14 = vpop.permute.xlu1 %879 }
  0xf0   : > { %v888_v62 = vsel %vm887_vm6, %v880_v14, %v2902_v4  ;;  %v890_v8 = vsel %vm887_vm6, %v2902_v4, %v880_v14  ;;  %v793_v4 = vadd.f32 %v789_v7, %v752_v52 }
  0xf2   : > { %v834_v48 = vadd.f32 %v830_v20, %v793_v4 }
  0xf3   : > { %v2987_v59 = vpop.permute.xlu1 %881 }
  0xf4   : > { %4087 = vst [vmem:[#allocation19_spill] sm:$0xff] %v2987_v59  ;;  %v3002_v59 = vsub.s32 6, %v2888_v61 }
  0xf6   : > { %4088 = vst [vmem:[#allocation20_spill] sm:$0xff] %v3002_v59  ;;  %v3037_v21 = vrot.slane %v2900_v3, %v3002_v59  ;;  %v3041_v2 = vrot.slane %v2907_v5, %v3002_v59  ;;  %v684_v3 = vsel %vm682_vm1, %v2828_v29, %v2833_v31  ;;  %v686_v5 = vsel %vm682_vm1, %v2833_v31, %v2828_v29 }
  0xf7   : > { %v3027_v33 = vpop.permute.xlu1 %885  ;;  %v727_v29 = vsel %vm723_vm2, %v2856_v44, %v2851_v42  ;;  %v697_v30 = vmul.f32 %v2944_v23, %v686_v5  ;;  %v698_v38 = vmul.f32 %v2948_v25, %v684_v3  ;;  %v875_v42 = vadd.f32 %v871_v53, %v834_v48  ;;  %v927_v5 = vpop.permute.xlu0 %926 }
  0xf8   : > { %v900_v32 = vmul.f32 %v3037_v21, %v888_v62  ;;  %v901_v58 = vmul.f32 %v3041_v2, %v890_v8  ;;  %v876_v44 = vadd.f32 %v872_v9, %v835_v6  ;;  %v738_v26 = vmul.f32 %v2959_v17, %v727_v29 }
  0xf9   : > { %v709_v36 = vmul.f32 %v2836_v34, %v697_v30  ;;  %v751_v9 = vmul.f32 %v2858_v45, %v739_v28  ;;  %v809_v29 = vsel %vm805_vm5, %v2878_v55, %v4090_v57 }
  0xfa   : > { %v912_v10 = vmul.f32 %v2950_v13, %v900_v32  ;;  %v913_v52 = vmul.f32 %v2950_v13, %v901_v58  ;;  %v766_v13 = vsel %vm764_vm3, %v2847_v41, %v2854_v43  ;;  %v710_v32 = vmul.f32 %v2836_v34, %v698_v38 }
  0xfb   : > { %v3059_v61 = vpop.permute.xlu1 %909  ;;  %v779_v58 = vmul.f32 %v2971_v37, %v768_v1  ;;  %v780_v3 = vmul.f32 %v2975_v19, %v766_v13  ;;  %v672_v43 = vadd.f32 %v668_v11, %v629_v47  ;;  %v750_v53 = vmul.f32 %v2858_v45, %v738_v26  ;;  %v4092_v11 = vld [vmem:[#allocation9_spill] sm:$0xff]  ;;  %v4096_v26 = vld [vmem:[#allocation19_spill] sm:$0xff] }
  0xfc   : > { %v916_v54 = vadd.f32 %v912_v10, %v875_v42  ;;  %v917_v16 = vadd.f32 %v913_v52, %v876_v44  ;;  %v807_v34 = vsel %vm805_vm5, %v4090_v57, %v2878_v55  ;;  %v714_v48 = vadd.f32 %v710_v32, %v673_v56  ;;  %v4091_v10 = vld [vmem:[#allocation3_spill] sm:$0xff]  ;;  %v4093_v55 = vld [vmem:[#allocation6_spill] sm:$0xff] }
  0xfd   : > { %v713_v6 = vadd.f32 %v709_v36, %v672_v43  ;;  %v791_v47 = vmul.f32 %v4091_v10, %v779_v58  ;;  %v792_v49 = vmul.f32 %v4091_v10, %v780_v3  ;;  %v820_v38 = vmul.f32 %v3021_v27, %v807_v34 }
  0xfe   : > { %v755_v30 = vadd.f32 %v751_v9, %v714_v48  ;;  %v889_v28 = vsel %vm887_vm6, %v4096_v26, %v3027_v33  ;;  %v930_v48 = vsel %vm928_vm7, %v3120_v51, %v927_v5 }
  0xff   : > { %v921_v14 = vpop.permute.xlu1 %920  ;;  %v754_v52 = vadd.f32 %v750_v53, %v713_v6  ;;  %v4098_v53 = vld [vmem:[#allocation7_spill] sm:$0xff]  ;;  %v902_v10 = vmul.f32 %v3037_v21, %v889_v28  ;;  %v943_v28 = vmul.f32 %v3086_v50, %v930_v48 }
 0x100   : > { %v832_v9 = vmul.f32 %v4098_v53, %v820_v38  ;;  %v796_v34 = vadd.f32 %v792_v49, %v755_v30 }
 0x103   : > { %v925_v31 = vpop.permute.xlu1 %924 }
 0x104   : > { %v929_v7 = vsel %vm928_vm7, %v921_v14, %v925_v31  ;;  %v931_v60 = vsel %vm928_vm7, %v925_v31, %v921_v14 }
 0x105   : > { %v941_v62 = vmul.f32 %v3086_v50, %v929_v7  ;;  %v942_v8 = vmul.f32 %v3090_v12, %v931_v60  ;;  %v821_v7 = vmul.f32 %v3025_v39, %v809_v29  ;;  %v4094_v60 = vld [vmem:[#allocation4_spill] sm:$0xff] }
 0x106   : > { %v848_v42 = vsel %vm846_vm4, %v4094_v60, %v4093_v55  ;;  %v850_v44 = vsel %vm846_vm4, %v4093_v55, %v4094_v60  ;;  %v4099_v55 = vld [vmem:[#allocation13_spill] sm:$0xff] }
 0x107   : > { %v947_v46 = vpop.permute.xlu1 %946  ;;  %v861_v43 = vmul.f32 %v2999_v40, %v848_v42  ;;  %v862_v56 = vmul.f32 %v3016_v22, %v850_v44  ;;  %v833_v57 = vmul.f32 %v4098_v53, %v821_v7  ;;  %v4100_v7 = vld [vmem:[#allocation8_spill] sm:$0xff] }
 0x108   : > { %v953_v14 = vmul.f32 %v947_v46, %v941_v62  ;;  %v954_v4 = vmul.f32 %v947_v46, %v942_v8  ;;  %v1002_v62 = vpop.permute.xlu0 %1001  ;;  %v4095_v8 = vld [vmem:[#allocation10_spill] sm:$0xff]  ;;  %v891_v46 = vsel %vm887_vm6, %v3027_v33, %v4096_v26  ;;  %v795_v33 = vadd.f32 %v791_v47, %v754_v52 }
 0x109   : > { %v873_v60 = vmul.f32 %v4100_v7, %v861_v43  ;;  %v874_v42 = vmul.f32 %v4100_v7, %v862_v56  ;;  %v4102_v43 = vld [vmem:[#allocation16_spill] sm:$0xff] }
 0x10a   : > { %v3146_v20 = vadd.f32 %v953_v14, %v916_v54  ;;  %v3148_v41 = vadd.f32 %v954_v4, %v917_v16  ;;  %v4097_v16 = vld [vmem:[#allocation11_spill] sm:$0xff]  ;;  %v836_v44 = vadd.f32 %v832_v9, %v795_v33 }
 0x10c   : > { %v972_v31 = vpop.permute.xlu1 %971  ;;  %v968_v45 = vrot.slane %v3148_v41, %v4092_v11  ;;  %v964_v24 = vrot.slane %v3146_v20, %v4092_v11  ;;  %v983_v13 = vrot.slane %v3148_v41, %v4095_v8  ;;  %v979_v1 = vrot.slane %v3146_v20, %v4095_v8 }
 0x10d   : > { %v999_v14 = vrot.slane %v3148_v41, %v4097_v16  ;;  %v995_v4 = vrot.slane %v3146_v20, %v4097_v16  ;;  %v1015_v47 = vrot.slane %v3148_v41, %v4099_v55  ;;  %v1011_v30 = vrot.slane %v3146_v20, %v4099_v55 }
 0x10e   : > { %v974_v36 = vmul.f32 %v972_v31, %v964_v24  ;;  %v975_v32 = vmul.f32 %v972_v31, %v968_v45  ;;  %v932_v31 = vsel %vm928_vm7, %v927_v5, %v3120_v51  ;;  %v903_v45 = vmul.f32 %v3041_v2, %v891_v46  ;;  %v1050_v24 = vpop.permute.xlu0 %1049 }
 0x10f   : > { %v1005_v38 = vmul.f32 %v1002_v62, %v999_v14  ;;  %v1004_v52 = vmul.f32 %v1002_v62, %v995_v4  ;;  %v837_v51 = vadd.f32 %v833_v57, %v796_v34  ;;  %v944_v46 = vmul.f32 %v3090_v12, %v932_v31  ;;  %v4101_v14 = vld [vmem:[#allocation18_spill] sm:$0xff] }
 0x110   : > { %v915_v62 = vmul.f32 %v3059_v61, %v903_v45  ;;  %v1031_v4 = vrot.slane %v3148_v41, %v4101_v14  ;;  %v1047_v56 = vrot.slane %v3148_v41, %v4102_v43  ;;  %v1043_v53 = vrot.slane %v3146_v20, %v4102_v43 }
 0x111   : > { %v986_v54 = vpop.permute.xlu1 %985 }
 0x112   : > { %v988_v58 = vmul.f32 %v986_v54, %v979_v1  ;;  %v989_v3 = vmul.f32 %v986_v54, %v983_v13  ;;  %v914_v54 = vmul.f32 %v3059_v61, %v902_v10  ;;  %v951_v9 = vpop.permute.xlu0 %950 }
 0x114   : > { %v990_v29 = vadd.f32 %v988_v58, %v974_v36  ;;  %v991_v6 = vadd.f32 %v989_v3, %v975_v32  ;;  %v1027_v36 = vrot.slane %v3146_v20, %v4101_v14  ;;  %v877_v32 = vadd.f32 %v873_v60, %v836_v44 }
 0x115   : > { %v878_v58 = vadd.f32 %v874_v42, %v837_v51 }
 0x116   : > { %v1018_v49 = vpop.permute.xlu1 %1017  ;;  %v1007_v5 = vadd.f32 %v1005_v38, %v991_v6  ;;  %v1006_v13 = vadd.f32 %v1004_v52, %v990_v29  ;;  %v955_v29 = vmul.f32 %v951_v9, %v943_v28  ;;  %v956_v6 = vmul.f32 %v951_v9, %v944_v46 }
 0x117   : > { %v1020_v1 = vmul.f32 %v1018_v49, %v1011_v30  ;;  %v1021_v26 = vmul.f32 %v1018_v49, %v1015_v47  ;;  %v918_v48 = vadd.f32 %v914_v54, %v877_v32  ;;  %v919_v31 = vadd.f32 %v915_v62, %v878_v58  ;;  %v1098_v58 = vpop.permute.xlu0 %1097 }
 0x118   : > { %v1053_v38 = vmul.f32 %v1050_v24, %v1047_v56  ;;  %v1063_v47 = vrot.slane %v3148_v41, %v3002_v59  ;;  %v1052_v52 = vmul.f32 %v1050_v24, %v1043_v53  ;;  %v1059_v30 = vrot.slane %v3146_v20, %v3002_v59 }
 0x119   : > { %v1022_v57 = vadd.f32 %v1020_v1, %v1006_v13  ;;  %v1023_v33 = vadd.f32 %v1021_v26, %v1007_v5  ;;  %v959_v7 = vadd.f32 %v955_v29, %v918_v48  ;;  %v960_v60 = vadd.f32 %v956_v6, %v919_v31 }
 0x11a   : > { %v1079_v13 = vrot.slane %v3148_v41, %v3032_v0  ;;  %v1075_v1 = vrot.slane %v3146_v20, %v3032_v0 }
 0x11b   : > { %v1034_v3 = vpop.permute.xlu1 %1033  ;;  %v1091_v26 = vrot.slane %v959_v7, %v4092_v11  ;;  %v1095_v28 = vrot.slane %v960_v60, %v4092_v11  ;;  %v1107_v53 = vrot.slane %v959_v7, %v4095_v8  ;;  %v1111_v41 = vrot.slane %v960_v60, %v4095_v8  ;;  %v1146_v31 = vpop.permute.xlu0 %1145 }
 0x11c   : > { %v1036_v34 = vmul.f32 %v1034_v3, %v1027_v36  ;;  %v1037_v61 = vmul.f32 %v1034_v3, %v1031_v4  ;;  %v1143_v29 = vrot.slane %v960_v60, %v4099_v55  ;;  %v1123_v6 = vrot.slane %v959_v7, %v4097_v16 }
 0x11d   : > { %v1100_v3 = vmul.f32 %v1098_v58, %v1091_v26  ;;  %v1101_v56 = vmul.f32 %v1098_v58, %v1095_v28  ;;  %v1127_v48 = vrot.slane %v960_v60, %v4097_v16  ;;  %v4103_v60 = vld [vmem:[#allocation2_spill] sm:$0xff]  ;;  %v4111_v58 = vmov 2  }
 0x11e   : > { %v1038_v10 = vadd.f32 %v1036_v34, %v1022_v57  ;;  %v1039_v45 = vadd.f32 %v1037_v61, %v1023_v33  ;;  %v1139_v61 = vrot.slane %v959_v7, %v4099_v55 }
 0x120   : > { %v1066_v49 = vpop.permute.xlu1 %1065  ;;  %v1055_v42 = vadd.f32 %v1053_v38, %v1039_v45  ;;  %v1054_v44 = vadd.f32 %v1052_v52, %v1038_v10  ;;  %v1148_v52 = vmul.f32 %v1146_v31, %v1139_v61 }
 0x121   : > { %v1068_v51 = vmul.f32 %v1066_v49, %v1059_v30  ;;  %v1069_v5 = vmul.f32 %v1066_v49, %v1063_v47  ;;  %v1149_v30 = vmul.f32 %v1146_v31, %v1143_v29 }
 0x123   : > { %v1070_v46 = vadd.f32 %v1068_v51, %v1054_v44  ;;  %v1071_v54 = vadd.f32 %v1069_v5, %v1055_v42 }
 0x125   : > { %v1082_v24 = vpop.permute.xlu1 %1081 }
 0x126   : > { %v1084_v62 = vmul.f32 %v1082_v24, %v1075_v1  ;;  %v1085_v4 = vmul.f32 %v1082_v24, %v1079_v13  ;;  %v4104_v24 = vmov 5  }
 0x128   : > { %v1086_v36 = vadd.f32 %v1084_v62, %v1070_v46  ;;  %v1087_v32 = vadd.f32 %v1085_v4, %v1071_v54  ;;  %v4105_v46 = vmov 6   ;;  %v4106_v54 = vmov 7   ;;  %v1160_v4 = vld [vmem:[%s3972_s6] sm:$0x3f] }
 0x129   : > { %v4107_v62 = vmov 1  }
 0x12a   : > { %v1114_v9 = vpop.permute.xlu1 %1113  ;;  %v1103_v20 = vadd.f32 %v1101_v56, %v1087_v32  ;;  %v1102_v57 = vadd.f32 %v1100_v3, %v1086_v36  ;;  %v4108_v36 = vmov 4   ;;  %v3279_v32 = vld [vmem:[%s3974_s8] sm:$0x3f]  ;;  %v4112_v3 = vmov 3  }
 0x12b   : > { %v1116_v33 = vmul.f32 %v1114_v9, %v1107_v53  ;;  %v1117_v34 = vmul.f32 %v1114_v9, %v1111_v41  ;;  %v4113_v56 = vmov 0   ;;  %v1161_v53 = vld [vmem:[%s3973_s7] sm:$0x3f]  ;;  %v4114_v41 = vmov 8  }
 0x12d   : > { %v1118_v45 = vadd.f32 %v1116_v33, %v1102_v57  ;;  %v1119_v38 = vadd.f32 %v1117_v34, %v1103_v20 }
 0x12f   : > { %v1130_v10 = vpop.permute.xlu1 %1129 }
 0x130   : > { %v1132_v47 = vmul.f32 %v1130_v10, %v1123_v6  ;;  %v1133_v49 = vmul.f32 %v1130_v10, %v1127_v48  ;;  %v1181_v6 = vpop.permute.xlu0 %1180 }
 0x132   : > { %v1134_v42 = vadd.f32 %v1132_v47, %v1118_v45  ;;  %v1135_v44 = vadd.f32 %v1133_v49, %v1119_v38 }
 0x134   : > { %v1151_v51 = vadd.f32 %v1149_v30, %v1135_v44  ;;  %v1155_v5 = vpop.permute.xlu1 %1154  ;;  %v1150_v13 = vadd.f32 %v1148_v52, %v1134_v42  ;;  %v1197_v31 = vpop.permute.xlu0 %1196 }
 0x136   : > { %v1157_v1 = vadd.f32 %v1155_v5, %v1150_v13  ;;  %v1158_v26 = vadd.f32 %v1155_v5, %v1151_v51 }
 0x138   : > { %v3238_v28 = vmax.f32 %v1157_v1, 0.0  ;;  %v3240_v7 = vmax.f32 %v1158_v26, 0.0  ;;  %v1213_v45 = vpop.permute.xlu0 %1212 }
 0x139   : > { %v1167_v9 = vpop.permute.xlu1 %1166 }
 0x13a   : > { %1173 = vrot.lane.b32.xlu1 %v3240_v7, %s4055_s27  ;;  %1171 = vrot.lane.b32.xlu0 %v3238_v28, %s4055_s27 }
 0x13e   : > { %1187 = vrot.lane.b32.xlu1 %v3238_v28, %s4053_s28  ;;  %1228 = vperm.xlu0 %2459, %v4103_v60  }
 0x142   : > { %1189 = vrot.lane.b32.xlu1 %v3240_v7, %s4053_s28  ;;  %2460 = vset.pattern.permute.xlu0 %v4104_v24 }
 0x143   : > { %1244 = vperm.xlu0 %2460, %v4103_v60  }
 0x146   : > { %1203 = vrot.lane.b32.xlu1 %v3238_v28, %s4046_s29 }
 0x147   : > { %2461 = vset.pattern.permute.xlu0 %v4105_v46 }
 0x148   : > { %1260 = vperm.xlu0 %2461, %v4103_v60  }
 0x14a   : > { %1205 = vrot.lane.b32.xlu1 %v3240_v7, %s4046_s29 }
 0x14c   : > { %2462 = vset.pattern.permute.xlu0 %v4106_v54 }
 0x14d   : > { %1276 = vperm.xlu0 %2462, %v4103_v60  }
 0x14e   : > { %1219 = vrot.lane.b32.xlu1 %v3238_v28, %s4034_s20 }
 0x151   : > { %1285 = vrot.lane.b32.xlu0 %v3240_v7, %s2550_s23 }
 0x152   : > { %1221 = vrot.lane.b32.xlu1 %v3240_v7, %s4034_s20  ;;  %2465 = vset.pattern.permute.xlu0 %v4107_v62  ;;  %s4109_s20 = smov 113  }
 0x155   : > { %1323 = vperm.xlu0 %2465, %v1160_v4  }
 0x156   : > { %1235 = vrot.lane.b32.xlu1 %v3238_v28, %s4044_s21 }
 0x159   : > { %2468 = vset.pattern.permute.xlu0 %v4108_v36 }
 0x15a   : > { %1237 = vrot.lane.b32.xlu1 %v3240_v7, %s4044_s21  ;;  %1371 = vperm.xlu0 %2468, %v1160_v4  }
 0x15e   : > { %1251 = vrot.lane.b32.xlu1 %v3238_v28, %s4109_s20  ;;  %1408 = vperm.xlu0 %2468, %v3279_v32  }
 0x162   : > { %1253 = vrot.lane.b32.xlu1 %v3240_v7, %s4109_s20  ;;  %2471 = vset.pattern.permute.xlu0 %v4107_v62 }
 0x163   : > { %1438 = vperm.xlu0 %2471, %v3279_v32  }
 0x166   : > { %1267 = vrot.lane.b32.xlu1 %v3238_v28, %s4110_s22 }
 0x167   : > { %2472 = vset.pattern.permute.xlu0 %v4111_v58 }
 0x168   : > { %1454 = vperm.xlu0 %2472, %v3279_v32  }
 0x16a   : > { %1269 = vrot.lane.b32.xlu1 %v3240_v7, %s4110_s22 }
 0x16c   : > { %2473 = vset.pattern.permute.xlu0 %v4112_v3 }
 0x16d   : > { %1470 = vperm.xlu0 %2473, %v3279_v32  }
 0x16e   : > { %1292 = vperm.xlu1 %2463, %v4103_v60  }
 0x171   : > { %2474 = vset.pattern.permute.xlu0 %v4104_v24 }
 0x172   : > { %1283 = vrot.lane.b32.xlu1 %v3238_v28, %s2550_s23  ;;  %1486 = vperm.xlu0 %2474, %v3279_v32  }
 0x173   : > { %2464 = vset.pattern.permute.xlu1 %v4113_v56 }
 0x176   : > { %1309 = vperm.xlu1 %2464, %v1160_v4   ;;  %2475 = vset.pattern.permute.xlu0 %v4105_v46 }
 0x177   : > { %1502 = vperm.xlu0 %2475, %v3279_v32  }
 0x17a   : > { %2466 = vset.pattern.permute.xlu1 %v4111_v58 }
 0x17b   : > { %1339 = vperm.xlu1 %2466, %v1160_v4   ;;  %2476 = vset.pattern.permute.xlu0 %v4106_v54 }
 0x17f   : > { %2467 = vset.pattern.permute.xlu1 %v4112_v3 }
 0x180   : > { %1355 = vperm.xlu1 %2467, %v1160_v4  }
 0x184   : > { %2469 = vset.pattern.permute.xlu1 %v4104_v24 }
 0x185   : > { %1387 = vperm.xlu1 %2469, %v1160_v4  }
 0x189   : > { %2470 = vset.pattern.permute.xlu1 %v4113_v56 }
 0x18a   : > { %1396 = vperm.xlu1 %2470, %v1161_v53  }
 0x18e   : > { %1422 = vperm.xlu1 %2470, %v3279_v32  }
 0x192   : > { %2477 = vset.pattern.permute.xlu1 %v4114_v41 }
 0x1ac   : > { %v1174_v20 = vpop.permute.xlu1 %1173  ;;  %v1172_v47 = vpop.permute.xlu0 %1171 }
 0x1ad   : > { %v1175_v42 = vsel %vm641_vm0, %v1172_v47, %v1174_v20  ;;  %v1176_v44 = vsel %vm641_vm0, %v1174_v20, %v1172_v47 }
 0x1ae   : > { %v1177_v51 = vmul.f32 %v1176_v44, %v2917_v18  ;;  %v1178_v5 = vmul.f32 %v1175_v42, %v2933_v35  ;;  %v1169_v35 = vmul.f32 %v1167_v9, %v3238_v28 }
 0x1b0   : > { %v1188_v57 = vpop.permute.xlu1 %1187  ;;  %v1183_v44 = vmul.f32 %v1181_v6, %v1177_v51  ;;  %v1184_v42 = vmul.f32 %v1181_v6, %v1178_v5 }
 0x1b2   : > { %v1185_v5 = vadd.f32 %v1183_v44, %v1169_v35 }
 0x1b4   : > { %v1190_v33 = vpop.permute.xlu1 %1189 }
 0x1b5   : > { %v1191_v13 = vsel %vm682_vm1, %v1188_v57, %v1190_v33  ;;  %v1192_v1 = vsel %vm682_vm1, %v1190_v33, %v1188_v57 }
 0x1b6   : > { %v1193_v20 = vmul.f32 %v1192_v1, %v2944_v23  ;;  %v1194_v47 = vmul.f32 %v1191_v13, %v2948_v25 }
 0x1b8   : > { %v1204_v34 = vpop.permute.xlu1 %1203  ;;  %v1199_v1 = vmul.f32 %v1197_v31, %v1193_v20  ;;  %v1200_v23 = vmul.f32 %v1197_v31, %v1194_v47 }
 0x1bc   : > { %v1206_v61 = vpop.permute.xlu1 %1205 }
 0x1bd   : > { %v1229_v52 = vpop.permute.xlu0 %1228  ;;  %v1207_v60 = vsel %vm723_vm2, %v1204_v34, %v1206_v61  ;;  %v1208_v4 = vsel %vm723_vm2, %v1206_v61, %v1204_v34  ;;  %v1170_v34 = vmul.f32 %v1167_v9, %v3240_v7 }
 0x1be   : > { %v1209_v0 = vmul.f32 %v1208_v4, %v2959_v17  ;;  %v1210_v59 = vmul.f32 %v1207_v60, %v2966_v15 }
 0x1bf   : > { %v1186_v13 = vadd.f32 %v1184_v42, %v1170_v34 }
 0x1c0   : > { %v1220_v29 = vpop.permute.xlu1 %1219  ;;  %v1216_v28 = vmul.f32 %v1213_v45, %v1210_v59 }
 0x1c1   : > { %v1202_v35 = vadd.f32 %v1200_v23, %v1186_v13 }
 0x1c2   : > { %v1245_v26 = vpop.permute.xlu0 %1244 }
 0x1c4   : > { %v1222_v48 = vpop.permute.xlu1 %1221 }
 0x1c5   : > { %v1223_v57 = vsel %vm764_vm3, %v1220_v29, %v1222_v48  ;;  %v1224_v33 = vsel %vm764_vm3, %v1222_v48, %v1220_v29  ;;  %v1215_v48 = vmul.f32 %v1213_v45, %v1209_v0 }
 0x1c6   : > { %v1225_v60 = vmul.f32 %v1224_v33, %v2971_v37  ;;  %v1226_v4 = vmul.f32 %v1223_v57, %v2975_v19 }
 0x1c7   : > { %v1261_v61 = vpop.permute.xlu0 %1260 }
 0x1c8   : > { %v1236_v10 = vpop.permute.xlu1 %1235  ;;  %v1231_v0 = vmul.f32 %v1229_v52, %v1225_v60  ;;  %v1232_v59 = vmul.f32 %v1229_v52, %v1226_v4 }
 0x1cc   : > { %v1238_v38 = vpop.permute.xlu1 %1237  ;;  %v1277_v45 = vpop.permute.xlu0 %1276 }
 0x1cd   : > { %v1239_v6 = vsel %vm805_vm5, %v1236_v10, %v1238_v38  ;;  %v1240_v51 = vsel %vm805_vm5, %v1238_v38, %v1236_v10  ;;  %v1201_v10 = vadd.f32 %v1199_v1, %v1185_v5 }
 0x1ce   : > { %v1241_v31 = vmul.f32 %v1239_v6, %v3021_v27  ;;  %v1242_v20 = vmul.f32 %v1240_v51, %v3025_v39 }
 0x1d0   : > { %v1252_v49 = vpop.permute.xlu1 %1251  ;;  %v1247_v57 = vmul.f32 %v1245_v26, %v1241_v31  ;;  %v1248_v33 = vmul.f32 %v1245_v26, %v1242_v20  ;;  %v1286_v60 = vpop.permute.xlu0 %1285 }
 0x1d4   : > { %v1254_v30 = vpop.permute.xlu1 %1253 }
 0x1d5   : > { %v1255_v7 = vsel %vm846_vm4, %v1252_v49, %v1254_v30  ;;  %v1256_v9 = vsel %vm846_vm4, %v1254_v30, %v1252_v49  ;;  %v1217_v49 = vadd.f32 %v1215_v48, %v1201_v10  ;;  %v1218_v30 = vadd.f32 %v1216_v28, %v1202_v35 }
 0x1d6   : > { %v1257_v44 = vmul.f32 %v1255_v7, %v2999_v40  ;;  %v1258_v42 = vmul.f32 %v1256_v9, %v3016_v22 }
 0x1d7   : > { %v1233_v6 = vadd.f32 %v1231_v0, %v1217_v49  ;;  %v1234_v51 = vadd.f32 %v1232_v59, %v1218_v30  ;;  %v1324_v49 = vpop.permute.xlu0 %1323 }
 0x1d8   : > { %v1268_v53 = vpop.permute.xlu1 %1267  ;;  %v1263_v5 = vmul.f32 %v1261_v61, %v1257_v44 }
 0x1d9   : > { %v1249_v13 = vadd.f32 %v1247_v57, %v1233_v6  ;;  %v1250_v52 = vadd.f32 %v1248_v33, %v1234_v51 }
 0x1db   : > { %v1265_v28 = vadd.f32 %v1263_v5, %v1249_v13 }
 0x1dc   : > { %v1270_v29 = vpop.permute.xlu1 %1269 }
 0x1dd   : > { %v1271_v38 = vsel %vm887_vm6, %v1268_v53, %v1270_v29  ;;  %v1272_v47 = vsel %vm887_vm6, %v1270_v29, %v1268_v53  ;;  %v1264_v53 = vmul.f32 %v1261_v61, %v1258_v42 }
 0x1de   : > { %v1273_v34 = vmul.f32 %v1271_v38, %v3037_v21  ;;  %v1274_v23 = vmul.f32 %v1272_v47, %v3041_v2 }
 0x1df   : > { %v1266_v9 = vadd.f32 %v1264_v53, %v1250_v52 }
 0x1e0   : > { %v1279_v4 = vmul.f32 %v1277_v45, %v1273_v34  ;;  %v1280_v29 = vmul.f32 %v1277_v45, %v1274_v23 }
 0x1e2   : > { %v1281_v10 = vadd.f32 %v1279_v4, %v1265_v28  ;;  %v1282_v61 = vadd.f32 %v1280_v29, %v1266_v9  ;;  %v1372_v28 = vpop.permute.xlu0 %1371 }
 0x1ed   : > { %v1293_v1 = vpop.permute.xlu1 %1292 }
 0x1f1   : > { %v1284_v7 = vpop.permute.xlu1 %1283 }
 0x1f2   : > { %v1287_v48 = vsel %vm928_vm7, %v1284_v7, %v1286_v60  ;;  %v1288_v26 = vsel %vm928_vm7, %v1286_v60, %v1284_v7 }
 0x1f3   : > { %v1289_v31 = vmul.f32 %v1287_v48, %v3086_v50  ;;  %v1290_v20 = vmul.f32 %v1288_v26, %v3090_v12 }
 0x1f5   : > { %v1295_v35 = vmul.f32 %v1293_v1, %v1289_v31  ;;  %v1296_v38 = vmul.f32 %v1293_v1, %v1290_v20  ;;  %v1310_v47 = vpop.permute.xlu1 %1309 }
 0x1f7   : > { %v1297_v0 = vadd.f32 %v1295_v35, %v1281_v10  ;;  %v1298_v59 = vadd.f32 %v1296_v38, %v1282_v61 }
 0x1f9   : > { %v1302_v45 = vrot.slane %v1297_v0, %v4092_v11  ;;  %v1306_v44 = vrot.slane %v1298_v59, %v4092_v11  ;;  %v1321_v42 = vrot.slane %v1298_v59, %v4095_v8  ;;  %v1317_v30 = vrot.slane %v1297_v0, %v4095_v8 }
 0x1fa   : > { %v1340_v57 = vpop.permute.xlu1 %1339  ;;  %v1333_v33 = vrot.slane %v1297_v0, %v4097_v16  ;;  %v1337_v34 = vrot.slane %v1298_v59, %v4097_v16  ;;  %v1369_v60 = vrot.slane %v1298_v59, %v4101_v14  ;;  %v1365_v4 = vrot.slane %v1297_v0, %v4101_v14 }
 0x1fb   : > { %v1312_v23 = vmul.f32 %v1310_v47, %v1302_v45  ;;  %v1313_v6 = vmul.f32 %v1310_v47, %v1306_v44  ;;  %v1326_v1 = vmul.f32 %v1324_v49, %v1317_v30  ;;  %v1327_v51 = vmul.f32 %v1324_v49, %v1321_v42 }
 0x1fc   : > { %v1342_v13 = vmul.f32 %v1340_v57, %v1333_v33  ;;  %v1343_v52 = vmul.f32 %v1340_v57, %v1337_v34  ;;  %v1349_v29 = vrot.slane %v1297_v0, %v4099_v55  ;;  %v1353_v7 = vrot.slane %v1298_v59, %v4099_v55 }
 0x1fd   : > { %v1328_v5 = vadd.f32 %v1326_v1, %v1312_v23  ;;  %v1329_v53 = vadd.f32 %v1327_v51, %v1313_v6  ;;  %v1374_v10 = vmul.f32 %v1372_v28, %v1365_v4  ;;  %v1375_v61 = vmul.f32 %v1372_v28, %v1369_v60 }
 0x1fe   : > { %v1381_v47 = vrot.slane %v1297_v0, %v4102_v43  ;;  %v1385_v45 = vrot.slane %v1298_v59, %v4102_v43  ;;  %v1402_v0 = vld [vmem:[%s3975_s9] sm:$0x3f] }
 0x1ff   : > { %v1344_v48 = vadd.f32 %v1342_v13, %v1328_v5  ;;  %v1345_v26 = vadd.f32 %v1343_v52, %v1329_v53  ;;  %v1356_v9 = vpop.permute.xlu1 %1355  ;;  %v1403_v59 = vld [vmem:[%s3976_s10] sm:$0x3f]  ;;  %v1409_v52 = vpop.permute.xlu0 %1408 }
 0x200   : > { %v1358_v31 = vmul.f32 %v1356_v9, %v1349_v29  ;;  %v1359_v20 = vmul.f32 %v1356_v9, %v1353_v7  ;;  %v3440_v53 = vld [vmem:[%s3978_s12] sm:$0x3f] }
 0x202   : > { %v1360_v35 = vadd.f32 %v1358_v31, %v1344_v48  ;;  %v1361_v38 = vadd.f32 %v1359_v20, %v1345_v26 }
 0x203   : > { %v1439_v4 = vpop.permute.xlu0 %1438 }
 0x204   : > { %v1388_v44 = vpop.permute.xlu1 %1387  ;;  %v1376_v42 = vadd.f32 %v1374_v10, %v1360_v35  ;;  %v1377_v49 = vadd.f32 %v1375_v61, %v1361_v38 }
 0x205   : > { %v1390_v30 = vmul.f32 %v1388_v44, %v1381_v47  ;;  %v1391_v57 = vmul.f32 %v1388_v44, %v1385_v45 }
 0x207   : > { %v1392_v33 = vadd.f32 %v1390_v30, %v1376_v42  ;;  %v1393_v34 = vadd.f32 %v1391_v57, %v1377_v49  ;;  %v1455_v7 = vpop.permute.xlu0 %1454 }
 0x209   : > { %v1397_v23 = vpop.permute.xlu1 %1396 }
 0x20a   : > { %v1399_v6 = vadd.f32 %v1397_v23, %v1392_v33  ;;  %v1400_v1 = vadd.f32 %v1397_v23, %v1393_v34  ;;  %v4116_v34 = vld [vmem:[#allocation12_spill] sm:$0xff] }
 0x20b   : > { %v1471_v26 = vpop.permute.xlu0 %1470 }
 0x20c   : > { %v3376_v51 = vmax.f32 %v1399_v6, 0.0  ;;  %v3378_v5 = vmax.f32 %v1400_v1, 0.0  ;;  %v4117_v6 = vld [vmem:[#allocation14_spill] sm:$0xff] }
 0x20d   : > { %v1423_v13 = vpop.permute.xlu1 %1422 }
 0x20e   : > { %1415 = vrot.lane.b32.xlu0 %v3378_v5, %s4055_s27  ;;  %1413 = vrot.lane.b32.xlu1 %v3376_v51, %s4055_s27 }
 0x20f   : > { %v1487_v31 = vpop.permute.xlu0 %1486 }
 0x212   : > { %1429 = vrot.lane.b32.xlu0 %v3376_v51, %s4053_s28  ;;  %1534 = vperm.xlu1 %2477, %v3279_v32  }
 0x213   : > { %v1503_v10 = vpop.permute.xlu0 %1502 }
 0x216   : > { %1518 = vperm.xlu0 %2476, %v3279_v32   ;;  %2478 = vset.pattern.permute.xlu1 %v4113_v56  ;;  %v1643_v32 = vld [vmem:[%s3977_s11] sm:$0x3f] }
 0x217   : > { %1551 = vperm.xlu1 %2478, %v1402_v0  }
 0x21a   : > { %1527 = vrot.lane.b32.xlu0 %v3378_v5, %s2550_s23 }
 0x21b   : > { %1431 = vrot.lane.b32.xlu1 %v3378_v5, %s4053_s28  ;;  %2479 = vset.pattern.permute.xlu0 %v4107_v62 }
 0x21c   : > { %2480 = vset.pattern.permute.xlu1 %v4111_v58 }
 0x21e   : > { %1565 = vperm.xlu0 %2479, %v1402_v0  }
 0x21f   : > { %1445 = vrot.lane.b32.xlu1 %v3376_v51, %s4046_s29 }
 0x222   : > { %2482 = vset.pattern.permute.xlu0 %v4108_v36 }
 0x223   : > { %1447 = vrot.lane.b32.xlu1 %v3378_v5, %s4046_s29  ;;  %1613 = vperm.xlu0 %2482, %v1402_v0   ;;  %s4118_s29 = smov 15  }
 0x227   : > { %1461 = vrot.lane.b32.xlu1 %v3376_v51, %s4115_s2  ;;  %1650 = vperm.xlu0 %2482, %v1643_v32  }
 0x22b   : > { %1463 = vrot.lane.b32.xlu1 %v3378_v5, %s4115_s2  ;;  %2485 = vset.pattern.permute.xlu0 %v4111_v58 }
 0x22c   : > { %1696 = vperm.xlu0 %2485, %v1643_v32  }
 0x22f   : > { %1477 = vrot.lane.b32.xlu1 %v3376_v51, %s4044_s21 }
 0x230   : > { %2486 = vset.pattern.permute.xlu0 %v4112_v3 }
 0x231   : > { %1712 = vperm.xlu0 %2486, %v1643_v32  }
 0x233   : > { %1479 = vrot.lane.b32.xlu1 %v3378_v5, %s4044_s21 }
 0x235   : > { %2487 = vset.pattern.permute.xlu0 %v4104_v24 }
 0x236   : > { %1728 = vperm.xlu0 %2487, %v1643_v32  }
 0x237   : > { %1493 = vrot.lane.b32.xlu1 %v3376_v51, %s4109_s20 }
 0x23a   : > { %2488 = vset.pattern.permute.xlu0 %v4105_v46 }
 0x23b   : > { %1495 = vrot.lane.b32.xlu1 %v3378_v5, %s4109_s20  ;;  %1744 = vperm.xlu0 %2488, %v1643_v32  }
 0x23f   : > { %1509 = vrot.lane.b32.xlu1 %v3376_v51, %s4110_s22  ;;  %2489 = vset.pattern.permute.xlu0 %v4106_v54 }
 0x240   : > { %1760 = vperm.xlu0 %2489, %v1643_v32  }
 0x243   : > { %1511 = vrot.lane.b32.xlu1 %v3378_v5, %s4110_s22 }
 0x244   : > { %2490 = vset.pattern.permute.xlu0 %v4107_v62 }
 0x245   : > { %1680 = vperm.xlu0 %2490, %v1643_v32  }
 0x247   : > { %1525 = vrot.lane.b32.xlu1 %v3376_v51, %s2550_s23 }
 0x24b   : > { %1581 = vperm.xlu1 %2480, %v1402_v0  }
 0x24f   : > { %2481 = vset.pattern.permute.xlu1 %v4112_v3 }
 0x250   : > { %1597 = vperm.xlu1 %2481, %v1402_v0  }
 0x254   : > { %2483 = vset.pattern.permute.xlu1 %v4104_v24 }
 0x255   : > { %1629 = vperm.xlu1 %2483, %v1402_v0  }
 0x259   : > { %2484 = vset.pattern.permute.xlu1 %v4113_v56 }
 0x25a   : > { %1638 = vperm.xlu1 %2484, %v1403_v59  }
 0x25e   : > { %1664 = vperm.xlu1 %2484, %v1643_v32  }
 0x262   : > { %2491 = vset.pattern.permute.xlu1 %v4114_v41 }
 0x263   : > { %1776 = vperm.xlu1 %2491, %v1643_v32  }
 0x267   : > { %2492 = vset.pattern.permute.xlu1 %v4113_v56 }
 0x268   : > { %1793 = vperm.xlu1 %2492, %v3440_v53  }
 0x26c   : > { %2493 = vset.pattern.permute.xlu1 %v4111_v58 }
 0x280   : > { %v1414_v60 = vpop.permute.xlu1 %1413  ;;  %v1416_v38 = vpop.permute.xlu0 %1415 }
 0x281   : > { %v1417_v45 = vsel %vm641_vm0, %v1414_v60, %v1416_v38  ;;  %v1418_v44 = vsel %vm641_vm0, %v1416_v38, %v1414_v60 }
 0x282   : > { %v1419_v33 = vmul.f32 %v1418_v44, %v2917_v18  ;;  %v1420_v23 = vmul.f32 %v1417_v45, %v4116_v34 }
 0x284   : > { %v1430_v42 = vpop.permute.xlu0 %1429  ;;  %v1425_v38 = vmul.f32 %v1423_v13, %v1419_v33  ;;  %v1426_v41 = vmul.f32 %v1423_v13, %v1420_v23 }
 0x291   : > { %v3445_v29 = vpop.permute.xlu1 %1534 }
 0x296   : > { %v3447_v48 = vpop.permute.xlu1 %1551 }
 0x29a   : > { %v1432_v28 = vpop.permute.xlu1 %1431 }
 0x29b   : > { %v1433_v30 = vsel %vm682_vm1, %v1430_v42, %v1432_v28  ;;  %v1434_v57 = vsel %vm682_vm1, %v1432_v28, %v1430_v42 }
 0x29c   : > { %v1435_v1 = vmul.f32 %v1434_v57, %v4117_v6  ;;  %v1436_v0 = vmul.f32 %v1433_v30, %v2948_v25  ;;  %v1412_v30 = vmul.f32 %v1409_v52, %v3378_v5  ;;  %v1411_v57 = vmul.f32 %v1409_v52, %v3376_v51 }
 0x29e   : > { %v1446_v9 = vpop.permute.xlu1 %1445  ;;  %v1441_v25 = vmul.f32 %v1439_v4, %v1435_v1  ;;  %v1442_v6 = vmul.f32 %v1439_v4, %v1436_v0  ;;  %v1428_v23 = vadd.f32 %v1426_v41, %v1412_v30 }
 0x2a2   : > { %v1448_v20 = vpop.permute.xlu1 %1447 }
 0x2a3   : > { %v1449_v32 = vsel %vm723_vm2, %v1446_v9, %v1448_v20  ;;  %v1450_v59 = vsel %vm723_vm2, %v1448_v20, %v1446_v9 }
 0x2a4   : > { %v1451_v45 = vmul.f32 %v1450_v59, %v2959_v17  ;;  %v1452_v42 = vmul.f32 %v1449_v32, %v2966_v15 }
 0x2a6   : > { %v1462_v61 = vpop.permute.xlu1 %1461  ;;  %v1457_v32 = vmul.f32 %v1455_v7, %v1451_v45  ;;  %v1458_v59 = vmul.f32 %v1455_v7, %v1452_v42 }
 0x2aa   : > { %v1464_v35 = vpop.permute.xlu1 %1463 }
 0x2ab   : > { %v1465_v28 = vsel %vm764_vm3, %v1462_v61, %v1464_v35  ;;  %v1466_v44 = vsel %vm764_vm3, %v1464_v35, %v1462_v61  ;;  %v1427_v35 = vadd.f32 %v1425_v38, %v1411_v57 }
 0x2ac   : > { %v1467_v20 = vmul.f32 %v1466_v44, %v2971_v37  ;;  %v1468_v13 = vmul.f32 %v1465_v28, %v2975_v19  ;;  %v1444_v28 = vadd.f32 %v1442_v6, %v1428_v23 }
 0x2ad   : > { %v1443_v0 = vadd.f32 %v1441_v25, %v1427_v35 }
 0x2ae   : > { %v1478_v47 = vpop.permute.xlu1 %1477  ;;  %v1473_v44 = vmul.f32 %v1471_v26, %v1467_v20  ;;  %v1474_v19 = vmul.f32 %v1471_v26, %v1468_v13  ;;  %v1460_v38 = vadd.f32 %v1458_v59, %v1444_v28 }
 0x2b0   : > { %v1476_v57 = vadd.f32 %v1474_v19, %v1460_v38 }
 0x2b2   : > { %v1480_v49 = vpop.permute.xlu1 %1479 }
 0x2b3   : > { %v1481_v33 = vsel %vm805_vm5, %v1478_v47, %v1480_v49  ;;  %v1482_v61 = vsel %vm805_vm5, %v1480_v49, %v1478_v47  ;;  %v1519_v47 = vpop.permute.xlu0 %1518  ;;  %v1459_v49 = vadd.f32 %v1457_v32, %v1443_v0 }
 0x2b4   : > { %v1483_v52 = vmul.f32 %v1481_v33, %v3021_v27  ;;  %v1484_v4 = vmul.f32 %v1482_v61, %v3025_v39 }
 0x2b6   : > { %v1494_v60 = vpop.permute.xlu1 %1493  ;;  %v1489_v45 = vmul.f32 %v1487_v31, %v1483_v52  ;;  %v1490_v42 = vmul.f32 %v1487_v31, %v1484_v4 }
 0x2b7   : > { %v1528_v33 = vpop.permute.xlu0 %1527 }
 0x2b8   : > { %v1492_v35 = vadd.f32 %v1490_v42, %v1476_v57 }
 0x2ba   : > { %v1496_v9 = vpop.permute.xlu1 %1495 }
 0x2bb   : > { %v1497_v51 = vsel %vm846_vm4, %v1494_v60, %v1496_v9  ;;  %v1498_v5 = vsel %vm846_vm4, %v1496_v9, %v1494_v60  ;;  %v1475_v60 = vadd.f32 %v1473_v44, %v1459_v49 }
 0x2bc   : > { %v1499_v41 = vmul.f32 %v1497_v51, %v2999_v40  ;;  %v1500_v7 = vmul.f32 %v1498_v5, %v3016_v22 }
 0x2bd   : > { %v1491_v61 = vadd.f32 %v1489_v45, %v1475_v60 }
 0x2be   : > { %v1510_v1 = vpop.permute.xlu1 %1509  ;;  %v1505_v6 = vmul.f32 %v1503_v10, %v1499_v41  ;;  %v1506_v26 = vmul.f32 %v1503_v10, %v1500_v7  ;;  %v1566_v7 = vpop.permute.xlu0 %1565 }
 0x2c0   : > { %v1507_v51 = vadd.f32 %v1505_v6, %v1491_v61  ;;  %v1508_v5 = vadd.f32 %v1506_v26, %v1492_v35 }
 0x2c2   : > { %v1512_v30 = vpop.permute.xlu1 %1511 }
 0x2c3   : > { %v1513_v9 = vsel %vm887_vm6, %v1510_v1, %v1512_v30  ;;  %v1514_v25 = vsel %vm887_vm6, %v1512_v30, %v1510_v1 }
 0x2c4   : > { %v1515_v20 = vmul.f32 %v1513_v9, %v3037_v21  ;;  %v1516_v13 = vmul.f32 %v1514_v25, %v3041_v2 }
 0x2c6   : > { %v1521_v23 = vmul.f32 %v1519_v47, %v1515_v20  ;;  %v1522_v31 = vmul.f32 %v1519_v47, %v1516_v13  ;;  %v1526_v32 = vpop.permute.xlu1 %1525 }
 0x2c7   : > { %v1529_v19 = vsel %vm928_vm7, %v1526_v32, %v1528_v33  ;;  %v1530_v59 = vsel %vm928_vm7, %v1528_v33, %v1526_v32 }
 0x2c8   : > { %v1531_v10 = vmul.f32 %v1529_v19, %v3086_v50  ;;  %v1532_v52 = vmul.f32 %v1530_v59, %v3090_v12  ;;  %v1523_v4 = vadd.f32 %v1521_v23, %v1507_v51  ;;  %v1524_v1 = vadd.f32 %v1522_v31, %v1508_v5  ;;  %v1614_v23 = vpop.permute.xlu0 %1613 }
 0x2ca   : > { %v1537_v0 = vmul.f32 %v3445_v29, %v1531_v10  ;;  %v1538_v28 = vmul.f32 %v3445_v29, %v1532_v52  ;;  %v1582_v44 = vpop.permute.xlu1 %1581 }
 0x2cc   : > { %v1539_v47 = vadd.f32 %v1537_v0, %v1523_v4  ;;  %v1540_v41 = vadd.f32 %v1538_v28, %v1524_v1 }
 0x2ce   : > { %v1544_v49 = vrot.slane %v1539_v47, %v4092_v11  ;;  %v1548_v38 = vrot.slane %v1540_v41, %v4092_v11  ;;  %v1559_v45 = vrot.slane %v1539_v47, %v4095_v8  ;;  %v1563_v42 = vrot.slane %v1540_v41, %v4095_v8 }
 0x2cf   : > { %v1579_v30 = vrot.slane %v1540_v41, %v4097_v16  ;;  %v1575_v60 = vrot.slane %v1539_v47, %v4097_v16  ;;  %v1598_v57 = vpop.permute.xlu1 %1597  ;;  %v1607_v13 = vrot.slane %v1539_v47, %v4101_v14  ;;  %v1611_v33 = vrot.slane %v1540_v41, %v4101_v14 }
 0x2d0   : > { %v1554_v9 = vmul.f32 %v3447_v48, %v1544_v49  ;;  %v1555_v29 = vmul.f32 %v3447_v48, %v1548_v38  ;;  %v1568_v25 = vmul.f32 %v1566_v7, %v1559_v45  ;;  %v1569_v6 = vmul.f32 %v1566_v7, %v1563_v42 }
 0x2d1   : > { %v1584_v26 = vmul.f32 %v1582_v44, %v1575_v60  ;;  %v1585_v20 = vmul.f32 %v1582_v44, %v1579_v30  ;;  %v1595_v31 = vrot.slane %v1540_v41, %v4099_v55  ;;  %v1591_v32 = vrot.slane %v1539_v47, %v4099_v55 }
 0x2d2   : > { %v1570_v61 = vadd.f32 %v1568_v25, %v1554_v9  ;;  %v1571_v35 = vadd.f32 %v1569_v6, %v1555_v29  ;;  %v1616_v48 = vmul.f32 %v1614_v23, %v1607_v13  ;;  %v1617_v10 = vmul.f32 %v1614_v23, %v1611_v33  ;;  %v3578_v25 = vld [vmem:[%s3981_s15] sm:$0x3f] }
 0x2d3   : > { %v1600_v51 = vmul.f32 %v1598_v57, %v1591_v32  ;;  %v1601_v5 = vmul.f32 %v1598_v57, %v1595_v31  ;;  %v1627_v0 = vrot.slane %v1540_v41, %v4102_v43  ;;  %v1623_v28 = vrot.slane %v1539_v47, %v4102_v43  ;;  %v1885_v47 = vld [vmem:[%s3980_s14] sm:$0x3f] }
 0x2d4   : > { %v1586_v19 = vadd.f32 %v1584_v26, %v1570_v61  ;;  %v1587_v59 = vadd.f32 %v1585_v20, %v1571_v35  ;;  %v1630_v52 = vpop.permute.xlu1 %1629  ;;  %v3566_v41 = vld [vmem:[%s3983_s17] sm:$0x3f]  ;;  %v1651_v26 = vpop.permute.xlu0 %1650 }
 0x2d5   : > { %v1632_v44 = vmul.f32 %v1630_v52, %v1623_v28  ;;  %v1633_v7 = vmul.f32 %v1630_v52, %v1627_v0  ;;  %v1645_v6 = vld [vmem:[%s3979_s13] sm:$0x3f] }
 0x2d6   : > { %v1602_v4 = vadd.f32 %v1600_v51, %v1586_v19  ;;  %v1603_v1 = vadd.f32 %v1601_v5, %v1587_v59 }
 0x2d8   : > { %v1619_v49 = vadd.f32 %v1617_v10, %v1603_v1  ;;  %v1618_v38 = vadd.f32 %v1616_v48, %v1602_v4  ;;  %v3596_v20 = vpop.permute.xlu0 %1696 }
 0x2d9   : > { %v1639_v30 = vpop.permute.xlu1 %1638 }
 0x2da   : > { %v1635_v45 = vadd.f32 %v1633_v7, %v1619_v49  ;;  %v1634_v42 = vadd.f32 %v1632_v44, %v1618_v38 }
 0x2dc   : > { %v1641_v60 = vadd.f32 %v1639_v30, %v1634_v42  ;;  %v1642_v9 = vadd.f32 %v1639_v30, %v1635_v45 }
 0x2dd   : > { %v1665_v33 = vpop.permute.xlu1 %1664 }
 0x2de   : > { %v3515_v29 = vmax.f32 %v1641_v60, 0.0  ;;  %v3517_v57 = vmax.f32 %v1642_v9, 0.0 }
 0x2e0   : > { %1657 = vrot.lane.b32.xlu0 %v3517_v57, %s4055_s27  ;;  %1655 = vrot.lane.b32.xlu1 %v3515_v29, %s4055_s27  ;;  %s4127_s27 = smov 17  }
 0x2e4   : > { %1671 = vrot.lane.b32.xlu0 %v3515_v29, %s4053_s28  ;;  %1823 = vperm.xlu1 %2493, %v3440_v53  }
 0x2e8   : > { %1807 = vperm.xlu0 %2490, %v3440_v53   ;;  %2494 = vset.pattern.permute.xlu1 %v4112_v3 }
 0x2e9   : > { %1839 = vperm.xlu1 %2494, %v3440_v53  }
 0x2ec   : > { %1769 = vrot.lane.b32.xlu0 %v3517_v57, %s2550_s23 }
 0x2ed   : > { %1673 = vrot.lane.b32.xlu1 %v3517_v57, %s4053_s28  ;;  %2495 = vset.pattern.permute.xlu0 %v4108_v36  ;;  %s4128_s28 = smov 16  }
 0x2ee   : > { %2496 = vset.pattern.permute.xlu1 %v4104_v24 }
 0x2f0   : > { %1855 = vperm.xlu0 %2495, %v3440_v53  }
 0x2f1   : > { %1687 = vrot.lane.b32.xlu1 %v3515_v29, %s4118_s29 }
 0x2f4   : > { %2498 = vset.pattern.permute.xlu0 %v4107_v62 }
 0x2f5   : > { %1689 = vrot.lane.b32.xlu1 %v3517_v57, %s4118_s29  ;;  %1922 = vperm.xlu0 %2498, %v1885_v47  }
 0x2f9   : > { %1703 = vrot.lane.b32.xlu1 %v3515_v29, %s4115_s2  ;;  %2499 = vset.pattern.permute.xlu0 %v4112_v3 }
 0x2fa   : > { %1954 = vperm.xlu0 %2499, %v1885_v47  }
 0x2fd   : > { %1705 = vrot.lane.b32.xlu1 %v3517_v57, %s4115_s2 }
 0x2fe   : > { %2500 = vset.pattern.permute.xlu0 %v4104_v24 }
 0x2ff   : > { %1970 = vperm.xlu0 %2500, %v1885_v47  }
 0x301   : > { %1719 = vrot.lane.b32.xlu1 %v3515_v29, %s4119_s3 }
 0x303   : > { %2501 = vset.pattern.permute.xlu0 %v4105_v46 }
 0x304   : > { %1986 = vperm.xlu0 %2501, %v1885_v47  }
 0x305   : > { %1721 = vrot.lane.b32.xlu1 %v3517_v57, %s4119_s3 }
 0x308   : > { %2504 = vset.pattern.permute.xlu0 %v4106_v54 }
 0x309   : > { %1735 = vrot.lane.b32.xlu1 %v3515_v29, %s4109_s20  ;;  %2002 = vperm.xlu0 %2504, %v1885_v47  }
 0x30d   : > { %1737 = vrot.lane.b32.xlu1 %v3517_v57, %s4109_s20  ;;  %2505 = vset.pattern.permute.xlu0 %v4108_v36 }
 0x30e   : > { %1892 = vperm.xlu0 %2505, %v1885_v47  }
 0x311   : > { %1751 = vrot.lane.b32.xlu1 %v3515_v29, %s4110_s22 }
 0x312   : > { %2201 = vperm.xlu0 %2505, %v3566_v41  }
 0x315   : > { %1753 = vrot.lane.b32.xlu1 %v3517_v57, %s4110_s22 }
 0x316   : > { %2508 = vset.pattern.permute.xlu0 %v4113_v56 }
 0x317   : > { %2139 = vperm.xlu0 %2508, %v3566_v41  }
 0x319   : > { %1767 = vrot.lane.b32.xlu1 %v3515_v29, %s2550_s23 }
 0x31b   : > { %2035 = vperm.xlu0 %2508, %v3578_v25  }
 0x31d   : > { %1871 = vperm.xlu1 %2496, %v3440_v53   ;;  %v4120_v53 = vmov 8  }
 0x31f   : > { %2511 = vset.pattern.permute.xlu0 %v4111_v58 }
 0x320   : > { %1938 = vperm.xlu0 %2511, %v1885_v47  }
 0x321   : > { %2497 = vset.pattern.permute.xlu1 %v4113_v56 }
 0x322   : > { %1880 = vperm.xlu1 %2497, %v1645_v6  }
 0x326   : > { %1906 = vperm.xlu1 %2497, %v1885_v47  }
 0x32a   : > { %2502 = vset.pattern.permute.xlu1 %v4107_v62 }
 0x32b   : > { %2153 = vperm.xlu1 %2502, %v3566_v41  }
 0x32f   : > { %2503 = vset.pattern.permute.xlu1 %v4111_v58  ;;  %v3600_v58 = vpop.permute.xlu0 %1712 }
 0x330   : > { %2169 = vperm.xlu1 %2503, %v3566_v41  }
 0x333   : > { %v3604_v13 = vpop.permute.xlu0 %1728 }
 0x334   : > { %2506 = vset.pattern.permute.xlu1 %v4112_v3 }
 0x335   : > { %2185 = vperm.xlu1 %2506, %v3566_v41  }
 0x337   : > { %v3608_v61 = vpop.permute.xlu0 %1744 }
 0x339   : > { %2507 = vset.pattern.permute.xlu1 %v4120_v53 }
 0x33a   : > { %2018 = vperm.xlu1 %2507, %v1885_v47   ;;  %v4123_v47 = vld [vmem:[#allocation14_spill] sm:$0xff] }
 0x33b   : > { %v3613_v35 = vpop.permute.xlu0 %1760 }
 0x33e   : > { %2509 = vset.pattern.permute.xlu1 %v4104_v24 }
 0x33f   : > { %2217 = vperm.xlu1 %2509, %v3566_v41  }
 0x343   : > { %2510 = vset.pattern.permute.xlu1 %v4105_v46  ;;  %v3611_v46 = vpop.permute.xlu1 %1776 }
 0x344   : > { %2233 = vperm.xlu1 %2510, %v3566_v41  }
 0x347   : > { %v3615_v23 = vpop.permute.xlu1 %1793 }
 0x348   : > { %2512 = vset.pattern.permute.xlu1 %v4107_v62  ;;  %v1681_v62 = vpop.permute.xlu0 %1680 }
 0x349   : > { %2049 = vperm.xlu1 %2512, %v3578_v25  }
 0x34d   : > { %2513 = vset.pattern.permute.xlu1 %v4106_v54 }
 0x34e   : > { %2249 = vperm.xlu1 %2513, %v3566_v41  }
 0x352   : > { %2514 = vset.pattern.permute.xlu1 %v4120_v53  ;;  %v1656_v31 = vpop.permute.xlu1 %1655  ;;  %v1658_v19 = vpop.permute.xlu0 %1657  ;;  %v4124_v53 = vld [vmem:[#allocation15_spill] sm:$0xff] }
 0x353   : > { %v1659_v7 = vsel %vm641_vm0, %v1656_v31, %v1658_v19  ;;  %v1660_v49 = vsel %vm641_vm0, %v1658_v19, %v1656_v31 }
 0x354   : > { %v1661_v60 = vmul.f32 %v1660_v49, %v2917_v18  ;;  %v1662_v9 = vmul.f32 %v1659_v7, %v4116_v34 }
 0x356   : > { %v1672_v54 = vpop.permute.xlu0 %1671  ;;  %v1667_v56 = vmul.f32 %v1665_v33, %v1661_v60  ;;  %v1668_v24 = vmul.f32 %v1665_v33, %v1662_v9  ;;  %v4126_v9 = vld [vmem:[#allocation17_spill] sm:$0xff] }
 0x363   : > { %v3617_v32 = vpop.permute.xlu1 %1823 }
 0x367   : > { %v3621_v5 = vpop.permute.xlu0 %1807 }
 0x368   : > { %v3619_v59 = vpop.permute.xlu1 %1839 }
 0x36b   : > { %v3623_v10 = vpop.permute.xlu0 %1769 }
 0x36c   : > { %v1674_v51 = vpop.permute.xlu1 %1673 }
 0x36d   : > { %v1675_v42 = vsel %vm682_vm1, %v1672_v54, %v1674_v51  ;;  %v1676_v30 = vsel %vm682_vm1, %v1674_v51, %v1672_v54 }
 0x36e   : > { %v1677_v6 = vmul.f32 %v1676_v30, %v4123_v47  ;;  %v1654_v30 = vmul.f32 %v1651_v26, %v3517_v57 }
 0x36f   : > { %v3625_v1 = vpop.permute.xlu0 %1855 }
 0x370   : > { %v1688_v48 = vpop.permute.xlu1 %1687 }
 0x374   : > { %v1690_v52 = vpop.permute.xlu1 %1689  ;;  %v3627_v28 = vpop.permute.xlu0 %1922 }
 0x375   : > { %4121 = vst [vmem:[#allocation5_spill] sm:$0xff] %v3627_v28  ;;  %v1678_v28 = vmul.f32 %v1675_v42, %v4124_v53  ;;  %v1691_v31 = vsel %vm723_vm2, %v1688_v48, %v1690_v52  ;;  %v1692_v19 = vsel %vm723_vm2, %v1690_v52, %v1688_v48  ;;  %v1653_v53 = vmul.f32 %v1651_v26, %v3515_v29 }
 0x376   : > { %v1693_v49 = vmul.f32 %v1692_v19, %v2959_v17  ;;  %v1694_v42 = vmul.f32 %v1691_v31, %v2966_v15  ;;  %v1683_v48 = vmul.f32 %v1681_v62, %v1677_v6 }
 0x377   : > { %v1684_v52 = vmul.f32 %v1681_v62, %v1678_v28  ;;  %v1669_v19 = vadd.f32 %v1667_v56, %v1653_v53 }
 0x378   : > { %v1704_v4 = vpop.permute.xlu1 %1703  ;;  %v1699_v31 = vmul.f32 %v3596_v20, %v1693_v49  ;;  %v1700_v57 = vmul.f32 %v3596_v20, %v1694_v42 }
 0x379   : > { %v3633_v45 = vpop.permute.xlu0 %1954 }
 0x37a   : > { %4122 = vst [vmem:[#allocation3_spill] sm:$0xff] %v3633_v45 }
 0x37c   : > { %v1706_v0 = vpop.permute.xlu1 %1705 }
 0x37d   : > { %v1707_v54 = vsel %vm764_vm3, %v1704_v4, %v1706_v0  ;;  %v1708_v51 = vsel %vm764_vm3, %v1706_v0, %v1704_v4 }
 0x37e   : > { %v3651_v7 = vpop.permute.xlu0 %1970  ;;  %v1709_v33 = vmul.f32 %v1708_v51, %v2971_v37  ;;  %v1710_v47 = vmul.f32 %v1707_v54, %v4126_v9 }
 0x37f   : > { %4125 = vst [vmem:[#allocation9_spill] sm:$0xff] %v3651_v7  ;;  %v1670_v7 = vadd.f32 %v1668_v24, %v1654_v30 }
 0x380   : > { %v1720_v44 = vpop.permute.xlu1 %1719  ;;  %v1715_v24 = vmul.f32 %v3600_v58, %v1709_v33 }
 0x381   : > { %v1686_v56 = vadd.f32 %v1684_v52, %v1670_v7 }
 0x383   : > { %v3671_v54 = vpop.permute.xlu0 %1986  ;;  %v1702_v49 = vadd.f32 %v1700_v57, %v1686_v56 }
 0x384   : > { %v1722_v38 = vpop.permute.xlu1 %1721 }
 0x385   : > { %v1723_v4 = vsel %vm805_vm5, %v1720_v44, %v1722_v38  ;;  %v1724_v0 = vsel %vm805_vm5, %v1722_v38, %v1720_v44  ;;  %v1685_v44 = vadd.f32 %v1683_v48, %v1669_v19  ;;  %v1716_v38 = vmul.f32 %v3600_v58, %v1710_v47 }
 0x386   : > { %v1725_v62 = vmul.f32 %v1723_v4, %v3021_v27  ;;  %v1726_v28 = vmul.f32 %v1724_v0, %v3025_v39 }
 0x387   : > { %v1701_v51 = vadd.f32 %v1699_v31, %v1685_v44  ;;  %v1718_v4 = vadd.f32 %v1716_v38, %v1702_v49 }
 0x388   : > { %v1736_v45 = vpop.permute.xlu1 %1735  ;;  %v1732_v42 = vmul.f32 %v3604_v13, %v1726_v28  ;;  %v3687_v0 = vpop.permute.xlu0 %2002 }
 0x38a   : > { %v1734_v19 = vadd.f32 %v1732_v42, %v1718_v4 }
 0x38c   : > { %v1738_v60 = vpop.permute.xlu1 %1737 }
 0x38d   : > { %v1739_v29 = vsel %vm846_vm4, %v1736_v45, %v1738_v60  ;;  %v1740_v26 = vsel %vm846_vm4, %v1738_v60, %v1736_v45  ;;  %v1731_v45 = vmul.f32 %v3604_v13, %v1725_v62  ;;  %v1717_v60 = vadd.f32 %v1715_v24, %v1701_v51 }
 0x38e   : > { %v1741_v20 = vmul.f32 %v1739_v29, %v2999_v40  ;;  %v1742_v53 = vmul.f32 %v1740_v26, %v3016_v22 }
 0x38f   : > { %v1733_v13 = vadd.f32 %v1731_v45, %v1717_v60 }
 0x390   : > { %v1752_v6 = vpop.permute.xlu1 %1751  ;;  %v1747_v58 = vmul.f32 %v3608_v61, %v1741_v20  ;;  %v1748_v47 = vmul.f32 %v3608_v61, %v1742_v53  ;;  %v3701_v20 = vpop.permute.xlu0 %1892 }
 0x392   : > { %v1749_v62 = vadd.f32 %v1747_v58, %v1733_v13  ;;  %v1750_v28 = vadd.f32 %v1748_v47, %v1734_v19 }
 0x394   : > { %v1754_v30 = vpop.permute.xlu1 %1753  ;;  %v3707_v60 = vpop.permute.xlu0 %2201 }
 0x395   : > { %v1755_v7 = vsel %vm887_vm6, %v1752_v6, %v1754_v30  ;;  %v1756_v48 = vsel %vm887_vm6, %v1754_v30, %v1752_v6 }
 0x396   : > { %v1757_v52 = vmul.f32 %v1755_v7, %v3037_v21  ;;  %v1758_v33 = vmul.f32 %v1756_v48, %v3041_v2 }
 0x398   : > { %v1763_v31 = vmul.f32 %v3613_v35, %v1757_v52  ;;  %v1764_v57 = vmul.f32 %v3613_v35, %v1758_v33  ;;  %v1768_v29 = vpop.permute.xlu1 %1767 }
 0x399   : > { %v1771_v26 = vsel %vm928_vm7, %v1768_v29, %v3623_v10  ;;  %v1772_v61 = vsel %vm928_vm7, %v3623_v10, %v1768_v29 }
 0x39a   : > { %v1773_v6 = vmul.f32 %v1771_v26, %v3086_v50  ;;  %v1774_v44 = vmul.f32 %v1772_v61, %v3090_v12  ;;  %v1765_v56 = vadd.f32 %v1763_v31, %v1749_v62  ;;  %v1766_v24 = vadd.f32 %v1764_v57, %v1750_v28 }
 0x39c   : > { %v1779_v38 = vmul.f32 %v3611_v46, %v1773_v6  ;;  %v1780_v35 = vmul.f32 %v3611_v46, %v1774_v44  ;;  %v1872_v53 = vpop.permute.xlu1 %1871 }
 0x39e   : > { %v1781_v51 = vadd.f32 %v1779_v38, %v1765_v56  ;;  %v1782_v49 = vadd.f32 %v1780_v35, %v1766_v24  ;;  %v2140_v38 = vpop.permute.xlu0 %2139 }
 0x3a0   : > { %v1786_v45 = vrot.slane %v1781_v51, %v4092_v11  ;;  %v1790_v10 = vrot.slane %v1782_v49, %v4092_v11  ;;  %v1801_v42 = vrot.slane %v1781_v51, %v4095_v8  ;;  %v1805_v30 = vrot.slane %v1782_v49, %v4095_v8 }
 0x3a1   : > { %v1817_v4 = vrot.slane %v1781_v51, %v4097_v16  ;;  %v1821_v7 = vrot.slane %v1782_v49, %v4097_v16  ;;  %v1833_v46 = vrot.slane %v1781_v51, %v4099_v55  ;;  %v1837_v48 = vrot.slane %v1782_v49, %v4099_v55  ;;  %v1881_v58 = vpop.permute.xlu1 %1880 }
 0x3a2   : > { %v1796_v47 = vmul.f32 %v3615_v23, %v1786_v45  ;;  %v1797_v52 = vmul.f32 %v3615_v23, %v1790_v10  ;;  %v1810_v33 = vmul.f32 %v3621_v5, %v1801_v42  ;;  %v1811_v13 = vmul.f32 %v3621_v5, %v1805_v30  ;;  %v3724_v23 = vld [vmem:[%s2682_s26] sm:$0xff]  ;;  %v3735_v45 = vld [vmem:[%s2682_s26 + $0x8] sm:$0xff] }
 0x3a3   : > { %v1826_v19 = vmul.f32 %v3617_v32, %v1817_v4  ;;  %v1827_v31 = vmul.f32 %v3617_v32, %v1821_v7  ;;  %v1849_v26 = vrot.slane %v1781_v51, %v4101_v14  ;;  %v1853_v61 = vrot.slane %v1782_v49, %v4101_v14 }
 0x3a4   : > { %v1812_v57 = vadd.f32 %v1810_v33, %v1796_v47  ;;  %v1813_v29 = vadd.f32 %v1811_v13, %v1797_v52  ;;  %v1842_v62 = vmul.f32 %v3619_v59, %v1833_v46  ;;  %v1843_v28 = vmul.f32 %v3619_v59, %v1837_v48 }
 0x3a5   : > { %v2132_v5 = vrot.slane %v3724_v23, %v4092_v11  ;;  %v1869_v32 = vrot.slane %v1782_v49, %v4102_v43  ;;  %v1865_v56 = vrot.slane %v1781_v51, %v4102_v43  ;;  %v3730_v24 = vpop.permute.xlu1 %1906  ;;  %v2147_v35 = vrot.slane %v3724_v23, %v4095_v8 }
 0x3a6   : > { %v1828_v6 = vadd.f32 %v1826_v19, %v1812_v57  ;;  %v1829_v44 = vadd.f32 %v1827_v31, %v1813_v29  ;;  %v2151_v59 = vrot.slane %v3735_v45, %v4095_v8  ;;  %v2136_v10 = vrot.slane %v3735_v45, %v4092_v11 }
 0x3a7   : > { %v1858_v49 = vmul.f32 %v3625_v1, %v1849_v26  ;;  %v1859_v51 = vmul.f32 %v3625_v1, %v1853_v61  ;;  %v2142_v4 = vmul.f32 %v2140_v38, %v2132_v5  ;;  %v1874_v48 = vmul.f32 %v1872_v53, %v1865_v56 }
 0x3a8   : > { %v1844_v42 = vadd.f32 %v1842_v62, %v1828_v6  ;;  %v1845_v30 = vadd.f32 %v1843_v28, %v1829_v44  ;;  %v1875_v47 = vmul.f32 %v1872_v53, %v1869_v32  ;;  %v2143_v19 = vmul.f32 %v2140_v38, %v2136_v10 }
 0x3a9   : > { %v2163_v29 = vrot.slane %v3724_v23, %v4097_v16  ;;  %v2167_v62 = vrot.slane %v3735_v45, %v4097_v16  ;;  %v2179_v56 = vrot.slane %v3724_v23, %v4099_v55  ;;  %v2183_v38 = vrot.slane %v3735_v45, %v4099_v55 }
 0x3aa   : > { %v1860_v7 = vadd.f32 %v1858_v49, %v1844_v42  ;;  %v1861_v46 = vadd.f32 %v1859_v51, %v1845_v30  ;;  %v2154_v52 = vpop.permute.xlu1 %2153  ;;  %v2195_v30 = vrot.slane %v3724_v23, %v4101_v14  ;;  %v2199_v49 = vrot.slane %v3735_v45, %v4101_v14 }
 0x3ab   : > { %v2156_v33 = vmul.f32 %v2154_v52, %v2147_v35  ;;  %v2157_v13 = vmul.f32 %v2154_v52, %v2151_v59  ;;  %v2215_v52 = vrot.slane %v3735_v45, %v4102_v43 }
 0x3ac   : > { %v1877_v31 = vadd.f32 %v1875_v47, %v1861_v46  ;;  %v1876_v57 = vadd.f32 %v1874_v48, %v1860_v7  ;;  %v2204_v7 = vmul.f32 %v3707_v60, %v2195_v30  ;;  %v2205_v46 = vmul.f32 %v3707_v60, %v2199_v49 }
 0x3ad   : > { %v2158_v1 = vadd.f32 %v2156_v33, %v2142_v4  ;;  %v2159_v5 = vadd.f32 %v2157_v13, %v2143_v19  ;;  %v2211_v47 = vrot.slane %v3724_v23, %v4102_v43  ;;  %v4129_v19 = vmov 9  }
 0x3ae   : > { %v1883_v26 = vadd.f32 %v1881_v58, %v1876_v57  ;;  %v1884_v28 = vadd.f32 %v1881_v58, %v1877_v31  ;;  %v4130_v57 = vld [vmem:[#allocation20_spill] sm:$0xff] }
 0x3af   : > { %v2170_v61 = vpop.permute.xlu1 %2169 }
 0x3b0   : > { %v3747_v6 = vmax.f32 %v1883_v26, 0.0  ;;  %v3749_v53 = vmax.f32 %v1884_v28, 0.0  ;;  %v2172_v44 = vmul.f32 %v2170_v61, %v2163_v29  ;;  %v2173_v32 = vmul.f32 %v2170_v61, %v2167_v62 }
 0x3b1   : > { %v2227_v29 = vrot.slane %v3724_v23, %v4130_v57  ;;  %v2231_v62 = vrot.slane %v3735_v45, %v4130_v57 }
 0x3b2   : > { %1899 = vrot.lane.b32.xlu0 %v3749_v53, %s4127_s27  ;;  %1897 = vrot.lane.b32.xlu1 %v3747_v6, %s4127_s27  ;;  %v2174_v58 = vadd.f32 %v2172_v44, %v2158_v1  ;;  %v2175_v35 = vadd.f32 %v2173_v32, %v2159_v5  ;;  %v4131_v44 = vmov 5  }
 0x3b4   : > { %v2186_v59 = vpop.permute.xlu1 %2185 }
 0x3b5   : > { %v2188_v10 = vmul.f32 %v2186_v59, %v2179_v56  ;;  %v2189_v42 = vmul.f32 %v2186_v59, %v2183_v38  ;;  %v2128_v56 = vld [vmem:[%s3984_s18] sm:$0x3f]  ;;  %v4132_v38 = vmov 0  }
 0x3b6   : > { %1913 = vrot.lane.b32.xlu0 %v3747_v6, %s4128_s28  ;;  %2265 = vperm.xlu1 %2514, %v3566_v41   ;;  %v1887_v59 = vld [vmem:[%s3982_s16] sm:$0x3f] }
 0x3b7   : > { %v2190_v51 = vadd.f32 %v2188_v10, %v2174_v58  ;;  %v2191_v4 = vadd.f32 %v2189_v42, %v2175_v35  ;;  %v4133_v58 = vmov 10   ;;  %v4134_v35 = vmov 11  }
 0x3b9   : > { %v3768_v48 = vpop.permute.xlu1 %2018  ;;  %v2206_v33 = vadd.f32 %v2204_v7, %v2190_v51  ;;  %v2207_v13 = vadd.f32 %v2205_v46, %v2191_v4  ;;  %v3835_v4 = vld [vmem:[%s2682_s26 + $0x10] sm:$0xf] }
 0x3ba   : > { %2065 = vperm.xlu0 %2511, %v3578_v25   ;;  %2515 = vset.pattern.permute.xlu1 %v4112_v3 }
 0x3bb   : > { %2081 = vperm.xlu1 %2515, %v3578_v25  }
 0x3be   : > { %2011 = vrot.lane.b32.xlu0 %v3749_v53, %s2550_s23  ;;  %v2218_v60 = vpop.permute.xlu1 %2217 }
 0x3bf   : > { %1915 = vrot.lane.b32.xlu1 %v3749_v53, %s4128_s28  ;;  %2516 = vset.pattern.permute.xlu0 %v4129_v19  ;;  %v2220_v3 = vmul.f32 %v2218_v60, %v2211_v47  ;;  %v2221_v31 = vmul.f32 %v2218_v60, %v2215_v52 }
 0x3c0   : > { %2517 = vset.pattern.permute.xlu1 %v4108_v36 }
 0x3c1   : > { %v2222_v26 = vadd.f32 %v2220_v3, %v2206_v33  ;;  %v2223_v28 = vadd.f32 %v2221_v31, %v2207_v13 }
 0x3c2   : > { %2281 = vperm.xlu0 %2516, %v3566_v41  }
 0x3c3   : > { %1929 = vrot.lane.b32.xlu1 %v3747_v6, %s4118_s29  ;;  %v2234_v1 = vpop.permute.xlu1 %2233 }
 0x3c4   : > { %v2236_v61 = vmul.f32 %v2234_v1, %v2227_v29  ;;  %v2237_v5 = vmul.f32 %v2234_v1, %v2231_v62 }
 0x3c6   : > { %2519 = vset.pattern.permute.xlu0 %v4131_v44  ;;  %v2238_v32 = vadd.f32 %v2236_v61, %v2222_v26  ;;  %v3791_v36 = vadd.f32 %v2237_v5, %v2223_v28 }
 0x3c7   : > { %1931 = vrot.lane.b32.xlu1 %v3749_v53, %s4118_s29  ;;  %2113 = vperm.xlu0 %2519, %v3578_v25  }
 0x3c8   : > { %v3827_v10 = vpop.permute.xlu1 %2049 }
 0x3cb   : > { %1945 = vrot.lane.b32.xlu1 %v3747_v6, %s4115_s2  ;;  %2522 = vset.pattern.permute.xlu0 %v4132_v38 }
 0x3cc   : > { %2322 = vperm.xlu0 %2522, %v2128_v56  }
 0x3cd   : > { %v3829_v42 = vpop.permute.xlu1 %2249 }
 0x3cf   : > { %1947 = vrot.lane.b32.xlu1 %v3749_v53, %s4115_s2 }
 0x3d3   : > { %1961 = vrot.lane.b32.xlu1 %v3747_v6, %s4119_s3 }
 0x3d7   : > { %1963 = vrot.lane.b32.xlu1 %v3749_v53, %s4119_s3 }
 0x3db   : > { %1977 = vrot.lane.b32.xlu1 %v3747_v6, %s4109_s20 }
 0x3df   : > { %1979 = vrot.lane.b32.xlu1 %v3749_v53, %s4109_s20 }
 0x3e3   : > { %1993 = vrot.lane.b32.xlu1 %v3747_v6, %s4110_s22 }
 0x3e7   : > { %1995 = vrot.lane.b32.xlu1 %v3749_v53, %s4110_s22 }
 0x3eb   : > { %2009 = vrot.lane.b32.xlu1 %v3747_v6, %s2550_s23 }
 0x3ef   : > { %2097 = vperm.xlu1 %2517, %v3578_v25   ;;  %v4135_v25 = vld [vmem:[#allocation21_spill] sm:$0xff] }
 0x3f0   : > { %v2243_v30 = vrot.slane %v3724_v23, %v4135_v25  ;;  %v3846_v23 = vpop.permute.xlu0 %2035 }
 0x3f2   : > { %v2252_v51 = vmul.f32 %v3829_v42, %v2243_v30 }
 0x3f3   : > { %2518 = vset.pattern.permute.xlu1 %v4133_v58 }
 0x3f4   : > { %2297 = vperm.xlu1 %2518, %v3566_v41   ;;  %v2254_v46 = vadd.f32 %v2252_v51, %v2238_v32  ;;  %v1939_v3 = vpop.permute.xlu0 %1938 }
 0x3f8   : > { %2520 = vset.pattern.permute.xlu1 %v4134_v35  ;;  %v4137_v35 = vld [vmem:[#allocation15_spill] sm:$0xff] }
 0x3f9   : > { %2313 = vperm.xlu1 %2520, %v3566_v41   ;;  %v2259_v41 = vrot.slane %v3835_v4, %v4092_v11 }
 0x3fd   : > { %2521 = vset.pattern.permute.xlu1 %v4132_v38  ;;  %v4136_v38 = vld [vmem:[#allocation14_spill] sm:$0xff] }
 0x3fe   : > { %2122 = vperm.xlu1 %2521, %v1887_v59  }
 0x424   : > { %v1898_v49 = vpop.permute.xlu1 %1897  ;;  %v1900_v29 = vpop.permute.xlu0 %1899 }
 0x425   : > { %v1901_v26 = vsel %vm641_vm0, %v1898_v49, %v1900_v29  ;;  %v1902_v28 = vsel %vm641_vm0, %v1900_v29, %v1898_v49  ;;  %v1895_v29 = vmul.f32 %v3701_v20, %v3747_v6 }
 0x426   : > { %v1903_v32 = vmul.f32 %v1902_v28, %v2917_v18  ;;  %v1904_v56 = vmul.f32 %v1901_v26, %v4116_v34 }
 0x428   : > { %v1914_v1 = vpop.permute.xlu0 %1913 }
 0x435   : > { %v3839_v7 = vpop.permute.xlu1 %2265 }
 0x436   : > { %v2268_v47 = vmul.f32 %v3839_v7, %v2259_v41  ;;  %v1909_v41 = vmul.f32 %v3730_v24, %v1903_v32 }
 0x438   : > { %v3842_v52 = vadd.f32 %v2268_v47, %v2254_v46  ;;  %v1910_v46 = vmul.f32 %v3730_v24, %v1904_v56 }
 0x439   : > { %v3888_v32 = vpop.permute.xlu0 %2065 }
 0x43a   : > { %v3844_v33 = vpop.permute.xlu1 %2081 }
 0x43e   : > { %v1916_v13 = vpop.permute.xlu1 %1915 }
 0x43f   : > { %v1917_v5 = vsel %vm682_vm1, %v1914_v1, %v1916_v13  ;;  %v1918_v44 = vsel %vm682_vm1, %v1916_v13, %v1914_v1 }
 0x440   : > { %v1919_v58 = vmul.f32 %v1918_v44, %v4136_v38  ;;  %v1920_v59 = vmul.f32 %v1917_v5, %v4137_v35 }
 0x442   : > { %v1930_v60 = vpop.permute.xlu1 %1929 }
 0x446   : > { %v1932_v19 = vpop.permute.xlu1 %1931 }
 0x447   : > { %v1933_v30 = vsel %vm723_vm2, %v1930_v60, %v1932_v19  ;;  %v1934_v49 = vsel %vm723_vm2, %v1932_v19, %v1930_v60  ;;  %v1896_v60 = vmul.f32 %v3701_v20, %v3749_v53  ;;  %v4138_v19 = vld [vmem:[#allocation5_spill] sm:$0xff] }
 0x448   : > { %v1935_v47 = vmul.f32 %v1934_v49, %v2959_v17  ;;  %v1936_v13 = vmul.f32 %v1933_v30, %v2966_v15  ;;  %v1925_v26 = vmul.f32 %v4138_v19, %v1919_v58  ;;  %v1926_v24 = vmul.f32 %v4138_v19, %v1920_v59 }
 0x449   : > { %v1912_v6 = vadd.f32 %v1910_v46, %v1896_v60 }
 0x44a   : > { %v1946_v31 = vpop.permute.xlu1 %1945  ;;  %v1942_v44 = vmul.f32 %v1939_v3, %v1936_v13 }
 0x44b   : > { %v1928_v58 = vadd.f32 %v1926_v24, %v1912_v6 }
 0x44d   : > { %v1944_v49 = vadd.f32 %v1942_v44, %v1928_v58  ;;  %v2291_v58 = vrot.slane %v3835_v4, %v4097_v16 }
 0x44e   : > { %v1948_v57 = vpop.permute.xlu1 %1947 }
 0x44f   : > { %v1949_v18 = vsel %vm764_vm3, %v1946_v31, %v1948_v57  ;;  %v1950_v34 = vsel %vm764_vm3, %v1948_v57, %v1946_v31  ;;  %v1911_v31 = vadd.f32 %v1909_v41, %v1895_v29  ;;  %v1941_v57 = vmul.f32 %v1939_v3, %v1935_v47  ;;  %v4140_v41 = vld [vmem:[#allocation9_spill] sm:$0xff] }
 0x450   : > { %v1951_v1 = vmul.f32 %v1950_v34, %v2971_v37  ;;  %v1952_v5 = vmul.f32 %v1949_v18, %v4126_v9 }
 0x451   : > { %v1927_v38 = vadd.f32 %v1925_v26, %v1911_v31 }
 0x452   : > { %v1962_v62 = vpop.permute.xlu1 %1961 }
 0x453   : > { %v1943_v30 = vadd.f32 %v1941_v57, %v1927_v38 }
 0x456   : > { %v1964_v61 = vpop.permute.xlu1 %1963 }
 0x457   : > { %v1965_v17 = vsel %vm805_vm5, %v1962_v62, %v1964_v61  ;;  %v1966_v15 = vsel %vm805_vm5, %v1964_v61, %v1962_v62  ;;  %v4139_v62 = vld [vmem:[#allocation3_spill] sm:$0xff] }
 0x458   : > { %v1967_v37 = vmul.f32 %v1965_v17, %v3021_v27  ;;  %v1968_v9 = vmul.f32 %v1966_v15, %v3025_v39  ;;  %v1957_v61 = vmul.f32 %v4139_v62, %v1951_v1  ;;  %v1958_v35 = vmul.f32 %v4139_v62, %v1952_v5  ;;  %v3912_v5 = vld [vmem:[%s2682_s26 + $0x18] sm:$0xf]  ;;  %s2398_s26 = sshll.u32 %s4142_s30, 4 }
 0x459   : > { %v2263_v17 = vrot.slane %v3912_v5, %v4092_v11  ;;  %v2279_v6 = vrot.slane %v3912_v5, %v4095_v8  ;;  %v2295_v62 = vrot.slane %v3912_v5, %v4097_v16  ;;  %s602_s29 = scalar_lea.vmem %s3985_s19, %s2398_s26 }
 0x45a   : > { %v1978_v51 = vpop.permute.xlu1 %1977  ;;  %v1973_v27 = vmul.f32 %v4140_v41, %v1967_v37  ;;  %v1974_v39 = vmul.f32 %v4140_v41, %v1968_v9  ;;  %v1959_v18 = vadd.f32 %v1957_v61, %v1943_v30  ;;  %v1960_v34 = vadd.f32 %v1958_v35, %v1944_v49 }
 0x45b   : > { %v2307_v61 = vrot.slane %v3835_v4, %v4099_v55 }
 0x45c   : > { %v1975_v60 = vadd.f32 %v1973_v27, %v1959_v18  ;;  %v1976_v19 = vadd.f32 %v1974_v39, %v1960_v34 }
 0x45e   : > { %v1980_v28 = vpop.permute.xlu1 %1979 }
 0x45f   : > { %v1981_v20 = vsel %vm846_vm4, %v1978_v51, %v1980_v28  ;;  %v1982_v53 = vsel %vm846_vm4, %v1980_v28, %v1978_v51  ;;  %v2247_v51 = vrot.slane %v3735_v45, %v4135_v25 }
 0x460   : > { %v1983_v3 = vmul.f32 %v1981_v20, %v2999_v40  ;;  %v1984_v59 = vmul.f32 %v1982_v53, %v3016_v22  ;;  %v2012_v22 = vpop.permute.xlu0 %2011 }
 0x461   : > { %v2253_v1 = vmul.f32 %v3829_v42, %v2247_v51  ;;  %v2275_v42 = vrot.slane %v3835_v4, %v4095_v8  ;;  %v2311_v51 = vrot.slane %v3912_v5, %v4099_v55 }
 0x462   : > { %v1994_v56 = vpop.permute.xlu1 %1993  ;;  %v1989_v13 = vmul.f32 %v3671_v54, %v1983_v3  ;;  %v1990_v29 = vmul.f32 %v3671_v54, %v1984_v59 }
 0x463   : > { %v2255_v9 = vadd.f32 %v2253_v1, %v3791_v36 }
 0x464   : > { %v1992_v15 = vadd.f32 %v1990_v29, %v1976_v19  ;;  %v2282_v57 = vpop.permute.xlu0 %2281 }
 0x465   : > { %v2284_v38 = vmul.f32 %v2282_v57, %v2275_v42  ;;  %v2285_v35 = vmul.f32 %v2282_v57, %v2279_v6 }
 0x466   : > { %v1996_v46 = vpop.permute.xlu1 %1995 }
 0x467   : > { %v1997_v47 = vsel %vm887_vm6, %v1994_v56, %v1996_v46  ;;  %v1998_v40 = vsel %vm887_vm6, %v1996_v46, %v1994_v56  ;;  %v2286_v46 = vadd.f32 %v2284_v38, %v3842_v52 }
 0x468   : > { %v1999_v45 = vmul.f32 %v1997_v47, %v3037_v21  ;;  %v2000_v25 = vmul.f32 %v1998_v40, %v3041_v2  ;;  %v1991_v2 = vadd.f32 %v1989_v13, %v1975_v60 }
 0x46a   : > { %v2005_v26 = vmul.f32 %v3687_v0, %v1999_v45  ;;  %v2006_v24 = vmul.f32 %v3687_v0, %v2000_v25  ;;  %v2010_v28 = vpop.permute.xlu1 %2009 }
 0x46b   : > { %v2013_v54 = vsel %vm928_vm7, %v2010_v28, %v2012_v22  ;;  %v2014_v21 = vsel %vm928_vm7, %v2012_v22, %v2010_v28 }
 0x46c   : > { %v2015_v31 = vmul.f32 %v2013_v54, %v3086_v50  ;;  %v2016_v0 = vmul.f32 %v2014_v21, %v3090_v12  ;;  %v2007_v44 = vadd.f32 %v2005_v26, %v1991_v2  ;;  %v2008_v20 = vadd.f32 %v2006_v24, %v1992_v15  ;;  %v2114_v26 = vpop.permute.xlu0 %2113 }
 0x46d   : > { %v2269_v50 = vmul.f32 %v3839_v7, %v2263_v17 }
 0x46e   : > { %v2021_v53 = vmul.f32 %v3768_v48, %v2015_v31  ;;  %v2022_v63 = vmul.f32 %v3768_v48, %v2016_v0  ;;  %v2098_v37 = vpop.permute.xlu1 %2097 }
 0x46f   : > { %v2271_v41 = vadd.f32 %v2269_v50, %v2255_v9 }
 0x470   : > { %v2023_v56 = vadd.f32 %v2021_v53, %v2007_v44  ;;  %v2024_v12 = vadd.f32 %v2022_v63, %v2008_v20  ;;  %v2323_v6 = vpop.permute.xlu0 %2322 }
 0x472   : > { %v2032_v48 = vrot.slane %v2024_v12, %v4092_v11  ;;  %v2047_v3 = vrot.slane %v2024_v12, %v4095_v8  ;;  %v2063_v36 = vrot.slane %v2024_v12, %v4097_v16  ;;  %v2028_v7 = vrot.slane %v2023_v56, %v4092_v11 }
 0x473   : > { %v2043_v59 = vrot.slane %v2023_v56, %v4095_v8  ;;  %v2059_v30 = vrot.slane %v2023_v56, %v4097_v16  ;;  %v2298_v49 = vpop.permute.xlu1 %2297  ;;  %v2079_v39 = vrot.slane %v2024_v12, %v4099_v55  ;;  %v2075_v8 = vrot.slane %v2023_v56, %v4099_v55 }
 0x474   : > { %v2039_v4 = vmul.f32 %v3846_v23, %v2032_v48  ;;  %v2053_v27 = vmul.f32 %v3827_v10, %v2047_v3  ;;  %v2038_v18 = vmul.f32 %v3846_v23, %v2028_v7  ;;  %v2287_v16 = vadd.f32 %v2285_v35, %v2271_v41 }
 0x475   : > { %v2052_v11 = vmul.f32 %v3827_v10, %v2043_v59  ;;  %v2069_v47 = vmul.f32 %v3888_v32, %v2063_v36  ;;  %v2095_v40 = vrot.slane %v2024_v12, %v4101_v14  ;;  %v2068_v13 = vmul.f32 %v3888_v32, %v2059_v30 }
 0x476   : > { %v2055_v34 = vadd.f32 %v2053_v27, %v2039_v4  ;;  %v2091_v29 = vrot.slane %v2023_v56, %v4101_v14  ;;  %v2300_v45 = vmul.f32 %v2298_v49, %v2291_v58  ;;  %v2085_v52 = vmul.f32 %v3844_v33, %v2079_v39 }
 0x477   : > { %v2054_v22 = vadd.f32 %v2052_v11, %v2038_v18  ;;  %v2111_v23 = vrot.slane %v2024_v12, %v4102_v43  ;;  %v2301_v10 = vmul.f32 %v2298_v49, %v2295_v62  ;;  %v2084_v19 = vmul.f32 %v3844_v33, %v2075_v8 }
 0x478   : > { %v2071_v25 = vadd.f32 %v2069_v47, %v2055_v34  ;;  %v2314_v60 = vpop.permute.xlu1 %2313  ;;  %v2107_v24 = vrot.slane %v2023_v56, %v4102_v43  ;;  %v2101_v32 = vmul.f32 %v2098_v37, %v2095_v40  ;;  %v2100_v54 = vmul.f32 %v2098_v37, %v2091_v29 }
 0x479   : > { %v2070_v55 = vadd.f32 %v2068_v13, %v2054_v22  ;;  %v2316_v28 = vmul.f32 %v2314_v60, %v2307_v61  ;;  %v2303_v5 = vadd.f32 %v2301_v10, %v2287_v16  ;;  %v2317_v14 = vmul.f32 %v2314_v60, %v2311_v51 }
 0x47a   : > { %v2087_v1 = vadd.f32 %v2085_v52, %v2071_v25  ;;  %v2302_v21 = vadd.f32 %v2300_v45, %v2286_v46  ;;  %v2117_v15 = vmul.f32 %v2114_v26, %v2111_v23  ;;  %v2116_v42 = vmul.f32 %v2114_v26, %v2107_v24 }
 0x47b   : > { %v2086_v17 = vadd.f32 %v2084_v19, %v2070_v55  ;;  %v2319_v31 = vadd.f32 %v2317_v14, %v2303_v5 }
 0x47c   : > { %v2103_v2 = vadd.f32 %v2101_v32, %v2087_v1  ;;  %v2318_v57 = vadd.f32 %v2316_v28, %v2302_v21 }
 0x47d   : > { %v2102_v0 = vadd.f32 %v2100_v54, %v2086_v17  ;;  %v2123_v33 = vpop.permute.xlu1 %2122  ;;  %v2326_v20 = vadd.f32 %v2323_v6, %v2319_v31 }
 0x47e   : > { %v2119_v44 = vadd.f32 %v2117_v15, %v2103_v2  ;;  %v2325_v63 = vadd.f32 %v2323_v6, %v2318_v57 }
 0x47f   : > { %v2118_v43 = vadd.f32 %v2116_v42, %v2102_v0 }
 0x480   : > { %v2126_v53 = vadd.f32 %v2123_v33, %v2119_v44 }
 0x481   : > { %v2125_v37 = vadd.f32 %v2123_v33, %v2118_v43 }
 0x482   : > { %v2328_v9 = vadd.f32 %v2326_v20, %v2126_v53 }
 0x483   : > { %v2327_v50 = vadd.f32 %v2325_v63, %v2125_v37 }
 0x484   : > { %2330 = vst [vmem:[%s602_s29 + $0x8] sm:$0x3f] %v2328_v9 }
 0x485   : > { %2329 = vst [vmem:[%s602_s29] sm:$0x3f] %v2327_v50 }
 0x486 PF: > { %s29_s0 = sadd.s32 1, %s2533_s0  }
 0x487   : > { %p26_p4 = scmp.ge.s32.totalorder %s29_s0, 4  }
 0x489   :  { %28 = sbr.rel (!%p26_p4) target bundleno = 5 (0x5), region = 126 }

</bundles_post_ra>
